<compile_context>
chip_gen: v6e
topology: v6e:2x2x1
jax: 0.10.0
libtpu: 0.0.40
codegen_flags: <defaults>
</compile_context>

<pallas_src>
import functools

import jax
import jax.numpy as jnp
from jax.experimental import pallas as pl
from jax.experimental.pallas import tpu as pltpu

DIM = 2                 # number of spatial dimensions
OUTPUT_CLASSES = 1      # classes excluding background (implicit=(True, True))
LRELU_SLOPE = 0.2
BN_EPS = 1e-5
EXP_STEPS = 8           # scaling-and-squaring steps for GridExp


# ----------------------------------------------------------------------------
# Fused conv block kernel:
#   y = conv3x3(leaky_relu(x * scale + shift)) + b        (stride 1 or 2)
#   partial BN stats of y per batch element
#   optional sigmoid on channels >= DIM (final layer)
# ----------------------------------------------------------------------------
def _fused_conv_kernel(x_ref, sc_ref, sh_ref, w_ref, b_ref,
                       y_ref, s_ref, ss_ref, pad_ref, *,
                       stride, apply_act, apply_sigmoid, Ho, Wo, Cin, Cout):
    x = x_ref[0]                                     # (Ho, Wo, Cblk)

    if apply_act:                                    # previous layer's BN + LeakyReLU
        z = x * sc_ref[...] + sh_ref[...]
        x = jnp.where(z >= 0.0, z, LRELU_SLOPE * z)

    # zero-padded activated input, built in VMEM (LeakyReLU(0)=0 so the border
    # of the padded buffer is exactly the conv's zero padding).
    pad_ref[...] = jnp.zeros_like(pad_ref)
    pad_ref[1:Ho + 1, 1:Wo + 1, :] = x

    taps = []
    if stride == 1:
        # pad_ref: (Ho+2, Wo+2, Cin)
        for kh in range(3):
            for kw in range(3):
                t = pad_ref[kh:kh + Ho, kw:kw + Wo, :]
                taps.append(t.reshape(Ho * Wo, Cin))
    else:
        # stride 2: x holds the four space-to-depth phases along channels
        # (phase p = pr*2+pc occupies channels [p*Cin, (p+1)*Cin)); every tap of
        # the stride-2 3x3 conv is a *contiguous* slice of one phase.
        # pad_ref: (Ho+1, Wo+1, 4*Cin)
        for kh in range(3):
            pr = 0 if kh == 1 else 1
            r0 = 0 if kh == 0 else 1
            for kw in range(3):
                pc = 0 if kw == 1 else 1
                c0 = 0 if kw == 0 else 1
                p = pr * 2 + pc
                t = pad_ref[r0:r0 + Ho, c0:c0 + Wo, p * Cin:(p + 1) * Cin]
                taps.append(t.reshape(Ho * Wo, Cin))

    # im2col with the 9 taps folded into the contraction dim -> ONE MXU matmul.
    im2col = jnp.concatenate(taps, axis=-1)          # (Ho*Wo, 9*Cin)
    acc = jnp.dot(im2col, w_ref[...], preferred_element_type=jnp.float32)
    acc = acc + b_ref[...]                           # (Ho*Wo, Cout)

    if apply_sigmoid:
        # implicit softmax with 1 explicit class == sigmoid; only on seg channels.
        ch = jax.lax.broadcasted_iota(jnp.int32, (Ho * Wo, Cout), 1)
        sig = 1.0 / (1.0 + jnp.exp(-acc))
        acc = jnp.where(ch >= DIM, sig, acc)

    y_ref[0] = acc
    s_ref[0] = jnp.sum(acc, axis=0, keepdims=True)
    ss_ref[0] = jnp.sum(acc * acc, axis=0, keepdims=True)


def fused_conv_bn_stats(x, scale, shift, w, b, *, stride=1, apply_act=True,
                        apply_sigmoid=False):
    """x: (N,H,W,Cin) raw pre-activation input; scale/shift: (Cin,);
    w: (3,3,Cin,Cout); b: (Cout,).
    Returns (y_raw (N,Ho,Wo,Cout), sum (N,1,Cout), sumsq (N,1,Cout))."""
    N, H, W, Cin = x.shape
    Cout = w.shape[-1]
    wf = w.reshape(9 * Cin, Cout).astype(jnp.float32)

    if stride == 2:
        assert H % 2 == 0 and W % 2 == 0
        Ho, Wo = H // 2, W // 2
        # space-to-depth phase split (cheap XLA repack, same total size).
        xin = jnp.concatenate(
            [x[:, pr::2, pc::2, :] for pr in range(2) for pc in range(2)],
            axis=-1)                                  # (N, Ho, Wo, 4*Cin)
        sc = jnp.tile(scale.reshape(1, Cin), (1, 4))
        sh = jnp.tile(shift.reshape(1, Cin), (1, 4))
        Cblk = 4 * Cin
        pad_shape = (Ho + 1, Wo + 1, 4 * Cin)
    else:
        Ho, Wo = H, W
        xin = x
        sc = scale.reshape(1, Cin)
        sh = shift.reshape(1, Cin)
        Cblk = Cin
        pad_shape = (Ho + 2, Wo + 2, Cin)

    HWo = Ho * Wo
    kernel = functools.partial(
        _fused_conv_kernel, stride=stride, apply_act=apply_act,
        apply_sigmoid=apply_sigmoid, Ho=Ho, Wo=Wo, Cin=Cin, Cout=Cout)

    # TODO(synk): at real nitorch resolutions (>=192^2), tile Ho*Wo on an extra
    # grid axis so double-buffered blocks fit v7x's 64 MiB VMEM.
    y, s, ss = pl.pallas_call(
        kernel,
        out_shape=(jax.ShapeDtypeStruct((N, HWo, Cout), jnp.float32),
                   jax.ShapeDtypeStruct((N, 1, Cout), jnp.float32),
                   jax.ShapeDtypeStruct((N, 1, Cout), jnp.float32)),
        grid=(N,),
        in_specs=[
            pl.BlockSpec((1, Ho, Wo, Cblk), lambda n: (n, 0, 0, 0)),
            pl.BlockSpec((1, Cblk), lambda n: (0, 0)),
            pl.BlockSpec((1, Cblk), lambda n: (0, 0)),
            pl.BlockSpec((9 * Cin, Cout), lambda n: (0, 0)),
            pl.BlockSpec((1, Cout), lambda n: (0, 0)),
        ],
        out_specs=(pl.BlockSpec((1, HWo, Cout), lambda n: (n, 0, 0)),
                   pl.BlockSpec((1, 1, Cout), lambda n: (n, 0, 0)),
                   pl.BlockSpec((1, 1, Cout), lambda n: (n, 0, 0))),
        scratch_shapes=[pltpu.VMEM(pad_shape, jnp.float32)],
        compiler_params=pltpu.CompilerParams(
            dimension_semantics=("parallel",)),
    )(xin.astype(jnp.float32), sc.astype(jnp.float32), sh.astype(jnp.float32),
      wf, b.reshape(1, Cout).astype(jnp.float32))
    return y.reshape(N, Ho, Wo, Cout), s, ss


def _bn_affine(s, ss, gamma, beta, count):
    """Finalise BN from partial sums: returns per-channel (scale, shift)."""
    s_tot = jnp.sum(s, axis=0).reshape(-1)
    ss_tot = jnp.sum(ss, axis=0).reshape(-1)
    mean = s_tot / count
    var = ss_tot / count - mean * mean          # biased variance (training BN)
    scale = gamma * jax.lax.rsqrt(var + BN_EPS)
    shift = beta - mean * scale
    return scale, shift


# ----------------------------------------------------------------------------
# Spatial transformer pieces (plain JAX glue; data-dependent gathers)
# ----------------------------------------------------------------------------
def _fold_index(i, n, bound):
    if bound == 'dft':                       # circular
        return jnp.mod(i, n)
    # 'dct2': half-sample symmetric reflection (replicated edge)
    m = jnp.mod(i, 2 * n)
    return jnp.where(m >= n, 2 * n - 1 - m, m)


def _bilinear_sample(img, gi, gj, bound):
    """img: (N, C, H, W); gi, gj: (N, H', W') voxel coords -> (N, C, H', W')."""
    N, C, H, W = img.shape
    i0 = jnp.floor(gi)
    j0 = jnp.floor(gj)
    di = gi - i0
    dj = gj - j0
    i0 = i0.astype(jnp.int32)
    j0 = j0.astype(jnp.int32)

    def gather(im, a, b):                    # im (C,H,W); a,b (H',W') int32
        return im[:, a, b]

    out = 0.0
    for ii, wi in ((i0, 1.0 - di), (i0 + 1, di)):
        for jj, wj in ((j0, 1.0 - dj), (j0 + 1, dj)):
            iif = _fold_index(ii, H, bound)
            jjf = _fold_index(jj, W, bound)
            v = jax.vmap(gather)(img, iif, jjf)      # (N, C, H', W')
            out = out + v * (wi * wj)[:, None, :, :]
    return out


def resize_displacement(disp, out_shape, bound='dft'):
    """GridResize(type='displacement'): bilinear resize, values scaled by zoom."""
    # TODO(synk): nitorch anchor/bound conventions approximated (centre-of-voxel
    # alignment, coord = (o + 0.5)/factor - 0.5).
    N, h, w, _ = disp.shape
    H2, W2 = out_shape
    fi = H2 / h
    fj = W2 / w
    oi = (jnp.arange(H2, dtype=jnp.float32) + 0.5) / fi - 0.5
    oj = (jnp.arange(W2, dtype=jnp.float32) + 0.5) / fj - 0.5
    gi = jnp.broadcast_to(oi[None, :, None], (N, H2, W2))
    gj = jnp.broadcast_to(oj[None, None, :], (N, H2, W2))
    img = jnp.transpose(disp, (0, 3, 1, 2))           # (N, dim, h, w)
    out = _bilinear_sample(img, gi, gj, bound)
    out = jnp.transpose(out, (0, 2, 3, 1))            # (N, H2, W2, dim)
    scale = jnp.array([fi, fj], jnp.float32)
    return out * scale


def velocity_exp(vel, nsteps=EXP_STEPS, bound='dft'):
    """GridExp (scaling and squaring), displacement in -> displacement out."""
    N, h, w, _ = vel.shape
    disp = vel / (2.0 ** nsteps)
    idi = jnp.broadcast_to(jnp.arange(h, dtype=jnp.float32)[:, None], (h, w))
    idj = jnp.broadcast_to(jnp.arange(w, dtype=jnp.float32)[None, :], (h, w))
    for _ in range(nsteps):
        gi = idi[None] + disp[..., 0]
        gj = idj[None] + disp[..., 1]
        img = jnp.transpose(disp, (0, 3, 1, 2))
        sampled = _bilinear_sample(img, gi, gj, bound)
        disp = disp + jnp.transpose(sampled, (0, 2, 3, 1))
    return disp


def grid_pull(img_nchw, grid, bound='dct2'):
    """GridPull: bilinear sample img at a transformation grid (voxel coords)."""
    return _bilinear_sample(img_nchw, grid[..., 0], grid[..., 1], bound)


# ----------------------------------------------------------------------------
# SegMorphUNet forward
# ----------------------------------------------------------------------------
def init_params(key):
    def conv_init(k, cin, cout, wscale=0.1):
        kw, _ = jax.random.split(k)
        return {
            'w': wscale * jax.random.normal(kw, (3, 3, cin, cout), jnp.float32),
            'b': jnp.zeros((cout,), jnp.float32),
            'gamma': jnp.ones((cout,), jnp.float32),
            'beta': jnp.zeros((cout,), jnp.float32),
        }
    keys = jax.random.split(key, 5)
    # out_channels = output_classes*2 + dim = 2 + 2 = 4
    # TODO(synk): nitorch UNet defaults (encoder=[16,32,32,32], transposed-conv
    # upsampling, groups/stitch) are simplified to a 2-level UNet with
    # nearest-neighbour upsampling + skip concat.
    return {
        'enc0': conv_init(keys[0], 2, 8),
        'enc1': conv_init(keys[1], 8, 16),
        'bott': conv_init(keys[2], 16, 16),
        'dec0': conv_init(keys[3], 24, 8),
        'final': conv_init(keys[4], 8, DIM + 2 * OUTPUT_CLASSES, wscale=0.05),
    }


@jax.jit
def seg_morph_unet_forward(params, source, target):
    """source, target: (N, 1, H, W) NCHW float32.

    Returns (source_seg_pred, target_seg_pred, deformed_source, velocity)
    with shapes ((N,1,H,W), (N,1,H,W), (N,1,H,W), (N,H,W,2)).
    """
    N, C, H, W = source.shape

    # cat along channel, go to NHWC for the kernels
    x = jnp.concatenate([source, target], axis=1)         # (N, 2, H, W)
    x = jnp.transpose(x, (0, 2, 3, 1))                     # (N, H, W, 2)

    # --- UNet: each layer = one fused pallas_call (conv + prev BN/LeakyReLU +
    # partial BN stats); stats finalised with tiny O(C) JAX math. -------------
    one2 = jnp.ones((2,), jnp.float32)
    zero2 = jnp.zeros((2,), jnp.float32)

    p = params
    y0, s0, ss0 = fused_conv_bn_stats(x, one2, zero2, p['enc0']['w'],
                                      p['enc0']['b'], stride=1, apply_act=False)
    sc0, sh0 = _bn_affine(s0, ss0, p['enc0']['gamma'], p['enc0']['beta'],
                          N * H * W)

    y1, s1, ss1 = fused_conv_bn_stats(y0, sc0, sh0, p['enc1']['w'],
                                      p['enc1']['b'], stride=2)
    sc1, sh1 = _bn_affine(s1, ss1, p['enc1']['gamma'], p['enc1']['beta'],
                          N * (H // 2) * (W // 2))

    y2, s2, ss2 = fused_conv_bn_stats(y1, sc1, sh1, p['bott']['w'],
                                      p['bott']['b'], stride=1)
    sc2, sh2 = _bn_affine(s2, ss2, p['bott']['gamma'], p['bott']['beta'],
                          N * (H // 2) * (W // 2))

    # nearest-neighbour 2x upsample of the RAW bottleneck output + RAW skip
    # concat; the per-channel BN affine + LeakyReLU of both parts is fused into
    # dec0's kernel (scale/shift vectors concatenated to match channel order).
    # TODO(synk): the repeat/concat still materialise two small XLA arrays; a
    # dedicated dec0 kernel could build them directly in VMEM.
    up = jnp.repeat(jnp.repeat(y2, 2, axis=1), 2, axis=2)   # (N, H, W, 16)
    cat = jnp.concatenate([up, y0], axis=-1)                # (N, H, W, 24)
    sc_cat = jnp.concatenate([sc2, sc0])
    sh_cat = jnp.concatenate([sh2, sh0])
    y3, s3, ss3 = fused_conv_bn_stats(cat, sc_cat, sh_cat, p['dec0']['w'],
                                      p['dec0']['b'], stride=1)
    sc3, sh3 = _bn_affine(s3, ss3, p['dec0']['gamma'], p['dec0']['beta'],
                          N * H * W)

    # final conv: no norm/act on its output; implicit softmax (== sigmoid for a
    # single explicit class) fused on the segmentation channels in-kernel.
    out, _, _ = fused_conv_bn_stats(y3, sc3, sh3, p['final']['w'],
                                    p['final']['b'], stride=1,
                                    apply_sigmoid=True)     # (N, H, W, 4)

    # --- split velocity / segmentations (sigmoid already applied) -----------
    velocity = out[..., :DIM]                                # (N, H, W, 2)
    oc = OUTPUT_CLASSES
    target_seg_pred = jnp.transpose(out[..., DIM:DIM + oc], (0, 3, 1, 2))
    source_seg_pred = jnp.transpose(out[..., DIM + oc:], (0, 3, 1, 2))

    # --- exp(velocity) -> deformation grid, then pull ------------------------
    vel_small = resize_displacement(velocity, (H // 2, W // 2), bound='dft')
    disp_small = velocity_exp(vel_small, nsteps=EXP_STEPS, bound='dft')
    disp = resize_displacement(disp_small, (H, W), bound='dft')
    idi = jnp.broadcast_to(jnp.arange(H, dtype=jnp.float32)[:, None], (H, W))
    idj = jnp.broadcast_to(jnp.arange(W, dtype=jnp.float32)[None, :], (H, W))
    identity = jnp.stack([idi, idj], axis=-1)                # (H, W, 2)
    grid = disp + identity[None]                             # transformation grid

    deformed_source = grid_pull(source, grid, bound='dct2')  # (N, 1, H, W)

    # TODO(synk): _loss/_metric bookkeeping and tensorboard `board` are
    # training/visualisation utilities and are not part of the kernel.
    return source_seg_pred, target_seg_pred, deformed_source, velocity


if __name__ == "__main__":
    key = jax.random.PRNGKey(0)
    kp, ks, kt = jax.random.split(key, 3)
    params = init_params(kp)
    source = jax.random.uniform(ks, (2, 1, 16, 16), dtype=jnp.float32)
    target = jax.random.uniform(kt, (2, 1, 16, 16), dtype=jnp.float32)

    outs = seg_morph_unet_forward(params, source, target)
    outs = jax.block_until_ready(outs)

    src_pred, tgt_pred, warped, vel = outs
    assert src_pred.shape == (2, 1, 16, 16)
    assert tgt_pred.shape == (2, 1, 16, 16)
    assert warped.shape == (2, 1, 16, 16)
    assert vel.shape == (2, 16, 16, 2)
    print("KERNEL_OK")
</pallas_src>

<mosaic_0001>
module attributes {stable_mosaic.version = 11 : i64} {
  func.func @_fused_conv_kernel(%arg0: i32, %arg1: memref<1x16x16x2xf32, #tpu.memory_space<vmem>>, %arg2: memref<1x2xf32, #tpu.memory_space<vmem>>, %arg3: memref<1x2xf32, #tpu.memory_space<vmem>>, %arg4: memref<18x8xf32, #tpu.memory_space<vmem>>, %arg5: memref<1x8xf32, #tpu.memory_space<vmem>>, %arg6: memref<1x256x8xf32, #tpu.memory_space<vmem>>, %arg7: memref<1x1x8xf32, #tpu.memory_space<vmem>>, %arg8: memref<1x1x8xf32, #tpu.memory_space<vmem>>, %arg9: memref<18x18x2xf32, #tpu.memory_space<vmem>>) attributes {dimension_semantics = [#tpu.dimension_semantics<parallel>], iteration_bounds = array<i64: 2>, scalar_prefetch = 0 : i64, scratch_operands = 1 : i64, tpu.core_type = #tpu.core_type<tc>, window_params = [{transform_indices = @transform_0, window_bounds = array<i64: 1, 16, 16, 2>}, {pipeline_mode = #tpu.pipeline_mode<synchronous>, transform_indices = @transform_1, window_bounds = array<i64: 1, 2>}, {pipeline_mode = #tpu.pipeline_mode<synchronous>, transform_indices = @transform_2, window_bounds = array<i64: 1, 2>}, {pipeline_mode = #tpu.pipeline_mode<synchronous>, transform_indices = @transform_3, window_bounds = array<i64: 18, 8>}, {pipeline_mode = #tpu.pipeline_mode<synchronous>, transform_indices = @transform_4, window_bounds = array<i64: 1, 8>}, {transform_indices = @transform_5, window_bounds = array<i64: 1, 256, 8>}, {transform_indices = @transform_6, window_bounds = array<i64: 1, 1, 8>}, {transform_indices = @transform_7, window_bounds = array<i64: 1, 1, 8>}]} {
    %c0 = arith.constant 0 : index
    %c0_0 = arith.constant 0 : index
    %c0_1 = arith.constant 0 : index
    %c0_2 = arith.constant 0 : index
    %0 = vector.load %arg1[%c0, %c0_0, %c0_1, %c0_2] : memref<1x16x16x2xf32, #tpu.memory_space<vmem>>, vector<1x16x16x2xf32>
    %1 = vector.shape_cast %0 : vector<1x16x16x2xf32> to vector<16x16x2xf32>
    %cst = arith.constant 0.000000e+00 : f32
    %2 = vector.broadcast %cst : f32 to vector<18x18x2xf32>
    %c0_3 = arith.constant 0 : index
    %c0_4 = arith.constant 0 : index
    %c0_5 = arith.constant 0 : index
    %3 = vector.load %arg9[%c0_3, %c0_4, %c0_5] : memref<18x18x2xf32, #tpu.memory_space<vmem>>, vector<18x18x2xf32>
    tpu.vector_store %arg9[%c0_3, %c0_4, %c0_5], %2 {strides = array<i32>} : memref<18x18x2xf32, #tpu.memory_space<vmem>>, vector<18x18x2xf32>,
    %c1 = arith.constant 1 : index
    %c1_6 = arith.constant 1 : index
    %c0_7 = arith.constant 0 : index
    %4 = vector.load %arg9[%c1, %c1_6, %c0_7] : memref<18x18x2xf32, #tpu.memory_space<vmem>>, vector<16x16x2xf32>
    tpu.vector_store %arg9[%c1, %c1_6, %c0_7], %1 {strides = array<i32>} : memref<18x18x2xf32, #tpu.memory_space<vmem>>, vector<16x16x2xf32>,
    %c0_8 = arith.constant 0 : index
    %c0_9 = arith.constant 0 : index
    %c0_10 = arith.constant 0 : index
    %5 = vector.load %arg9[%c0_8, %c0_9, %c0_10] : memref<18x18x2xf32, #tpu.memory_space<vmem>>, vector<16x16x2xf32>
    %6 = vector.shape_cast %5 : vector<16x16x2xf32> to vector<256x2xf32>
    %c0_11 = arith.constant 0 : index
    %c1_12 = arith.constant 1 : index
    %c0_13 = arith.constant 0 : index
    %7 = vector.load %arg9[%c0_11, %c1_12, %c0_13] : memref<18x18x2xf32, #tpu.memory_space<vmem>>, vector<16x16x2xf32>
    %8 = vector.shape_cast %7 : vector<16x16x2xf32> to vector<256x2xf32>
    %c0_14 = arith.constant 0 : index
    %c2 = arith.constant 2 : index
    %c0_15 = arith.constant 0 : index
    %9 = vector.load %arg9[%c0_14, %c2, %c0_15] : memref<18x18x2xf32, #tpu.memory_space<vmem>>, vector<16x16x2xf32>
    %10 = vector.shape_cast %9 : vector<16x16x2xf32> to vector<256x2xf32>
    %c1_16 = arith.constant 1 : index
    %c0_17 = arith.constant 0 : index
    %c0_18 = arith.constant 0 : index
    %11 = vector.load %arg9[%c1_16, %c0_17, %c0_18] : memref<18x18x2xf32, #tpu.memory_space<vmem>>, vector<16x16x2xf32>
    %12 = vector.shape_cast %11 : vector<16x16x2xf32> to vector<256x2xf32>
    %c1_19 = arith.constant 1 : index
    %c1_20 = arith.constant 1 : index
    %c0_21 = arith.constant 0 : index
    %13 = vector.load %arg9[%c1_19, %c1_20, %c0_21] : memref<18x18x2xf32, #tpu.memory_space<vmem>>, vector<16x16x2xf32>
    %14 = vector.shape_cast %13 : vector<16x16x2xf32> to vector<256x2xf32>
    %c1_22 = arith.constant 1 : index
    %c2_23 = arith.constant 2 : index
    %c0_24 = arith.constant 0 : index
    %15 = vector.load %arg9[%c1_22, %c2_23, %c0_24] : memref<18x18x2xf32, #tpu.memory_space<vmem>>, vector<16x16x2xf32>
    %16 = vector.shape_cast %15 : vector<16x16x2xf32> to vector<256x2xf32>
    %c2_25 = arith.constant 2 : index
    %c0_26 = arith.constant 0 : index
    %c0_27 = arith.constant 0 : index
    %17 = vector.load %arg9[%c2_25, %c0_26, %c0_27] : memref<18x18x2xf32, #tpu.memory_space<vmem>>, vector<16x16x2xf32>
    %18 = vector.shape_cast %17 : vector<16x16x2xf32> to vector<256x2xf32>
    %c2_28 = arith.constant 2 : index
    %c1_29 = arith.constant 1 : index
    %c0_30 = arith.constant 0 : index
    %19 = vector.load %arg9[%c2_28, %c1_29, %c0_30] : memref<18x18x2xf32, #tpu.memory_space<vmem>>, vector<16x16x2xf32>
    %20 = vector.shape_cast %19 : vector<16x16x2xf32> to vector<256x2xf32>
    %c2_31 = arith.constant 2 : index
    %c2_32 = arith.constant 2 : index
    %c0_33 = arith.constant 0 : index
    %21 = vector.load %arg9[%c2_31, %c2_32, %c0_33] : memref<18x18x2xf32, #tpu.memory_space<vmem>>, vector<16x16x2xf32>
    %22 = vector.shape_cast %21 : vector<16x16x2xf32> to vector<256x2xf32>
    %23 = tpu.concatenate %6, %8, %10, %12, %14, %16, %18, %20, %22 in 1 : vector<256x2xf32>, vector<256x2xf32>, vector<256x2xf32>, vector<256x2xf32>, vector<256x2xf32>, vector<256x2xf32>, vector<256x2xf32>, vector<256x2xf32>, vector<256x2xf32> -> vector<256x18xf32>
    %c0_34 = arith.constant 0 : index
    %c0_35 = arith.constant 0 : index
    %24 = vector.load %arg4[%c0_34, %c0_35] : memref<18x8xf32, #tpu.memory_space<vmem>>, vector<18x8xf32>
    %cst_36 = arith.constant dense<0.000000e+00> : vector<256x8xf32>
    %25 = tpu.matmul %23, %24, %cst_36 {dimension_numbers = #tpu.dot_dimension_numbers<[1], [0], [0], [1], [0, 0, 1, 1], [], []>} : vector<256x18xf32>, vector<18x8xf32>, vector<256x8xf32> -> vector<256x8xf32>
    %c0_37 = arith.constant 0 : index
    %c0_38 = arith.constant 0 : index
    %26 = vector.load %arg5[%c0_37, %c0_38] : memref<1x8xf32, #tpu.memory_space<vmem>>, vector<1x8xf32>
    %27 = vector.broadcast %26 : vector<1x8xf32> to vector<256x8xf32>
    %28 = arith.addf %25, %27 : vector<256x8xf32>
    %c0_39 = arith.constant 0 : index
    %c0_40 = arith.constant 0 : index
    %c0_41 = arith.constant 0 : index
    %29 = vector.load %arg6[%c0_39, %c0_40, %c0_41] : memref<1x256x8xf32, #tpu.memory_space<vmem>>, vector<1x256x8xf32>
    %30 = vector.shape_cast %29 : vector<1x256x8xf32> to vector<256x8xf32>
    %31 = vector.shape_cast %28 : vector<256x8xf32> to vector<1x256x8xf32>
    tpu.vector_store %arg6[%c0_39, %c0_40, %c0_41], %31 {strides = array<i32>} : memref<1x256x8xf32, #tpu.memory_space<vmem>>, vector<1x256x8xf32>,
    %cst_42 = arith.constant dense<0.000000e+00> : vector<8xf32>
    %32 = vector.multi_reduction <add>, %28, %cst_42 [0] : vector<256x8xf32> to vector<8xf32>
    %33 = vector.shape_cast %32 : vector<8xf32> to vector<1x8xf32>
    %c0_43 = arith.constant 0 : index
    %c0_44 = arith.constant 0 : index
    %c0_45 = arith.constant 0 : index
    %34 = vector.load %arg7[%c0_43, %c0_44, %c0_45] : memref<1x1x8xf32, #tpu.memory_space<vmem>>, vector<1x1x8xf32>
    %35 = vector.shape_cast %34 : vector<1x1x8xf32> to vector<1x8xf32>
    %36 = vector.shape_cast %33 : vector<1x8xf32> to vector<1x1x8xf32>
    tpu.vector_store %arg7[%c0_43, %c0_44, %c0_45], %36 {strides = array<i32>} : memref<1x1x8xf32, #tpu.memory_space<vmem>>, vector<1x1x8xf32>,
    %37 = arith.mulf %28, %28 : vector<256x8xf32>
    %cst_46 = arith.constant dense<0.000000e+00> : vector<8xf32>
    %38 = vector.multi_reduction <add>, %37, %cst_46 [0] : vector<256x8xf32> to vector<8xf32>
    %39 = vector.shape_cast %38 : vector<8xf32> to vector<1x8xf32>
    %c0_47 = arith.constant 0 : index
    %c0_48 = arith.constant 0 : index
    %c0_49 = arith.constant 0 : index
    %40 = vector.load %arg8[%c0_47, %c0_48, %c0_49] : memref<1x1x8xf32, #tpu.memory_space<vmem>>, vector<1x1x8xf32>
    %41 = vector.shape_cast %40 : vector<1x1x8xf32> to vector<1x8xf32>
    %42 = vector.shape_cast %39 : vector<1x8xf32> to vector<1x1x8xf32>
    tpu.vector_store %arg8[%c0_47, %c0_48, %c0_49], %42 {strides = array<i32>} : memref<1x1x8xf32, #tpu.memory_space<vmem>>, vector<1x1x8xf32>,
    return
  }
  func.func @transform_0(%arg0: i32) -> (i32, i32, i32, i32) {
    %c0_i32 = arith.constant 0 : i32
    %c0_i32_0 = arith.constant 0 : i32
    %c0_i32_1 = arith.constant 0 : i32
    %c0_i32_2 = arith.constant 0 : i32
    return %arg0, %c0_i32, %c0_i32_0, %c0_i32_1 : i32, i32, i32, i32
  }
  func.func @transform_1(%arg0: i32) -> (i32, i32) {
    %c0_i32 = arith.constant 0 : i32
    %c0_i32_0 = arith.constant 0 : i32
    %c0_i32_1 = arith.constant 0 : i32
    return %c0_i32, %c0_i32_0 : i32, i32
  }
  func.func @transform_2(%arg0: i32) -> (i32, i32) {
    %c0_i32 = arith.constant 0 : i32
    %c0_i32_0 = arith.constant 0 : i32
    %c0_i32_1 = arith.constant 0 : i32
    return %c0_i32, %c0_i32_0 : i32, i32
  }
  func.func @transform_3(%arg0: i32) -> (i32, i32) {
    %c0_i32 = arith.constant 0 : i32
    %c0_i32_0 = arith.constant 0 : i32
    %c0_i32_1 = arith.constant 0 : i32
    return %c0_i32, %c0_i32_0 : i32, i32
  }
  func.func @transform_4(%arg0: i32) -> (i32, i32) {
    %c0_i32 = arith.constant 0 : i32
    %c0_i32_0 = arith.constant 0 : i32
    %c0_i32_1 = arith.constant 0 : i32
    return %c0_i32, %c0_i32_0 : i32, i32
  }
  func.func @transform_5(%arg0: i32) -> (i32, i32, i32) {
    %c0_i32 = arith.constant 0 : i32
    %c0_i32_0 = arith.constant 0 : i32
    %c0_i32_1 = arith.constant 0 : i32
    return %arg0, %c0_i32, %c0_i32_0 : i32, i32, i32
  }
  func.func @transform_6(%arg0: i32) -> (i32, i32, i32) {
    %c0_i32 = arith.constant 0 : i32
    %c0_i32_0 = arith.constant 0 : i32
    %c0_i32_1 = arith.constant 0 : i32
    return %arg0, %c0_i32, %c0_i32_0 : i32, i32, i32
  }
  func.func @transform_7(%arg0: i32) -> (i32, i32, i32) {
    %c0_i32 = arith.constant 0 : i32
    %c0_i32_0 = arith.constant 0 : i32
    %c0_i32_1 = arith.constant 0 : i32
    return %arg0, %c0_i32, %c0_i32_0 : i32, i32, i32
  }
}

module attributes {stable_mosaic.version = 11 : i64} {
  func.func @_fused_conv_kernel(%arg0: i32, %arg1: memref<1x8x8x32xf32, #tpu.memory_space<vmem>>, %arg2: memref<1x32xf32, #tpu.memory_space<vmem>>, %arg3: memref<1x32xf32, #tpu.memory_space<vmem>>, %arg4: memref<72x16xf32, #tpu.memory_space<vmem>>, %arg5: memref<1x16xf32, #tpu.memory_space<vmem>>, %arg6: memref<1x64x16xf32, #tpu.memory_space<vmem>>, %arg7: memref<1x1x16xf32, #tpu.memory_space<vmem>>, %arg8: memref<1x1x16xf32, #tpu.memory_space<vmem>>, %arg9: memref<9x9x32xf32, #tpu.memory_space<vmem>>) attributes {dimension_semantics = [#tpu.dimension_semantics<parallel>], iteration_bounds = array<i64: 2>, scalar_prefetch = 0 : i64, scratch_operands = 1 : i64, tpu.core_type = #tpu.core_type<tc>, window_params = [{transform_indices = @transform_0, window_bounds = array<i64: 1, 8, 8, 32>}, {pipeline_mode = #tpu.pipeline_mode<synchronous>, transform_indices = @transform_1, window_bounds = array<i64: 1, 32>}, {pipeline_mode = #tpu.pipeline_mode<synchronous>, transform_indices = @transform_2, window_bounds = array<i64: 1, 32>}, {pipeline_mode = #tpu.pipeline_mode<synchronous>, transform_indices = @transform_3, window_bounds = array<i64: 72, 16>}, {pipeline_mode = #tpu.pipeline_mode<synchronous>, transform_indices = @transform_4, window_bounds = array<i64: 1, 16>}, {transform_indices = @transform_5, window_bounds = array<i64: 1, 64, 16>}, {transform_indices = @transform_6, window_bounds = array<i64: 1, 1, 16>}, {transform_indices = @transform_7, window_bounds = array<i64: 1, 1, 16>}]} {
    %c0 = arith.constant 0 : index
    %c0_0 = arith.constant 0 : index
    %c0_1 = arith.constant 0 : index
    %c0_2 = arith.constant 0 : index
    %0 = vector.load %arg1[%c0, %c0_0, %c0_1, %c0_2] : memref<1x8x8x32xf32, #tpu.memory_space<vmem>>, vector<1x8x8x32xf32>
    %1 = vector.shape_cast %0 : vector<1x8x8x32xf32> to vector<8x8x32xf32>
    %c0_3 = arith.constant 0 : index
    %c0_4 = arith.constant 0 : index
    %2 = vector.load %arg2[%c0_3, %c0_4] : memref<1x32xf32, #tpu.memory_space<vmem>>, vector<1x32xf32>
    %3 = vector.shape_cast %2 : vector<1x32xf32> to vector<1x1x32xf32>
    %4 = vector.broadcast %3 : vector<1x1x32xf32> to vector<8x8x32xf32>
    %5 = arith.mulf %1, %4 : vector<8x8x32xf32>
    %c0_5 = arith.constant 0 : index
    %c0_6 = arith.constant 0 : index
    %6 = vector.load %arg3[%c0_5, %c0_6] : memref<1x32xf32, #tpu.memory_space<vmem>>, vector<1x32xf32>
    %7 = vector.shape_cast %6 : vector<1x32xf32> to vector<1x1x32xf32>
    %8 = vector.broadcast %7 : vector<1x1x32xf32> to vector<8x8x32xf32>
    %9 = arith.addf %5, %8 : vector<8x8x32xf32>
    %cst = arith.constant 0.000000e+00 : f32
    %10 = vector.broadcast %cst : f32 to vector<8x8x32xf32>
    %11 = arith.cmpf oge, %9, %10 : vector<8x8x32xf32>
    %cst_7 = arith.constant 2.000000e-01 : f32
    %12 = vector.broadcast %cst_7 : f32 to vector<8x8x32xf32>
    %13 = arith.mulf %12, %9 : vector<8x8x32xf32>
    %14 = arith.select %11, %9, %13 : vector<8x8x32xi1>, vector<8x8x32xf32>
    %cst_8 = arith.constant 0.000000e+00 : f32
    %15 = vector.broadcast %cst_8 : f32 to vector<9x9x32xf32>
    %c0_9 = arith.constant 0 : index
    %c0_10 = arith.constant 0 : index
    %c0_11 = arith.constant 0 : index
    %16 = vector.load %arg9[%c0_9, %c0_10, %c0_11] : memref<9x9x32xf32, #tpu.memory_space<vmem>>, vector<9x9x32xf32>
    tpu.vector_store %arg9[%c0_9, %c0_10, %c0_11], %15 {strides = array<i32>} : memref<9x9x32xf32, #tpu.memory_space<vmem>>, vector<9x9x32xf32>,
    %c1 = arith.constant 1 : index
    %c1_12 = arith.constant 1 : index
    %c0_13 = arith.constant 0 : index
    %17 = vector.load %arg9[%c1, %c1_12, %c0_13] : memref<9x9x32xf32, #tpu.memory_space<vmem>>, vector<8x8x32xf32>
    tpu.vector_store %arg9[%c1, %c1_12, %c0_13], %14 {strides = array<i32>} : memref<9x9x32xf32, #tpu.memory_space<vmem>>, vector<8x8x32xf32>,
    %c0_14 = arith.constant 0 : index
    %c0_15 = arith.constant 0 : index
    %c24 = arith.constant 24 : index
    %18 = vector.load %arg9[%c0_14, %c0_15, %c24] : memref<9x9x32xf32, #tpu.memory_space<vmem>>, vector<8x8x8xf32>
    %19 = vector.shape_cast %18 : vector<8x8x8xf32> to vector<64x8xf32>
    %c0_16 = arith.constant 0 : index
    %c1_17 = arith.constant 1 : index
    %c16 = arith.constant 16 : index
    %20 = vector.load %arg9[%c0_16, %c1_17, %c16] : memref<9x9x32xf32, #tpu.memory_space<vmem>>, vector<8x8x8xf32>
    %21 = vector.shape_cast %20 : vector<8x8x8xf32> to vector<64x8xf32>
    %c0_18 = arith.constant 0 : index
    %c1_19 = arith.constant 1 : index
    %c24_20 = arith.constant 24 : index
    %22 = vector.load %arg9[%c0_18, %c1_19, %c24_20] : memref<9x9x32xf32, #tpu.memory_space<vmem>>, vector<8x8x8xf32>
    %23 = vector.shape_cast %22 : vector<8x8x8xf32> to vector<64x8xf32>
    %c1_21 = arith.constant 1 : index
    %c0_22 = arith.constant 0 : index
    %c8 = arith.constant 8 : index
    %24 = vector.load %arg9[%c1_21, %c0_22, %c8] : memref<9x9x32xf32, #tpu.memory_space<vmem>>, vector<8x8x8xf32>
    %25 = vector.shape_cast %24 : vector<8x8x8xf32> to vector<64x8xf32>
    %c1_23 = arith.constant 1 : index
    %c1_24 = arith.constant 1 : index
    %c0_25 = arith.constant 0 : index
    %26 = vector.load %arg9[%c1_23, %c1_24, %c0_25] : memref<9x9x32xf32, #tpu.memory_space<vmem>>, vector<8x8x8xf32>
    %27 = vector.shape_cast %26 : vector<8x8x8xf32> to vector<64x8xf32>
    %c1_26 = arith.constant 1 : index
    %c1_27 = arith.constant 1 : index
    %c8_28 = arith.constant 8 : index
    %28 = vector.load %arg9[%c1_26, %c1_27, %c8_28] : memref<9x9x32xf32, #tpu.memory_space<vmem>>, vector<8x8x8xf32>
    %29 = vector.shape_cast %28 : vector<8x8x8xf32> to vector<64x8xf32>
    %c1_29 = arith.constant 1 : index
    %c0_30 = arith.constant 0 : index
    %c24_31 = arith.constant 24 : index
    %30 = vector.load %arg9[%c1_29, %c0_30, %c24_31] : memref<9x9x32xf32, #tpu.memory_space<vmem>>, vector<8x8x8xf32>
    %31 = vector.shape_cast %30 : vector<8x8x8xf32> to vector<64x8xf32>
    %c1_32 = arith.constant 1 : index
    %c1_33 = arith.constant 1 : index
    %c16_34 = arith.constant 16 : index
    %32 = vector.load %arg9[%c1_32, %c1_33, %c16_34] : memref<9x9x32xf32, #tpu.memory_space<vmem>>, vector<8x8x8xf32>
    %33 = vector.shape_cast %32 : vector<8x8x8xf32> to vector<64x8xf32>
    %c1_35 = arith.constant 1 : index
    %c1_36 = arith.constant 1 : index
    %c24_37 = arith.constant 24 : index
    %34 = vector.load %arg9[%c1_35, %c1_36, %c24_37] : memref<9x9x32xf32, #tpu.memory_space<vmem>>, vector<8x8x8xf32>
    %35 = vector.shape_cast %34 : vector<8x8x8xf32> to vector<64x8xf32>
    %36 = tpu.concatenate %19, %21, %23, %25, %27, %29, %31, %33, %35 in 1 : vector<64x8xf32>, vector<64x8xf32>, vector<64x8xf32>, vector<64x8xf32>, vector<64x8xf32>, vector<64x8xf32>, vector<64x8xf32>, vector<64x8xf32>, vector<64x8xf32> -> vector<64x72xf32>
    %c0_38 = arith.constant 0 : index
    %c0_39 = arith.constant 0 : index
    %37 = vector.load %arg4[%c0_38, %c0_39] : memref<72x16xf32, #tpu.memory_space<vmem>>, vector<72x16xf32>
    %cst_40 = arith.constant dense<0.000000e+00> : vector<64x16xf32>
    %38 = tpu.matmul %36, %37, %cst_40 {dimension_numbers = #tpu.dot_dimension_numbers<[1], [0], [0], [1], [0, 0, 1, 1], [], []>} : vector<64x72xf32>, vector<72x16xf32>, vector<64x16xf32> -> vector<64x16xf32>
    %c0_41 = arith.constant 0 : index
    %c0_42 = arith.constant 0 : index
    %39 = vector.load %arg5[%c0_41, %c0_42] : memref<1x16xf32, #tpu.memory_space<vmem>>, vector<1x16xf32>
    %40 = vector.broadcast %39 : vector<1x16xf32> to vector<64x16xf32>
    %41 = arith.addf %38, %40 : vector<64x16xf32>
    %c0_43 = arith.constant 0 : index
    %c0_44 = arith.constant 0 : index
    %c0_45 = arith.constant 0 : index
    %42 = vector.load %arg6[%c0_43, %c0_44, %c0_45] : memref<1x64x16xf32, #tpu.memory_space<vmem>>, vector<1x64x16xf32>
    %43 = vector.shape_cast %42 : vector<1x64x16xf32> to vector<64x16xf32>
    %44 = vector.shape_cast %41 : vector<64x16xf32> to vector<1x64x16xf32>
    tpu.vector_store %arg6[%c0_43, %c0_44, %c0_45], %44 {strides = array<i32>} : memref<1x64x16xf32, #tpu.memory_space<vmem>>, vector<1x64x16xf32>,
    %cst_46 = arith.constant dense<0.000000e+00> : vector<16xf32>
    %45 = vector.multi_reduction <add>, %41, %cst_46 [0] : vector<64x16xf32> to vector<16xf32>
    %46 = vector.shape_cast %45 : vector<16xf32> to vector<1x16xf32>
    %c0_47 = arith.constant 0 : index
    %c0_48 = arith.constant 0 : index
    %c0_49 = arith.constant 0 : index
    %47 = vector.load %arg7[%c0_47, %c0_48, %c0_49] : memref<1x1x16xf32, #tpu.memory_space<vmem>>, vector<1x1x16xf32>
    %48 = vector.shape_cast %47 : vector<1x1x16xf32> to vector<1x16xf32>
    %49 = vector.shape_cast %46 : vector<1x16xf32> to vector<1x1x16xf32>
    tpu.vector_store %arg7[%c0_47, %c0_48, %c0_49], %49 {strides = array<i32>} : memref<1x1x16xf32, #tpu.memory_space<vmem>>, vector<1x1x16xf32>,
    %50 = arith.mulf %41, %41 : vector<64x16xf32>
    %cst_50 = arith.constant dense<0.000000e+00> : vector<16xf32>
    %51 = vector.multi_reduction <add>, %50, %cst_50 [0] : vector<64x16xf32> to vector<16xf32>
    %52 = vector.shape_cast %51 : vector<16xf32> to vector<1x16xf32>
    %c0_51 = arith.constant 0 : index
    %c0_52 = arith.constant 0 : index
    %c0_53 = arith.constant 0 : index
    %53 = vector.load %arg8[%c0_51, %c0_52, %c0_53] : memref<1x1x16xf32, #tpu.memory_space<vmem>>, vector<1x1x16xf32>
    %54 = vector.shape_cast %53 : vector<1x1x16xf32> to vector<1x16xf32>
    %55 = vector.shape_cast %52 : vector<1x16xf32> to vector<1x1x16xf32>
    tpu.vector_store %arg8[%c0_51, %c0_52, %c0_53], %55 {strides = array<i32>} : memref<1x1x16xf32, #tpu.memory_space<vmem>>, vector<1x1x16xf32>,
    return
  }
  func.func @transform_0(%arg0: i32) -> (i32, i32, i32, i32) {
    %c0_i32 = arith.constant 0 : i32
    %c0_i32_0 = arith.constant 0 : i32
    %c0_i32_1 = arith.constant 0 : i32
    %c0_i32_2 = arith.constant 0 : i32
    return %arg0, %c0_i32, %c0_i32_0, %c0_i32_1 : i32, i32, i32, i32
  }
  func.func @transform_1(%arg0: i32) -> (i32, i32) {
    %c0_i32 = arith.constant 0 : i32
    %c0_i32_0 = arith.constant 0 : i32
    %c0_i32_1 = arith.constant 0 : i32
    return %c0_i32, %c0_i32_0 : i32, i32
  }
  func.func @transform_2(%arg0: i32) -> (i32, i32) {
    %c0_i32 = arith.constant 0 : i32
    %c0_i32_0 = arith.constant 0 : i32
    %c0_i32_1 = arith.constant 0 : i32
    return %c0_i32, %c0_i32_0 : i32, i32
  }
  func.func @transform_3(%arg0: i32) -> (i32, i32) {
    %c0_i32 = arith.constant 0 : i32
    %c0_i32_0 = arith.constant 0 : i32
    %c0_i32_1 = arith.constant 0 : i32
    return %c0_i32, %c0_i32_0 : i32, i32
  }
  func.func @transform_4(%arg0: i32) -> (i32, i32) {
    %c0_i32 = arith.constant 0 : i32
    %c0_i32_0 = arith.constant 0 : i32
    %c0_i32_1 = arith.constant 0 : i32
    return %c0_i32, %c0_i32_0 : i32, i32
  }
  func.func @transform_5(%arg0: i32) -> (i32, i32, i32) {
    %c0_i32 = arith.constant 0 : i32
    %c0_i32_0 = arith.constant 0 : i32
    %c0_i32_1 = arith.constant 0 : i32
    return %arg0, %c0_i32, %c0_i32_0 : i32, i32, i32
  }
  func.func @transform_6(%arg0: i32) -> (i32, i32, i32) {
    %c0_i32 = arith.constant 0 : i32
    %c0_i32_0 = arith.constant 0 : i32
    %c0_i32_1 = arith.constant 0 : i32
    return %arg0, %c0_i32, %c0_i32_0 : i32, i32, i32
  }
  func.func @transform_7(%arg0: i32) -> (i32, i32, i32) {
    %c0_i32 = arith.constant 0 : i32
    %c0_i32_0 = arith.constant 0 : i32
    %c0_i32_1 = arith.constant 0 : i32
    return %arg0, %c0_i32, %c0_i32_0 : i32, i32, i32
  }
}

module attributes {stable_mosaic.version = 11 : i64} {
  func.func @_fused_conv_kernel(%arg0: i32, %arg1: memref<1x8x8x16xf32, #tpu.memory_space<vmem>>, %arg2: memref<1x16xf32, #tpu.memory_space<vmem>>, %arg3: memref<1x16xf32, #tpu.memory_space<vmem>>, %arg4: memref<144x16xf32, #tpu.memory_space<vmem>>, %arg5: memref<1x16xf32, #tpu.memory_space<vmem>>, %arg6: memref<1x64x16xf32, #tpu.memory_space<vmem>>, %arg7: memref<1x1x16xf32, #tpu.memory_space<vmem>>, %arg8: memref<1x1x16xf32, #tpu.memory_space<vmem>>, %arg9: memref<10x10x16xf32, #tpu.memory_space<vmem>>) attributes {dimension_semantics = [#tpu.dimension_semantics<parallel>], iteration_bounds = array<i64: 2>, scalar_prefetch = 0 : i64, scratch_operands = 1 : i64, tpu.core_type = #tpu.core_type<tc>, window_params = [{transform_indices = @transform_0, window_bounds = array<i64: 1, 8, 8, 16>}, {pipeline_mode = #tpu.pipeline_mode<synchronous>, transform_indices = @transform_1, window_bounds = array<i64: 1, 16>}, {pipeline_mode = #tpu.pipeline_mode<synchronous>, transform_indices = @transform_2, window_bounds = array<i64: 1, 16>}, {pipeline_mode = #tpu.pipeline_mode<synchronous>, transform_indices = @transform_3, window_bounds = array<i64: 144, 16>}, {pipeline_mode = #tpu.pipeline_mode<synchronous>, transform_indices = @transform_4, window_bounds = array<i64: 1, 16>}, {transform_indices = @transform_5, window_bounds = array<i64: 1, 64, 16>}, {transform_indices = @transform_6, window_bounds = array<i64: 1, 1, 16>}, {transform_indices = @transform_7, window_bounds = array<i64: 1, 1, 16>}]} {
    %c0 = arith.constant 0 : index
    %c0_0 = arith.constant 0 : index
    %c0_1 = arith.constant 0 : index
    %c0_2 = arith.constant 0 : index
    %0 = vector.load %arg1[%c0, %c0_0, %c0_1, %c0_2] : memref<1x8x8x16xf32, #tpu.memory_space<vmem>>, vector<1x8x8x16xf32>
    %1 = vector.shape_cast %0 : vector<1x8x8x16xf32> to vector<8x8x16xf32>
    %c0_3 = arith.constant 0 : index
    %c0_4 = arith.constant 0 : index
    %2 = vector.load %arg2[%c0_3, %c0_4] : memref<1x16xf32, #tpu.memory_space<vmem>>, vector<1x16xf32>
    %3 = vector.shape_cast %2 : vector<1x16xf32> to vector<1x1x16xf32>
    %4 = vector.broadcast %3 : vector<1x1x16xf32> to vector<8x8x16xf32>
    %5 = arith.mulf %1, %4 : vector<8x8x16xf32>
    %c0_5 = arith.constant 0 : index
    %c0_6 = arith.constant 0 : index
    %6 = vector.load %arg3[%c0_5, %c0_6] : memref<1x16xf32, #tpu.memory_space<vmem>>, vector<1x16xf32>
    %7 = vector.shape_cast %6 : vector<1x16xf32> to vector<1x1x16xf32>
    %8 = vector.broadcast %7 : vector<1x1x16xf32> to vector<8x8x16xf32>
    %9 = arith.addf %5, %8 : vector<8x8x16xf32>
    %cst = arith.constant 0.000000e+00 : f32
    %10 = vector.broadcast %cst : f32 to vector<8x8x16xf32>
    %11 = arith.cmpf oge, %9, %10 : vector<8x8x16xf32>
    %cst_7 = arith.constant 2.000000e-01 : f32
    %12 = vector.broadcast %cst_7 : f32 to vector<8x8x16xf32>
    %13 = arith.mulf %12, %9 : vector<8x8x16xf32>
    %14 = arith.select %11, %9, %13 : vector<8x8x16xi1>, vector<8x8x16xf32>
    %cst_8 = arith.constant 0.000000e+00 : f32
    %15 = vector.broadcast %cst_8 : f32 to vector<10x10x16xf32>
    %c0_9 = arith.constant 0 : index
    %c0_10 = arith.constant 0 : index
    %c0_11 = arith.constant 0 : index
    %16 = vector.load %arg9[%c0_9, %c0_10, %c0_11] : memref<10x10x16xf32, #tpu.memory_space<vmem>>, vector<10x10x16xf32>
    tpu.vector_store %arg9[%c0_9, %c0_10, %c0_11], %15 {strides = array<i32>} : memref<10x10x16xf32, #tpu.memory_space<vmem>>, vector<10x10x16xf32>,
    %c1 = arith.constant 1 : index
    %c1_12 = arith.constant 1 : index
    %c0_13 = arith.constant 0 : index
    %17 = vector.load %arg9[%c1, %c1_12, %c0_13] : memref<10x10x16xf32, #tpu.memory_space<vmem>>, vector<8x8x16xf32>
    tpu.vector_store %arg9[%c1, %c1_12, %c0_13], %14 {strides = array<i32>} : memref<10x10x16xf32, #tpu.memory_space<vmem>>, vector<8x8x16xf32>,
    %c0_14 = arith.constant 0 : index
    %c0_15 = arith.constant 0 : index
    %c0_16 = arith.constant 0 : index
    %18 = vector.load %arg9[%c0_14, %c0_15, %c0_16] : memref<10x10x16xf32, #tpu.memory_space<vmem>>, vector<8x8x16xf32>
    %19 = vector.shape_cast %18 : vector<8x8x16xf32> to vector<64x16xf32>
    %c0_17 = arith.constant 0 : index
    %c1_18 = arith.constant 1 : index
    %c0_19 = arith.constant 0 : index
    %20 = vector.load %arg9[%c0_17, %c1_18, %c0_19] : memref<10x10x16xf32, #tpu.memory_space<vmem>>, vector<8x8x16xf32>
    %21 = vector.shape_cast %20 : vector<8x8x16xf32> to vector<64x16xf32>
    %c0_20 = arith.constant 0 : index
    %c2 = arith.constant 2 : index
    %c0_21 = arith.constant 0 : index
    %22 = vector.load %arg9[%c0_20, %c2, %c0_21] : memref<10x10x16xf32, #tpu.memory_space<vmem>>, vector<8x8x16xf32>
    %23 = vector.shape_cast %22 : vector<8x8x16xf32> to vector<64x16xf32>
    %c1_22 = arith.constant 1 : index
    %c0_23 = arith.constant 0 : index
    %c0_24 = arith.constant 0 : index
    %24 = vector.load %arg9[%c1_22, %c0_23, %c0_24] : memref<10x10x16xf32, #tpu.memory_space<vmem>>, vector<8x8x16xf32>
    %25 = vector.shape_cast %24 : vector<8x8x16xf32> to vector<64x16xf32>
    %c1_25 = arith.constant 1 : index
    %c1_26 = arith.constant 1 : index
    %c0_27 = arith.constant 0 : index
    %26 = vector.load %arg9[%c1_25, %c1_26, %c0_27] : memref<10x10x16xf32, #tpu.memory_space<vmem>>, vector<8x8x16xf32>
    %27 = vector.shape_cast %26 : vector<8x8x16xf32> to vector<64x16xf32>
    %c1_28 = arith.constant 1 : index
    %c2_29 = arith.constant 2 : index
    %c0_30 = arith.constant 0 : index
    %28 = vector.load %arg9[%c1_28, %c2_29, %c0_30] : memref<10x10x16xf32, #tpu.memory_space<vmem>>, vector<8x8x16xf32>
    %29 = vector.shape_cast %28 : vector<8x8x16xf32> to vector<64x16xf32>
    %c2_31 = arith.constant 2 : index
    %c0_32 = arith.constant 0 : index
    %c0_33 = arith.constant 0 : index
    %30 = vector.load %arg9[%c2_31, %c0_32, %c0_33] : memref<10x10x16xf32, #tpu.memory_space<vmem>>, vector<8x8x16xf32>
    %31 = vector.shape_cast %30 : vector<8x8x16xf32> to vector<64x16xf32>
    %c2_34 = arith.constant 2 : index
    %c1_35 = arith.constant 1 : index
    %c0_36 = arith.constant 0 : index
    %32 = vector.load %arg9[%c2_34, %c1_35, %c0_36] : memref<10x10x16xf32, #tpu.memory_space<vmem>>, vector<8x8x16xf32>
    %33 = vector.shape_cast %32 : vector<8x8x16xf32> to vector<64x16xf32>
    %c2_37 = arith.constant 2 : index
    %c2_38 = arith.constant 2 : index
    %c0_39 = arith.constant 0 : index
    %34 = vector.load %arg9[%c2_37, %c2_38, %c0_39] : memref<10x10x16xf32, #tpu.memory_space<vmem>>, vector<8x8x16xf32>
    %35 = vector.shape_cast %34 : vector<8x8x16xf32> to vector<64x16xf32>
    %36 = tpu.concatenate %19, %21, %23, %25, %27, %29, %31, %33, %35 in 1 : vector<64x16xf32>, vector<64x16xf32>, vector<64x16xf32>, vector<64x16xf32>, vector<64x16xf32>, vector<64x16xf32>, vector<64x16xf32>, vector<64x16xf32>, vector<64x16xf32> -> vector<64x144xf32>
    %c0_40 = arith.constant 0 : index
    %c0_41 = arith.constant 0 : index
    %37 = vector.load %arg4[%c0_40, %c0_41] : memref<144x16xf32, #tpu.memory_space<vmem>>, vector<144x16xf32>
    %cst_42 = arith.constant dense<0.000000e+00> : vector<64x16xf32>
    %38 = tpu.matmul %36, %37, %cst_42 {dimension_numbers = #tpu.dot_dimension_numbers<[1], [0], [0], [1], [0, 0, 1, 1], [], []>} : vector<64x144xf32>, vector<144x16xf32>, vector<64x16xf32> -> vector<64x16xf32>
    %c0_43 = arith.constant 0 : index
    %c0_44 = arith.constant 0 : index
    %39 = vector.load %arg5[%c0_43, %c0_44] : memref<1x16xf32, #tpu.memory_space<vmem>>, vector<1x16xf32>
    %40 = vector.broadcast %39 : vector<1x16xf32> to vector<64x16xf32>
    %41 = arith.addf %38, %40 : vector<64x16xf32>
    %c0_45 = arith.constant 0 : index
    %c0_46 = arith.constant 0 : index
    %c0_47 = arith.constant 0 : index
    %42 = vector.load %arg6[%c0_45, %c0_46, %c0_47] : memref<1x64x16xf32, #tpu.memory_space<vmem>>, vector<1x64x16xf32>
    %43 = vector.shape_cast %42 : vector<1x64x16xf32> to vector<64x16xf32>
    %44 = vector.shape_cast %41 : vector<64x16xf32> to vector<1x64x16xf32>
    tpu.vector_store %arg6[%c0_45, %c0_46, %c0_47], %44 {strides = array<i32>} : memref<1x64x16xf32, #tpu.memory_space<vmem>>, vector<1x64x16xf32>,
    %cst_48 = arith.constant dense<0.000000e+00> : vector<16xf32>
    %45 = vector.multi_reduction <add>, %41, %cst_48 [0] : vector<64x16xf32> to vector<16xf32>
    %46 = vector.shape_cast %45 : vector<16xf32> to vector<1x16xf32>
    %c0_49 = arith.constant 0 : index
    %c0_50 = arith.constant 0 : index
    %c0_51 = arith.constant 0 : index
    %47 = vector.load %arg7[%c0_49, %c0_50, %c0_51] : memref<1x1x16xf32, #tpu.memory_space<vmem>>, vector<1x1x16xf32>
    %48 = vector.shape_cast %47 : vector<1x1x16xf32> to vector<1x16xf32>
    %49 = vector.shape_cast %46 : vector<1x16xf32> to vector<1x1x16xf32>
    tpu.vector_store %arg7[%c0_49, %c0_50, %c0_51], %49 {strides = array<i32>} : memref<1x1x16xf32, #tpu.memory_space<vmem>>, vector<1x1x16xf32>,
    %50 = arith.mulf %41, %41 : vector<64x16xf32>
    %cst_52 = arith.constant dense<0.000000e+00> : vector<16xf32>
    %51 = vector.multi_reduction <add>, %50, %cst_52 [0] : vector<64x16xf32> to vector<16xf32>
    %52 = vector.shape_cast %51 : vector<16xf32> to vector<1x16xf32>
    %c0_53 = arith.constant 0 : index
    %c0_54 = arith.constant 0 : index
    %c0_55 = arith.constant 0 : index
    %53 = vector.load %arg8[%c0_53, %c0_54, %c0_55] : memref<1x1x16xf32, #tpu.memory_space<vmem>>, vector<1x1x16xf32>
    %54 = vector.shape_cast %53 : vector<1x1x16xf32> to vector<1x16xf32>
    %55 = vector.shape_cast %52 : vector<1x16xf32> to vector<1x1x16xf32>
    tpu.vector_store %arg8[%c0_53, %c0_54, %c0_55], %55 {strides = array<i32>} : memref<1x1x16xf32, #tpu.memory_space<vmem>>, vector<1x1x16xf32>,
    return
  }
  func.func @transform_0(%arg0: i32) -> (i32, i32, i32, i32) {
    %c0_i32 = arith.constant 0 : i32
    %c0_i32_0 = arith.constant 0 : i32
    %c0_i32_1 = arith.constant 0 : i32
    %c0_i32_2 = arith.constant 0 : i32
    return %arg0, %c0_i32, %c0_i32_0, %c0_i32_1 : i32, i32, i32, i32
  }
  func.func @transform_1(%arg0: i32) -> (i32, i32) {
    %c0_i32 = arith.constant 0 : i32
    %c0_i32_0 = arith.constant 0 : i32
    %c0_i32_1 = arith.constant 0 : i32
    return %c0_i32, %c0_i32_0 : i32, i32
  }
  func.func @transform_2(%arg0: i32) -> (i32, i32) {
    %c0_i32 = arith.constant 0 : i32
    %c0_i32_0 = arith.constant 0 : i32
    %c0_i32_1 = arith.constant 0 : i32
    return %c0_i32, %c0_i32_0 : i32, i32
  }
  func.func @transform_3(%arg0: i32) -> (i32, i32) {
    %c0_i32 = arith.constant 0 : i32
    %c0_i32_0 = arith.constant 0 : i32
    %c0_i32_1 = arith.constant 0 : i32
    return %c0_i32, %c0_i32_0 : i32, i32
  }
  func.func @transform_4(%arg0: i32) -> (i32, i32) {
    %c0_i32 = arith.constant 0 : i32
    %c0_i32_0 = arith.constant 0 : i32
    %c0_i32_1 = arith.constant 0 : i32
    return %c0_i32, %c0_i32_0 : i32, i32
  }
  func.func @transform_5(%arg0: i32) -> (i32, i32, i32) {
    %c0_i32 = arith.constant 0 : i32
    %c0_i32_0 = arith.constant 0 : i32
    %c0_i32_1 = arith.constant 0 : i32
    return %arg0, %c0_i32, %c0_i32_0 : i32, i32, i32
  }
  func.func @transform_6(%arg0: i32) -> (i32, i32, i32) {
    %c0_i32 = arith.constant 0 : i32
    %c0_i32_0 = arith.constant 0 : i32
    %c0_i32_1 = arith.constant 0 : i32
    return %arg0, %c0_i32, %c0_i32_0 : i32, i32, i32
  }
  func.func @transform_7(%arg0: i32) -> (i32, i32, i32) {
    %c0_i32 = arith.constant 0 : i32
    %c0_i32_0 = arith.constant 0 : i32
    %c0_i32_1 = arith.constant 0 : i32
    return %arg0, %c0_i32, %c0_i32_0 : i32, i32, i32
  }
}

module attributes {stable_mosaic.version = 11 : i64} {
  func.func @_fused_conv_kernel(%arg0: i32, %arg1: memref<1x16x16x24xf32, #tpu.memory_space<vmem>>, %arg2: memref<1x24xf32, #tpu.memory_space<vmem>>, %arg3: memref<1x24xf32, #tpu.memory_space<vmem>>, %arg4: memref<216x8xf32, #tpu.memory_space<vmem>>, %arg5: memref<1x8xf32, #tpu.memory_space<vmem>>, %arg6: memref<1x256x8xf32, #tpu.memory_space<vmem>>, %arg7: memref<1x1x8xf32, #tpu.memory_space<vmem>>, %arg8: memref<1x1x8xf32, #tpu.memory_space<vmem>>, %arg9: memref<18x18x24xf32, #tpu.memory_space<vmem>>) attributes {dimension_semantics = [#tpu.dimension_semantics<parallel>], iteration_bounds = array<i64: 2>, scalar_prefetch = 0 : i64, scratch_operands = 1 : i64, tpu.core_type = #tpu.core_type<tc>, window_params = [{transform_indices = @transform_0, window_bounds = array<i64: 1, 16, 16, 24>}, {pipeline_mode = #tpu.pipeline_mode<synchronous>, transform_indices = @transform_1, window_bounds = array<i64: 1, 24>}, {pipeline_mode = #tpu.pipeline_mode<synchronous>, transform_indices = @transform_2, window_bounds = array<i64: 1, 24>}, {pipeline_mode = #tpu.pipeline_mode<synchronous>, transform_indices = @transform_3, window_bounds = array<i64: 216, 8>}, {pipeline_mode = #tpu.pipeline_mode<synchronous>, transform_indices = @transform_4, window_bounds = array<i64: 1, 8>}, {transform_indices = @transform_5, window_bounds = array<i64: 1, 256, 8>}, {transform_indices = @transform_6, window_bounds = array<i64: 1, 1, 8>}, {transform_indices = @transform_7, window_bounds = array<i64: 1, 1, 8>}]} {
    %c0 = arith.constant 0 : index
    %c0_0 = arith.constant 0 : index
    %c0_1 = arith.constant 0 : index
    %c0_2 = arith.constant 0 : index
    %0 = vector.load %arg1[%c0, %c0_0, %c0_1, %c0_2] : memref<1x16x16x24xf32, #tpu.memory_space<vmem>>, vector<1x16x16x24xf32>
    %1 = vector.shape_cast %0 : vector<1x16x16x24xf32> to vector<16x16x24xf32>
    %c0_3 = arith.constant 0 : index
    %c0_4 = arith.constant 0 : index
    %2 = vector.load %arg2[%c0_3, %c0_4] : memref<1x24xf32, #tpu.memory_space<vmem>>, vector<1x24xf32>
    %3 = vector.shape_cast %2 : vector<1x24xf32> to vector<1x1x24xf32>
    %4 = vector.broadcast %3 : vector<1x1x24xf32> to vector<16x16x24xf32>
    %5 = arith.mulf %1, %4 : vector<16x16x24xf32>
    %c0_5 = arith.constant 0 : index
    %c0_6 = arith.constant 0 : index
    %6 = vector.load %arg3[%c0_5, %c0_6] : memref<1x24xf32, #tpu.memory_space<vmem>>, vector<1x24xf32>
    %7 = vector.shape_cast %6 : vector<1x24xf32> to vector<1x1x24xf32>
    %8 = vector.broadcast %7 : vector<1x1x24xf32> to vector<16x16x24xf32>
    %9 = arith.addf %5, %8 : vector<16x16x24xf32>
    %cst = arith.constant 0.000000e+00 : f32
    %10 = vector.broadcast %cst : f32 to vector<16x16x24xf32>
    %11 = arith.cmpf oge, %9, %10 : vector<16x16x24xf32>
    %cst_7 = arith.constant 2.000000e-01 : f32
    %12 = vector.broadcast %cst_7 : f32 to vector<16x16x24xf32>
    %13 = arith.mulf %12, %9 : vector<16x16x24xf32>
    %14 = arith.select %11, %9, %13 : vector<16x16x24xi1>, vector<16x16x24xf32>
    %cst_8 = arith.constant 0.000000e+00 : f32
    %15 = vector.broadcast %cst_8 : f32 to vector<18x18x24xf32>
    %c0_9 = arith.constant 0 : index
    %c0_10 = arith.constant 0 : index
    %c0_11 = arith.constant 0 : index
    %16 = vector.load %arg9[%c0_9, %c0_10, %c0_11] : memref<18x18x24xf32, #tpu.memory_space<vmem>>, vector<18x18x24xf32>
    tpu.vector_store %arg9[%c0_9, %c0_10, %c0_11], %15 {strides = array<i32>} : memref<18x18x24xf32, #tpu.memory_space<vmem>>, vector<18x18x24xf32>,
    %c1 = arith.constant 1 : index
    %c1_12 = arith.constant 1 : index
    %c0_13 = arith.constant 0 : index
    %17 = vector.load %arg9[%c1, %c1_12, %c0_13] : memref<18x18x24xf32, #tpu.memory_space<vmem>>, vector<16x16x24xf32>
    tpu.vector_store %arg9[%c1, %c1_12, %c0_13], %14 {strides = array<i32>} : memref<18x18x24xf32, #tpu.memory_space<vmem>>, vector<16x16x24xf32>,
    %c0_14 = arith.constant 0 : index
    %c0_15 = arith.constant 0 : index
    %c0_16 = arith.constant 0 : index
    %18 = vector.load %arg9[%c0_14, %c0_15, %c0_16] : memref<18x18x24xf32, #tpu.memory_space<vmem>>, vector<16x16x24xf32>
    %19 = vector.shape_cast %18 : vector<16x16x24xf32> to vector<256x24xf32>
    %c0_17 = arith.constant 0 : index
    %c1_18 = arith.constant 1 : index
    %c0_19 = arith.constant 0 : index
    %20 = vector.load %arg9[%c0_17, %c1_18, %c0_19] : memref<18x18x24xf32, #tpu.memory_space<vmem>>, vector<16x16x24xf32>
    %21 = vector.shape_cast %20 : vector<16x16x24xf32> to vector<256x24xf32>
    %c0_20 = arith.constant 0 : index
    %c2 = arith.constant 2 : index
    %c0_21 = arith.constant 0 : index
    %22 = vector.load %arg9[%c0_20, %c2, %c0_21] : memref<18x18x24xf32, #tpu.memory_space<vmem>>, vector<16x16x24xf32>
    %23 = vector.shape_cast %22 : vector<16x16x24xf32> to vector<256x24xf32>
    %c1_22 = arith.constant 1 : index
    %c0_23 = arith.constant 0 : index
    %c0_24 = arith.constant 0 : index
    %24 = vector.load %arg9[%c1_22, %c0_23, %c0_24] : memref<18x18x24xf32, #tpu.memory_space<vmem>>, vector<16x16x24xf32>
    %25 = vector.shape_cast %24 : vector<16x16x24xf32> to vector<256x24xf32>
    %c1_25 = arith.constant 1 : index
    %c1_26 = arith.constant 1 : index
    %c0_27 = arith.constant 0 : index
    %26 = vector.load %arg9[%c1_25, %c1_26, %c0_27] : memref<18x18x24xf32, #tpu.memory_space<vmem>>, vector<16x16x24xf32>
    %27 = vector.shape_cast %26 : vector<16x16x24xf32> to vector<256x24xf32>
    %c1_28 = arith.constant 1 : index
    %c2_29 = arith.constant 2 : index
    %c0_30 = arith.constant 0 : index
    %28 = vector.load %arg9[%c1_28, %c2_29, %c0_30] : memref<18x18x24xf32, #tpu.memory_space<vmem>>, vector<16x16x24xf32>
    %29 = vector.shape_cast %28 : vector<16x16x24xf32> to vector<256x24xf32>
    %c2_31 = arith.constant 2 : index
    %c0_32 = arith.constant 0 : index
    %c0_33 = arith.constant 0 : index
    %30 = vector.load %arg9[%c2_31, %c0_32, %c0_33] : memref<18x18x24xf32, #tpu.memory_space<vmem>>, vector<16x16x24xf32>
    %31 = vector.shape_cast %30 : vector<16x16x24xf32> to vector<256x24xf32>
    %c2_34 = arith.constant 2 : index
    %c1_35 = arith.constant 1 : index
    %c0_36 = arith.constant 0 : index
    %32 = vector.load %arg9[%c2_34, %c1_35, %c0_36] : memref<18x18x24xf32, #tpu.memory_space<vmem>>, vector<16x16x24xf32>
    %33 = vector.shape_cast %32 : vector<16x16x24xf32> to vector<256x24xf32>
    %c2_37 = arith.constant 2 : index
    %c2_38 = arith.constant 2 : index
    %c0_39 = arith.constant 0 : index
    %34 = vector.load %arg9[%c2_37, %c2_38, %c0_39] : memref<18x18x24xf32, #tpu.memory_space<vmem>>, vector<16x16x24xf32>
    %35 = vector.shape_cast %34 : vector<16x16x24xf32> to vector<256x24xf32>
    %36 = tpu.concatenate %19, %21, %23, %25, %27, %29, %31, %33, %35 in 1 : vector<256x24xf32>, vector<256x24xf32>, vector<256x24xf32>, vector<256x24xf32>, vector<256x24xf32>, vector<256x24xf32>, vector<256x24xf32>, vector<256x24xf32>, vector<256x24xf32> -> vector<256x216xf32>
    %c0_40 = arith.constant 0 : index
    %c0_41 = arith.constant 0 : index
    %37 = vector.load %arg4[%c0_40, %c0_41] : memref<216x8xf32, #tpu.memory_space<vmem>>, vector<216x8xf32>
    %cst_42 = arith.constant dense<0.000000e+00> : vector<256x8xf32>
    %38 = tpu.matmul %36, %37, %cst_42 {dimension_numbers = #tpu.dot_dimension_numbers<[1], [0], [0], [1], [0, 0, 1, 1], [], []>} : vector<256x216xf32>, vector<216x8xf32>, vector<256x8xf32> -> vector<256x8xf32>
    %c0_43 = arith.constant 0 : index
    %c0_44 = arith.constant 0 : index
    %39 = vector.load %arg5[%c0_43, %c0_44] : memref<1x8xf32, #tpu.memory_space<vmem>>, vector<1x8xf32>
    %40 = vector.broadcast %39 : vector<1x8xf32> to vector<256x8xf32>
    %41 = arith.addf %38, %40 : vector<256x8xf32>
    %c0_45 = arith.constant 0 : index
    %c0_46 = arith.constant 0 : index
    %c0_47 = arith.constant 0 : index
    %42 = vector.load %arg6[%c0_45, %c0_46, %c0_47] : memref<1x256x8xf32, #tpu.memory_space<vmem>>, vector<1x256x8xf32>
    %43 = vector.shape_cast %42 : vector<1x256x8xf32> to vector<256x8xf32>
    %44 = vector.shape_cast %41 : vector<256x8xf32> to vector<1x256x8xf32>
    tpu.vector_store %arg6[%c0_45, %c0_46, %c0_47], %44 {strides = array<i32>} : memref<1x256x8xf32, #tpu.memory_space<vmem>>, vector<1x256x8xf32>,
    %cst_48 = arith.constant dense<0.000000e+00> : vector<8xf32>
    %45 = vector.multi_reduction <add>, %41, %cst_48 [0] : vector<256x8xf32> to vector<8xf32>
    %46 = vector.shape_cast %45 : vector<8xf32> to vector<1x8xf32>
    %c0_49 = arith.constant 0 : index
    %c0_50 = arith.constant 0 : index
    %c0_51 = arith.constant 0 : index
    %47 = vector.load %arg7[%c0_49, %c0_50, %c0_51] : memref<1x1x8xf32, #tpu.memory_space<vmem>>, vector<1x1x8xf32>
    %48 = vector.shape_cast %47 : vector<1x1x8xf32> to vector<1x8xf32>
    %49 = vector.shape_cast %46 : vector<1x8xf32> to vector<1x1x8xf32>
    tpu.vector_store %arg7[%c0_49, %c0_50, %c0_51], %49 {strides = array<i32>} : memref<1x1x8xf32, #tpu.memory_space<vmem>>, vector<1x1x8xf32>,
    %50 = arith.mulf %41, %41 : vector<256x8xf32>
    %cst_52 = arith.constant dense<0.000000e+00> : vector<8xf32>
    %51 = vector.multi_reduction <add>, %50, %cst_52 [0] : vector<256x8xf32> to vector<8xf32>
    %52 = vector.shape_cast %51 : vector<8xf32> to vector<1x8xf32>
    %c0_53 = arith.constant 0 : index
    %c0_54 = arith.constant 0 : index
    %c0_55 = arith.constant 0 : index
    %53 = vector.load %arg8[%c0_53, %c0_54, %c0_55] : memref<1x1x8xf32, #tpu.memory_space<vmem>>, vector<1x1x8xf32>
    %54 = vector.shape_cast %53 : vector<1x1x8xf32> to vector<1x8xf32>
    %55 = vector.shape_cast %52 : vector<1x8xf32> to vector<1x1x8xf32>
    tpu.vector_store %arg8[%c0_53, %c0_54, %c0_55], %55 {strides = array<i32>} : memref<1x1x8xf32, #tpu.memory_space<vmem>>, vector<1x1x8xf32>,
    return
  }
  func.func @transform_0(%arg0: i32) -> (i32, i32, i32, i32) {
    %c0_i32 = arith.constant 0 : i32
    %c0_i32_0 = arith.constant 0 : i32
    %c0_i32_1 = arith.constant 0 : i32
    %c0_i32_2 = arith.constant 0 : i32
    return %arg0, %c0_i32, %c0_i32_0, %c0_i32_1 : i32, i32, i32, i32
  }
  func.func @transform_1(%arg0: i32) -> (i32, i32) {
    %c0_i32 = arith.constant 0 : i32
    %c0_i32_0 = arith.constant 0 : i32
    %c0_i32_1 = arith.constant 0 : i32
    return %c0_i32, %c0_i32_0 : i32, i32
  }
  func.func @transform_2(%arg0: i32) -> (i32, i32) {
    %c0_i32 = arith.constant 0 : i32
    %c0_i32_0 = arith.constant 0 : i32
    %c0_i32_1 = arith.constant 0 : i32
    return %c0_i32, %c0_i32_0 : i32, i32
  }
  func.func @transform_3(%arg0: i32) -> (i32, i32) {
    %c0_i32 = arith.constant 0 : i32
    %c0_i32_0 = arith.constant 0 : i32
    %c0_i32_1 = arith.constant 0 : i32
    return %c0_i32, %c0_i32_0 : i32, i32
  }
  func.func @transform_4(%arg0: i32) -> (i32, i32) {
    %c0_i32 = arith.constant 0 : i32
    %c0_i32_0 = arith.constant 0 : i32
    %c0_i32_1 = arith.constant 0 : i32
    return %c0_i32, %c0_i32_0 : i32, i32
  }
  func.func @transform_5(%arg0: i32) -> (i32, i32, i32) {
    %c0_i32 = arith.constant 0 : i32
    %c0_i32_0 = arith.constant 0 : i32
    %c0_i32_1 = arith.constant 0 : i32
    return %arg0, %c0_i32, %c0_i32_0 : i32, i32, i32
  }
  func.func @transform_6(%arg0: i32) -> (i32, i32, i32) {
    %c0_i32 = arith.constant 0 : i32
    %c0_i32_0 = arith.constant 0 : i32
    %c0_i32_1 = arith.constant 0 : i32
    return %arg0, %c0_i32, %c0_i32_0 : i32, i32, i32
  }
  func.func @transform_7(%arg0: i32) -> (i32, i32, i32) {
    %c0_i32 = arith.constant 0 : i32
    %c0_i32_0 = arith.constant 0 : i32
    %c0_i32_1 = arith.constant 0 : i32
    return %arg0, %c0_i32, %c0_i32_0 : i32, i32, i32
  }
}

module attributes {stable_mosaic.version = 11 : i64} {
  func.func @_fused_conv_kernel(%arg0: i32, %arg1: memref<1x16x16x8xf32, #tpu.memory_space<vmem>>, %arg2: memref<1x8xf32, #tpu.memory_space<vmem>>, %arg3: memref<1x8xf32, #tpu.memory_space<vmem>>, %arg4: memref<72x4xf32, #tpu.memory_space<vmem>>, %arg5: memref<1x4xf32, #tpu.memory_space<vmem>>, %arg6: memref<1x256x4xf32, #tpu.memory_space<vmem>>, %arg7: memref<1x1x4xf32, #tpu.memory_space<vmem>>, %arg8: memref<1x1x4xf32, #tpu.memory_space<vmem>>, %arg9: memref<18x18x8xf32, #tpu.memory_space<vmem>>) attributes {dimension_semantics = [#tpu.dimension_semantics<parallel>], iteration_bounds = array<i64: 2>, scalar_prefetch = 0 : i64, scratch_operands = 1 : i64, tpu.core_type = #tpu.core_type<tc>, window_params = [{transform_indices = @transform_0, window_bounds = array<i64: 1, 16, 16, 8>}, {pipeline_mode = #tpu.pipeline_mode<synchronous>, transform_indices = @transform_1, window_bounds = array<i64: 1, 8>}, {pipeline_mode = #tpu.pipeline_mode<synchronous>, transform_indices = @transform_2, window_bounds = array<i64: 1, 8>}, {pipeline_mode = #tpu.pipeline_mode<synchronous>, transform_indices = @transform_3, window_bounds = array<i64: 72, 4>}, {pipeline_mode = #tpu.pipeline_mode<synchronous>, transform_indices = @transform_4, window_bounds = array<i64: 1, 4>}, {transform_indices = @transform_5, window_bounds = array<i64: 1, 256, 4>}, {transform_indices = @transform_6, window_bounds = array<i64: 1, 1, 4>}, {transform_indices = @transform_7, window_bounds = array<i64: 1, 1, 4>}]} {
    %c0 = arith.constant 0 : index
    %c0_0 = arith.constant 0 : index
    %c0_1 = arith.constant 0 : index
    %c0_2 = arith.constant 0 : index
    %0 = vector.load %arg1[%c0, %c0_0, %c0_1, %c0_2] : memref<1x16x16x8xf32, #tpu.memory_space<vmem>>, vector<1x16x16x8xf32>
    %1 = vector.shape_cast %0 : vector<1x16x16x8xf32> to vector<16x16x8xf32>
    %c0_3 = arith.constant 0 : index
    %c0_4 = arith.constant 0 : index
    %2 = vector.load %arg2[%c0_3, %c0_4] : memref<1x8xf32, #tpu.memory_space<vmem>>, vector<1x8xf32>
    %3 = vector.shape_cast %2 : vector<1x8xf32> to vector<1x1x8xf32>
    %4 = vector.broadcast %3 : vector<1x1x8xf32> to vector<16x16x8xf32>
    %5 = arith.mulf %1, %4 : vector<16x16x8xf32>
    %c0_5 = arith.constant 0 : index
    %c0_6 = arith.constant 0 : index
    %6 = vector.load %arg3[%c0_5, %c0_6] : memref<1x8xf32, #tpu.memory_space<vmem>>, vector<1x8xf32>
    %7 = vector.shape_cast %6 : vector<1x8xf32> to vector<1x1x8xf32>
    %8 = vector.broadcast %7 : vector<1x1x8xf32> to vector<16x16x8xf32>
    %9 = arith.addf %5, %8 : vector<16x16x8xf32>
    %cst = arith.constant 0.000000e+00 : f32
    %10 = vector.broadcast %cst : f32 to vector<16x16x8xf32>
    %11 = arith.cmpf oge, %9, %10 : vector<16x16x8xf32>
    %cst_7 = arith.constant 2.000000e-01 : f32
    %12 = vector.broadcast %cst_7 : f32 to vector<16x16x8xf32>
    %13 = arith.mulf %12, %9 : vector<16x16x8xf32>
    %14 = arith.select %11, %9, %13 : vector<16x16x8xi1>, vector<16x16x8xf32>
    %cst_8 = arith.constant 0.000000e+00 : f32
    %15 = vector.broadcast %cst_8 : f32 to vector<18x18x8xf32>
    %c0_9 = arith.constant 0 : index
    %c0_10 = arith.constant 0 : index
    %c0_11 = arith.constant 0 : index
    %16 = vector.load %arg9[%c0_9, %c0_10, %c0_11] : memref<18x18x8xf32, #tpu.memory_space<vmem>>, vector<18x18x8xf32>
    tpu.vector_store %arg9[%c0_9, %c0_10, %c0_11], %15 {strides = array<i32>} : memref<18x18x8xf32, #tpu.memory_space<vmem>>, vector<18x18x8xf32>,
    %c1 = arith.constant 1 : index
    %c1_12 = arith.constant 1 : index
    %c0_13 = arith.constant 0 : index
    %17 = vector.load %arg9[%c1, %c1_12, %c0_13] : memref<18x18x8xf32, #tpu.memory_space<vmem>>, vector<16x16x8xf32>
    tpu.vector_store %arg9[%c1, %c1_12, %c0_13], %14 {strides = array<i32>} : memref<18x18x8xf32, #tpu.memory_space<vmem>>, vector<16x16x8xf32>,
    %c0_14 = arith.constant 0 : index
    %c0_15 = arith.constant 0 : index
    %c0_16 = arith.constant 0 : index
    %18 = vector.load %arg9[%c0_14, %c0_15, %c0_16] : memref<18x18x8xf32, #tpu.memory_space<vmem>>, vector<16x16x8xf32>
    %19 = vector.shape_cast %18 : vector<16x16x8xf32> to vector<256x8xf32>
    %c0_17 = arith.constant 0 : index
    %c1_18 = arith.constant 1 : index
    %c0_19 = arith.constant 0 : index
    %20 = vector.load %arg9[%c0_17, %c1_18, %c0_19] : memref<18x18x8xf32, #tpu.memory_space<vmem>>, vector<16x16x8xf32>
    %21 = vector.shape_cast %20 : vector<16x16x8xf32> to vector<256x8xf32>
    %c0_20 = arith.constant 0 : index
    %c2 = arith.constant 2 : index
    %c0_21 = arith.constant 0 : index
    %22 = vector.load %arg9[%c0_20, %c2, %c0_21] : memref<18x18x8xf32, #tpu.memory_space<vmem>>, vector<16x16x8xf32>
    %23 = vector.shape_cast %22 : vector<16x16x8xf32> to vector<256x8xf32>
    %c1_22 = arith.constant 1 : index
    %c0_23 = arith.constant 0 : index
    %c0_24 = arith.constant 0 : index
    %24 = vector.load %arg9[%c1_22, %c0_23, %c0_24] : memref<18x18x8xf32, #tpu.memory_space<vmem>>, vector<16x16x8xf32>
    %25 = vector.shape_cast %24 : vector<16x16x8xf32> to vector<256x8xf32>
    %c1_25 = arith.constant 1 : index
    %c1_26 = arith.constant 1 : index
    %c0_27 = arith.constant 0 : index
    %26 = vector.load %arg9[%c1_25, %c1_26, %c0_27] : memref<18x18x8xf32, #tpu.memory_space<vmem>>, vector<16x16x8xf32>
    %27 = vector.shape_cast %26 : vector<16x16x8xf32> to vector<256x8xf32>
    %c1_28 = arith.constant 1 : index
    %c2_29 = arith.constant 2 : index
    %c0_30 = arith.constant 0 : index
    %28 = vector.load %arg9[%c1_28, %c2_29, %c0_30] : memref<18x18x8xf32, #tpu.memory_space<vmem>>, vector<16x16x8xf32>
    %29 = vector.shape_cast %28 : vector<16x16x8xf32> to vector<256x8xf32>
    %c2_31 = arith.constant 2 : index
    %c0_32 = arith.constant 0 : index
    %c0_33 = arith.constant 0 : index
    %30 = vector.load %arg9[%c2_31, %c0_32, %c0_33] : memref<18x18x8xf32, #tpu.memory_space<vmem>>, vector<16x16x8xf32>
    %31 = vector.shape_cast %30 : vector<16x16x8xf32> to vector<256x8xf32>
    %c2_34 = arith.constant 2 : index
    %c1_35 = arith.constant 1 : index
    %c0_36 = arith.constant 0 : index
    %32 = vector.load %arg9[%c2_34, %c1_35, %c0_36] : memref<18x18x8xf32, #tpu.memory_space<vmem>>, vector<16x16x8xf32>
    %33 = vector.shape_cast %32 : vector<16x16x8xf32> to vector<256x8xf32>
    %c2_37 = arith.constant 2 : index
    %c2_38 = arith.constant 2 : index
    %c0_39 = arith.constant 0 : index
    %34 = vector.load %arg9[%c2_37, %c2_38, %c0_39] : memref<18x18x8xf32, #tpu.memory_space<vmem>>, vector<16x16x8xf32>
    %35 = vector.shape_cast %34 : vector<16x16x8xf32> to vector<256x8xf32>
    %36 = tpu.concatenate %19, %21, %23, %25, %27, %29, %31, %33, %35 in 1 : vector<256x8xf32>, vector<256x8xf32>, vector<256x8xf32>, vector<256x8xf32>, vector<256x8xf32>, vector<256x8xf32>, vector<256x8xf32>, vector<256x8xf32>, vector<256x8xf32> -> vector<256x72xf32>
    %c0_40 = arith.constant 0 : index
    %c0_41 = arith.constant 0 : index
    %37 = vector.load %arg4[%c0_40, %c0_41] : memref<72x4xf32, #tpu.memory_space<vmem>>, vector<72x4xf32>
    %cst_42 = arith.constant dense<0.000000e+00> : vector<256x4xf32>
    %38 = tpu.matmul %36, %37, %cst_42 {dimension_numbers = #tpu.dot_dimension_numbers<[1], [0], [0], [1], [0, 0, 1, 1], [], []>} : vector<256x72xf32>, vector<72x4xf32>, vector<256x4xf32> -> vector<256x4xf32>
    %c0_43 = arith.constant 0 : index
    %c0_44 = arith.constant 0 : index
    %39 = vector.load %arg5[%c0_43, %c0_44] : memref<1x4xf32, #tpu.memory_space<vmem>>, vector<1x4xf32>
    %40 = vector.broadcast %39 : vector<1x4xf32> to vector<256x4xf32>
    %41 = arith.addf %38, %40 : vector<256x4xf32>
    %42 = tpu.iota {dimensions = array<i32: 1>} : vector<256x4xi32>
    %cst_45 = arith.constant 0.000000e+00 : f32
    %43 = vector.broadcast %cst_45 : f32 to vector<256x4xf32>
    %44 = arith.subf %43, %41 : vector<256x4xf32>
    %45 = math.exp %44 : vector<256x4xf32>
    %cst_46 = arith.constant 1.000000e+00 : f32
    %46 = vector.broadcast %cst_46 : f32 to vector<256x4xf32>
    %47 = arith.addf %46, %45 : vector<256x4xf32>
    %cst_47 = arith.constant 1.000000e+00 : f32
    %48 = vector.broadcast %cst_47 : f32 to vector<256x4xf32>
    %49 = arith.divf %48, %47 : vector<256x4xf32>
    %c2_i32 = arith.constant 2 : i32
    %50 = vector.broadcast %c2_i32 : i32 to vector<256x4xi32>
    %51 = arith.cmpi sge, %42, %50 : vector<256x4xi32>
    %52 = arith.select %51, %49, %41 : vector<256x4xi1>, vector<256x4xf32>
    %c0_48 = arith.constant 0 : index
    %c0_49 = arith.constant 0 : index
    %c0_50 = arith.constant 0 : index
    %53 = vector.load %arg6[%c0_48, %c0_49, %c0_50] : memref<1x256x4xf32, #tpu.memory_space<vmem>>, vector<1x256x4xf32>
    %54 = vector.shape_cast %53 : vector<1x256x4xf32> to vector<256x4xf32>
    %55 = vector.shape_cast %52 : vector<256x4xf32> to vector<1x256x4xf32>
    tpu.vector_store %arg6[%c0_48, %c0_49, %c0_50], %55 {strides = array<i32>} : memref<1x256x4xf32, #tpu.memory_space<vmem>>, vector<1x256x4xf32>,
    %cst_51 = arith.constant dense<0.000000e+00> : vector<4xf32>
    %56 = vector.multi_reduction <add>, %52, %cst_51 [0] : vector<256x4xf32> to vector<4xf32>
    %57 = vector.shape_cast %56 : vector<4xf32> to vector<1x4xf32>
    %c0_52 = arith.constant 0 : index
    %c0_53 = arith.constant 0 : index
    %c0_54 = arith.constant 0 : index
    %58 = vector.load %arg7[%c0_52, %c0_53, %c0_54] : memref<1x1x4xf32, #tpu.memory_space<vmem>>, vector<1x1x4xf32>
    %59 = vector.shape_cast %58 : vector<1x1x4xf32> to vector<1x4xf32>
    %60 = vector.shape_cast %57 : vector<1x4xf32> to vector<1x1x4xf32>
    tpu.vector_store %arg7[%c0_52, %c0_53, %c0_54], %60 {strides = array<i32>} : memref<1x1x4xf32, #tpu.memory_space<vmem>>, vector<1x1x4xf32>,
    %61 = arith.mulf %52, %52 : vector<256x4xf32>
    %cst_55 = arith.constant dense<0.000000e+00> : vector<4xf32>
    %62 = vector.multi_reduction <add>, %61, %cst_55 [0] : vector<256x4xf32> to vector<4xf32>
    %63 = vector.shape_cast %62 : vector<4xf32> to vector<1x4xf32>
    %c0_56 = arith.constant 0 : index
    %c0_57 = arith.constant 0 : index
    %c0_58 = arith.constant 0 : index
    %64 = vector.load %arg8[%c0_56, %c0_57, %c0_58] : memref<1x1x4xf32, #tpu.memory_space<vmem>>, vector<1x1x4xf32>
    %65 = vector.shape_cast %64 : vector<1x1x4xf32> to vector<1x4xf32>
    %66 = vector.shape_cast %63 : vector<1x4xf32> to vector<1x1x4xf32>
    tpu.vector_store %arg8[%c0_56, %c0_57, %c0_58], %66 {strides = array<i32>} : memref<1x1x4xf32, #tpu.memory_space<vmem>>, vector<1x1x4xf32>,
    return
  }
  func.func @transform_0(%arg0: i32) -> (i32, i32, i32, i32) {
    %c0_i32 = arith.constant 0 : i32
    %c0_i32_0 = arith.constant 0 : i32
    %c0_i32_1 = arith.constant 0 : i32
    %c0_i32_2 = arith.constant 0 : i32
    return %arg0, %c0_i32, %c0_i32_0, %c0_i32_1 : i32, i32, i32, i32
  }
  func.func @transform_1(%arg0: i32) -> (i32, i32) {
    %c0_i32 = arith.constant 0 : i32
    %c0_i32_0 = arith.constant 0 : i32
    %c0_i32_1 = arith.constant 0 : i32
    return %c0_i32, %c0_i32_0 : i32, i32
  }
  func.func @transform_2(%arg0: i32) -> (i32, i32) {
    %c0_i32 = arith.constant 0 : i32
    %c0_i32_0 = arith.constant 0 : i32
    %c0_i32_1 = arith.constant 0 : i32
    return %c0_i32, %c0_i32_0 : i32, i32
  }
  func.func @transform_3(%arg0: i32) -> (i32, i32) {
    %c0_i32 = arith.constant 0 : i32
    %c0_i32_0 = arith.constant 0 : i32
    %c0_i32_1 = arith.constant 0 : i32
    return %c0_i32, %c0_i32_0 : i32, i32
  }
  func.func @transform_4(%arg0: i32) -> (i32, i32) {
    %c0_i32 = arith.constant 0 : i32
    %c0_i32_0 = arith.constant 0 : i32
    %c0_i32_1 = arith.constant 0 : i32
    return %c0_i32, %c0_i32_0 : i32, i32
  }
  func.func @transform_5(%arg0: i32) -> (i32, i32, i32) {
    %c0_i32 = arith.constant 0 : i32
    %c0_i32_0 = arith.constant 0 : i32
    %c0_i32_1 = arith.constant 0 : i32
    return %arg0, %c0_i32, %c0_i32_0 : i32, i32, i32
  }
  func.func @transform_6(%arg0: i32) -> (i32, i32, i32) {
    %c0_i32 = arith.constant 0 : i32
    %c0_i32_0 = arith.constant 0 : i32
    %c0_i32_1 = arith.constant 0 : i32
    return %arg0, %c0_i32, %c0_i32_0 : i32, i32, i32
  }
  func.func @transform_7(%arg0: i32) -> (i32, i32, i32) {
    %c0_i32 = arith.constant 0 : i32
    %c0_i32_0 = arith.constant 0 : i32
    %c0_i32_1 = arith.constant 0 : i32
    return %arg0, %c0_i32, %c0_i32_0 : i32, i32, i32
  }
}

</mosaic_0001>

<bundles_post_ra>
// kernel: seg_morph_unet_forward.6
= control target key start
LH: loop header
LB: loop body
LE: loop exit
PB: predicated region body
PF: predicated region fallthrough
CT: control target
= control target key end

     0   :  { %s1137_s24 = smov 0   ;;  %s1390_s0 = inlined_call_operand.vmem [shape: f32[2,8,8,32], index: 0, kind: input, shape index: {}]   ;;  %s1391_s1 = inlined_call_operand.vmem [shape: f32[1,32], index: 1, kind: input, shape index: {}]   ;;  %s1392_s2 = inlined_call_operand.vmem [shape: f32[1,32], index: 2, kind: input, shape index: {}]   ;;  %s1393_s3 = inlined_call_operand.vmem [shape: f32[72,16], index: 3, kind: input, shape index: {}]   ;;  %s1394_s4 = inlined_call_operand.vmem [shape: f32[1,16], index: 4, kind: input, shape index: {}]   ;;  %s1395_s5 = inlined_call_operand.vmem [shape: f32[2,64,16], index: 5, kind: output, shape index: {0}]   ;;  %s1396_s6 = inlined_call_operand.vmem [shape: f32[2,1,16], index: 6, kind: output, shape index: {1}]   ;;  %s1397_s7 = inlined_call_operand.vmem [shape: f32[2,1,16], index: 7, kind: output, shape index: {2}]  }
   0x1 LB: > { %s978_s25 = sadd.s32 4294967295, %s1088_s24   ;;  %p982_p0 = scmp.ge.s32.totalorder %s1088_s24, 1  ;;  %s1088_s24 = sphi %s1137_s24, %s18_s24  }
   0x2   : > { %p242_p1 = scmp.lt.s32.totalorder %s1088_s24, 3 }
   0x4   : > { %p243_p2 = pnand %p982_p0, %p242_p1 }
   0x5   : > { %p280_p3 = scmp.lt.s32.totalorder (!%p243_p2), %s978_s25, 1  ;;  %s1091_s11 = smov (!%p243_p2), 104  }
   0x6   : > { %246 = sbr.rel (%p243_p2) target bundleno = 457 (0x1c9), region = 40  ;;  %s1092_s12 = smov (!%p243_p2), 120  }
   0x7   : > { %s1093_s13 = smov (!%p243_p2), 16   ;;  %s1094_s18 = smov (!%p243_p2), 32  }
   0x8   : > { %s1095_s9 = smov (!%p243_p2), 24   ;;  %s1096_s17 = smov (!%p243_p2), 40  }
   0xb   : > { %vm358_vm0 = vcmask 261120   ;;  %vm360_vm1 = vcmask 253952   ;;  %v1090_v0 = vmov 0.0   ;;  %s1399_s25 = smov (!%p280_p3, %s978_s25), 1  ;;  %v987_v1 = vld [vmem:[%s1391_s1] ss:$0 sm:$0xff] }
   0xc   : > { %359 = vst.msk [vmem:[#allocation2] sm:$0xff] %vm358_vm0, %v1090_v0  ;;  %362 = vst.msk [vmem:[#allocation2 + $0x10] sm:$0xff] %vm358_vm0, %v1090_v0  ;;  %s1000_s26 = sshll.u32 %s1399_s25, 6  ;;  %v988_v2 = vld [vmem:[%s1392_s2] ss:$0 sm:$0xff]  ;;  %v673_v48 = vld [vmem:[%s1393_s3 + $0x38] sm:$0xff]  ;;  %s292_s21 = scalar_lea.vmem %s1396_s6, %s1399_s25 }
   0xd   : > { %364 = vst.msk [vmem:[#allocation2 + $0x20] sm:$0xff] %vm358_vm0, %v1090_v0  ;;  %366 = vst.msk [vmem:[#allocation2 + $0x30] sm:$0xff] %vm358_vm0, %v1090_v0  ;;  %s284_s8 = scalar_lea.vmem %s1390_s0, %s1000_s26  ;;  %v674_v47 = vld [vmem:[%s1393_s3 + $0x40] sm:$0xff]  ;;  %v672_v51 = vld [vmem:[%s1393_s3 + $0x30] sm:$0xff]  ;;  %vm595_vm10 = vcmask 64512   ;;  %vm604_vm11 = vcmask 130048   ;;  %s1345_s19 = scalar_lea.vmem %s1395_s5, %s1000_s26 }
   0xe   : > { %368 = vst.msk [vmem:[#allocation2 + $0x40] sm:$0xff] %vm358_vm0, %v1090_v0  ;;  %370 = vst.msk [vmem:[#allocation2 + $0x50] sm:$0xff] %vm358_vm0, %v1090_v0  ;;  %v296_v3 = vld [vmem:[%s284_s8] sm:$0xff]  ;;  %v297_v4 = vld [vmem:[%s284_s8 + $0x8] sm:$0xff]  ;;  %1019 = vmatprep.subr.mxu0 %v674_v47  ;;  %1049 = vmatprep.subr.mxu1 %v674_v47  ;;  %vm613_vm12 = vcmask 195584   ;;  %vm630_vm13 = vcmask 326656   ;;  %s295_s27 = scalar_lea.vmem %s1397_s7, %s1399_s25 }
   0xf   : > { %372 = vst.msk [vmem:[#allocation2 + $0x60] sm:$0xff] %vm358_vm0, %v1090_v0  ;;  %374 = vst.msk [vmem:[#allocation2 + $0x70] sm:$0xff] %vm358_vm0, %v1090_v0  ;;  %v298_v5 = vld [vmem:[%s284_s8 + $0x10] sm:$0xff]  ;;  %v311_v7 = vmul.f32 %v987_v1, %v296_v3  ;;  %v312_v8 = vmul.f32 %v987_v1, %v297_v4  ;;  %v299_v10 = vld [vmem:[%s284_s8 + $0x18] sm:$0xff]  ;;  %1020 = vmatpush3.msra.mxu0 %v674_v47  ;;  %1058 = vmatpush3.msra.mxu1 %v674_v47  ;;  %vm639_vm14 = vcmask 392192   ;;  %vm648_vm15 = vcmask 457728  }
  0x10   : > { %376 = vst.msk [vmem:[#allocation2 + $0x80] sm:$0xff] %vm358_vm0, %v1090_v0  ;;  %v313_v9 = vmul.f32 %v987_v1, %v298_v5  ;;  %v314_v11 = vmul.f32 %v987_v1, %v299_v10  ;;  %v300_v12 = vld [vmem:[%s284_s8 + $0x20] sm:$0xff]  ;;  %v301_v13 = vld [vmem:[%s284_s8 + $0x28] sm:$0xff]  ;;  %v302_v14 = vld [vmem:[%s284_s8 + $0x30] sm:$0xff]  ;;  %1021 = vmatprep.subr.mxu0 %v673_v48  ;;  %1050 = vmatprep.subr.mxu1 %v673_v48 }
  0x11   : > { %361 = vst.msk [vmem:[#allocation2 + $0x8] sm:$0x1] %vm360_vm1, %v1090_v0  ;;  %363 = vst.msk [vmem:[#allocation2 + $0x18] sm:$0x1] %vm360_vm1, %v1090_v0  ;;  %v326_v16 = vadd.f32 %v988_v2, %v311_v7  ;;  %v327_v17 = vadd.f32 %v988_v2, %v312_v8  ;;  %v315_v19 = vmul.f32 %v987_v1, %v300_v12  ;;  %v303_v20 = vld [vmem:[%s284_s8 + $0x38] sm:$0xff]  ;;  %1022 = vmatpush3.msra.mxu0 %v673_v48  ;;  %v671_v52 = vld [vmem:[%s1393_s3 + $0x28] sm:$0xff] }
  0x12   : > { %365 = vst.msk [vmem:[#allocation2 + $0x28] sm:$0x1] %vm360_vm1, %v1090_v0  ;;  %367 = vst.msk [vmem:[#allocation2 + $0x38] sm:$0x1] %vm360_vm1, %v1090_v0  ;;  %v328_v18 = vadd.f32 %v988_v2, %v313_v9  ;;  %v329_v21 = vadd.f32 %v988_v2, %v314_v11  ;;  %v316_v22 = vmul.f32 %v987_v1, %v301_v13  ;;  %1059 = vmatpush3.msra.mxu1 %v673_v48  ;;  %v670_v54 = vld [vmem:[%s1393_s3 + $0x20] sm:$0xff]  ;;  %v669_v55 = vld [vmem:[%s1393_s3 + $0x18] sm:$0xff] }
  0x13   : > { %369 = vst.msk [vmem:[#allocation2 + $0x48] sm:$0x1] %vm360_vm1, %v1090_v0  ;;  %371 = vst.msk [vmem:[#allocation2 + $0x58] sm:$0x1] %vm360_vm1, %v1090_v0  ;;  %v387_v6 = vld [vmem:[#allocation2] sm:$0xff]  ;;  %v317_v23 = vmul.f32 %v987_v1, %v302_v14  ;;  %v318_v24 = vmul.f32 %v987_v1, %v303_v20  ;;  %vm334_vm2 = vcmp.ge.f32.partialorder %v326_v16, 0.0  ;;  %v330_v31 = vadd.f32 %v988_v2, %v315_v19 }
  0x14   : > { %373 = vst.msk [vmem:[#allocation2 + $0x68] sm:$0x1] %vm360_vm1, %v1090_v0  ;;  %375 = vst.msk [vmem:[#allocation2 + $0x78] sm:$0x1] %vm360_vm1, %v1090_v0  ;;  %427 = vrot.lane.b32.xlu0 %v387_v6, %s1091_s11  ;;  %v342_v25 = vmul.f32 0.2, %v326_v16  ;;  %v331_v32 = vadd.f32 %v988_v2, %v316_v22  ;;  %1023 = vmatprep.subr.mxu0 %v672_v51 }
  0x15   : > { %377 = vst.msk [vmem:[#allocation2 + $0x88] sm:$0x1] %vm360_vm1, %v1090_v0  ;;  %vm335_vm3 = vcmp.ge.f32.partialorder %v327_v17, 0.0  ;;  %v343_v26 = vmul.f32 0.2, %v327_v17  ;;  %vm336_vm4 = vcmp.ge.f32.partialorder %v328_v18, 0.0  ;;  %v332_v35 = vadd.f32 %v988_v2, %v317_v23  ;;  %1051 = vmatprep.subr.mxu1 %v672_v51  ;;  %1024 = vmatpush3.msra.mxu0 %v672_v51 }
  0x16   : > { %v344_v27 = vmul.f32 0.2, %v328_v18  ;;  %vm337_vm5 = vcmp.ge.f32.partialorder %v329_v21, 0.0  ;;  %v345_v28 = vmul.f32 0.2, %v329_v21  ;;  %v350_v29 = vsel %vm334_vm2, %v326_v16, %v342_v25  ;;  %1060 = vmatpush3.msra.mxu1 %v672_v51  ;;  %1025 = vmatprep.subr.mxu0 %v671_v52  ;;  %v668_v56 = vld [vmem:[%s1393_s3 + $0x10] sm:$0xff] }
  0x17   : > { %v351_v30 = vsel %vm335_vm3, %v327_v17, %v343_v26  ;;  %379 = vst.msk [vmem:[#allocation2 + $0x11] sm:$0xff] %vm358_vm0, %v350_v29  ;;  %v333_v36 = vadd.f32 %v988_v2, %v318_v24  ;;  %vm338_vm6 = vcmp.ge.f32.partialorder %v330_v31, 0.0  ;;  %v346_v37 = vmul.f32 0.2, %v330_v31  ;;  %1052 = vmatprep.subr.mxu1 %v671_v52  ;;  %1026 = vmatpush3.msra.mxu0 %v671_v52  ;;  %v667_v58 = vld [vmem:[%s1393_s3 + $0x8] sm:$0xff]  ;;  %v666_v59 = vld [vmem:[%s1393_s3] sm:$0xff] }
  0x18   : > { %v395_v15 = vld [vmem:[#allocation2 + $0x1] sm:$0xff]  ;;  %380 = vst.msk [vmem:[#allocation2 + $0x21] sm:$0xff] %vm358_vm0, %v351_v30  ;;  %v352_v33 = vsel %vm336_vm4, %v328_v18, %v344_v27  ;;  %v353_v34 = vsel %vm337_vm5, %v329_v21, %v345_v28  ;;  %vm339_vm7 = vcmp.ge.f32.partialorder %v331_v32, 0.0  ;;  %v347_v38 = vmul.f32 0.2, %v331_v32  ;;  %1061 = vmatpush3.msra.mxu1 %v671_v52  ;;  %1027 = vmatprep.subr.mxu0 %v670_v54 }
  0x19   : > { %459 = vrot.lane.b32.xlu0 %v395_v15, %s1092_s12  ;;  %381 = vst.msk [vmem:[#allocation2 + $0x31] sm:$0xff] %vm358_vm0, %v352_v33  ;;  %382 = vst.msk [vmem:[#allocation2 + $0x41] sm:$0xff] %vm358_vm0, %v353_v34  ;;  %vm340_vm8 = vcmp.ge.f32.partialorder %v332_v35, 0.0  ;;  %v348_v39 = vmul.f32 0.2, %v332_v35  ;;  %vm341_vm9 = vcmp.ge.f32.partialorder %v333_v36, 0.0  ;;  %v354_v41 = vsel %vm338_vm6, %v330_v31, %v346_v37  ;;  %1053 = vmatprep.subr.mxu1 %v670_v54 }
  0x1a   : > { %v349_v40 = vmul.f32 0.2, %v333_v36  ;;  %v355_v42 = vsel %vm339_vm7, %v331_v32, %v347_v38  ;;  %383 = vst.msk [vmem:[#allocation2 + $0x51] sm:$0xff] %vm358_vm0, %v354_v41  ;;  %1028 = vmatpush3.msra.mxu0 %v670_v54  ;;  %1062 = vmatpush3.msra.mxu1 %v670_v54  ;;  %vm657_vm1 = vcmask 523264   ;;  %vm682_vm2 = vcmask 588800  }
  0x1b   : > { %384 = vst.msk [vmem:[#allocation2 + $0x61] sm:$0xff] %vm358_vm0, %v355_v42  ;;  %v356_v43 = vsel %vm340_vm8, %v332_v35, %v348_v39  ;;  %1029 = vmatprep.subr.mxu0 %v669_v55  ;;  %1054 = vmatprep.subr.mxu1 %v669_v55 }
  0x1c   : > { %v357_v44 = vsel %vm341_vm9, %v333_v36, %v349_v40  ;;  %385 = vst.msk [vmem:[#allocation2 + $0x71] sm:$0xff] %vm358_vm0, %v356_v43  ;;  %1030 = vmatpush3.msra.mxu0 %v669_v55  ;;  %1063 = vmatpush3.msra.mxu1 %v669_v55 }
  0x1d   : > { %386 = vst.msk [vmem:[#allocation2 + $0x81] sm:$0xff] %vm358_vm0, %v357_v44  ;;  %1031 = vmatprep.subr.mxu0 %v668_v56  ;;  %1055 = vmatprep.subr.mxu1 %v668_v56 }
  0x1e   : > { %v403_v45 = vld [vmem:[#allocation2 + $0x10] sm:$0xff]  ;;  %1032 = vmatpush3.msra.mxu0 %v668_v56  ;;  %1064 = vmatpush3.msra.mxu1 %v668_v56 }
  0x1f   : > { %491 = vrot.lane.b32.xlu0 %v403_v45, %s1093_s13  ;;  %429 = vrot.lane.b32.xlu1 %v403_v45, %s1091_s11  ;;  %v1189_v46 = vld [vmem:[#allocation2 + $0x11] sm:$0xff]  ;;  %v397_v49 = vld [vmem:[#allocation2 + $0x21] sm:$0xff] }
  0x20   : > { %v404_v50 = vld [vmem:[#allocation2 + $0x20] sm:$0xff]  ;;  %v390_v53 = vld [vmem:[#allocation2 + $0x30] sm:$0xff]  ;;  %1033 = vmatprep.subr.mxu0 %v667_v58  ;;  %1056 = vmatprep.subr.mxu1 %v667_v58 }
  0x21   : > { %v398_v57 = vld [vmem:[#allocation2 + $0x31] sm:$0xff]  ;;  %v406_v60 = vld [vmem:[#allocation2 + $0x40] sm:$0xff]  ;;  %1034 = vmatpush3.msra.mxu0 %v667_v58  ;;  %1065 = vmatpush3.msra.mxu1 %v667_v58 }
  0x22   : > { %1035 = vmatprep.subr.mxu0 %v666_v59  ;;  %1057 = vmatprep.subr.mxu1 %v666_v59  ;;  %v399_v61 = vld [vmem:[#allocation2 + $0x41] sm:$0xff]  ;;  %v392_v62 = vld [vmem:[#allocation2 + $0x50] sm:$0xff] }
  0x23   : > { %523 = vrot.lane.b32.xlu0 %v1189_v46, %s1094_s18  ;;  %461 = vrot.lane.b32.xlu1 %v1189_v46, %s1092_s12  ;;  %v400_v63 = vld [vmem:[#allocation2 + $0x51] sm:$0xff]  ;;  %v408_v0 = vld [vmem:[#allocation2 + $0x60] sm:$0xff] }
  0x24   : > { %1036 = vmatpush3.msra.mxu0 %v666_v59  ;;  %1066 = vmatpush3.msra.mxu1 %v666_v59  ;;  %v401_v1 = vld [vmem:[#allocation2 + $0x61] sm:$0xff]  ;;  %v394_v2 = vld [vmem:[#allocation2 + $0x70] sm:$0xff] }
  0x25   : > { %v402_v3 = vld [vmem:[#allocation2 + $0x71] sm:$0xff]  ;;  %v410_v4 = vld [vmem:[#allocation2 + $0x80] sm:$0xff] }
  0x26   : > { %v418_v5 = vld [vmem:[#allocation2 + $0x81] sm:$0xff] }
  0x27   : > { %463 = vrot.lane.b32.xlu0 %v397_v49, %s1092_s12  ;;  %493 = vrot.lane.b32.xlu1 %v404_v50, %s1093_s13 }
  0x2b   : > { %433 = vrot.lane.b32.xlu0 %v390_v53, %s1091_s11  ;;  %431 = vrot.lane.b32.xlu1 %v404_v50, %s1091_s11 }
  0x2f   : > { %547 = vrot.lane.b32.xlu0 %v403_v45, %s1095_s9  ;;  %525 = vrot.lane.b32.xlu1 %v397_v49, %s1094_s18 }
  0x33   : > { %549 = vrot.lane.b32.xlu0 %v404_v50, %s1095_s9  ;;  %465 = vrot.lane.b32.xlu1 %v398_v57, %s1092_s12 }
  0x37   : > { %497 = vrot.lane.b32.xlu0 %v406_v60, %s1093_s13  ;;  %495 = vrot.lane.b32.xlu1 %v390_v53, %s1093_s13 }
  0x3b   : > { %573 = vrot.lane.b32.xlu0 %v397_v49, %s1096_s17  ;;  %571 = vrot.lane.b32.xlu1 %v1189_v46, %s1096_s17 }
  0x3f   : > { %467 = vrot.lane.b32.xlu0 %v399_v61, %s1092_s12  ;;  %527 = vrot.lane.b32.xlu1 %v398_v57, %s1094_s18 }
  0x43   : > { %437 = vrot.lane.b32.xlu0 %v392_v62, %s1091_s11  ;;  %435 = vrot.lane.b32.xlu1 %v406_v60, %s1091_s11 }
  0x47   : > { %551 = vrot.lane.b32.xlu0 %v390_v53, %s1095_s9  ;;  %529 = vrot.lane.b32.xlu1 %v399_v61, %s1094_s18 }
  0x4b   : > { %553 = vrot.lane.b32.xlu0 %v406_v60, %s1095_s9  ;;  %469 = vrot.lane.b32.xlu1 %v400_v63, %s1092_s12 }
  0x4f   : > { %501 = vrot.lane.b32.xlu0 %v408_v0, %s1093_s13  ;;  %499 = vrot.lane.b32.xlu1 %v392_v62, %s1093_s13 }
  0x53   : > { %577 = vrot.lane.b32.xlu0 %v399_v61, %s1096_s17  ;;  %575 = vrot.lane.b32.xlu1 %v398_v57, %s1096_s17 }
  0x57   : > { %471 = vrot.lane.b32.xlu0 %v401_v1, %s1092_s12  ;;  %531 = vrot.lane.b32.xlu1 %v400_v63, %s1094_s18 }
  0x5b   : > { %441 = vrot.lane.b32.xlu0 %v394_v2, %s1091_s11  ;;  %439 = vrot.lane.b32.xlu1 %v408_v0, %s1091_s11 }
  0x5f   : > { %555 = vrot.lane.b32.xlu0 %v392_v62, %s1095_s9  ;;  %533 = vrot.lane.b32.xlu1 %v401_v1, %s1094_s18 }
  0x63   : > { %557 = vrot.lane.b32.xlu0 %v408_v0, %s1095_s9  ;;  %473 = vrot.lane.b32.xlu1 %v402_v3, %s1092_s12 }
  0x67   : > { %505 = vrot.lane.b32.xlu0 %v410_v4, %s1093_s13  ;;  %503 = vrot.lane.b32.xlu1 %v394_v2, %s1093_s13 }
  0x6b   : > { %581 = vrot.lane.b32.xlu0 %v401_v1, %s1096_s17  ;;  %579 = vrot.lane.b32.xlu1 %v400_v63, %s1096_s17 }
  0x6f   : > { %559 = vrot.lane.b32.xlu0 %v394_v2, %s1095_s9  ;;  %535 = vrot.lane.b32.xlu1 %v402_v3, %s1094_s18 }
  0x73   : > { %583 = vrot.lane.b32.xlu0 %v402_v3, %s1096_s17  ;;  %537 = vrot.lane.b32.xlu1 %v418_v5, %s1094_s18 }
  0x77   : > { %561 = vrot.lane.b32.xlu1 %v410_v4, %s1095_s9 }
  0x7b   : > { %585 = vrot.lane.b32.xlu1 %v418_v5, %s1096_s17 }
  0x86   : > { %v428_v6 = vpop.permute.xlu0 %427 }
  0x8b   : > { %v460_v7 = vpop.permute.xlu0 %459 }
  0x8c   : > { %v596_v18 = vsel %vm595_vm10, %v428_v6, %v460_v7 }
  0x8d   : > { %v605_v20 = vsel %vm604_vm11, %v596_v18, %v460_v7 }
  0x91   : > { %v492_v8 = vpop.permute.xlu0 %491  ;;  %v430_v9 = vpop.permute.xlu1 %429 }
  0x92   : > { %v614_v24 = vsel %vm613_vm12, %v605_v20, %v492_v8 }
  0x95   : > { %v524_v10 = vpop.permute.xlu0 %523  ;;  %v462_v11 = vpop.permute.xlu1 %461 }
  0x96   : > { %v597_v19 = vsel %vm595_vm10, %v430_v9, %v462_v11  ;;  %v622_v26 = vsel %vm358_vm0, %v614_v24, %v524_v10 }
  0x97   : > { %v606_v23 = vsel %vm604_vm11, %v597_v19, %v462_v11  ;;  %v631_v30 = vsel %vm630_vm13, %v622_v26, %v524_v10 }
  0x99   : > { %v464_v12 = vpop.permute.xlu0 %463  ;;  %v494_v13 = vpop.permute.xlu1 %493 }
  0x9a   : > { %v615_v25 = vsel %vm613_vm12, %v606_v23, %v494_v13 }
  0x9d   : > { %v434_v14 = vpop.permute.xlu0 %433  ;;  %v432_v15 = vpop.permute.xlu1 %431 }
  0x9e   : > { %v598_v46 = vsel %vm595_vm10, %v432_v15, %v464_v12 }
  0x9f   : > { %v607_v51 = vsel %vm604_vm11, %v598_v46, %v464_v12 }
  0xa1   : > { %v548_v16 = vpop.permute.xlu0 %547  ;;  %v526_v17 = vpop.permute.xlu1 %525 }
  0xa2   : > { %v623_v27 = vsel %vm358_vm0, %v615_v25, %v526_v17  ;;  %v640_v32 = vsel %vm639_vm14, %v631_v30, %v548_v16 }
  0xa3   : > { %v632_v31 = vsel %vm630_vm13, %v623_v27, %v526_v17 }
  0xa5   : > { %v550_v21 = vpop.permute.xlu0 %549  ;;  %v466_v22 = vpop.permute.xlu1 %465 }
  0xa6   : > { %v641_v33 = vsel %vm639_vm14, %v632_v31, %v550_v21  ;;  %v599_v47 = vsel %vm595_vm10, %v434_v14, %v466_v22 }
  0xa7   : > { %v608_v50 = vsel %vm604_vm11, %v599_v47, %v466_v22 }
  0xa9   : > { %v498_v28 = vpop.permute.xlu0 %497  ;;  %v496_v29 = vpop.permute.xlu1 %495 }
  0xaa   : > { %v617_v52 = vsel %vm613_vm12, %v608_v50, %v498_v28  ;;  %v616_v53 = vsel %vm613_vm12, %v607_v51, %v496_v29 }
  0xad   : > { %v574_v34 = vpop.permute.xlu0 %573  ;;  %v572_v35 = vpop.permute.xlu1 %571 }
  0xae   : > { %v650_v36 = vsel %vm648_vm15, %v641_v33, %v574_v34  ;;  %v649_v37 = vsel %vm648_vm15, %v640_v32, %v572_v35 }
  0xaf   : > { %v659_v38 = vsel %vm657_vm1, %v650_v36, %v574_v34  ;;  %v658_v39 = vsel %vm657_vm1, %v649_v37, %v572_v35 }
  0xb0   : > { %1037 = vmatprep.mubr.msk.f32.mxu0 %vm682_vm2, %v658_v39 }
  0xb1   : > { %v468_v40 = vpop.permute.xlu0 %467  ;;  %1038 = vmatmul.mubr.msk.f32.vlgmr.msra.gmra.mxu0 %vm682_vm2, %v659_v38  ;;  %v528_v41 = vpop.permute.xlu1 %527 }
  0xb2   : > { %v624_v54 = vsel %vm358_vm0, %v616_v53, %v528_v41 }
  0xb3   : > { %v633_v58 = vsel %vm630_vm13, %v624_v54, %v528_v41  ;;  %v989_v54 = vld [vmem:[%s1394_s4] ss:$0 sm:$0xff] }
  0xb5   : > { %v438_v42 = vpop.permute.xlu0 %437  ;;  %v436_v43 = vpop.permute.xlu1 %435 }
  0xb6   : > { %v600_v10 = vsel %vm595_vm10, %v436_v43, %v468_v40 }
  0xb7   : > { %v609_v16 = vsel %vm604_vm11, %v600_v10, %v468_v40 }
  0xb9   : > { %v552_v44 = vpop.permute.xlu0 %551  ;;  %v530_v45 = vpop.permute.xlu1 %529 }
  0xba   : > { %v625_v55 = vsel %vm358_vm0, %v617_v52, %v530_v45  ;;  %v642_v60 = vsel %vm639_vm14, %v633_v58, %v552_v44 }
  0xbb   : > { %v634_v59 = vsel %vm630_vm13, %v625_v55, %v530_v45 }
  0xbd   : > { %v554_v48 = vpop.permute.xlu0 %553  ;;  %v470_v49 = vpop.permute.xlu1 %469 }
  0xbe   : > { %v643_v61 = vsel %vm639_vm14, %v634_v59, %v554_v48  ;;  %v601_v11 = vsel %vm595_vm10, %v438_v42, %v470_v49 }
  0xbf   : > { %v610_v15 = vsel %vm604_vm11, %v601_v11, %v470_v49 }
  0xc1   : > { %v502_v56 = vpop.permute.xlu0 %501  ;;  %v500_v57 = vpop.permute.xlu1 %499 }
  0xc2   : > { %v619_v17 = vsel %vm613_vm12, %v610_v15, %v502_v56  ;;  %v618_v18 = vsel %vm613_vm12, %v609_v16, %v500_v57 }
  0xc5   : > { %v578_v62 = vpop.permute.xlu0 %577  ;;  %v576_v63 = vpop.permute.xlu1 %575 }
  0xc6   : > { %v652_v0 = vsel %vm648_vm15, %v643_v61, %v578_v62  ;;  %v651_v1 = vsel %vm648_vm15, %v642_v60, %v576_v63 }
  0xc7   : > { %v661_v2 = vsel %vm657_vm1, %v652_v0, %v578_v62  ;;  %v660_v3 = vsel %vm657_vm1, %v651_v1, %v576_v63 }
  0xc8   : > { %1040 = vmatprep.mubr.msk.f32.mxu0 %vm682_vm2, %v660_v3 }
  0xc9   : > { %v472_v4 = vpop.permute.xlu0 %471  ;;  %1041 = vmatmul.mubr.msk.f32.gmra.mxu0 %vm682_vm2, %v661_v2  ;;  %v532_v5 = vpop.permute.xlu1 %531 }
  0xca   : > { %v626_v19 = vsel %vm358_vm0, %v618_v18, %v532_v5 }
  0xcb   : > { %v635_v25 = vsel %vm630_vm13, %v626_v19, %v532_v5 }
  0xcd   : > { %v442_v6 = vpop.permute.xlu0 %441  ;;  %v440_v7 = vpop.permute.xlu1 %439 }
  0xce   : > { %v602_v27 = vsel %vm595_vm10, %v440_v7, %v472_v4 }
  0xcf   : > { %v611_v36 = vsel %vm604_vm11, %v602_v27, %v472_v4 }
  0xd1   : > { %v556_v8 = vpop.permute.xlu0 %555  ;;  %v534_v9 = vpop.permute.xlu1 %533 }
  0xd2   : > { %v627_v20 = vsel %vm358_vm0, %v619_v17, %v534_v9  ;;  %v644_v28 = vsel %vm639_vm14, %v635_v25, %v556_v8 }
  0xd3   : > { %v636_v26 = vsel %vm630_vm13, %v627_v20, %v534_v9 }
  0xd5   : > { %v558_v12 = vpop.permute.xlu0 %557  ;;  %v474_v13 = vpop.permute.xlu1 %473 }
  0xd6   : > { %v603_v14 = vsel %vm595_vm10, %v442_v6, %v474_v13  ;;  %v645_v29 = vsel %vm639_vm14, %v636_v26, %v558_v12 }
  0xd7   : > { %v612_v21 = vsel %vm604_vm11, %v603_v14, %v474_v13 }
  0xd9   : > { %v506_v22 = vpop.permute.xlu0 %505  ;;  %v504_v23 = vpop.permute.xlu1 %503 }
  0xda   : > { %v621_v24 = vsel %vm613_vm12, %v612_v21, %v506_v22  ;;  %v620_v37 = vsel %vm613_vm12, %v611_v36, %v504_v23 }
  0xdd   : > { %v582_v30 = vpop.permute.xlu0 %581  ;;  %v580_v31 = vpop.permute.xlu1 %579 }
  0xde   : > { %v654_v32 = vsel %vm648_vm15, %v645_v29, %v582_v30  ;;  %v653_v33 = vsel %vm648_vm15, %v644_v28, %v580_v31 }
  0xdf   : > { %v663_v34 = vsel %vm657_vm1, %v654_v32, %v582_v30  ;;  %v662_v35 = vsel %vm657_vm1, %v653_v33, %v580_v31 }
  0xe0   : > { %1043 = vmatprep.mubr.msk.f32.mxu1 %vm682_vm2, %v662_v35 }
  0xe1   : > { %v560_v38 = vpop.permute.xlu0 %559  ;;  %1044 = vmatmul.mubr.msk.f32.vlgmr.msra.gmra.mxu1 %vm682_vm2, %v663_v34  ;;  %v536_v39 = vpop.permute.xlu1 %535 }
  0xe2   : > { %v628_v40 = vsel %vm358_vm0, %v620_v37, %v536_v39 }
  0xe3   : > { %v637_v41 = vsel %vm630_vm13, %v628_v40, %v536_v39 }
  0xe4   : > { %v646_v42 = vsel %vm639_vm14, %v637_v41, %v560_v38 }
  0xe5   : > { %v584_v43 = vpop.permute.xlu0 %583  ;;  %v538_v44 = vpop.permute.xlu1 %537 }
  0xe6   : > { %v655_v45 = vsel %vm648_vm15, %v646_v42, %v584_v43  ;;  %v629_v46 = vsel %vm358_vm0, %v621_v24, %v538_v44  ;;  %vm841_vm0 = vcmask 122880  }
  0xe7   : > { %v664_v47 = vsel %vm657_vm1, %v655_v45, %v584_v43  ;;  %v638_v48 = vsel %vm630_vm13, %v629_v46, %v538_v44 }
  0xe8   : > { %1046 = vmatprep.mubr.msk.f32.mxu1 %vm682_vm2, %v664_v47 }
  0xe9   : > { %v562_v49 = vpop.permute.xlu1 %561 }
  0xea   : > { %v647_v50 = vsel %vm639_vm14, %v638_v48, %v562_v49 }
  0xed   : > { %v586_v51 = vpop.permute.xlu1 %585 }
  0xee   : > { %v656_v52 = vsel %vm648_vm15, %v647_v50, %v586_v51 }
  0xef   : > { %v665_v53 = vsel %vm657_vm1, %v656_v52, %v586_v51 }
  0xf0   : > { %1047 = vmatmul.mubr.msk.f32.gmra.mxu1 %vm682_vm2, %v665_v53 }
 0x171   : > { %v1039_v55 = vpop.f32.mrf.mxu0 }
 0x172   : > { %v779_v56 = vadd.f32 %v1039_v55, %v989_v54 }
 0x173   : > { %v773_v57 = vpop.f32.mrf.mxu0 }
 0x174   : > { %813 = vst.msk [vmem:[%s1345_s19 + $0x8] sm:$0xff] %vm604_vm11, %v779_v56  ;;  %v774_v58 = vadd.f32 %v989_v54, %v773_v57  ;;  %v844_v4 = vmul.f32 %v779_v56, %v779_v56  ;;  %v821_v7 = vsel %vm604_vm11, %v779_v56, 0.0 }
 0x176   : > { %812 = vst.msk [vmem:[%s1345_s19] sm:$0xff] %vm604_vm11, %v774_v58  ;;  %v843_v1 = vmul.f32 %v774_v58, %v774_v58  ;;  %v820_v5 = vsel %vm604_vm11, %v774_v58, 0.0  ;;  %v852_v11 = vsel %vm604_vm11, %v844_v4, 0.0 }
 0x177   : > { %v822_v10 = vadd.f32 %v821_v7, %v820_v5 }
 0x178   : > { %v851_v8 = vsel %vm604_vm11, %v843_v1, 0.0 }
 0x179   : > { %v853_v13 = vadd.f32 %v852_v11, %v851_v8 }
 0x189   : > { %v1042_v59 = vpop.f32.mrf.mxu0 }
 0x18a   : > { %v789_v60 = vadd.f32 %v1042_v59, %v989_v54 }
 0x18b   : > { %v783_v61 = vpop.f32.mrf.mxu0 }
 0x18c   : > { %815 = vst.msk [vmem:[%s1345_s19 + $0x18] sm:$0xff] %vm604_vm11, %v789_v60  ;;  %v784_v62 = vadd.f32 %v989_v54, %v783_v61  ;;  %v846_v15 = vmul.f32 %v789_v60, %v789_v60  ;;  %v825_v18 = vsel %vm604_vm11, %v789_v60, 0.0 }
 0x18e   : > { %814 = vst.msk [vmem:[%s1345_s19 + $0x10] sm:$0xff] %vm604_vm11, %v784_v62  ;;  %v845_v6 = vmul.f32 %v784_v62, %v784_v62  ;;  %v823_v9 = vsel %vm604_vm11, %v784_v62, 0.0  ;;  %v856_v21 = vsel %vm604_vm11, %v846_v15, 0.0 }
 0x18f   : > { %v824_v14 = vadd.f32 %v823_v9, %v822_v10 }
 0x190   : > { %v854_v12 = vsel %vm604_vm11, %v845_v6, 0.0 }
 0x191   : > { %v855_v17 = vadd.f32 %v854_v12, %v853_v13  ;;  %v826_v20 = vadd.f32 %v825_v18, %v824_v14 }
 0x193   : > { %v857_v24 = vadd.f32 %v856_v21, %v855_v17 }
 0x1a1   : > { %v1045_v63 = vpop.f32.mrf.mxu1 }
 0x1a2   : > { %v799_v0 = vadd.f32 %v1045_v63, %v989_v54 }
 0x1a3   : > { %v793_v2 = vpop.f32.mrf.mxu1 }
 0x1a4   : > { %817 = vst.msk [vmem:[%s1345_s19 + $0x28] sm:$0xff] %vm604_vm11, %v799_v0  ;;  %v794_v3 = vadd.f32 %v989_v54, %v793_v2  ;;  %v848_v26 = vmul.f32 %v799_v0, %v799_v0  ;;  %v829_v30 = vsel %vm604_vm11, %v799_v0, 0.0 }
 0x1a6   : > { %816 = vst.msk [vmem:[%s1345_s19 + $0x20] sm:$0xff] %vm604_vm11, %v794_v3  ;;  %v847_v16 = vmul.f32 %v794_v3, %v794_v3  ;;  %v827_v19 = vsel %vm604_vm11, %v794_v3, 0.0  ;;  %v860_v33 = vsel %vm604_vm11, %v848_v26, 0.0 }
 0x1a7   : > { %v828_v23 = vadd.f32 %v827_v19, %v826_v20 }
 0x1a8   : > { %v858_v22 = vsel %vm604_vm11, %v847_v16, 0.0 }
 0x1a9   : > { %v859_v28 = vadd.f32 %v858_v22, %v857_v24  ;;  %v830_v32 = vadd.f32 %v829_v30, %v828_v23 }
 0x1ab   : > { %v861_v38 = vadd.f32 %v860_v33, %v859_v28 }
 0x1b0   : > { %v1048_v25 = vpop.f32.mrf.mxu1 }
 0x1b1   : > { %v809_v27 = vadd.f32 %v1048_v25, %v989_v54 }
 0x1b2   : > { %v803_v29 = vpop.f32.mrf.mxu1 }
 0x1b3   : > { %819 = vst.msk [vmem:[%s1345_s19 + $0x38] sm:$0xff] %vm604_vm11, %v809_v27  ;;  %v804_v31 = vadd.f32 %v989_v54, %v803_v29  ;;  %v850_v34 = vmul.f32 %v809_v27, %v809_v27  ;;  %v833_v39 = vsel %vm604_vm11, %v809_v27, 0.0 }
 0x1b5   : > { %818 = vst.msk [vmem:[%s1345_s19 + $0x30] sm:$0xff] %vm604_vm11, %v804_v31  ;;  %v831_v35 = vsel %vm604_vm11, %v804_v31, 0.0  ;;  %v849_v36 = vmul.f32 %v804_v31, %v804_v31  ;;  %v864_v43 = vsel %vm604_vm11, %v850_v34, 0.0 }
 0x1b6   : > { %v832_v37 = vadd.f32 %v831_v35, %v830_v32 }
 0x1b7   : > { %v862_v40 = vsel %vm604_vm11, %v849_v36, 0.0 }
 0x1b8   : > { %v834_v41 = vadd.f32 %v833_v39, %v832_v37  ;;  %v863_v42 = vadd.f32 %v862_v40, %v861_v38 }
 0x1ba   : > { %v835_v44 = vrot.slane %v834_v41, 4  ;;  %v865_v45 = vadd.f32 %v864_v43, %v863_v42 }
 0x1bc   : > { %v836_v46 = vadd.f32 %v835_v44, %v834_v41  ;;  %v866_v47 = vrot.slane %v865_v45, 4 }
 0x1be   : > { %v837_v48 = vrot.slane %v836_v46, 2  ;;  %v867_v49 = vadd.f32 %v866_v47, %v865_v45 }
 0x1c0   : > { %v838_v50 = vadd.f32 %v837_v48, %v836_v46  ;;  %v868_v51 = vrot.slane %v867_v49, 2 }
 0x1c2   : > { %v839_v52 = vrot.slane %v838_v50, 1  ;;  %v869_v53 = vadd.f32 %v868_v51, %v867_v49 }
 0x1c4   : > { %v840_v54 = vadd.f32 %v839_v52, %v838_v50  ;;  %v870_v55 = vrot.slane %v869_v53, 1 }
 0x1c6   : > { %842 = vst.msk [vmem:[%s292_s21] sm:$0x1] %vm841_vm0, %v840_v54  ;;  %v871_v56 = vadd.f32 %v870_v55, %v869_v53 }
 0x1c8   : > { %872 = vst.msk [vmem:[%s295_s27] sm:$0x1] %vm841_vm0, %v871_v56 }
 0x1c9 PF: > { %s18_s24 = sadd.s32 1, %s1088_s24  }
 0x1ca   : > { %p15_p4 = scmp.ge.s32.totalorder %s18_s24, 4  }
 0x1cc   :  { %17 = sbr.rel (!%p15_p4) target bundleno = 1 (0x1), region = 95 }

// kernel: seg_morph_unet_forward.7
= control target key start
LH: loop header
LB: loop body
LE: loop exit
PB: predicated region body
PF: predicated region fallthrough
CT: control target
= control target key end

     0   :  { %s1325_s24 = smov 0   ;;  %s1701_s0 = inlined_call_operand.vmem [shape: f32[2,8,8,16], index: 0, kind: input, shape index: {}]   ;;  %s1702_s1 = inlined_call_operand.vmem [shape: f32[1,16], index: 1, kind: input, shape index: {}]   ;;  %s1703_s2 = inlined_call_operand.vmem [shape: f32[1,16], index: 2, kind: input, shape index: {}]   ;;  %s1704_s3 = inlined_call_operand.vmem [shape: f32[144,16], index: 3, kind: input, shape index: {}]   ;;  %s1705_s4 = inlined_call_operand.vmem [shape: f32[1,16], index: 4, kind: input, shape index: {}]   ;;  %s1706_s5 = inlined_call_operand.vmem [shape: f32[2,64,16], index: 5, kind: output, shape index: {0}]   ;;  %s1707_s6 = inlined_call_operand.vmem [shape: f32[2,1,16], index: 6, kind: output, shape index: {1}]   ;;  %s1708_s7 = inlined_call_operand.vmem [shape: f32[2,1,16], index: 7, kind: output, shape index: {2}]  }
   0x1 LB: > { %s1068_s25 = sadd.s32 4294967295, %s1275_s24   ;;  %p1072_p0 = scmp.ge.s32.totalorder %s1275_s24, 1  ;;  %s1275_s24 = sphi %s1325_s24, %s18_s24  }
   0x2   : > { %p242_p1 = scmp.lt.s32.totalorder %s1275_s24, 3 }
   0x4   : > { %p243_p2 = pnand %p1072_p0, %p242_p1 }
   0x5   : > { %p280_p3 = scmp.lt.s32.totalorder (!%p243_p2), %s1068_s25, 1  ;;  %s1278_s15 = smov (!%p243_p2), 48  }
   0x6   : > { %246 = sbr.rel (%p243_p2) target bundleno = 425 (0x1a9), region = 40  ;;  %s1279_s16 = smov (!%p243_p2), 16  }
   0x7   : > { %s1280_s19 = smov (!%p243_p2), 64   ;;  %s1281_s20 = smov (!%p243_p2), 32  }
   0x8   : > { %s1282_s27 = smov (!%p243_p2), 96   ;;  %s1283_s28 = smov (!%p243_p2), 80  }
   0x9   : > { %s1284_s9 = smov (!%p243_p2), 112  }
   0xb   : > { %vm358_vm0 = vcmask 130048   ;;  %vm360_vm1 = vcmask 123904   ;;  %v763_v0 = vld [vmem:[%s1704_s3 + $0x78] sm:$0xff]  ;;  %s1710_s25 = smov (!%p280_p3, %s1068_s25), 1  ;;  %v1277_v1 = vmov 0.0   ;;  %v762_v2 = vld [vmem:[%s1704_s3 + $0x70] sm:$0xff] }
   0xc   : > { %362 = vst.msk [vmem:[#allocation2 + $0x10] sm:$0xff] %vm358_vm0, %v1277_v1  ;;  %364 = vst.msk [vmem:[#allocation2 + $0x20] sm:$0xff] %vm358_vm0, %v1277_v1  ;;  %797 = vmatprep.subr.mxu0 %v1277_v1  ;;  %1092 = vmatprep.subr.mxu1 %v1277_v1  ;;  %s1090_s30 = sshll.u32 %s1710_s25, 6  ;;  %v1077_v3 = vld [vmem:[%s1702_s1] ss:$0 sm:$0xff]  ;;  %v761_v4 = vld [vmem:[%s1704_s3 + $0x68] sm:$0xff]  ;;  %s295_s23 = scalar_lea.vmem %s1708_s7, %s1710_s25 }
   0xd   : > { %363 = vst.msk [vmem:[#allocation2 + $0x18] sm:$0x3] %vm360_vm1, %v1277_v1  ;;  %365 = vst.msk [vmem:[#allocation2 + $0x28] sm:$0x3] %vm360_vm1, %v1277_v1  ;;  %798 = vmatpush1.msra.mxu0 %v763_v0  ;;  %1110 = vmatpush1.msra.mxu1 %v763_v0  ;;  %s284_s14 = scalar_lea.vmem %s1701_s0, %s1090_s30  ;;  %v1400_v5 = vld [vmem:[%s1703_s2] ss:$0 sm:$0xff]  ;;  %s1656_s18 = scalar_lea.vmem %s1706_s5, %s1090_s30 }
   0xe   : > { %359 = vst.msk [vmem:[#allocation2] sm:$0xff] %vm358_vm0, %v1277_v1  ;;  %366 = vst.msk [vmem:[#allocation2 + $0x30] sm:$0xff] %vm358_vm0, %v1277_v1  ;;  %799 = vmatprep.subr.mxu0 %v1277_v1  ;;  %1093 = vmatprep.subr.mxu1 %v1277_v1  ;;  %v760_v6 = vld [vmem:[%s1704_s3 + $0x60] sm:$0xff]  ;;  %v297_v8 = vld [vmem:[%s284_s14 + $0x8] sm:$0xff]  ;;  %vm694_vm10 = vcmask 261120   ;;  %vm703_vm11 = vcmask 392192  }
   0xf   : > { %361 = vst.msk [vmem:[#allocation2 + $0x8] sm:$0x3] %vm360_vm1, %v1277_v1  ;;  %367 = vst.msk [vmem:[#allocation2 + $0x38] sm:$0x3] %vm360_vm1, %v1277_v1  ;;  %800 = vmatpush1.msra.mxu0 %v762_v2  ;;  %1111 = vmatpush1.msra.mxu1 %v762_v2  ;;  %v296_v7 = vld [vmem:[%s284_s14] sm:$0xff]  ;;  %v298_v9 = vld [vmem:[%s284_s14 + $0x10] sm:$0xff]  ;;  %v312_v11 = vmul.f32 %v1077_v3, %v297_v8 }
  0x10   : > { %368 = vst.msk [vmem:[#allocation2 + $0x40] sm:$0xff] %vm358_vm0, %v1277_v1  ;;  %370 = vst.msk [vmem:[#allocation2 + $0x50] sm:$0xff] %vm358_vm0, %v1277_v1  ;;  %801 = vmatprep.subr.mxu0 %v1277_v1  ;;  %1094 = vmatprep.subr.mxu1 %v1277_v1  ;;  %v311_v10 = vmul.f32 %v1077_v3, %v296_v7  ;;  %v313_v12 = vmul.f32 %v1077_v3, %v298_v9  ;;  %v299_v13 = vld [vmem:[%s284_s14 + $0x18] sm:$0xff]  ;;  %v300_v14 = vld [vmem:[%s284_s14 + $0x20] sm:$0xff]  ;;  %vm712_vm12 = vcmask 523264   ;;  %vm721_vm13 = vcmask 654336  }
  0x11   : > { %369 = vst.msk [vmem:[#allocation2 + $0x48] sm:$0x3] %vm360_vm1, %v1277_v1  ;;  %371 = vst.msk [vmem:[#allocation2 + $0x58] sm:$0x3] %vm360_vm1, %v1277_v1  ;;  %v301_v15 = vld [vmem:[%s284_s14 + $0x28] sm:$0xff]  ;;  %802 = vmatpush1.msra.mxu0 %v761_v4  ;;  %1112 = vmatpush1.msra.mxu1 %v761_v4  ;;  %v314_v16 = vmul.f32 %v1077_v3, %v299_v13  ;;  %v315_v17 = vmul.f32 %v1077_v3, %v300_v14  ;;  %v302_v19 = vld [vmem:[%s284_s14 + $0x30] sm:$0xff] }
  0x12   : > { %372 = vst.msk [vmem:[#allocation2 + $0x60] sm:$0xff] %vm358_vm0, %v1277_v1  ;;  %374 = vst.msk [vmem:[#allocation2 + $0x70] sm:$0xff] %vm358_vm0, %v1277_v1  ;;  %v316_v18 = vmul.f32 %v1077_v3, %v301_v15  ;;  %v303_v20 = vld [vmem:[%s284_s14 + $0x38] sm:$0xff]  ;;  %803 = vmatprep.subr.mxu0 %v1277_v1  ;;  %1095 = vmatprep.subr.mxu1 %v1277_v1  ;;  %v326_v22 = vadd.f32 %v1400_v5, %v311_v10  ;;  %v758_v30 = vld [vmem:[%s1704_s3 + $0x50] sm:$0xff]  ;;  %vm730_vm14 = vcmask 785408   ;;  %vm739_vm15 = vcmask 916480  }
  0x13   : > { %373 = vst.msk [vmem:[#allocation2 + $0x68] sm:$0x3] %vm360_vm1, %v1277_v1  ;;  %375 = vst.msk [vmem:[#allocation2 + $0x78] sm:$0x3] %vm360_vm1, %v1277_v1  ;;  %v759_v21 = vld [vmem:[%s1704_s3 + $0x58] sm:$0xff]  ;;  %v327_v23 = vadd.f32 %v1400_v5, %v312_v11  ;;  %v328_v24 = vadd.f32 %v1400_v5, %v313_v12  ;;  %v317_v25 = vmul.f32 %v1077_v3, %v302_v19  ;;  %804 = vmatpush1.msra.mxu0 %v760_v6  ;;  %v757_v31 = vld [vmem:[%s1704_s3 + $0x48] sm:$0xff] }
  0x14   : > { %376 = vst.msk [vmem:[#allocation2 + $0x80] sm:$0xff] %vm358_vm0, %v1277_v1  ;;  %378 = vst.msk [vmem:[#allocation2 + $0x90] sm:$0xff] %vm358_vm0, %v1277_v1  ;;  %v329_v26 = vadd.f32 %v1400_v5, %v314_v16  ;;  %v330_v27 = vadd.f32 %v1400_v5, %v315_v17  ;;  %v331_v28 = vadd.f32 %v1400_v5, %v316_v18  ;;  %805 = vmatprep.subr.mxu0 %v1277_v1  ;;  %v756_v42 = vld [vmem:[%s1704_s3 + $0x40] sm:$0xff]  ;;  %v755_v47 = vld [vmem:[%s1704_s3 + $0x38] sm:$0xff] }
  0x15   : > { %377 = vst.msk [vmem:[#allocation2 + $0x88] sm:$0x3] %vm360_vm1, %v1277_v1  ;;  %379 = vst.msk [vmem:[#allocation2 + $0x98] sm:$0x3] %vm360_vm1, %v1277_v1  ;;  %v318_v29 = vmul.f32 %v1077_v3, %v303_v20  ;;  %vm334_vm2 = vcmp.ge.f32.partialorder %v326_v22, 0.0  ;;  %vm335_vm3 = vcmp.ge.f32.partialorder %v327_v23, 0.0  ;;  %806 = vmatpush1.msra.mxu0 %v759_v21  ;;  %1113 = vmatpush1.msra.mxu1 %v760_v6 }
  0x16   : > { %v342_v32 = vmul.f32 0.2, %v326_v22  ;;  %v343_v33 = vmul.f32 0.2, %v327_v23  ;;  %vm336_vm4 = vcmp.ge.f32.partialorder %v328_v24, 0.0  ;;  %vm337_vm5 = vcmp.ge.f32.partialorder %v329_v26, 0.0  ;;  %807 = vmatprep.subr.mxu0 %v1277_v1  ;;  %1096 = vmatprep.subr.mxu1 %v1277_v1 }
  0x17   : > { %v344_v34 = vmul.f32 0.2, %v328_v24  ;;  %v345_v35 = vmul.f32 0.2, %v329_v26  ;;  %vm338_vm6 = vcmp.ge.f32.partialorder %v330_v27, 0.0  ;;  %808 = vmatpush1.msra.mxu0 %v758_v30  ;;  %1114 = vmatpush1.msra.mxu1 %v759_v21  ;;  %vm339_vm7 = vcmp.ge.f32.partialorder %v331_v28, 0.0 }
  0x18   : > { %v350_v36 = vsel %vm334_vm2, %v326_v22, %v342_v32  ;;  %v351_v37 = vsel %vm335_vm3, %v327_v23, %v343_v33  ;;  %v346_v38 = vmul.f32 0.2, %v330_v27  ;;  %v347_v41 = vmul.f32 0.2, %v331_v28  ;;  %809 = vmatprep.subr.mxu0 %v1277_v1  ;;  %1097 = vmatprep.subr.mxu1 %v1277_v1  ;;  %v754_v50 = vld [vmem:[%s1704_s3 + $0x30] sm:$0xff]  ;;  %v397_v51 = vld [vmem:[#allocation2 + $0x1] sm:$0xff] }
  0x19   : > { %381 = vst.msk [vmem:[#allocation2 + $0x11] sm:$0xff] %vm358_vm0, %v350_v36  ;;  %382 = vst.msk [vmem:[#allocation2 + $0x21] sm:$0xff] %vm358_vm0, %v351_v37  ;;  %v352_v39 = vsel %vm336_vm4, %v328_v24, %v344_v34  ;;  %v353_v40 = vsel %vm337_vm5, %v329_v26, %v345_v35  ;;  %v332_v44 = vadd.f32 %v1400_v5, %v317_v25  ;;  %810 = vmatpush1.msra.mxu0 %v757_v31  ;;  %v405_v54 = vld [vmem:[#allocation2 + $0x2] sm:$0xff]  ;;  %v750_v8 = vld [vmem:[%s1704_s3 + $0x10] sm:$0xff]  ;;  %vm931_vm1 = vcmask 122880  }
  0x1a   : > { %383 = vst.msk [vmem:[#allocation2 + $0x31] sm:$0xff] %vm358_vm0, %v352_v39  ;;  %384 = vst.msk [vmem:[#allocation2 + $0x41] sm:$0xff] %vm358_vm0, %v353_v40  ;;  %v354_v43 = vsel %vm338_vm6, %v330_v27, %v346_v38  ;;  %v333_v45 = vadd.f32 %v1400_v5, %v318_v29  ;;  %1115 = vmatpush1.msra.mxu1 %v758_v30  ;;  %v355_v46 = vsel %vm339_vm7, %v331_v28, %v347_v41  ;;  %v753_v55 = vld [vmem:[%s1704_s3 + $0x28] sm:$0xff]  ;;  %v752_v63 = vld [vmem:[%s1704_s3 + $0x20] sm:$0xff] }
  0x1b   : > { %385 = vst.msk [vmem:[#allocation2 + $0x51] sm:$0xff] %vm358_vm0, %v354_v43  ;;  %811 = vmatprep.subr.mxu0 %v1277_v1  ;;  %1098 = vmatprep.subr.mxu1 %v1277_v1  ;;  %386 = vst.msk [vmem:[#allocation2 + $0x61] sm:$0xff] %vm358_vm0, %v355_v46  ;;  %vm340_vm8 = vcmp.ge.f32.partialorder %v332_v44, 0.0  ;;  %v348_v48 = vmul.f32 0.2, %v332_v44  ;;  %v751_v5 = vld [vmem:[%s1704_s3 + $0x18] sm:$0xff] }
  0x1c   : > { %vm341_vm9 = vcmp.ge.f32.partialorder %v333_v45, 0.0  ;;  %v349_v49 = vmul.f32 0.2, %v333_v45  ;;  %812 = vmatpush1.msra.mxu0 %v756_v42  ;;  %1116 = vmatpush1.msra.mxu1 %v757_v31  ;;  %v749_v11 = vld [vmem:[%s1704_s3 + $0x8] sm:$0xff]  ;;  %v748_v16 = vld [vmem:[%s1704_s3] sm:$0xff] }
  0x1d   : > { %813 = vmatprep.subr.mxu0 %v1277_v1  ;;  %1099 = vmatprep.subr.mxu1 %v1277_v1  ;;  %v356_v52 = vsel %vm340_vm8, %v332_v44, %v348_v48  ;;  %v765_v19 = vld [vmem:[%s1704_s3 + $0x88] sm:$0xff]  ;;  %v764_v21 = vld [vmem:[%s1704_s3 + $0x80] sm:$0xff]  ;;  %v445_v44 = vld [vmem:[#allocation2 + $0x90] sm:$0xff] }
  0x1e   : > { %v357_v53 = vsel %vm341_vm9, %v333_v45, %v349_v49  ;;  %814 = vmatpush1.msra.mxu0 %v755_v47  ;;  %1117 = vmatpush1.msra.mxu1 %v756_v42  ;;  %387 = vst.msk [vmem:[#allocation2 + $0x71] sm:$0xff] %vm358_vm0, %v356_v52  ;;  %v453_v45 = vld [vmem:[#allocation2 + $0x91] sm:$0xff] }
  0x1f   : > { %388 = vst.msk [vmem:[#allocation2 + $0x81] sm:$0xff] %vm358_vm0, %v357_v53  ;;  %815 = vmatprep.subr.mxu0 %v1277_v1  ;;  %1100 = vmatprep.subr.mxu1 %v1277_v1 }
  0x20   : > { %v1457_v56 = vld [vmem:[#allocation2 + $0x10] sm:$0xff]  ;;  %v1459_v57 = vld [vmem:[#allocation2 + $0x20] sm:$0xff]  ;;  %816 = vmatpush1.msra.mxu0 %v754_v50  ;;  %1118 = vmatpush1.msra.mxu1 %v755_v47 }
  0x21   : > { %v398_v58 = vld [vmem:[#allocation2 + $0x11] sm:$0xff]  ;;  %v1154_v59 = vpack.i.bf16 %v1459_v57, %v1457_v56  ;;  %v422_v61 = vld [vmem:[#allocation2 + $0x21] sm:$0xff]  ;;  %817 = vmatprep.subr.mxu0 %v1277_v1  ;;  %1101 = vmatprep.subr.mxu1 %v1277_v1 }
  0x22   : > { %v1144_v60 = vpack.i.bf16 %v398_v58, %v397_v51  ;;  %v406_v62 = vld [vmem:[#allocation2 + $0x12] sm:$0xff]  ;;  %818 = vmatpush1.msra.mxu0 %v753_v55  ;;  %1119 = vmatpush1.msra.mxu1 %v754_v50  ;;  %v1159_v0 = vpack.i.bf16 %v422_v61, %v398_v58  ;;  %v430_v3 = vld [vmem:[#allocation2 + $0x22] sm:$0xff] }
  0x23   : > { %1155 = vrot.lane.b32.xlu1 %v1154_v59, %s1278_s15  ;;  %v1149_v2 = vpack.i.bf16 %v406_v62, %v405_v54  ;;  %v1470_v4 = vld [vmem:[#allocation2 + $0x30] sm:$0xff]  ;;  %819 = vmatprep.subr.mxu0 %v1277_v1  ;;  %v1164_v7 = vpack.i.bf16 %v430_v3, %v406_v62  ;;  %v1486_v9 = vld [vmem:[#allocation2 + $0x41] sm:$0xff] }
  0x24   : > { %1145 = vrot.lane.b32.xlu0 %v1144_v60, %s1279_s16  ;;  %1080 = vmatprep.mubr.msk.f32.mxu0 %vm358_vm0, %v430_v3  ;;  %v1169_v6 = vpack.i.bf16 %v1470_v4, %v1459_v57  ;;  %v447_v10 = vld [vmem:[#allocation2 + $0x31] sm:$0xff]  ;;  %v1179_v12 = vpack.i.bf16 %v1486_v9, %v422_v61  ;;  %v1499_v15 = vld [vmem:[#allocation2 + $0x42] sm:$0xff] }
  0x25   : > { %820 = vmatpush1.msra.mxu0 %v752_v63  ;;  %1102 = vmatprep.subr.mxu1 %v1277_v1  ;;  %v1174_v13 = vpack.i.bf16 %v447_v10, %v422_v61  ;;  %v1497_v14 = vld [vmem:[#allocation2 + $0x50] sm:$0xff]  ;;  %v1184_v18 = vpack.i.bf16 %v1499_v15, %v430_v3  ;;  %v434_v25 = vld [vmem:[#allocation2 + $0x62] sm:$0xff] }
  0x26   : > { %821 = vmatprep.subr.mxu0 %v1277_v1  ;;  %1120 = vmatpush1.msra.mxu1 %v753_v55  ;;  %v1189_v17 = vpack.i.bf16 %v1497_v14, %v1470_v4  ;;  %v402_v20 = vld [vmem:[#allocation2 + $0x51] sm:$0xff]  ;;  %v1534_v27 = vld [vmem:[#allocation2 + $0x40] sm:$0xff] }
  0x27   : > { %1160 = vrot.lane.b32.xlu1 %v1159_v0, %s1280_s19  ;;  %822 = vmatpush1.msra.mxu0 %v751_v5  ;;  %v1199_v22 = vpack.i.bf16 %v402_v20, %v447_v10  ;;  %v1523_v23 = vld [vmem:[#allocation2 + $0x32] sm:$0xff]  ;;  %v1536_v28 = vld [vmem:[#allocation2 + $0x60] sm:$0xff] }
  0x28   : > { %1150 = vrot.lane.b32.xlu0 %v1149_v2, %s1281_s20  ;;  %1103 = vmatprep.subr.mxu1 %v1277_v1  ;;  %v1525_v24 = vld [vmem:[#allocation2 + $0x52] sm:$0xff]  ;;  %v1219_v29 = vpack.i.bf16 %v1536_v28, %v1534_v27  ;;  %v426_v30 = vld [vmem:[#allocation2 + $0x61] sm:$0xff] }
  0x29   : > { %823 = vmatprep.subr.mxu0 %v1277_v1  ;;  %1121 = vmatpush1.msra.mxu1 %v752_v63  ;;  %v1209_v26 = vpack.i.bf16 %v1525_v24, %v1523_v23  ;;  %v1229_v31 = vpack.i.bf16 %v426_v30, %v1486_v9  ;;  %v404_v32 = vld [vmem:[#allocation2 + $0x71] sm:$0xff]  ;;  %v420_v38 = vld [vmem:[#allocation2 + $0x80] sm:$0xff] }
  0x2a   : > { %824 = vmatpush1.msra.mxu0 %v750_v8  ;;  %1104 = vmatprep.subr.mxu1 %v1277_v1  ;;  %v1234_v33 = vpack.i.bf16 %v404_v32, %v426_v30  ;;  %v1549_v34 = vld [vmem:[#allocation2 + $0x70] sm:$0xff]  ;;  %v1259_v39 = vpack.i.bf16 %v404_v32, %v402_v20  ;;  %v428_v41 = vld [vmem:[#allocation2 + $0x81] sm:$0xff] }
  0x2b   : > { %1170 = vrot.lane.b32.xlu1 %v1169_v6, %s1282_s27  ;;  %825 = vmatprep.subr.mxu0 %v1277_v1  ;;  %v1551_v35 = vld [vmem:[#allocation2 + $0x72] sm:$0xff]  ;;  %v1249_v36 = vpack.i.bf16 %v1549_v34, %v1497_v14  ;;  %v1254_v40 = vpack.i.bf16 %v420_v38, %v1549_v34  ;;  %v1264_v42 = vpack.i.bf16 %v428_v41, %v404_v32  ;;  %v1568_v43 = vld [vmem:[#allocation2 + $0x82] sm:$0xff] }
  0x2c   : > { %1165 = vrot.lane.b32.xlu0 %v1164_v7, %s1283_s28  ;;  %1122 = vmatpush1.msra.mxu1 %v751_v5  ;;  %v1244_v37 = vpack.i.bf16 %v1551_v35, %v434_v25  ;;  %v389_v50 = vld [vmem:[#allocation2] sm:$0xff] }
  0x2d   : > { %826 = vmatpush1.msra.mxu0 %v749_v11  ;;  %1105 = vmatprep.subr.mxu1 %v1277_v1 }
  0x2e   : > { %827 = vmatprep.subr.mxu0 %v1277_v1  ;;  %1123 = vmatpush1.msra.mxu1 %v750_v8 }
  0x2f   : > { %1180 = vrot.lane.b32.xlu1 %v1179_v12, %s1279_s16  ;;  %828 = vmatpush1.msra.mxu0 %v748_v16 }
  0x30   : > { %1175 = vrot.lane.b32.xlu0 %v1174_v13, %s1284_s9  ;;  %1106 = vmatprep.subr.mxu1 %v1277_v1 }
  0x31   : > { %857 = vmatprep.subr.mxu0 %v1277_v1  ;;  %1124 = vmatpush1.msra.mxu1 %v749_v11 }
  0x32   : > { %858 = vmatpush2.msra.mxu0 %v765_v19  ;;  %1107 = vmatprep.subr.mxu1 %v1277_v1 }
  0x33   : > { %1190 = vrot.lane.b32.xlu1 %v1189_v17, %s1278_s15  ;;  %859 = vmatprep.subr.mxu0 %v1277_v1 }
  0x34   : > { %1185 = vrot.lane.b32.xlu0 %v1184_v18, %s1281_s20  ;;  %1125 = vmatpush1.msra.mxu1 %v748_v16 }
  0x35   : > { %860 = vmatpush2.msra.mxu0 %v764_v21  ;;  %1108 = vmatprep.subr.mxu1 %v1277_v1 }
  0x36   : > { %1126 = vmatpush2.msra.mxu1 %v765_v19  ;;  %1084 = vmatprep.mubr.msk.f32.mxu1 %vm358_vm0, %v434_v25 }
  0x37   : > { %1200 = vrot.lane.b32.xlu1 %v1199_v22, %s1279_s16  ;;  %1109 = vmatprep.subr.mxu1 %v1277_v1  ;;  %v1239_v1 = vpack.i.bf16 %v434_v25, %v1499_v15 }
  0x38   : > { %1195 = vrot.lane.b32.xlu0 %v1199_v22, %s1280_s19  ;;  %1127 = vmatpush2.msra.mxu1 %v764_v21 }
  0x3b   : > { %1210 = vrot.lane.b32.xlu1 %v1209_v26, %s1281_s20 }
  0x3c   : > { %1205 = vrot.lane.b32.xlu0 %v1209_v26, %s1283_s28 }
  0x3f   : > { %1220 = vrot.lane.b32.xlu1 %v1219_v29, %s1278_s15 }
  0x40   : > { %1215 = vrot.lane.b32.xlu0 %v1219_v29, %s1282_s27 }
  0x43   : > { %1230 = vrot.lane.b32.xlu1 %v1229_v31, %s1280_s19 }
  0x44   : > { %1225 = vrot.lane.b32.xlu0 %v1229_v31, %s1284_s9 }
  0x47   : > { %1240 = vrot.lane.b32.xlu1 %v1239_v1, %s1283_s28 }
  0x48   : > { %1235 = vrot.lane.b32.xlu0 %v1234_v33, %s1279_s16 }
  0x4b   : > { %1250 = vrot.lane.b32.xlu1 %v1249_v36, %s1282_s27 }
  0x4c   : > { %1245 = vrot.lane.b32.xlu0 %v1244_v37, %s1281_s20  ;;  %s292_s20 = scalar_lea.vmem %s1707_s6, %s1710_s25 }
  0x4f   : > { %1260 = vrot.lane.b32.xlu1 %v1259_v39, %s1284_s9 }
  0x50   : > { %1255 = vrot.lane.b32.xlu0 %v1254_v40, %s1278_s15 }
  0x53   : > { %610 = vrot.lane.b32.xlu1 %v1551_v35, %s1283_s28 }
  0x54   : > { %1265 = vrot.lane.b32.xlu0 %v1264_v42, %s1280_s19 }
  0x57   : > { %674 = vrot.lane.b32.xlu1 %v428_v41, %s1284_s9 }
  0x58   : > { %642 = vrot.lane.b32.xlu0 %v420_v38, %s1282_s27 }
  0x5b   : > { %644 = vrot.lane.b32.xlu1 %v445_v44, %s1282_s27 }
  0x5c   : > { %612 = vrot.lane.b32.xlu0 %v1568_v43, %s1283_s28 }
  0x60   : > { %676 = vrot.lane.b32.xlu0 %v453_v45, %s1284_s9 }
  0x95   : > { %v1156_v46 = vpop.permute.xlu1 %1155 }
  0x96   : > { %v1146_v47 = vpop.permute.xlu0 %1145  ;;  %v1157_v55 = vunpack.i.l.bf16 %v1156_v46  ;;  %v1158_v61 = vunpack.i.h.bf16 %v1156_v46 }
  0x97   : > { %v1148_v48 = vunpack.i.h.bf16 %v1146_v47  ;;  %v1147_v49 = vunpack.i.l.bf16 %v1146_v47 }
  0x99   : > { %v1161_v51 = vpop.permute.xlu1 %1160  ;;  %v686_v58 = vsel %vm358_vm0, %v389_v50, %v1147_v49  ;;  %v687_v59 = vsel %vm358_vm0, %v1457_v56, %v1148_v48 }
  0x9a   : > { %v1151_v52 = vpop.permute.xlu0 %1150  ;;  %v1162_v60 = vunpack.i.l.bf16 %v1161_v51  ;;  %v1163_v0 = vunpack.i.h.bf16 %v1161_v51 }
  0x9b   : > { %v1153_v53 = vunpack.i.h.bf16 %v1151_v52  ;;  %v1152_v54 = vunpack.i.l.bf16 %v1151_v52 }
  0x9d   : > { %v695_v62 = vsel %vm694_vm10, %v686_v58, %v1152_v54  ;;  %v696_v63 = vsel %vm694_vm10, %v687_v59, %v1153_v53  ;;  %v1171_v3 = vpop.permute.xlu1 %1170 }
  0x9e   : > { %v704_v2 = vsel %vm703_vm11, %v695_v62, %v1157_v55  ;;  %v1166_v5 = vpop.permute.xlu0 %1165  ;;  %v705_v6 = vsel %vm703_vm11, %v696_v63, %v1158_v61  ;;  %v1172_v8 = vunpack.i.l.bf16 %v1171_v3  ;;  %v1173_v17 = vunpack.i.h.bf16 %v1171_v3 }
  0x9f   : > { %v1167_v7 = vunpack.i.l.bf16 %v1166_v5  ;;  %v713_v9 = vsel %vm712_vm12, %v704_v2, %v1162_v60  ;;  %v1168_v56 = vunpack.i.h.bf16 %v1166_v5  ;;  %v714_v13 = vsel %vm712_vm12, %v705_v6, %v1163_v0 }
  0xa1   : > { %v722_v10 = vsel %vm721_vm13, %v713_v9, %v1167_v7  ;;  %v1181_v11 = vpop.permute.xlu1 %1180  ;;  %v723_v21 = vsel %vm721_vm13, %v714_v13, %v1168_v56 }
  0xa2   : > { %v1176_v12 = vpop.permute.xlu0 %1175  ;;  %v731_v18 = vsel %vm730_vm14, %v722_v10, %v1172_v8  ;;  %v732_v26 = vsel %vm730_vm14, %v723_v21, %v1173_v17  ;;  %v1183_v32 = vunpack.i.h.bf16 %v1181_v11  ;;  %v1182_v1 = vunpack.i.l.bf16 %v1181_v11 }
  0xa3   : > { %v1177_v16 = vunpack.i.l.bf16 %v1176_v12  ;;  %v1178_v19 = vunpack.i.h.bf16 %v1176_v12 }
  0xa4   : > { %v690_v39 = vsel %vm358_vm0, %v1534_v27, %v1183_v32 }
  0xa5   : > { %v740_v20 = vsel %vm739_vm15, %v731_v18, %v1177_v16  ;;  %v1191_v22 = vpop.permute.xlu1 %1190  ;;  %v741_v29 = vsel %vm739_vm15, %v732_v26, %v1178_v19 }
  0xa6   : > { %v1186_v25 = vpop.permute.xlu0 %1185  ;;  %862 = vmatmul.mubr.f32.vlgmr.msra.gmra.mxu0 %v740_v20  ;;  %v1193_v40 = vunpack.i.h.bf16 %v1191_v22  ;;  %v1192_v41 = vunpack.i.l.bf16 %v1191_v22 }
  0xa7   : > { %1081 = vmatprep.mubr.msk.f32.mxu0 %vm358_vm0, %v1523_v23  ;;  %v1188_v33 = vunpack.i.h.bf16 %v1186_v25  ;;  %v1187_v36 = vunpack.i.l.bf16 %v1186_v25  ;;  %v688_v23 = vsel %vm358_vm0, %v1459_v57, %v1182_v1 }
  0xa9   : > { %v1201_v30 = vpop.permute.xlu1 %1200  ;;  %v699_v42 = vsel %vm694_vm10, %v690_v39, %v1188_v33  ;;  %v697_v44 = vsel %vm694_vm10, %v688_v23, %v1187_v36 }
  0xaa   : > { %v1196_v31 = vpop.permute.xlu0 %1195  ;;  %867 = vmatmul.mubr.f32.gmra.mxu0 %v741_v29  ;;  %v706_v52 = vsel %vm703_vm11, %v697_v44, %v1192_v41  ;;  %v708_v27 = vsel %vm703_vm11, %v699_v42, %v1193_v40  ;;  %v1202_v62 = vunpack.i.l.bf16 %v1201_v30  ;;  %v1203_v2 = vunpack.i.h.bf16 %v1201_v30 }
  0xab   : > { %1082 = vmatprep.mubr.msk.f32.mxu0 %vm358_vm0, %v1499_v15  ;;  %v1198_v45 = vunpack.i.h.bf16 %v1196_v31  ;;  %v1197_v46 = vunpack.i.l.bf16 %v1196_v31 }
  0xac   : > { %v689_v9 = vsel %vm358_vm0, %v1470_v4, %v1202_v62  ;;  %v691_v11 = vsel %vm358_vm0, %v1497_v14, %v1203_v2 }
  0xad   : > { %v1211_v37 = vpop.permute.xlu1 %1210  ;;  %v715_v57 = vsel %vm712_vm12, %v706_v52, %v1197_v46  ;;  %v717_v53 = vsel %vm712_vm12, %v708_v27, %v1198_v45 }
  0xae   : > { %v1206_v38 = vpop.permute.xlu0 %1205  ;;  %v1212_v8 = vunpack.i.l.bf16 %v1211_v37  ;;  %v1213_v56 = vunpack.i.h.bf16 %v1211_v37 }
  0xaf   : > { %v1208_v48 = vunpack.i.h.bf16 %v1206_v38  ;;  %v1207_v49 = vunpack.i.l.bf16 %v1206_v38 }
  0xb0   : > { %v698_v20 = vsel %vm694_vm10, %v689_v9, %v1212_v8  ;;  %v700_v21 = vsel %vm694_vm10, %v691_v11, %v1213_v56 }
  0xb1   : > { %v1221_v47 = vpop.permute.xlu1 %1220  ;;  %v724_v60 = vsel %vm721_vm13, %v715_v57, %v1207_v49  ;;  %v726_v61 = vsel %vm721_vm13, %v717_v53, %v1208_v48 }
  0xb2   : > { %v1216_v15 = vpop.permute.xlu0 %1215  ;;  %v1222_v10 = vunpack.i.l.bf16 %v1221_v47  ;;  %v1223_v12 = vunpack.i.h.bf16 %v1221_v47 }
  0xb3   : > { %v1218_v50 = vunpack.i.h.bf16 %v1216_v15  ;;  %v1217_v51 = vunpack.i.l.bf16 %v1216_v15 }
  0xb4   : > { %v709_v25 = vsel %vm703_vm11, %v700_v21, %v1223_v12 }
  0xb5   : > { %v1231_v54 = vpop.permute.xlu1 %1230  ;;  %v733_v63 = vsel %vm730_vm14, %v724_v60, %v1217_v51  ;;  %v735_v0 = vsel %vm730_vm14, %v726_v61, %v1218_v50 }
  0xb6   : > { %v1226_v55 = vpop.permute.xlu0 %1225  ;;  %v1232_v13 = vunpack.i.l.bf16 %v1231_v54  ;;  %v1233_v16 = vunpack.i.h.bf16 %v1231_v54 }
  0xb7   : > { %v1228_v58 = vunpack.i.h.bf16 %v1226_v55  ;;  %v1227_v59 = vunpack.i.l.bf16 %v1226_v55  ;;  %v461_v55 = vld [vmem:[#allocation2 + $0x92] sm:$0xff] }
  0xb8   : > { %v718_v14 = vsel %vm712_vm12, %v709_v25, %v1233_v16 }
  0xb9   : > { %v742_v3 = vsel %vm739_vm15, %v733_v63, %v1227_v59  ;;  %v744_v5 = vsel %vm739_vm15, %v735_v0, %v1228_v58  ;;  %v1241_v6 = vpop.permute.xlu1 %1240 }
  0xba   : > { %v1236_v7 = vpop.permute.xlu0 %1235  ;;  %872 = vmatmul.mubr.f32.gmra.mxu0 %v742_v3  ;;  %882 = vmatmul.mubr.f32.vlgmr.msra.gmra.mxu1 %v744_v5  ;;  %v1242_v17 = vunpack.i.l.bf16 %v1241_v6  ;;  %v1079_v3 = vld [vmem:[%s1705_s4] ss:$0 sm:$0xff] }
  0xbb   : > { %1083 = vmatprep.mubr.msk.f32.mxu0 %vm358_vm0, %v1525_v24  ;;  %1085 = vmatprep.mubr.msk.f32.mxu1 %vm358_vm0, %v1551_v35  ;;  %v1243_v24 = vunpack.i.h.bf16 %v1241_v6  ;;  %v707_v35 = vsel %vm703_vm11, %v698_v20, %v1222_v10  ;;  %v1237_v29 = vunpack.i.l.bf16 %v1236_v7  ;;  %v1238_v46 = vunpack.i.h.bf16 %v1236_v7 }
  0xbc   : > { %v716_v26 = vsel %vm712_vm12, %v707_v35, %v1232_v13 }
  0xbd   : > { %v1251_v18 = vpop.permute.xlu1 %1250  ;;  %v725_v32 = vsel %vm721_vm13, %v716_v26, %v1242_v17  ;;  %v727_v37 = vsel %vm721_vm13, %v718_v14, %v1243_v24  ;;  %v692_v42 = vsel %vm358_vm0, %v1536_v28, %v1237_v29  ;;  %v693_v53 = vsel %vm358_vm0, %v1549_v34, %v1238_v46 }
  0xbe   : > { %v1246_v19 = vpop.permute.xlu0 %1245  ;;  %v1253_v22 = vunpack.i.h.bf16 %v1251_v18  ;;  %v1252_v4 = vunpack.i.l.bf16 %v1251_v18 }
  0xbf   : > { %v1247_v1 = vunpack.i.l.bf16 %v1246_v19  ;;  %v1248_v48 = vunpack.i.h.bf16 %v1246_v19 }
  0xc0   : > { %v734_v39 = vsel %vm730_vm14, %v725_v32, %v1252_v4  ;;  %v736_v23 = vsel %vm730_vm14, %v727_v37, %v1253_v22 }
  0xc1   : > { %v1261_v30 = vpop.permute.xlu1 %1260  ;;  %v701_v47 = vsel %vm694_vm10, %v692_v42, %v1247_v1 }
  0xc2   : > { %v1256_v31 = vpop.permute.xlu0 %1255  ;;  %v1263_v33 = vunpack.i.h.bf16 %v1261_v30  ;;  %v1262_v36 = vunpack.i.l.bf16 %v1261_v30 }
  0xc3   : > { %v1257_v38 = vunpack.i.l.bf16 %v1256_v31  ;;  %v1258_v50 = vunpack.i.h.bf16 %v1256_v31 }
  0xc4   : > { %v743_v40 = vsel %vm739_vm15, %v734_v39, %v1262_v36  ;;  %v745_v41 = vsel %vm739_vm15, %v736_v23, %v1263_v33 }
  0xc5   : > { %877 = vmatmul.mubr.f32.gmra.mxu0 %v743_v40  ;;  %887 = vmatmul.mubr.f32.gmra.mxu1 %v745_v41  ;;  %v611_v45 = vpop.permute.xlu1 %610  ;;  %v710_v49 = vsel %vm703_vm11, %v701_v47, %v1257_v38 }
  0xc6   : > { %v1266_v44 = vpop.permute.xlu0 %1265  ;;  %1086 = vmatprep.mubr.msk.f32.mxu1 %vm358_vm0, %v1568_v43  ;;  %v702_v43 = vsel %vm694_vm10, %v693_v53, %v1248_v48 }
  0xc7   : > { %v1267_v15 = vunpack.i.l.bf16 %v1266_v44  ;;  %v1268_v52 = vunpack.i.h.bf16 %v1266_v44  ;;  %v711_v59 = vsel %vm703_vm11, %v702_v43, %v1258_v50 }
  0xc9   : > { %v719_v51 = vsel %vm712_vm12, %v710_v49, %v1267_v15  ;;  %v675_v57 = vpop.permute.xlu1 %674  ;;  %v720_v61 = vsel %vm712_vm12, %v711_v59, %v1268_v52 }
  0xca   : > { %v728_v28 = vsel %vm721_vm13, %v719_v51, %v611_v45  ;;  %v643_v27 = vpop.permute.xlu0 %642 }
  0xcb   : > { %v737_v54 = vsel %vm730_vm14, %v728_v28, %v643_v27 }
  0xcc   : > { %v746_v58 = vsel %vm739_vm15, %v737_v54, %v675_v57 }
  0xcd   : > { %892 = vmatmul.mubr.f32.gmra.mxu1 %v746_v58  ;;  %v645_v63 = vpop.permute.xlu1 %644 }
  0xce   : > { %v613_v60 = vpop.permute.xlu0 %612  ;;  %1087 = vmatprep.mubr.msk.f32.mxu1 %vm358_vm0, %v461_v55 }
  0xcf   : > { %v729_v62 = vsel %vm721_vm13, %v720_v61, %v613_v60 }
  0xd0   : > { %v738_v34 = vsel %vm730_vm14, %v729_v62, %v645_v63 }
  0xd2   : > { %v677_v0 = vpop.permute.xlu0 %676 }
  0xd3   : > { %v747_v2 = vsel %vm739_vm15, %v738_v34, %v677_v0 }
  0xd4   : > { %897 = vmatmul.mubr.f32.gmra.mxu1 %v747_v2 }
 0x166   : > { %v863_v5 = vpop.f32.mrf.mxu0 }
 0x167   : > { %v864_v6 = vadd.f32 %v1079_v3, %v863_v5 }
 0x168   : > { %v865_v7 = vpop.f32.mrf.mxu0 }
 0x169   : > { %902 = vst.msk [vmem:[%s1656_s18] sm:$0xff] %vm358_vm0, %v864_v6  ;;  %v933_v19 = vmul.f32 %v864_v6, %v864_v6  ;;  %v910_v21 = vsel %vm358_vm0, %v864_v6, 0.0 }
 0x16a   : > { %v868_v8 = vpop.f32.mrf.mxu0 }
 0x16b   : > { %v869_v9 = vadd.f32 %v1079_v3, %v868_v8  ;;  %v941_v14 = vsel %vm358_vm0, %v933_v19, 0.0 }
 0x16c   : > { %v870_v56 = vpop.f32.mrf.mxu0 }
 0x16d   : > { %903 = vst.msk [vmem:[%s1656_s18 + $0x8] sm:$0xff] %vm358_vm0, %v869_v9  ;;  %v934_v18 = vmul.f32 %v869_v9, %v869_v9  ;;  %v911_v20 = vsel %vm358_vm0, %v869_v9, 0.0 }
 0x16e   : > { %v912_v4 = vadd.f32 %v911_v20, %v910_v21 }
 0x16f   : > { %v942_v35 = vsel %vm358_vm0, %v934_v18, 0.0 }
 0x170   : > { %v943_v32 = vadd.f32 %v942_v35, %v941_v14 }
 0x17a   : > { %v873_v10 = vpop.f32.mrf.mxu0  ;;  %v883_v11 = vpop.f32.mrf.mxu1 }
 0x17b   : > { %v874_v12 = vadd.f32 %v1079_v3, %v873_v10  ;;  %v884_v13 = vadd.f32 %v1079_v3, %v883_v11 }
 0x17c   : > { %v875_v16 = vpop.f32.mrf.mxu0  ;;  %v885_v17 = vpop.f32.mrf.mxu1 }
 0x17d   : > { %904 = vst.msk [vmem:[%s1656_s18 + $0x10] sm:$0xff] %vm358_vm0, %v874_v12  ;;  %906 = vst.msk [vmem:[%s1656_s18 + $0x20] sm:$0xff] %vm358_vm0, %v884_v13  ;;  %v935_v24 = vmul.f32 %v874_v12, %v874_v12  ;;  %v913_v22 = vsel %vm358_vm0, %v874_v12, 0.0  ;;  %v937_v40 = vmul.f32 %v884_v13, %v884_v13  ;;  %v917_v44 = vsel %vm358_vm0, %v884_v13, 0.0 }
 0x17e   : > { %v914_v1 = vadd.f32 %v913_v22, %v912_v4 }
 0x17f   : > { %v944_v29 = vsel %vm358_vm0, %v935_v24, 0.0  ;;  %v948_v15 = vsel %vm358_vm0, %v937_v40, 0.0 }
 0x180   : > { %v945_v39 = vadd.f32 %v944_v29, %v943_v32 }
 0x185   : > { %v878_v25 = vpop.f32.mrf.mxu0  ;;  %v888_v26 = vpop.f32.mrf.mxu1 }
 0x186   : > { %v879_v30 = vadd.f32 %v1079_v3, %v878_v25  ;;  %v889_v31 = vadd.f32 %v1079_v3, %v888_v26 }
 0x187   : > { %v880_v33 = vpop.f32.mrf.mxu0  ;;  %v890_v36 = vpop.f32.mrf.mxu1 }
 0x188   : > { %905 = vst.msk [vmem:[%s1656_s18 + $0x18] sm:$0xff] %vm358_vm0, %v879_v30  ;;  %v915_v37 = vsel %vm358_vm0, %v879_v30, 0.0  ;;  %v936_v38 = vmul.f32 %v879_v30, %v879_v30  ;;  %907 = vst.msk [vmem:[%s1656_s18 + $0x28] sm:$0xff] %vm358_vm0, %v889_v31  ;;  %v938_v48 = vmul.f32 %v889_v31, %v889_v31  ;;  %v919_v51 = vsel %vm358_vm0, %v889_v31, 0.0 }
 0x189   : > { %v916_v23 = vadd.f32 %v915_v37, %v914_v1 }
 0x18a   : > { %v946_v41 = vsel %vm358_vm0, %v936_v38, 0.0  ;;  %v950_v27 = vsel %vm358_vm0, %v938_v48, 0.0 }
 0x18b   : > { %v947_v42 = vadd.f32 %v946_v41, %v945_v39  ;;  %v918_v46 = vadd.f32 %v917_v44, %v916_v23 }
 0x18d   : > { %v893_v45 = vpop.f32.mrf.mxu1  ;;  %v949_v50 = vadd.f32 %v948_v15, %v947_v42  ;;  %v920_v28 = vadd.f32 %v919_v51, %v918_v46 }
 0x18e   : > { %v894_v47 = vadd.f32 %v1079_v3, %v893_v45 }
 0x18f   : > { %v895_v49 = vpop.f32.mrf.mxu1  ;;  %v951_v53 = vadd.f32 %v950_v27, %v949_v50 }
 0x190   : > { %908 = vst.msk [vmem:[%s1656_s18 + $0x30] sm:$0xff] %vm358_vm0, %v894_v47  ;;  %v939_v52 = vmul.f32 %v894_v47, %v894_v47  ;;  %v921_v57 = vsel %vm358_vm0, %v894_v47, 0.0 }
 0x191   : > { %v922_v58 = vadd.f32 %v921_v57, %v920_v28 }
 0x192   : > { %v952_v55 = vsel %vm358_vm0, %v939_v52, 0.0 }
 0x193   : > { %v953_v62 = vadd.f32 %v952_v55, %v951_v53 }
 0x194   : > { %v898_v54 = vpop.f32.mrf.mxu1 }
 0x195   : > { %v899_v43 = vadd.f32 %v1079_v3, %v898_v54 }
 0x196   : > { %v900_v59 = vpop.f32.mrf.mxu1 }
 0x197   : > { %909 = vst.msk [vmem:[%s1656_s18 + $0x38] sm:$0xff] %vm358_vm0, %v899_v43  ;;  %v923_v60 = vsel %vm358_vm0, %v899_v43, 0.0  ;;  %v940_v61 = vmul.f32 %v899_v43, %v899_v43 }
 0x198   : > { %v924_v63 = vadd.f32 %v923_v60, %v922_v58 }
 0x199   : > { %v954_v34 = vsel %vm358_vm0, %v940_v61, 0.0 }
 0x19a   : > { %v925_v0 = vrot.slane %v924_v63, 4  ;;  %v955_v2 = vadd.f32 %v954_v34, %v953_v62 }
 0x19c   : > { %v926_v5 = vadd.f32 %v925_v0, %v924_v63  ;;  %v956_v6 = vrot.slane %v955_v2, 4 }
 0x19e   : > { %v927_v7 = vrot.slane %v926_v5, 2  ;;  %v957_v8 = vadd.f32 %v956_v6, %v955_v2 }
 0x1a0   : > { %v928_v3 = vadd.f32 %v927_v7, %v926_v5  ;;  %v958_v9 = vrot.slane %v957_v8, 2 }
 0x1a2   : > { %v929_v56 = vrot.slane %v928_v3, 1  ;;  %v959_v10 = vadd.f32 %v958_v9, %v957_v8 }
 0x1a4   : > { %v930_v11 = vadd.f32 %v929_v56, %v928_v3  ;;  %v960_v12 = vrot.slane %v959_v10, 1 }
 0x1a6   : > { %932 = vst.msk [vmem:[%s292_s20] sm:$0x1] %vm931_vm1, %v930_v11  ;;  %v961_v13 = vadd.f32 %v960_v12, %v959_v10 }
 0x1a8   : > { %962 = vst.msk [vmem:[%s295_s23] sm:$0x1] %vm931_vm1, %v961_v13 }
 0x1a9 PF: > { %s18_s24 = sadd.s32 1, %s1275_s24  }
 0x1aa   : > { %p15_p4 = scmp.ge.s32.totalorder %s18_s24, 4  }
 0x1ac   :  { %17 = sbr.rel (!%p15_p4) target bundleno = 1 (0x1), region = 96 }

// kernel: seg_morph_unet_forward.5
= control target key start
LH: loop header
LB: loop body
LE: loop exit
PB: predicated region body
PF: predicated region fallthrough
CT: control target
= control target key end

     0   :  { %s2863_s24 = smov 0   ;;  %s4284_s0 = inlined_call_operand.vmem [shape: f32[2,16,16,2], index: 0, kind: input, shape index: {}]   ;;  %s4285_s1 = inlined_call_operand.vmem [shape: f32[1,2], index: 1, kind: input, shape index: {}]   ;;  %s4286_s2 = inlined_call_operand.vmem [shape: f32[1,2], index: 2, kind: input, shape index: {}]   ;;  %s4287_s3 = inlined_call_operand.vmem [shape: f32[18,8], index: 3, kind: input, shape index: {}]   ;;  %s4288_s4 = inlined_call_operand.vmem [shape: f32[1,8], index: 4, kind: input, shape index: {}]   ;;  %s4289_s5 = inlined_call_operand.vmem [shape: f32[2,256,8], index: 5, kind: output, shape index: {0}]   ;;  %s4290_s6 = inlined_call_operand.vmem [shape: f32[2,1,8], index: 6, kind: output, shape index: {1}]   ;;  %s4291_s7 = inlined_call_operand.vmem [shape: f32[2,1,8], index: 7, kind: output, shape index: {2}]  }
   0x1 LB: > { %s2639_s1 = sadd.s32 4294967295, %s2812_s24   ;;  %p2643_p0 = scmp.ge.s32.totalorder %s2812_s24, 1  ;;  %s2812_s24 = sphi %s2863_s24, %s18_s24  }
   0x2   : > { %p242_p1 = scmp.lt.s32.totalorder %s2812_s24, 3 }
   0x4   : > { %p243_p2 = pnand %p2643_p0, %p242_p1 }
   0x6   : > { %246 = sbr.rel (%p243_p2) target bundleno = 888 (0x378), region = 40 }
   0xb   : > { %vm328_vm0 = vcmask 15360   ;;  %vm331_vm1 = vcmask 9216   ;;  %p2873_p3 = scmp.lt.s32.totalorder %s2639_s1, 1  ;;  %v2814_v0 = vmov 0.0   ;;  %s2815_s29 = smov 2   ;;  %vm2100_vm2 = vcmask 1041408  }
   0xc   : > { %329 = vst.msk [vmem:[#allocation2] sm:$0xff] %vm328_vm0, %v2814_v0  ;;  %330 = vst.msk [vmem:[#allocation2 + $0x8] sm:$0xff] %vm328_vm0, %v2814_v0  ;;  %s2816_s30 = smov 4   ;;  %s2817_s8 = smov 6   ;;  %vm1762_vm3 = vcmask 31744   ;;  %vm1795_vm4 = vcmask 48128  }
   0xd   : > { %333 = vst.msk [vmem:[#allocation2 + $0x18] sm:$0xff] %vm328_vm0, %v2814_v0  ;;  %334 = vst.msk [vmem:[#allocation2 + $0x20] sm:$0xff] %vm328_vm0, %v2814_v0  ;;  %s4424_s1 = smov (!%p2873_p3, %s2639_s1), 1  ;;  %s2818_s9 = smov 8   ;;  %vm1828_vm5 = vcmask 64512   ;;  %vm1861_vm6 = vcmask 80896  }
   0xe   : > { %336 = vst.msk [vmem:[#allocation2 + $0x30] sm:$0xff] %vm328_vm0, %v2814_v0  ;;  %337 = vst.msk [vmem:[#allocation2 + $0x38] sm:$0xff] %vm328_vm0, %v2814_v0  ;;  %s2684_s25 = sshll.u32 %s4424_s1, 8  ;;  %s2819_s10 = smov 10   ;;  %vm1894_vm7 = vcmask 97280   ;;  %vm1927_vm8 = vcmask 113664  }
   0xf   : > { %339 = vst.msk [vmem:[#allocation2 + $0x48] sm:$0xff] %vm328_vm0, %v2814_v0  ;;  %340 = vst.msk [vmem:[#allocation2 + $0x50] sm:$0xff] %vm328_vm0, %v2814_v0  ;;  %s2943_s28 = scalar_lea.vmem %s4284_s0, %s2684_s25  ;;  %s2820_s15 = smov 12   ;;  %vm1960_vm9 = vcmask 130048   ;;  %vm2003_vm10 = vcmask 146432   ;;  %vm2430_vm11 = vcmask 57344  }
  0x10   : > { %342 = vst.msk [vmem:[#allocation2 + $0x60] sm:$0xff] %vm328_vm0, %v2814_v0  ;;  %343 = vst.msk [vmem:[#allocation2 + $0x68] sm:$0xff] %vm328_vm0, %v2814_v0  ;;  %v296_v1 = vld [vmem:[%s2943_s28] sm:$0xff]  ;;  %v298_v2 = vld [vmem:[%s2943_s28 + $0x10] sm:$0xff]  ;;  %s2821_s18 = smov 14   ;;  %s2822_s19 = smov 16  }
  0x11   : > { %345 = vst.msk [vmem:[#allocation2 + $0x78] sm:$0xff] %vm328_vm0, %v2814_v0  ;;  %346 = vst.msk [vmem:[#allocation2 + $0x80] sm:$0xff] %vm328_vm0, %v2814_v0  ;;  %v297_v3 = vld [vmem:[%s2943_s28 + $0x8] sm:$0xff]  ;;  %v300_v4 = vld [vmem:[%s2943_s28 + $0x20] sm:$0xff]  ;;  %s3958_s2 = scalar_lea.vmem %s4289_s5, %s2684_s25  ;;  %s292_s27 = scalar_lea.vmem %s4290_s6, %s4424_s1 }
  0x12   : > { %348 = vst.msk [vmem:[#allocation2 + $0x90] sm:$0xff] %vm328_vm0, %v2814_v0  ;;  %349 = vst.msk [vmem:[#allocation2 + $0x98] sm:$0xff] %vm328_vm0, %v2814_v0  ;;  %v299_v5 = vld [vmem:[%s2943_s28 + $0x18] sm:$0xff]  ;;  %v302_v6 = vld [vmem:[%s2943_s28 + $0x30] sm:$0xff] }
  0x13   : > { %351 = vst.msk [vmem:[#allocation2 + $0xa8] sm:$0xff] %vm328_vm0, %v2814_v0  ;;  %352 = vst.msk [vmem:[#allocation2 + $0xb0] sm:$0xff] %vm328_vm0, %v2814_v0  ;;  %v449_v7 = vld [vmem:[#allocation2 + $0x1] sm:$0xff]  ;;  %v303_v11 = vld [vmem:[%s2943_s28 + $0x38] sm:$0xff] }
  0x14   : > { %354 = vst.msk [vmem:[#allocation2 + $0xc0] sm:$0xff] %vm328_vm0, %v2814_v0  ;;  %355 = vst.msk [vmem:[#allocation2 + $0xc8] sm:$0xff] %vm328_vm0, %v2814_v0  ;;  %v301_v9 = vld [vmem:[%s2943_s28 + $0x28] sm:$0xff]  ;;  %738 = vrot.lane.b32.xlu0 %v449_v7, %s2815_s29  ;;  %v304_v10 = vld [vmem:[%s2943_s28 + $0x40] sm:$0xff] }
  0x15   : > { %357 = vst.msk [vmem:[#allocation2 + $0xd8] sm:$0xff] %vm328_vm0, %v2814_v0  ;;  %358 = vst.msk [vmem:[#allocation2 + $0xe0] sm:$0xff] %vm328_vm0, %v2814_v0  ;;  %v306_v12 = vld [vmem:[%s2943_s28 + $0x50] sm:$0xff]  ;;  %v305_v13 = vld [vmem:[%s2943_s28 + $0x48] sm:$0xff] }
  0x16   : > { %360 = vst.msk [vmem:[#allocation2 + $0xf0] sm:$0xff] %vm328_vm0, %v2814_v0  ;;  %361 = vst.msk [vmem:[#allocation2 + $0xf8] sm:$0xff] %vm328_vm0, %v2814_v0  ;;  %v308_v14 = vld [vmem:[%s2943_s28 + $0x60] sm:$0xff]  ;;  %v307_v15 = vld [vmem:[%s2943_s28 + $0x58] sm:$0xff] }
  0x17   : > { %363 = vst.msk [vmem:[#allocation2 + $0x108] sm:$0xff] %vm328_vm0, %v2814_v0  ;;  %364 = vst.msk [vmem:[#allocation2 + $0x110] sm:$0xff] %vm328_vm0, %v2814_v0  ;;  %v310_v16 = vld [vmem:[%s2943_s28 + $0x70] sm:$0xff]  ;;  %v309_v17 = vld [vmem:[%s2943_s28 + $0x68] sm:$0xff] }
  0x18   : > { %366 = vst.msk [vmem:[#allocation2 + $0x120] sm:$0xff] %vm328_vm0, %v2814_v0  ;;  %367 = vst.msk [vmem:[#allocation2 + $0x128] sm:$0xff] %vm328_vm0, %v2814_v0  ;;  %v312_v18 = vld [vmem:[%s2943_s28 + $0x80] sm:$0xff]  ;;  %v311_v19 = vld [vmem:[%s2943_s28 + $0x78] sm:$0xff] }
  0x19   : > { %369 = vst.msk [vmem:[#allocation2 + $0x138] sm:$0xff] %vm328_vm0, %v2814_v0  ;;  %370 = vst.msk [vmem:[#allocation2 + $0x140] sm:$0xff] %vm328_vm0, %v2814_v0  ;;  %v314_v20 = vld [vmem:[%s2943_s28 + $0x90] sm:$0xff]  ;;  %v313_v21 = vld [vmem:[%s2943_s28 + $0x88] sm:$0xff] }
  0x1a   : > { %372 = vst.msk [vmem:[#allocation2 + $0x150] sm:$0xff] %vm328_vm0, %v2814_v0  ;;  %373 = vst.msk [vmem:[#allocation2 + $0x158] sm:$0xff] %vm328_vm0, %v2814_v0  ;;  %v316_v22 = vld [vmem:[%s2943_s28 + $0xa0] sm:$0xff]  ;;  %v315_v23 = vld [vmem:[%s2943_s28 + $0x98] sm:$0xff] }
  0x1b   : > { %375 = vst.msk [vmem:[#allocation2 + $0x168] sm:$0xff] %vm328_vm0, %v2814_v0  ;;  %376 = vst.msk [vmem:[#allocation2 + $0x170] sm:$0xff] %vm328_vm0, %v2814_v0  ;;  %v318_v24 = vld [vmem:[%s2943_s28 + $0xb0] sm:$0xff]  ;;  %v317_v28 = vld [vmem:[%s2943_s28 + $0xa8] sm:$0xff] }
  0x1c   : > { %378 = vst.msk [vmem:[#allocation2 + $0x180] sm:$0xff] %vm328_vm0, %v2814_v0  ;;  %379 = vst.msk [vmem:[#allocation2 + $0x188] sm:$0xff] %vm328_vm0, %v2814_v0  ;;  %v320_v29 = vld [vmem:[%s2943_s28 + $0xc0] sm:$0xff]  ;;  %v319_v33 = vld [vmem:[%s2943_s28 + $0xb8] sm:$0xff] }
  0x1d   : > { %381 = vst.msk [vmem:[#allocation2 + $0x198] sm:$0xff] %vm328_vm0, %v2814_v0  ;;  %382 = vst.msk [vmem:[#allocation2 + $0x1a0] sm:$0xff] %vm328_vm0, %v2814_v0  ;;  %v322_v34 = vld [vmem:[%s2943_s28 + $0xd0] sm:$0xff]  ;;  %v321_v35 = vld [vmem:[%s2943_s28 + $0xc8] sm:$0xff] }
  0x1e   : > { %332 = vst.msk [vmem:[#allocation2 + $0x10] sm:$0x3] %vm331_vm1, %v2814_v0  ;;  %335 = vst.msk [vmem:[#allocation2 + $0x28] sm:$0x3] %vm331_vm1, %v2814_v0  ;;  %v324_v36 = vld [vmem:[%s2943_s28 + $0xe0] sm:$0xff]  ;;  %v323_v37 = vld [vmem:[%s2943_s28 + $0xd8] sm:$0xff] }
  0x1f   : > { %338 = vst.msk [vmem:[#allocation2 + $0x40] sm:$0x3] %vm331_vm1, %v2814_v0  ;;  %341 = vst.msk [vmem:[#allocation2 + $0x58] sm:$0x3] %vm331_vm1, %v2814_v0  ;;  %v325_v39 = vld [vmem:[%s2943_s28 + $0xe8] sm:$0xff] }
  0x20   : > { %344 = vst.msk [vmem:[#allocation2 + $0x70] sm:$0x3] %vm331_vm1, %v2814_v0  ;;  %347 = vst.msk [vmem:[#allocation2 + $0x88] sm:$0x3] %vm331_vm1, %v2814_v0  ;;  %v481_v62 = vld [vmem:[#allocation2 + $0x2] sm:$0xff] }
  0x21   : > { %350 = vst.msk [vmem:[#allocation2 + $0xa0] sm:$0x3] %vm331_vm1, %v2814_v0  ;;  %353 = vst.msk [vmem:[#allocation2 + $0xb8] sm:$0x3] %vm331_vm1, %v2814_v0 }
  0x22   : > { %356 = vst.msk [vmem:[#allocation2 + $0xd0] sm:$0x3] %vm331_vm1, %v2814_v0  ;;  %359 = vst.msk [vmem:[#allocation2 + $0xe8] sm:$0x3] %vm331_vm1, %v2814_v0 }
  0x23   : > { %362 = vst.msk [vmem:[#allocation2 + $0x100] sm:$0x3] %vm331_vm1, %v2814_v0  ;;  %365 = vst.msk [vmem:[#allocation2 + $0x118] sm:$0x3] %vm331_vm1, %v2814_v0 }
  0x24   : > { %368 = vst.msk [vmem:[#allocation2 + $0x130] sm:$0x3] %vm331_vm1, %v2814_v0  ;;  %371 = vst.msk [vmem:[#allocation2 + $0x148] sm:$0x3] %vm331_vm1, %v2814_v0 }
  0x25   : > { %374 = vst.msk [vmem:[#allocation2 + $0x160] sm:$0x3] %vm331_vm1, %v2814_v0  ;;  %377 = vst.msk [vmem:[#allocation2 + $0x178] sm:$0x3] %vm331_vm1, %v2814_v0  ;;  %v450_v8 = vld [vmem:[#allocation2 + $0x9] sm:$0xff] }
  0x26   : > { %380 = vst.msk [vmem:[#allocation2 + $0x190] sm:$0x3] %vm331_vm1, %v2814_v0  ;;  %383 = vst.msk [vmem:[#allocation2 + $0x1a8] sm:$0x3] %vm331_vm1, %v2814_v0  ;;  %740 = vrot.lane.b32.xlu0 %v450_v8, %s2815_s29 }
  0x27   : > { %385 = vst.msk [vmem:[#allocation2 + $0x19] sm:$0xff] %vm328_vm0, %v296_v1  ;;  %387 = vst.msk [vmem:[#allocation2 + $0x31] sm:$0xff] %vm328_vm0, %v298_v2  ;;  %v482_v1 = vld [vmem:[#allocation2 + $0xa] sm:$0xff] }
  0x28   : > { %386 = vst.msk [vmem:[#allocation2 + $0x21] sm:$0xff] %vm328_vm0, %v297_v3  ;;  %389 = vst.msk [vmem:[#allocation2 + $0x49] sm:$0xff] %vm328_vm0, %v300_v4 }
  0x29   : > { %388 = vst.msk [vmem:[#allocation2 + $0x39] sm:$0xff] %vm328_vm0, %v299_v5  ;;  %391 = vst.msk [vmem:[#allocation2 + $0x61] sm:$0xff] %vm328_vm0, %v302_v6 }
  0x2a   : > { %390 = vst.msk [vmem:[#allocation2 + $0x51] sm:$0xff] %vm328_vm0, %v301_v9  ;;  %393 = vst.msk [vmem:[#allocation2 + $0x79] sm:$0xff] %vm328_vm0, %v304_v10 }
  0x2b   : > { %392 = vst.msk [vmem:[#allocation2 + $0x69] sm:$0xff] %vm328_vm0, %v303_v11  ;;  %395 = vst.msk [vmem:[#allocation2 + $0x91] sm:$0xff] %vm328_vm0, %v306_v12 }
  0x2c   : > { %394 = vst.msk [vmem:[#allocation2 + $0x81] sm:$0xff] %vm328_vm0, %v305_v13  ;;  %397 = vst.msk [vmem:[#allocation2 + $0xa9] sm:$0xff] %vm328_vm0, %v308_v14 }
  0x2d   : > { %396 = vst.msk [vmem:[#allocation2 + $0x99] sm:$0xff] %vm328_vm0, %v307_v15  ;;  %399 = vst.msk [vmem:[#allocation2 + $0xc1] sm:$0xff] %vm328_vm0, %v310_v16 }
  0x2e   : > { %398 = vst.msk [vmem:[#allocation2 + $0xb1] sm:$0xff] %vm328_vm0, %v309_v17  ;;  %401 = vst.msk [vmem:[#allocation2 + $0xd9] sm:$0xff] %vm328_vm0, %v312_v18  ;;  %v2988_v25 = vld [vmem:[#allocation2 + $0x19] sm:$0xff]  ;;  %v2990_v26 = vld [vmem:[#allocation2 + $0x31] sm:$0xff] }
  0x2f   : > { %400 = vst.msk [vmem:[#allocation2 + $0xc9] sm:$0xff] %vm328_vm0, %v311_v19  ;;  %403 = vst.msk [vmem:[#allocation2 + $0xf1] sm:$0xff] %vm328_vm0, %v314_v20  ;;  %742 = vrot.lane.b32.xlu1 %v2988_v25, %s2815_s29  ;;  %v2997_v27 = vld [vmem:[#allocation2 + $0x21] sm:$0xff]  ;;  %746 = vrot.lane.b32.xlu0 %v2990_v26, %s2815_s29  ;;  %v3005_v30 = vld [vmem:[#allocation2 + $0x49] sm:$0xff] }
  0x30   : > { %402 = vst.msk [vmem:[#allocation2 + $0xe1] sm:$0xff] %vm328_vm0, %v313_v21  ;;  %405 = vst.msk [vmem:[#allocation2 + $0x109] sm:$0xff] %vm328_vm0, %v316_v22  ;;  %v3009_v31 = vld [vmem:[#allocation2 + $0x39] sm:$0xff]  ;;  %v3013_v32 = vld [vmem:[#allocation2 + $0x61] sm:$0xff] }
  0x31   : > { %404 = vst.msk [vmem:[#allocation2 + $0xf9] sm:$0xff] %vm328_vm0, %v315_v23  ;;  %407 = vst.msk [vmem:[#allocation2 + $0x121] sm:$0xff] %vm328_vm0, %v318_v24  ;;  %v3025_v38 = vld [vmem:[#allocation2 + $0x51] sm:$0xff]  ;;  %v3033_v40 = vld [vmem:[#allocation2 + $0x79] sm:$0xff] }
  0x32   : > { %406 = vst.msk [vmem:[#allocation2 + $0x111] sm:$0xff] %vm328_vm0, %v317_v28  ;;  %409 = vst.msk [vmem:[#allocation2 + $0x139] sm:$0xff] %vm328_vm0, %v320_v29  ;;  %v3037_v41 = vld [vmem:[#allocation2 + $0x69] sm:$0xff]  ;;  %v3041_v42 = vld [vmem:[#allocation2 + $0x91] sm:$0xff] }
  0x33   : > { %744 = vrot.lane.b32.xlu1 %v2997_v27, %s2815_s29  ;;  %750 = vrot.lane.b32.xlu0 %v3005_v30, %s2815_s29  ;;  %408 = vst.msk [vmem:[#allocation2 + $0x129] sm:$0xff] %vm328_vm0, %v319_v33  ;;  %411 = vst.msk [vmem:[#allocation2 + $0x151] sm:$0xff] %vm328_vm0, %v322_v34  ;;  %v3045_v43 = vld [vmem:[#allocation2 + $0x81] sm:$0xff]  ;;  %v3049_v44 = vld [vmem:[#allocation2 + $0xa9] sm:$0xff] }
  0x34   : > { %410 = vst.msk [vmem:[#allocation2 + $0x141] sm:$0xff] %vm328_vm0, %v321_v35  ;;  %413 = vst.msk [vmem:[#allocation2 + $0x169] sm:$0xff] %vm328_vm0, %v324_v36  ;;  %v3053_v45 = vld [vmem:[#allocation2 + $0x99] sm:$0xff]  ;;  %v465_v46 = vld [vmem:[#allocation2 + $0xc1] sm:$0xff] }
  0x35   : > { %412 = vst.msk [vmem:[#allocation2 + $0x159] sm:$0xff] %vm328_vm0, %v323_v37  ;;  %414 = vst.msk [vmem:[#allocation2 + $0x171] sm:$0xff] %vm328_vm0, %v325_v39  ;;  %v3059_v47 = vld [vmem:[#allocation2 + $0xb1] sm:$0xff]  ;;  %v467_v48 = vld [vmem:[#allocation2 + $0xd9] sm:$0xff] }
  0x36   : > { %v466_v49 = vld [vmem:[#allocation2 + $0xc9] sm:$0xff]  ;;  %v469_v50 = vld [vmem:[#allocation2 + $0xf1] sm:$0xff]  ;;  %v3079_v0 = vld [vmem:[#allocation2 + $0x1a] sm:$0xff] }
  0x37   : > { %748 = vrot.lane.b32.xlu1 %v3009_v31, %s2815_s29  ;;  %754 = vrot.lane.b32.xlu0 %v3013_v32, %s2815_s29  ;;  %v468_v51 = vld [vmem:[#allocation2 + $0xe1] sm:$0xff]  ;;  %v471_v52 = vld [vmem:[#allocation2 + $0x109] sm:$0xff]  ;;  %v3084_v2 = vld [vmem:[#allocation2 + $0x32] sm:$0xff] }
  0x38   : > { %v470_v53 = vld [vmem:[#allocation2 + $0xf9] sm:$0xff]  ;;  %v473_v54 = vld [vmem:[#allocation2 + $0x121] sm:$0xff]  ;;  %v3091_v4 = vld [vmem:[#allocation2 + $0x4a] sm:$0xff] }
  0x39   : > { %v472_v55 = vld [vmem:[#allocation2 + $0x111] sm:$0xff]  ;;  %v475_v56 = vld [vmem:[#allocation2 + $0x139] sm:$0xff]  ;;  %v3087_v3 = vld [vmem:[#allocation2 + $0x22] sm:$0xff] }
  0x3a   : > { %v474_v57 = vld [vmem:[#allocation2 + $0x129] sm:$0xff]  ;;  %v477_v58 = vld [vmem:[#allocation2 + $0x151] sm:$0xff]  ;;  %v3095_v5 = vld [vmem:[#allocation2 + $0x3a] sm:$0xff] }
  0x3b   : > { %752 = vrot.lane.b32.xlu1 %v3025_v38, %s2815_s29  ;;  %758 = vrot.lane.b32.xlu0 %v3033_v40, %s2815_s29  ;;  %v476_v59 = vld [vmem:[#allocation2 + $0x141] sm:$0xff]  ;;  %v479_v60 = vld [vmem:[#allocation2 + $0x169] sm:$0xff]  ;;  %v3103_v7 = vld [vmem:[#allocation2 + $0x52] sm:$0xff] }
  0x3c   : > { %v478_v61 = vld [vmem:[#allocation2 + $0x159] sm:$0xff]  ;;  %v480_v63 = vld [vmem:[#allocation2 + $0x171] sm:$0xff]  ;;  %v3099_v6 = vld [vmem:[#allocation2 + $0x62] sm:$0xff] }
  0x3d   : > { %v3107_v8 = vld [vmem:[#allocation2 + $0x7a] sm:$0xff]  ;;  %v3111_v9 = vld [vmem:[#allocation2 + $0x6a] sm:$0xff]  ;;  %v3115_v10 = vld [vmem:[#allocation2 + $0x92] sm:$0xff] }
  0x3e   : > { %v3119_v11 = vld [vmem:[#allocation2 + $0x82] sm:$0xff]  ;;  %v3123_v12 = vld [vmem:[#allocation2 + $0xaa] sm:$0xff]  ;;  %v3127_v13 = vld [vmem:[#allocation2 + $0x9a] sm:$0xff] }
  0x3f   : > { %756 = vrot.lane.b32.xlu1 %v3037_v41, %s2815_s29  ;;  %762 = vrot.lane.b32.xlu0 %v3041_v42, %s2815_s29  ;;  %v3131_v14 = vld [vmem:[#allocation2 + $0xc2] sm:$0xff]  ;;  %v3135_v15 = vld [vmem:[#allocation2 + $0xb2] sm:$0xff]  ;;  %v499_v16 = vld [vmem:[#allocation2 + $0xda] sm:$0xff] }
  0x40   : > { %v3141_v17 = vld [vmem:[#allocation2 + $0xca] sm:$0xff]  ;;  %v501_v18 = vld [vmem:[#allocation2 + $0xf2] sm:$0xff]  ;;  %v3146_v19 = vld [vmem:[#allocation2 + $0xe2] sm:$0xff] }
  0x41   : > { %v503_v20 = vld [vmem:[#allocation2 + $0x10a] sm:$0xff]  ;;  %v502_v21 = vld [vmem:[#allocation2 + $0xfa] sm:$0xff]  ;;  %v505_v22 = vld [vmem:[#allocation2 + $0x122] sm:$0xff] }
  0x42   : > { %v504_v23 = vld [vmem:[#allocation2 + $0x112] sm:$0xff]  ;;  %v507_v24 = vld [vmem:[#allocation2 + $0x13a] sm:$0xff]  ;;  %v506_v29 = vld [vmem:[#allocation2 + $0x12a] sm:$0xff] }
  0x43   : > { %760 = vrot.lane.b32.xlu1 %v3045_v43, %s2815_s29  ;;  %766 = vrot.lane.b32.xlu0 %v3049_v44, %s2815_s29  ;;  %v509_v33 = vld [vmem:[#allocation2 + $0x152] sm:$0xff]  ;;  %v508_v35 = vld [vmem:[#allocation2 + $0x142] sm:$0xff]  ;;  %v511_v37 = vld [vmem:[#allocation2 + $0x16a] sm:$0xff] }
  0x47   : > { %764 = vrot.lane.b32.xlu1 %v3053_v45, %s2815_s29  ;;  %770 = vrot.lane.b32.xlu0 %v465_v46, %s2815_s29  ;;  %v510_v46 = vld [vmem:[#allocation2 + $0x15a] sm:$0xff] }
  0x4b   : > { %768 = vrot.lane.b32.xlu1 %v3059_v47, %s2815_s29  ;;  %774 = vrot.lane.b32.xlu0 %v467_v48, %s2815_s29 }
  0x4f   : > { %772 = vrot.lane.b32.xlu1 %v466_v49, %s2815_s29  ;;  %778 = vrot.lane.b32.xlu0 %v469_v50, %s2815_s29  ;;  %v3173_v50 = vld [vmem:[#allocation2 + $0x18] sm:$0xff] }
  0x53   : > { %776 = vrot.lane.b32.xlu1 %v468_v51, %s2815_s29  ;;  %782 = vrot.lane.b32.xlu0 %v471_v52, %s2815_s29  ;;  %v512_v51 = vld [vmem:[#allocation2 + $0x172] sm:$0xff] }
  0x57   : > { %780 = vrot.lane.b32.xlu1 %v470_v53, %s2815_s29  ;;  %786 = vrot.lane.b32.xlu0 %v473_v54, %s2815_s29  ;;  %v3182_v54 = vld [vmem:[#allocation2 + $0x30] sm:$0xff] }
  0x5b   : > { %784 = vrot.lane.b32.xlu1 %v472_v55, %s2815_s29  ;;  %790 = vrot.lane.b32.xlu0 %v475_v56, %s2815_s29  ;;  %v3188_v56 = vld [vmem:[#allocation2 + $0x20] sm:$0xff] }
  0x5f   : > { %788 = vrot.lane.b32.xlu1 %v474_v57, %s2815_s29  ;;  %794 = vrot.lane.b32.xlu0 %v477_v58, %s2815_s29  ;;  %v3194_v58 = vld [vmem:[#allocation2 + $0x48] sm:$0xff] }
  0x63   : > { %792 = vrot.lane.b32.xlu1 %v476_v59, %s2815_s29  ;;  %798 = vrot.lane.b32.xlu0 %v479_v60, %s2815_s29  ;;  %v3200_v60 = vld [vmem:[#allocation2 + $0x38] sm:$0xff] }
  0x67   : > { %796 = vrot.lane.b32.xlu1 %v478_v61, %s2815_s29  ;;  %866 = vrot.lane.b32.xlu0 %v481_v62, %s2816_s30  ;;  %v3206_v62 = vld [vmem:[#allocation2 + $0x60] sm:$0xff] }
  0x6b   : > { %800 = vrot.lane.b32.xlu1 %v480_v63, %s2815_s29  ;;  %870 = vrot.lane.b32.xlu0 %v3079_v0, %s2816_s30 }
  0x6f   : > { %868 = vrot.lane.b32.xlu1 %v482_v1, %s2816_s30  ;;  %874 = vrot.lane.b32.xlu0 %v3084_v2, %s2816_s30  ;;  %v3212_v1 = vld [vmem:[#allocation2 + $0x50] sm:$0xff] }
  0x73   : > { %872 = vrot.lane.b32.xlu1 %v3087_v3, %s2816_s30  ;;  %878 = vrot.lane.b32.xlu0 %v3091_v4, %s2816_s30 }
  0x77   : > { %876 = vrot.lane.b32.xlu1 %v3095_v5, %s2816_s30  ;;  %882 = vrot.lane.b32.xlu0 %v3099_v6, %s2816_s30 }
  0x7b   : > { %880 = vrot.lane.b32.xlu1 %v3103_v7, %s2816_s30  ;;  %886 = vrot.lane.b32.xlu0 %v3107_v8, %s2816_s30 }
  0x7f   : > { %884 = vrot.lane.b32.xlu1 %v3111_v9, %s2816_s30  ;;  %890 = vrot.lane.b32.xlu0 %v3115_v10, %s2816_s30 }
  0x83   : > { %888 = vrot.lane.b32.xlu1 %v3119_v11, %s2816_s30  ;;  %894 = vrot.lane.b32.xlu0 %v3123_v12, %s2816_s30 }
  0x86   : > { %v3154_v28 = vpop.permute.xlu0 %738 }
  0x87   : > { %892 = vrot.lane.b32.xlu1 %v3127_v13, %s2816_s30  ;;  %898 = vrot.lane.b32.xlu0 %v3131_v14, %s2816_s30 }
  0x8b   : > { %896 = vrot.lane.b32.xlu1 %v3135_v15, %s2816_s30  ;;  %902 = vrot.lane.b32.xlu0 %v499_v16, %s2816_s30 }
  0x8f   : > { %900 = vrot.lane.b32.xlu1 %v3141_v17, %s2816_s30  ;;  %906 = vrot.lane.b32.xlu0 %v501_v18, %s2816_s30  ;;  %v3218_v18 = vld [vmem:[#allocation2 + $0x78] sm:$0xff] }
  0x93   : > { %904 = vrot.lane.b32.xlu1 %v3146_v19, %s2816_s30  ;;  %910 = vrot.lane.b32.xlu0 %v503_v20, %s2816_s30 }
  0x97   : > { %908 = vrot.lane.b32.xlu1 %v502_v21, %s2816_s30  ;;  %914 = vrot.lane.b32.xlu0 %v505_v22, %s2816_s30  ;;  %v3224_v21 = vld [vmem:[#allocation2 + $0x68] sm:$0xff] }
  0x98   : > { %v3158_v34 = vpop.permute.xlu0 %740 }
  0x9b   : > { %912 = vrot.lane.b32.xlu1 %v504_v23, %s2816_s30  ;;  %918 = vrot.lane.b32.xlu0 %v507_v24, %s2816_s30  ;;  %v3230_v23 = vld [vmem:[#allocation2 + $0x90] sm:$0xff] }
  0x9f   : > { %916 = vrot.lane.b32.xlu1 %v506_v29, %s2816_s30  ;;  %922 = vrot.lane.b32.xlu0 %v509_v33, %s2816_s30  ;;  %v3236_v29 = vld [vmem:[#allocation2 + $0x80] sm:$0xff] }
  0xa1   : > { %v3162_v36 = vpop.permute.xlu1 %742  ;;  %v3164_v39 = vpop.permute.xlu0 %746 }
  0xa3   : > { %920 = vrot.lane.b32.xlu1 %v508_v35, %s2816_s30  ;;  %926 = vrot.lane.b32.xlu0 %v511_v37, %s2816_s30  ;;  %v3242_v35 = vld [vmem:[#allocation2 + $0xa8] sm:$0xff] }
  0xa4   : > { %4308 = vst [vmem:[#allocation14_spill] sm:$0xff] %v3242_v35 }
  0xa5   : > { %v3168_v48 = vpop.permute.xlu1 %744  ;;  %v3170_v49 = vpop.permute.xlu0 %750 }
  0xa7   : > { %924 = vrot.lane.b32.xlu1 %v510_v46, %s2816_s30  ;;  %994 = vrot.lane.b32.xlu0 %v3173_v50, %s2817_s8  ;;  %v3248_v46 = vld [vmem:[#allocation2 + $0x98] sm:$0xff] }
  0xa8   : > { %4310 = vst [vmem:[#allocation16_spill] sm:$0xff] %v3248_v46 }
  0xa9   : > { %v3177_v52 = vpop.permute.xlu1 %748  ;;  %v3179_v53 = vpop.permute.xlu0 %754 }
  0xaa   : > { %4297 = vst [vmem:[#allocation3_spill] sm:$0xff] %v3179_v53 }
  0xab   : > { %928 = vrot.lane.b32.xlu1 %v512_v51, %s2816_s30  ;;  %998 = vrot.lane.b32.xlu0 %v3182_v54, %s2817_s8  ;;  %s295_s30 = scalar_lea.vmem %s4291_s7, %s4424_s1 }
  0xad   : > { %v3186_v55 = vpop.permute.xlu1 %752  ;;  %v3190_v57 = vpop.permute.xlu0 %758 }
  0xae   : > { %4298 = vst [vmem:[#allocation4_spill] sm:$0xff] %v3186_v55  ;;  %4299 = vst [vmem:[#allocation5_spill] sm:$0xff] %v3190_v57 }
  0xaf   : > { %996 = vrot.lane.b32.xlu1 %v3188_v56, %s2817_s8  ;;  %1002 = vrot.lane.b32.xlu0 %v3194_v58, %s2817_s8 }
  0xb1   : > { %v3198_v59 = vpop.permute.xlu1 %756  ;;  %v3202_v61 = vpop.permute.xlu0 %762 }
  0xb2   : > { %4300 = vst [vmem:[#allocation6_spill] sm:$0xff] %v3198_v59  ;;  %4301 = vst [vmem:[#allocation7_spill] sm:$0xff] %v3202_v61  ;;  %v3296_v59 = vld [vmem:[#allocation2 + $0xf8] sm:$0xff] }
  0xb3   : > { %1000 = vrot.lane.b32.xlu1 %v3200_v60, %s2817_s8  ;;  %1006 = vrot.lane.b32.xlu0 %v3206_v62, %s2817_s8 }
  0xb5   : > { %v3210_v63 = vpop.permute.xlu1 %760  ;;  %v3214_v16 = vpop.permute.xlu0 %766 }
  0xb6   : > { %4302 = vst [vmem:[#allocation8_spill] sm:$0xff] %v3210_v63  ;;  %4303 = vst [vmem:[#allocation9_spill] sm:$0xff] %v3214_v16  ;;  %v3284_v63 = vld [vmem:[#allocation2 + $0xe0] sm:$0xff] }
  0xb7   : > { %1004 = vrot.lane.b32.xlu1 %v3212_v1, %s2817_s8  ;;  %1010 = vrot.lane.b32.xlu0 %v3218_v18, %s2817_s8 }
  0xb9   : > { %v3222_v20 = vpop.permute.xlu1 %764  ;;  %v3226_v22 = vpop.permute.xlu0 %770 }
  0xba   : > { %4304 = vst [vmem:[#allocation10_spill] sm:$0xff] %v3222_v20  ;;  %4305 = vst [vmem:[#allocation11_spill] sm:$0xff] %v3226_v22  ;;  %v3254_v22 = vld [vmem:[#allocation2 + $0xc0] sm:$0xff]  ;;  %v3272_v20 = vld [vmem:[#allocation2 + $0xc8] sm:$0xff] }
  0xbb   : > { %1008 = vrot.lane.b32.xlu1 %v3224_v21, %s2817_s8  ;;  %1014 = vrot.lane.b32.xlu0 %v3230_v23, %s2817_s8 }
  0xbd   : > { %v3234_v24 = vpop.permute.xlu1 %768  ;;  %v3238_v33 = vpop.permute.xlu0 %774 }
  0xbe   : > { %4306 = vst [vmem:[#allocation12_spill] sm:$0xff] %v3234_v24  ;;  %4307 = vst [vmem:[#allocation13_spill] sm:$0xff] %v3238_v33  ;;  %v3260_v24 = vld [vmem:[#allocation2 + $0xb0] sm:$0xff] }
  0xbf   : > { %1012 = vrot.lane.b32.xlu1 %v3236_v29, %s2817_s8  ;;  %1018 = vrot.lane.b32.xlu0 %v3242_v35, %s2817_s8  ;;  %4313 = vst [vmem:[#allocation19_spill] sm:$0xff] %v3260_v24 }
  0xc1   : > { %v3246_v37 = vpop.permute.xlu1 %772  ;;  %v3250_v51 = vpop.permute.xlu0 %778 }
  0xc2   : > { %4309 = vst [vmem:[#allocation15_spill] sm:$0xff] %v3246_v37  ;;  %4311 = vst [vmem:[#allocation17_spill] sm:$0xff] %v3250_v51  ;;  %v3266_v37 = vld [vmem:[#allocation2 + $0xd8] sm:$0xff] }
  0xc3   : > { %1016 = vrot.lane.b32.xlu1 %v3248_v46, %s2817_s8  ;;  %1022 = vrot.lane.b32.xlu0 %v3254_v22, %s2817_s8 }
  0xc5   : > { %v3258_v33 = vpop.permute.xlu1 %776  ;;  %v3262_v16 = vpop.permute.xlu0 %782 }
  0xc6   : > { %4312 = vst [vmem:[#allocation18_spill] sm:$0xff] %v3258_v33  ;;  %4314 = vst [vmem:[#allocation20_spill] sm:$0xff] %v3262_v16  ;;  %v3278_v33 = vld [vmem:[#allocation2 + $0xf0] sm:$0xff] }
  0xc7   : > { %1020 = vrot.lane.b32.xlu1 %v3260_v24, %s2817_s8  ;;  %1026 = vrot.lane.b32.xlu0 %v3266_v37, %s2817_s8 }
  0xc9   : > { %v3270_v51 = vpop.permute.xlu1 %780  ;;  %v3274_v61 = vpop.permute.xlu0 %786 }
  0xca   : > { %4315 = vst [vmem:[#allocation21_spill] sm:$0xff] %v3270_v51  ;;  %4316 = vst [vmem:[#allocation22_spill] sm:$0xff] %v3274_v61  ;;  %v3290_v51 = vld [vmem:[#allocation2 + $0x108] sm:$0xff] }
  0xcb   : > { %1024 = vrot.lane.b32.xlu1 %v3272_v20, %s2817_s8  ;;  %1030 = vrot.lane.b32.xlu0 %v3278_v33, %s2817_s8 }
  0xcd   : > { %v3282_v16 = vpop.permute.xlu1 %784  ;;  %v3286_v57 = vpop.permute.xlu0 %790 }
  0xce   : > { %4317 = vst [vmem:[#allocation23_spill] sm:$0xff] %v3282_v16  ;;  %4318 = vst [vmem:[#allocation24_spill] sm:$0xff] %v3286_v57  ;;  %v3306_v16 = vld [vmem:[#allocation2 + $0x110] sm:$0xff] }
  0xcf   : > { %1028 = vrot.lane.b32.xlu1 %v3284_v63, %s2817_s8  ;;  %1034 = vrot.lane.b32.xlu0 %v3290_v51, %s2817_s8  ;;  %4322 = vst [vmem:[#allocation28_spill] sm:$0xff] %v3306_v16 }
  0xd1   : > { %v3294_v61 = vpop.permute.xlu1 %788  ;;  %v3298_v53 = vpop.permute.xlu0 %794 }
  0xd2   : > { %4319 = vst [vmem:[#allocation25_spill] sm:$0xff] %v3294_v61  ;;  %4320 = vst [vmem:[#allocation26_spill] sm:$0xff] %v3298_v53  ;;  %v1995_v61 = vld [vmem:[%s4287_s3 + $0x10] sm:$0x3] }
  0xd3   : > { %1032 = vrot.lane.b32.xlu1 %v3296_v59, %s2817_s8  ;;  %1122 = vrot.lane.b32.xlu0 %v2988_v25, %s2818_s9 }
  0xd4   : > { %2721 = vmatprep.subr.msk.mxu0 %vm2100_vm2, %v1995_v61  ;;  %2775 = vmatprep.subr.msk.mxu1 %vm2100_vm2, %v1995_v61 }
  0xd5   : > { %v3304_v57 = vpop.permute.xlu1 %792  ;;  %v3308_v55 = vpop.permute.xlu0 %798  ;;  %2722 = vmatpush3.msk.msra.mxu0 %vm2100_vm2, %v1995_v61  ;;  %2778 = vmatpush3.msk.msra.mxu1 %vm2100_vm2, %v1995_v61 }
  0xd6   : > { %4321 = vst [vmem:[#allocation27_spill] sm:$0xff] %v3304_v57  ;;  %4323 = vst [vmem:[#allocation29_spill] sm:$0xff] %v3308_v55  ;;  %v1994_v55 = vld [vmem:[%s4287_s3 + $0x8] sm:$0xff] }
  0xd7   : > { %1036 = vrot.lane.b32.xlu1 %v3306_v16, %s2817_s8  ;;  %1250 = vrot.lane.b32.xlu0 %v3079_v0, %s2819_s10 }
  0xd8   : > { %2723 = vmatprep.subr.mxu0 %v1994_v55  ;;  %2776 = vmatprep.subr.mxu1 %v1994_v55 }
  0xd9   : > { %v3314_v53 = vpop.permute.xlu1 %796  ;;  %v3319_v25 = vpop.permute.xlu0 %866  ;;  %2724 = vmatpush3.msra.mxu0 %v1994_v55  ;;  %2779 = vmatpush3.msra.mxu1 %v1994_v55 }
  0xda   : > { %4324 = vst [vmem:[#allocation30_spill] sm:$0xff] %v3314_v53  ;;  %v1993_v53 = vld [vmem:[%s4287_s3] sm:$0xff] }
  0xdb   : > { %1124 = vrot.lane.b32.xlu1 %v2997_v27, %s2818_s9  ;;  %1378 = vrot.lane.b32.xlu0 %v3182_v54, %s2820_s15 }
  0xdc   : > { %2725 = vmatprep.subr.mxu0 %v1993_v53  ;;  %2777 = vmatprep.subr.mxu1 %v1993_v53 }
  0xdd   : > { %v3328_v0 = vpop.permute.xlu1 %800  ;;  %v3333_v27 = vpop.permute.xlu0 %870  ;;  %2726 = vmatpush3.msra.mxu0 %v1993_v53  ;;  %2780 = vmatpush3.msra.mxu1 %v1993_v53 }
  0xde   : > { %4325 = vst [vmem:[#allocation31_spill] sm:$0xff] %v3328_v0 }
  0xdf   : > { %1252 = vrot.lane.b32.xlu1 %v3087_v3, %s2819_s10  ;;  %1506 = vrot.lane.b32.xlu0 %v2990_v26, %s2821_s18 }
  0xe1   : > { %v3339_v0 = vpop.permute.xlu1 %868  ;;  %v3341_v57 = vpop.permute.xlu0 %874 }
  0xe3   : > { %1380 = vrot.lane.b32.xlu1 %v3200_v60, %s2820_s15  ;;  %1508 = vrot.lane.b32.xlu0 %v3009_v31, %s2821_s18 }
  0xe5   : > { %v3347_v3 = vpop.permute.xlu1 %872  ;;  %v3349_v61 = vpop.permute.xlu0 %878 }
  0xe6   : > { %4326 = vst [vmem:[#allocation32_spill] sm:$0xff] %v3349_v61 }
  0xe7   : > { %1126 = vrot.lane.b32.xlu1 %v2990_v26, %s2818_s9  ;;  %1128 = vrot.lane.b32.xlu0 %v3009_v31, %s2818_s9 }
  0xe9   : > { %v3355_v55 = vpop.permute.xlu1 %876  ;;  %v3357_v16 = vpop.permute.xlu0 %882 }
  0xea   : > { %4327 = vst [vmem:[#allocation33_spill] sm:$0xff] %v3357_v16 }
  0xeb   : > { %1634 = vrot.lane.b32.xlu1 %v3084_v2, %s2822_s19  ;;  %1636 = vrot.lane.b32.xlu0 %v3095_v5, %s2822_s19 }
  0xed   : > { %v3363_v53 = vpop.permute.xlu1 %880  ;;  %v3365_v61 = vpop.permute.xlu0 %886 }
  0xee   : > { %4328 = vst [vmem:[#allocation34_spill] sm:$0xff] %v3363_v53  ;;  %4329 = vst [vmem:[#allocation35_spill] sm:$0xff] %v3365_v61 }
  0xef   : > { %1254 = vrot.lane.b32.xlu1 %v3084_v2, %s2819_s10  ;;  %1382 = vrot.lane.b32.xlu0 %v3194_v58, %s2820_s15 }
  0xf1   : > { %v3371_v26 = vpop.permute.xlu1 %884  ;;  %v3373_v31 = vpop.permute.xlu0 %890 }
  0xf2   : > { %4330 = vst [vmem:[#allocation36_spill] sm:$0xff] %v3373_v31 }
  0xf3   : > { %1256 = vrot.lane.b32.xlu1 %v3095_v5, %s2819_s10  ;;  %1510 = vrot.lane.b32.xlu0 %v3005_v30, %s2821_s18 }
  0xf5   : > { %v3379_v16 = vpop.permute.xlu1 %888  ;;  %v3381_v53 = vpop.permute.xlu0 %894 }
  0xf6   : > { %4331 = vst [vmem:[#allocation37_spill] sm:$0xff] %v3381_v53 }
  0xf7   : > { %1384 = vrot.lane.b32.xlu1 %v3212_v1, %s2820_s15  ;;  %1512 = vrot.lane.b32.xlu0 %v3025_v38, %s2821_s18 }
  0xf9   : > { %v3387_v2 = vpop.permute.xlu1 %892  ;;  %v3389_v61 = vpop.permute.xlu0 %898 }
  0xfa   : > { %4332 = vst [vmem:[#allocation38_spill] sm:$0xff] %v3387_v2  ;;  %4333 = vst [vmem:[#allocation39_spill] sm:$0xff] %v3389_v61 }
  0xfb   : > { %1130 = vrot.lane.b32.xlu1 %v3005_v30, %s2818_s9  ;;  %1132 = vrot.lane.b32.xlu0 %v3025_v38, %s2818_s9 }
  0xfd   : > { %v3395_v5 = vpop.permute.xlu1 %896  ;;  %v3397_v31 = vpop.permute.xlu0 %902 }
  0xfe   : > { %4334 = vst [vmem:[#allocation40_spill] sm:$0xff] %v3395_v5  ;;  %4335 = vst [vmem:[#allocation41_spill] sm:$0xff] %v3397_v31 }
  0xff   : > { %1638 = vrot.lane.b32.xlu1 %v3091_v4, %s2822_s19  ;;  %1640 = vrot.lane.b32.xlu0 %v3103_v7, %s2822_s19 }
 0x101   : > { %v3403_v53 = vpop.permute.xlu1 %900  ;;  %v3405_v2 = vpop.permute.xlu0 %906 }
 0x102   : > { %4336 = vst [vmem:[#allocation42_spill] sm:$0xff] %v3403_v53  ;;  %4337 = vst [vmem:[#allocation43_spill] sm:$0xff] %v3405_v2 }
 0x103   : > { %1258 = vrot.lane.b32.xlu1 %v3091_v4, %s2819_s10  ;;  %1386 = vrot.lane.b32.xlu0 %v3206_v62, %s2820_s15 }
 0x105   : > { %v3411_v30 = vpop.permute.xlu1 %904  ;;  %v3413_v38 = vpop.permute.xlu0 %910 }
 0x106   : > { %4338 = vst [vmem:[#allocation44_spill] sm:$0xff] %v3411_v30  ;;  %4339 = vst [vmem:[#allocation45_spill] sm:$0xff] %v3413_v38 }
 0x107   : > { %1260 = vrot.lane.b32.xlu1 %v3103_v7, %s2819_s10  ;;  %1514 = vrot.lane.b32.xlu0 %v3013_v32, %s2821_s18 }
 0x109   : > { %v3419_v31 = vpop.permute.xlu1 %908  ;;  %v3421_v53 = vpop.permute.xlu0 %914 }
 0x10a   : > { %4340 = vst [vmem:[#allocation46_spill] sm:$0xff] %v3419_v31  ;;  %4341 = vst [vmem:[#allocation47_spill] sm:$0xff] %v3421_v53 }
 0x10b   : > { %1388 = vrot.lane.b32.xlu1 %v3224_v21, %s2820_s15  ;;  %1516 = vrot.lane.b32.xlu0 %v3037_v41, %s2821_s18 }
 0x10d   : > { %v3427_v4 = vpop.permute.xlu1 %912  ;;  %v3429_v2 = vpop.permute.xlu0 %918 }
 0x10e   : > { %4342 = vst [vmem:[#allocation48_spill] sm:$0xff] %v3427_v4  ;;  %4343 = vst [vmem:[#allocation49_spill] sm:$0xff] %v3429_v2 }
 0x10f   : > { %1134 = vrot.lane.b32.xlu1 %v3013_v32, %s2818_s9  ;;  %1136 = vrot.lane.b32.xlu0 %v3037_v41, %s2818_s9 }
 0x111   : > { %v3435_v7 = vpop.permute.xlu1 %916  ;;  %v3437_v38 = vpop.permute.xlu0 %922 }
 0x112   : > { %4344 = vst [vmem:[#allocation50_spill] sm:$0xff] %v3435_v7  ;;  %4345 = vst [vmem:[#allocation51_spill] sm:$0xff] %v3437_v38 }
 0x113   : > { %1642 = vrot.lane.b32.xlu1 %v3099_v6, %s2822_s19  ;;  %1644 = vrot.lane.b32.xlu0 %v3111_v9, %s2822_s19 }
 0x115   : > { %v3443_v53 = vpop.permute.xlu1 %920  ;;  %v3445_v4 = vpop.permute.xlu0 %926 }
 0x116   : > { %4346 = vst [vmem:[#allocation52_spill] sm:$0xff] %v3443_v53  ;;  %4347 = vst [vmem:[#allocation53_spill] sm:$0xff] %v3445_v4 }
 0x117   : > { %1262 = vrot.lane.b32.xlu1 %v3099_v6, %s2819_s10  ;;  %1390 = vrot.lane.b32.xlu0 %v3218_v18, %s2820_s15 }
 0x119   : > { %v3451_v32 = vpop.permute.xlu1 %924  ;;  %v3453_v41 = vpop.permute.xlu0 %994 }
 0x11a   : > { %4348 = vst [vmem:[#allocation54_spill] sm:$0xff] %v3451_v32 }
 0x11b   : > { %1264 = vrot.lane.b32.xlu1 %v3111_v9, %s2819_s10  ;;  %1518 = vrot.lane.b32.xlu0 %v3033_v40, %s2821_s18 }
 0x11d   : > { %v3459_v38 = vpop.permute.xlu1 %928  ;;  %v3461_v53 = vpop.permute.xlu0 %998 }
 0x11e   : > { %4349 = vst [vmem:[#allocation55_spill] sm:$0xff] %v3459_v38 }
 0x11f   : > { %1392 = vrot.lane.b32.xlu1 %v3236_v29, %s2820_s15  ;;  %1520 = vrot.lane.b32.xlu0 %v3045_v43, %s2821_s18 }
 0x121   : > { %v3467_v6 = vpop.permute.xlu1 %996  ;;  %v3469_v4 = vpop.permute.xlu0 %1002 }
 0x123   : > { %1138 = vrot.lane.b32.xlu1 %v3033_v40, %s2818_s9  ;;  %1140 = vrot.lane.b32.xlu0 %v3045_v43, %s2818_s9 }
 0x125   : > { %v3475_v9 = vpop.permute.xlu1 %1000  ;;  %v3477_v38 = vpop.permute.xlu0 %1006 }
 0x127   : > { %1646 = vrot.lane.b32.xlu1 %v3107_v8, %s2822_s19  ;;  %1648 = vrot.lane.b32.xlu0 %v3119_v11, %s2822_s19 }
 0x129   : > { %v3483_v32 = vpop.permute.xlu1 %1004  ;;  %v3485_v2 = vpop.permute.xlu0 %1010 }
 0x12b   : > { %1266 = vrot.lane.b32.xlu1 %v3107_v8, %s2819_s10  ;;  %1394 = vrot.lane.b32.xlu0 %v3230_v23, %s2820_s15 }
 0x12d   : > { %v3491_v40 = vpop.permute.xlu1 %1008  ;;  %v3493_v43 = vpop.permute.xlu0 %1014 }
 0x12f   : > { %1268 = vrot.lane.b32.xlu1 %v3119_v11, %s2819_s10  ;;  %1522 = vrot.lane.b32.xlu0 %v3041_v42, %s2821_s18 }
 0x131   : > { %v3499_v7 = vpop.permute.xlu1 %1012  ;;  %v3501_v31 = vpop.permute.xlu0 %1018 }
 0x132   : > { %4350 = vst [vmem:[#allocation56_spill] sm:$0xff] %v3501_v31 }
 0x133   : > { %1396 = vrot.lane.b32.xlu1 %v3248_v46, %s2820_s15  ;;  %1524 = vrot.lane.b32.xlu0 %v3053_v45, %s2821_s18 }
 0x135   : > { %v3507_v8 = vpop.permute.xlu1 %1016  ;;  %v3509_v30 = vpop.permute.xlu0 %1022 }
 0x136   : > { %4351 = vst [vmem:[#allocation57_spill] sm:$0xff] %v3509_v30  ;;  %v418_v30 = vld [vmem:[#allocation2 + $0x8] sm:$0xff] }
 0x137   : > { %1142 = vrot.lane.b32.xlu1 %v3041_v42, %s2818_s9  ;;  %1144 = vrot.lane.b32.xlu0 %v3053_v45, %s2818_s9 }
 0x139   : > { %v3515_v11 = vpop.permute.xlu1 %1020  ;;  %v3517_v61 = vpop.permute.xlu0 %1026 }
 0x13a   : > { %4352 = vst [vmem:[#allocation58_spill] sm:$0xff] %v3515_v11  ;;  %4353 = vst [vmem:[#allocation59_spill] sm:$0xff] %v3517_v61 }
 0x13b   : > { %1650 = vrot.lane.b32.xlu1 %v3115_v10, %s2822_s19  ;;  %1652 = vrot.lane.b32.xlu0 %v3127_v13, %s2822_s19 }
 0x13d   : > { %v3523_v5 = vpop.permute.xlu1 %1024  ;;  %v3525_v31 = vpop.permute.xlu0 %1030 }
 0x13e   : > { %4354 = vst [vmem:[#allocation60_spill] sm:$0xff] %v3523_v5  ;;  %4355 = vst [vmem:[#allocation61_spill] sm:$0xff] %v3525_v31 }
 0x13f   : > { %1270 = vrot.lane.b32.xlu1 %v3115_v10, %s2819_s10  ;;  %1398 = vrot.lane.b32.xlu0 %v3242_v35, %s2820_s15  ;;  %v557_v10 = vld [vmem:[#allocation2 + $0xa9] sm:$0xff]  ;;  %v1731_v35 = vsel %vm328_vm0, %v418_v30, %v3158_v34 }
 0x141   : > { %v3531_v42 = vpop.permute.xlu1 %1028  ;;  %v3533_v45 = vpop.permute.xlu0 %1034 }
 0x142   : > { %4356 = vst [vmem:[#allocation62_spill] sm:$0xff] %v3531_v42  ;;  %4357 = vst [vmem:[#allocation63_spill] sm:$0xff] %v3533_v45 }
 0x143   : > { %1272 = vrot.lane.b32.xlu1 %v3127_v13, %s2819_s10  ;;  %1526 = vrot.lane.b32.xlu0 %v3049_v44, %s2821_s18 }
 0x145   : > { %v3539_v61 = vpop.permute.xlu1 %1032  ;;  %v1123_v5 = vpop.permute.xlu0 %1122 }
 0x146   : > { %4358 = vst [vmem:[#allocation64_spill] sm:$0xff] %v3539_v61 }
 0x147   : > { %1400 = vrot.lane.b32.xlu1 %v3260_v24, %s2820_s15  ;;  %1528 = vrot.lane.b32.xlu0 %v3059_v47, %s2821_s18 }
 0x149   : > { %v3545_v31 = vpop.permute.xlu1 %1036  ;;  %v1251_v42 = vpop.permute.xlu0 %1250 }
 0x14a   : > { %4359 = vst [vmem:[#allocation65_spill] sm:$0xff] %v3545_v31  ;;  %v417_v31 = vld [vmem:[#allocation2] sm:$0xff] }
 0x14b   : > { %1146 = vrot.lane.b32.xlu1 %v557_v10, %s2818_s9  ;;  %1148 = vrot.lane.b32.xlu0 %v3059_v47, %s2818_s9  ;;  %v654_v10 = vld [vmem:[#allocation2 + $0xc1] sm:$0xff]  ;;  %v1730_v24 = vsel %vm328_vm0, %v417_v31, %v3154_v28 }
 0x14d   : > { %v1125_v13 = vpop.permute.xlu1 %1124  ;;  %v1379_v44 = vpop.permute.xlu0 %1378 }
 0x14f   : > { %1654 = vrot.lane.b32.xlu1 %v3123_v12, %s2822_s19  ;;  %1656 = vrot.lane.b32.xlu0 %v3135_v15, %s2822_s19 }
 0x151   : > { %v1253_v45 = vpop.permute.xlu1 %1252  ;;  %v1507_v61 = vpop.permute.xlu0 %1506 }
 0x153   : > { %1274 = vrot.lane.b32.xlu1 %v3123_v12, %s2819_s10  ;;  %1402 = vrot.lane.b32.xlu0 %v3254_v22, %s2820_s15  ;;  %v1763_v12 = vsel %vm1762_vm3, %v1730_v24, %v3319_v25  ;;  %v1764_v22 = vsel %vm1762_vm3, %v1731_v35, %v3339_v0  ;;  %v655_v24 = vld [vmem:[#allocation2 + $0xc9] sm:$0xff] }
 0x154   : > { %v1796_v46 = vsel %vm1795_vm4, %v1763_v12, %v3453_v41  ;;  %v1797_v28 = vsel %vm1795_vm4, %v1764_v22, %v3467_v6  ;;  %v656_v22 = vld [vmem:[#allocation2 + $0xd9] sm:$0xff] }
 0x155   : > { %v1381_v47 = vpop.permute.xlu1 %1380  ;;  %v1509_v11 = vpop.permute.xlu0 %1508  ;;  %v1829_v31 = vsel %vm1828_vm5, %v1796_v46, %v1123_v5 }
 0x156   : > { %v1862_v25 = vsel %vm1861_vm6, %v1829_v31, %v1251_v42 }
 0x157   : > { %1276 = vrot.lane.b32.xlu1 %v3135_v15, %s2819_s10  ;;  %1530 = vrot.lane.b32.xlu0 %v654_v10, %s2821_s18  ;;  %v1830_v15 = vsel %vm1828_vm5, %v1797_v28, %v1125_v13  ;;  %v1895_v30 = vsel %vm1894_vm7, %v1862_v25, %v1379_v44  ;;  %v1733_v28 = vsel %vm328_vm0, %v3188_v56, %v3168_v48 }
 0x158   : > { %v1863_v35 = vsel %vm1861_vm6, %v1830_v15, %v1253_v45  ;;  %v1928_v46 = vsel %vm1927_vm8, %v1895_v30, %v1507_v61  ;;  %v688_v30 = vld [vmem:[#allocation2 + $0xda] sm:$0xff] }
 0x159   : > { %v1127_v34 = vpop.permute.xlu1 %1126  ;;  %v1129_v0 = vpop.permute.xlu0 %1128  ;;  %v1896_v41 = vsel %vm1894_vm7, %v1863_v35, %v1381_v47  ;;  %v1732_v47 = vsel %vm328_vm0, %v3173_v50, %v3162_v36  ;;  %v1766_v36 = vsel %vm1762_vm3, %v1733_v28, %v3347_v3 }
 0x15a   : > { %v1929_v42 = vsel %vm1927_vm8, %v1896_v41, %v1509_v11  ;;  %v1765_v12 = vsel %vm1762_vm3, %v1732_v47, %v3333_v27 }
 0x15b   : > { %1404 = vrot.lane.b32.xlu1 %v3272_v20, %s2820_s15  ;;  %1532 = vrot.lane.b32.xlu0 %v655_v24, %s2821_s18  ;;  %v1798_v31 = vsel %vm1795_vm4, %v1765_v12, %v3461_v53  ;;  %v657_v53 = vld [vmem:[#allocation2 + $0xe1] sm:$0xff] }
 0x15c   : > { %v1831_v50 = vsel %vm1828_vm5, %v1798_v31, %v1127_v34 }
 0x15d   : > { %v1635_v5 = vpop.permute.xlu1 %1634  ;;  %v1637_v45 = vpop.permute.xlu0 %1636 }
 0x15e   : > { %v1961_v6 = vsel %vm1960_vm9, %v1928_v46, %v1635_v5  ;;  %v1962_v20 = vsel %vm1960_vm9, %v1929_v42, %v1637_v45  ;;  %v594_v42 = vld [vmem:[#allocation2 + $0xe2] sm:$0xff]  ;;  %v326_v45 = vld [vmem:[%s2943_s28 + $0xf0] sm:$0xff] }
 0x15f   : > { %1150 = vrot.lane.b32.xlu1 %v654_v10, %s2818_s9  ;;  %2727 = vmatprep.mubr.msk.f32.mxu0 %vm2003_vm10, %v1961_v6  ;;  %415 = vst.msk [vmem:[#allocation2 + $0x181] sm:$0xff] %vm328_vm0, %v326_v45 }
 0x160   : > { %1152 = vrot.lane.b32.xlu0 %v655_v24, %s2818_s9  ;;  %2728 = vmatmul.mubr.msk.f32.vlgmr.msra.gmra.mxu0 %vm2003_vm10, %v1962_v20  ;;  %v1734_v20 = vsel %vm328_vm0, %v3182_v54, %v3164_v39 }
 0x161   : > { %v1255_v13 = vpop.permute.xlu1 %1254  ;;  %v1383_v61 = vpop.permute.xlu0 %1382 }
 0x162   : > { %v1864_v27 = vsel %vm1861_vm6, %v1831_v50, %v1255_v13 }
 0x163   : > { %1658 = vrot.lane.b32.xlu1 %v3131_v14, %s2822_s19 }
 0x164   : > { %1660 = vrot.lane.b32.xlu0 %v3141_v17, %s2822_s19 }
 0x165   : > { %v1257_v11 = vpop.permute.xlu1 %1256  ;;  %v1511_v44 = vpop.permute.xlu0 %1510 }
 0x167   : > { %1278 = vrot.lane.b32.xlu1 %v3131_v14, %s2819_s10 }
 0x168   : > { %1406 = vrot.lane.b32.xlu0 %v3266_v37, %s2820_s15  ;;  %v1799_v37 = vsel %vm1795_vm4, %v1766_v36, %v3475_v9 }
 0x169   : > { %v1385_v10 = vpop.permute.xlu1 %1384  ;;  %v1513_v14 = vpop.permute.xlu0 %1512  ;;  %v1832_v56 = vsel %vm1828_vm5, %v1799_v37, %v1129_v0  ;;  %v690_v37 = vld [vmem:[#allocation2 + $0xf2] sm:$0xff] }
 0x16a   : > { %v1865_v15 = vsel %vm1861_vm6, %v1832_v56, %v1257_v11  ;;  %v1735_v11 = vsel %vm328_vm0, %v3200_v60, %v3177_v52 }
 0x16b   : > { %1280 = vrot.lane.b32.xlu1 %v3141_v17, %s2819_s10  ;;  %v1897_v17 = vsel %vm1894_vm7, %v1864_v27, %v1383_v61  ;;  %v1898_v3 = vsel %vm1894_vm7, %v1865_v15, %v1385_v10  ;;  %v658_v61 = vld [vmem:[#allocation2 + $0xf1] sm:$0xff]  ;;  %v1768_v39 = vsel %vm1762_vm3, %v1735_v11, %v3355_v55 }
 0x16c   : > { %1534 = vrot.lane.b32.xlu0 %v656_v22, %s2821_s18  ;;  %v1930_v9 = vsel %vm1927_vm8, %v1897_v17, %v1511_v44  ;;  %v1931_v35 = vsel %vm1927_vm8, %v1898_v3, %v1513_v14  ;;  %v4360_v3 = vld [vmem:[#allocation32_spill] sm:$0xff] }
 0x16d   : > { %v1131_v48 = vpop.permute.xlu1 %1130  ;;  %v1133_v24 = vpop.permute.xlu0 %1132 }
 0x16f   : > { %1408 = vrot.lane.b32.xlu1 %v3284_v63, %s2820_s15 }
 0x170   : > { %1536 = vrot.lane.b32.xlu0 %v657_v53, %s2821_s18 }
 0x171   : > { %v1639_v34 = vpop.permute.xlu1 %1638  ;;  %v1641_v0 = vpop.permute.xlu0 %1640 }
 0x172   : > { %v1963_v25 = vsel %vm1960_vm9, %v1930_v9, %v1639_v34  ;;  %v1964_v63 = vsel %vm1960_vm9, %v1931_v35, %v1641_v0  ;;  %v660_v34 = vld [vmem:[#allocation2 + $0x109] sm:$0xff] }
 0x173   : > { %1154 = vrot.lane.b32.xlu1 %v656_v22, %s2818_s9  ;;  %2730 = vmatprep.mubr.msk.f32.mxu0 %vm2003_vm10, %v1963_v25  ;;  %v4361_v25 = vld [vmem:[#allocation4_spill] sm:$0xff] }
 0x174   : > { %1156 = vrot.lane.b32.xlu0 %v657_v53, %s2818_s9  ;;  %2731 = vmatmul.mubr.msk.f32.gmra.mxu0 %vm2003_vm10, %v1964_v63  ;;  %v1737_v35 = vsel %vm328_vm0, %v3212_v1, %v4361_v25 }
 0x175   : > { %v1259_v41 = vpop.permute.xlu1 %1258  ;;  %v1387_v46 = vpop.permute.xlu0 %1386 }
 0x177   : > { %1662 = vrot.lane.b32.xlu1 %v688_v30, %s2822_s19 }
 0x178   : > { %1664 = vrot.lane.b32.xlu0 %v3146_v19, %s2822_s19  ;;  %v1767_v19 = vsel %vm1762_vm3, %v1734_v20, %v3341_v57  ;;  %v1801_v57 = vsel %vm1795_vm4, %v1768_v39, %v3483_v32 }
 0x179   : > { %v1261_v5 = vpop.permute.xlu1 %1260  ;;  %v1515_v6 = vpop.permute.xlu0 %1514  ;;  %v1800_v44 = vsel %vm1795_vm4, %v1767_v19, %v3469_v4  ;;  %v1834_v60 = vsel %vm1828_vm5, %v1801_v57, %v1133_v24  ;;  %v659_v4 = vld [vmem:[#allocation2 + $0xf9] sm:$0xff]  ;;  %v1736_v24 = vsel %vm328_vm0, %v3194_v58, %v3170_v49 }
 0x17a   : > { %v1833_v54 = vsel %vm1828_vm5, %v1800_v44, %v1131_v48  ;;  %v1867_v12 = vsel %vm1861_vm6, %v1834_v60, %v1261_v5  ;;  %v691_v48 = vld [vmem:[#allocation2 + $0xfa] sm:$0xff]  ;;  %v1769_v9 = vsel %vm1762_vm3, %v1736_v24, %v4360_v3  ;;  %v661_v5 = vld [vmem:[#allocation2 + $0x111] sm:$0xff] }
 0x17b   : > { %1282 = vrot.lane.b32.xlu1 %v688_v30, %s2819_s10  ;;  %v1866_v10 = vsel %vm1861_vm6, %v1833_v54, %v1259_v41  ;;  %v1802_v0 = vsel %vm1795_vm4, %v1769_v9, %v3477_v38  ;;  %v4362_v30 = vld [vmem:[#allocation34_spill] sm:$0xff]  ;;  %v693_v54 = vld [vmem:[#allocation2 + $0x112] sm:$0xff] }
 0x17c   : > { %1410 = vrot.lane.b32.xlu0 %v3278_v33, %s2820_s15  ;;  %v327_v33 = vld [vmem:[%s2943_s28 + $0xf8] sm:$0xff]  ;;  %v1899_v55 = vsel %vm1894_vm7, %v1866_v10, %v1387_v46  ;;  %v1770_v49 = vsel %vm1762_vm3, %v1737_v35, %v4362_v30  ;;  %v4364_v60 = vld [vmem:[#allocation3_spill] sm:$0xff] }
 0x17d   : > { %v1389_v13 = vpop.permute.xlu1 %1388  ;;  %v1517_v47 = vpop.permute.xlu0 %1516  ;;  %416 = vst.msk [vmem:[#allocation2 + $0x189] sm:$0xff] %vm328_vm0, %v327_v33  ;;  %v1932_v28 = vsel %vm1927_vm8, %v1899_v55, %v1515_v6  ;;  %v695_v30 = vld [vmem:[#allocation2 + $0x12a] sm:$0xff] }
 0x17e   : > { %v1900_v32 = vsel %vm1894_vm7, %v1867_v12, %v1389_v13 }
 0x17f   : > { %1284 = vrot.lane.b32.xlu1 %v594_v42, %s2819_s10  ;;  %v1933_v36 = vsel %vm1927_vm8, %v1900_v32, %v1517_v47  ;;  %v4363_v42 = vld [vmem:[#allocation28_spill] sm:$0xff]  ;;  %v692_v47 = vld [vmem:[#allocation2 + $0x10a] sm:$0xff] }
 0x180   : > { %1538 = vrot.lane.b32.xlu0 %v658_v61, %s2821_s18  ;;  %v4366_v32 = vld [vmem:[#allocation6_spill] sm:$0xff] }
 0x181   : > { %v1135_v52 = vpop.permute.xlu1 %1134  ;;  %v1137_v22 = vpop.permute.xlu0 %1136 }
 0x182   : > { %v1835_v58 = vsel %vm1828_vm5, %v1802_v0, %v1135_v52  ;;  %v3716_v52 = vld [vmem:[#allocation2 + $0x120] sm:$0xff] }
 0x183   : > { %1412 = vrot.lane.b32.xlu1 %v3296_v59, %s2820_s15  ;;  %v694_v0 = vld [vmem:[#allocation2 + $0x122] sm:$0xff] }
 0x184   : > { %1540 = vrot.lane.b32.xlu0 %v659_v4, %s2821_s18 }
 0x185   : > { %v1643_v31 = vpop.permute.xlu1 %1642  ;;  %v1645_v50 = vpop.permute.xlu0 %1644 }
 0x186   : > { %v1965_v14 = vsel %vm1960_vm9, %v1932_v28, %v1643_v31  ;;  %v1966_v59 = vsel %vm1960_vm9, %v1933_v36, %v1645_v50  ;;  %v1739_v28 = vsel %vm328_vm0, %v3224_v21, %v4366_v32  ;;  %v3731_v36 = vld [vmem:[#allocation2 + $0x128] sm:$0xff] }
 0x187   : > { %1158 = vrot.lane.b32.xlu1 %v658_v61, %s2818_s9  ;;  %2733 = vmatprep.mubr.msk.f32.mxu0 %vm2003_vm10, %v1965_v14 }
 0x188   : > { %1160 = vrot.lane.b32.xlu0 %v659_v4, %s2818_s9  ;;  %2734 = vmatmul.mubr.msk.f32.gmra.mxu0 %vm2003_vm10, %v1966_v59  ;;  %v1738_v4 = vsel %vm328_vm0, %v3206_v62, %v4364_v60  ;;  %v1772_v62 = vsel %vm1762_vm3, %v1739_v28, %v3371_v26  ;;  %v664_v60 = vld [vmem:[#allocation2 + $0x139] sm:$0xff] }
 0x189   : > { %v1263_v27 = vpop.permute.xlu1 %1262  ;;  %v1391_v56 = vpop.permute.xlu0 %1390  ;;  %v1805_v59 = vsel %vm1795_vm4, %v1772_v62, %v3499_v7  ;;  %v696_v28 = vld [vmem:[#allocation2 + $0x13a] sm:$0xff] }
 0x18a   : > { %v1868_v41 = vsel %vm1861_vm6, %v1835_v58, %v1263_v27  ;;  %v4367_v58 = vld [vmem:[#allocation5_spill] sm:$0xff] }
 0x18b   : > { %1666 = vrot.lane.b32.xlu1 %v690_v37, %s2822_s19  ;;  %v1901_v45 = vsel %vm1894_vm7, %v1868_v41, %v1391_v56 }
 0x18c   : > { %1668 = vrot.lane.b32.xlu0 %v691_v48, %s2822_s19 }
 0x18d   : > { %v1265_v53 = vpop.permute.xlu1 %1264  ;;  %v1519_v15 = vpop.permute.xlu0 %1518 }
 0x18f   : > { %1286 = vrot.lane.b32.xlu1 %v690_v37, %s2819_s10 }
 0x190   : > { %1414 = vrot.lane.b32.xlu0 %v3290_v51, %s2820_s15  ;;  %v1803_v51 = vsel %vm1795_vm4, %v1770_v49, %v3491_v40  ;;  %v1934_v40 = vsel %vm1927_vm8, %v1901_v45, %v1519_v15 }
 0x191   : > { %v1393_v17 = vpop.permute.xlu1 %1392  ;;  %v1521_v63 = vpop.permute.xlu0 %1520  ;;  %v1836_v1 = vsel %vm1828_vm5, %v1803_v51, %v1137_v22  ;;  %v4365_v22 = vld [vmem:[#allocation33_spill] sm:$0xff]  ;;  %v1740_v51 = vsel %vm328_vm0, %v3218_v18, %v4367_v58 }
 0x192   : > { %v1869_v38 = vsel %vm1861_vm6, %v1836_v1, %v1265_v53  ;;  %v1771_v55 = vsel %vm1762_vm3, %v1738_v4, %v4365_v22  ;;  %v662_v53 = vld [vmem:[#allocation2 + $0x121] sm:$0xff] }
 0x193   : > { %1288 = vrot.lane.b32.xlu1 %v691_v48, %s2819_s10  ;;  %v1902_v20 = vsel %vm1894_vm7, %v1869_v38, %v1393_v17  ;;  %v1804_v31 = vsel %vm1795_vm4, %v1771_v55, %v3485_v2  ;;  %v663_v17 = vld [vmem:[#allocation2 + $0x129] sm:$0xff]  ;;  %v4369_v38 = vld [vmem:[#allocation8_spill] sm:$0xff] }
 0x194   : > { %1542 = vrot.lane.b32.xlu0 %v660_v34, %s2821_s18  ;;  %v1935_v61 = vsel %vm1927_vm8, %v1902_v20, %v1521_v63 }
 0x195   : > { %v1139_v46 = vpop.permute.xlu1 %1138  ;;  %v1141_v6 = vpop.permute.xlu0 %1140 }
 0x196   : > { %v1837_v50 = vsel %vm1828_vm5, %v1804_v31, %v1139_v46  ;;  %v1838_v2 = vsel %vm1828_vm5, %v1805_v59, %v1141_v6  ;;  %v4368_v46 = vld [vmem:[#allocation35_spill] sm:$0xff]  ;;  %v1741_v6 = vsel %vm328_vm0, %v3236_v29, %v4369_v38 }
 0x197   : > { %1416 = vrot.lane.b32.xlu1 %v4363_v42, %s2820_s15  ;;  %v1773_v1 = vsel %vm1762_vm3, %v1740_v51, %v4368_v46  ;;  %v1774_v18 = vsel %vm1762_vm3, %v1741_v6, %v3379_v16  ;;  %v4370_v31 = vld [vmem:[#allocation7_spill] sm:$0xff]  ;;  %v635_v51 = vld [vmem:[#allocation2 + $0x158] sm:$0xff] }
 0x198   : > { %1544 = vrot.lane.b32.xlu0 %v661_v5, %s2821_s18  ;;  %v1806_v42 = vsel %vm1795_vm4, %v1773_v1, %v3493_v43  ;;  %v666_v6 = vld [vmem:[#allocation2 + $0x151] sm:$0xff] }
 0x199   : > { %v1647_v13 = vpop.permute.xlu1 %1646  ;;  %v1649_v11 = vpop.permute.xlu0 %1648 }
 0x19a   : > { %v1967_v19 = vsel %vm1960_vm9, %v1934_v40, %v1647_v13  ;;  %v1968_v44 = vsel %vm1960_vm9, %v1935_v61, %v1649_v11  ;;  %v1807_v40 = vsel %vm1795_vm4, %v1774_v18, %v3507_v8  ;;  %v3782_v11 = vld [vmem:[#allocation2 + $0x140] sm:$0xff] }
 0x19b   : > { %1162 = vrot.lane.b32.xlu1 %v660_v34, %s2818_s9  ;;  %2736 = vmatprep.mubr.msk.f32.mxu0 %vm2003_vm10, %v1967_v19 }
 0x19c   : > { %1164 = vrot.lane.b32.xlu0 %v661_v5, %s2818_s9  ;;  %2737 = vmatmul.mubr.msk.f32.gmra.mxu0 %vm2003_vm10, %v1968_v44  ;;  %v632_v5 = vld [vmem:[#allocation2 + $0x138] sm:$0xff] }
 0x19d   : > { %v1267_v39 = vpop.permute.xlu1 %1266  ;;  %v1395_v33 = vpop.permute.xlu0 %1394 }
 0x19e   : > { %v1870_v37 = vsel %vm1861_vm6, %v1837_v50, %v1267_v39  ;;  %v4371_v50 = vld [vmem:[#allocation36_spill] sm:$0xff] }
 0x19f   : > { %1670 = vrot.lane.b32.xlu1 %v692_v47, %s2822_s19  ;;  %v1903_v26 = vsel %vm1894_vm7, %v1870_v37, %v1395_v33  ;;  %v697_v37 = vld [vmem:[#allocation2 + $0x142] sm:$0xff] }
 0x1a0   : > { %1672 = vrot.lane.b32.xlu0 %v693_v54, %s2822_s19 }
 0x1a1   : > { %v1269_v57 = vpop.permute.xlu1 %1268  ;;  %v1523_v10 = vpop.permute.xlu0 %1522 }
 0x1a2   : > { %v1871_v27 = vsel %vm1861_vm6, %v1838_v2, %v1269_v57  ;;  %v1936_v7 = vsel %vm1927_vm8, %v1903_v26, %v1523_v10  ;;  %v4373_v2 = vld [vmem:[#allocation16_spill] sm:$0xff] }
 0x1a3   : > { %1290 = vrot.lane.b32.xlu1 %v692_v47, %s2819_s10 }
 0x1a4   : > { %1418 = vrot.lane.b32.xlu0 %v3716_v52, %s2820_s15 }
 0x1a5   : > { %v1397_v12 = vpop.permute.xlu1 %1396  ;;  %v1525_v14 = vpop.permute.xlu0 %1524 }
 0x1a6   : > { %v1904_v56 = vsel %vm1894_vm7, %v1871_v27, %v1397_v12  ;;  %v665_v12 = vld [vmem:[#allocation2 + $0x141] sm:$0xff] }
 0x1a7   : > { %1292 = vrot.lane.b32.xlu1 %v693_v54, %s2819_s10  ;;  %v1937_v3 = vsel %vm1927_vm8, %v1904_v56, %v1525_v14  ;;  %v538_v54 = vld [vmem:[#allocation2 + $0x140] sm:$0xff]  ;;  %v1742_v14 = vsel %vm328_vm0, %v3230_v23, %v4370_v31 }
 0x1a8   : > { %1420 = vrot.lane.b32.xlu0 %v3731_v36, %s2820_s15  ;;  %v1775_v59 = vsel %vm1762_vm3, %v1742_v14, %v4371_v50 }
 0x1a9   : > { %v1143_v21 = vpop.permute.xlu1 %1142  ;;  %v1145_v48 = vpop.permute.xlu0 %1144 }
 0x1aa   : > { %v1839_v20 = vsel %vm1828_vm5, %v1806_v42, %v1143_v21  ;;  %v1840_v29 = vsel %vm1828_vm5, %v1807_v40, %v1145_v48  ;;  %v4372_v21 = vld [vmem:[#allocation10_spill] sm:$0xff]  ;;  %v4374_v48 = vld [vmem:[#allocation56_spill] sm:$0xff] }
 0x1ab   : > { %1038 = vrot.lane.b32.xlu1 %v3716_v52, %s2817_s8  ;;  %v1743_v27 = vsel %vm328_vm0, %v4373_v2, %v4372_v21  ;;  %v1808_v26 = vsel %vm1795_vm4, %v1775_v59, %v4374_v48  ;;  %v4378_v40 = vld [vmem:[#allocation14_spill] sm:$0xff] }
 0x1ac   : > { %1040 = vrot.lane.b32.xlu0 %v3731_v36, %s2817_s8  ;;  %v636_v21 = vld [vmem:[#allocation2 + $0x168] sm:$0xff] }
 0x1ad   : > { %v1651_v15 = vpop.permute.xlu1 %1650  ;;  %v1653_v9 = vpop.permute.xlu0 %1652 }
 0x1ae   : > { %v1969_v24 = vsel %vm1960_vm9, %v1936_v7, %v1651_v15  ;;  %v1970_v34 = vsel %vm1960_vm9, %v1937_v3, %v1653_v9  ;;  %v4376_v15 = vld [vmem:[#allocation58_spill] sm:$0xff] }
 0x1af   : > { %1546 = vrot.lane.b32.xlu1 %v662_v53, %s2821_s18  ;;  %2739 = vmatprep.mubr.msk.f32.mxu0 %vm2003_vm10, %v1969_v24 }
 0x1b0   : > { %1548 = vrot.lane.b32.xlu0 %v663_v17, %s2821_s18  ;;  %2740 = vmatmul.mubr.msk.f32.gmra.mxu0 %vm2003_vm10, %v1970_v34  ;;  %v634_v34 = vld [vmem:[#allocation2 + $0x150] sm:$0xff] }
 0x1b1   : > { %v1271_v25 = vpop.permute.xlu1 %1270  ;;  %v1399_v35 = vpop.permute.xlu0 %1398 }
 0x1b2   : > { %v1872_v13 = vsel %vm1861_vm6, %v1839_v20, %v1271_v25  ;;  %v4377_v20 = vld [vmem:[#allocation9_spill] sm:$0xff] }
 0x1b3   : > { %1166 = vrot.lane.b32.xlu1 %v662_v53, %s2818_s9  ;;  %v1905_v16 = vsel %vm1894_vm7, %v1872_v13, %v1399_v35  ;;  %v4375_v53 = vld [vmem:[#allocation38_spill] sm:$0xff]  ;;  %v1744_v13 = vsel %vm328_vm0, %v4378_v40, %v4377_v20 }
 0x1b4   : > { %1168 = vrot.lane.b32.xlu0 %v663_v17, %s2818_s9  ;;  %v1776_v23 = vsel %vm1762_vm3, %v1743_v27, %v4375_v53 }
 0x1b5   : > { %v1273_v63 = vpop.permute.xlu1 %1272  ;;  %v1527_v49 = vpop.permute.xlu0 %1526  ;;  %v1809_v24 = vsel %vm1795_vm4, %v1776_v23, %v4376_v15  ;;  %v668_v15 = vld [vmem:[#allocation2 + $0x169] sm:$0xff] }
 0x1b6   : > { %v1873_v43 = vsel %vm1861_vm6, %v1840_v29, %v1273_v63  ;;  %v1938_v8 = vsel %vm1927_vm8, %v1905_v16, %v1527_v49  ;;  %v4379_v29 = vld [vmem:[#allocation37_spill] sm:$0xff]  ;;  %v4381_v16 = vld [vmem:[#allocation19_spill] sm:$0xff] }
 0x1b7   : > { %1674 = vrot.lane.b32.xlu1 %v694_v0, %s2822_s19 }
 0x1b8   : > { %1676 = vrot.lane.b32.xlu0 %v695_v30, %s2822_s19 }
 0x1b9   : > { %v1401_v41 = vpop.permute.xlu1 %1400  ;;  %v1529_v45 = vpop.permute.xlu0 %1528 }
 0x1ba   : > { %v1906_v44 = vsel %vm1894_vm7, %v1873_v43, %v1401_v41  ;;  %v1777_v43 = vsel %vm1762_vm3, %v1744_v13, %v4379_v29 }
 0x1bb   : > { %1294 = vrot.lane.b32.xlu1 %v694_v0, %s2819_s10  ;;  %v1939_v33 = vsel %vm1927_vm8, %v1906_v44, %v1529_v45  ;;  %v667_v45 = vld [vmem:[#allocation2 + $0x159] sm:$0xff] }
 0x1bc   : > { %1422 = vrot.lane.b32.xlu0 %v632_v5, %s2820_s15 }
 0x1bd   : > { %v1147_v19 = vpop.permute.xlu1 %1146  ;;  %v1149_v61 = vpop.permute.xlu0 %1148 }
 0x1be   : > { %v1841_v7 = vsel %vm1828_vm5, %v1808_v26, %v1147_v19  ;;  %v1842_v9 = vsel %vm1828_vm5, %v1809_v24, %v1149_v61  ;;  %v4380_v61 = vld [vmem:[#allocation12_spill] sm:$0xff]  ;;  %v2798_v24 = vld [vmem:[#allocation2 + $0xc0] sm:$0xff] }
 0x1bf   : > { %1296 = vrot.lane.b32.xlu1 %v695_v30, %s2819_s10  ;;  %v1745_v44 = vsel %vm328_vm0, %v4381_v16, %v4380_v61  ;;  %v701_v16 = vld [vmem:[#allocation2 + $0x172] sm:$0xff] }
 0x1c0   : > { %1424 = vrot.lane.b32.xlu0 %v3782_v11, %s2820_s15 }
 0x1c1   : > { %v1655_v47 = vpop.permute.xlu1 %1654  ;;  %v1657_v57 = vpop.permute.xlu0 %1656 }
 0x1c2   : > { %v1971_v39 = vsel %vm1960_vm9, %v1938_v8, %v1655_v47  ;;  %v1972_v10 = vsel %vm1960_vm9, %v1939_v33, %v1657_v57  ;;  %v4382_v8 = vld [vmem:[#allocation57_spill] sm:$0xff] }
 0x1c3   : > { %1042 = vrot.lane.b32.xlu1 %v632_v5, %s2817_s8  ;;  %2742 = vmatprep.mubr.msk.f32.mxu0 %vm2003_vm10, %v1971_v39  ;;  %v1810_v47 = vsel %vm1795_vm4, %v1777_v43, %v4382_v8 }
 0x1c4   : > { %1044 = vrot.lane.b32.xlu0 %v538_v54, %s2817_s8  ;;  %2743 = vmatmul.mubr.msk.f32.gmra.mxu0 %vm2003_vm10, %v1972_v10  ;;  %v4383_v54 = vld [vmem:[#allocation40_spill] sm:$0xff] }
 0x1c5   : > { %v1275_v4 = vpop.permute.xlu1 %1274  ;;  %v1403_v22 = vpop.permute.xlu0 %1402  ;;  %v1778_v33 = vsel %vm1762_vm3, %v1745_v44, %v4383_v54  ;;  %v698_v10 = vld [vmem:[#allocation2 + $0x152] sm:$0xff]  ;;  %v638_v54 = vld [vmem:[#allocation2 + $0x180] sm:$0xff] }
 0x1c6   : > { %v1874_v17 = vsel %vm1861_vm6, %v1841_v7, %v1275_v4 }
 0x1c7   : > { %1550 = vrot.lane.b32.xlu1 %v664_v60, %s2821_s18  ;;  %v1907_v0 = vsel %vm1894_vm7, %v1874_v17, %v1403_v22  ;;  %v4385_v17 = vld [vmem:[#allocation11_spill] sm:$0xff] }
 0x1c8   : > { %1552 = vrot.lane.b32.xlu0 %v665_v12, %s2821_s18 }
 0x1c9   : > { %v1277_v55 = vpop.permute.xlu1 %1276  ;;  %v1531_v32 = vpop.permute.xlu0 %1530 }
 0x1ca   : > { %v1875_v25 = vsel %vm1861_vm6, %v1842_v9, %v1277_v55  ;;  %v1940_v30 = vsel %vm1927_vm8, %v1907_v0, %v1531_v32  ;;  %v699_v32 = vld [vmem:[#allocation2 + $0x15a] sm:$0xff]  ;;  %v2799_v0 = vld [vmem:[#allocation2 + $0xc8] sm:$0xff] }
 0x1cb   : > { %1170 = vrot.lane.b32.xlu1 %v664_v60, %s2818_s9  ;;  %v4384_v60 = vld [vmem:[#allocation60_spill] sm:$0xff] }
 0x1cc   : > { %1172 = vrot.lane.b32.xlu0 %v665_v12, %s2818_s9  ;;  %v1811_v4 = vsel %vm1795_vm4, %v1778_v33, %v4384_v60 }
 0x1cd   : > { %v1405_v62 = vpop.permute.xlu1 %1404  ;;  %v1533_v56 = vpop.permute.xlu0 %1532 }
 0x1ce   : > { %v1908_v63 = vsel %vm1894_vm7, %v1875_v25, %v1405_v62 }
 0x1cf   : > { %1678 = vrot.lane.b32.xlu1 %v696_v28, %s2822_s19  ;;  %v1941_v41 = vsel %vm1927_vm8, %v1908_v63, %v1533_v56  ;;  %v637_v56 = vld [vmem:[#allocation2 + $0x170] sm:$0xff] }
 0x1d0   : > { %1680 = vrot.lane.b32.xlu0 %v697_v37, %s2822_s19  ;;  %v4387_v63 = vld [vmem:[#allocation15_spill] sm:$0xff] }
 0x1d1   : > { %v1151_v3 = vpop.permute.xlu1 %1150 }
 0x1d2   : > { %v1153_v35 = vpop.permute.xlu0 %1152  ;;  %v1843_v57 = vsel %vm1828_vm5, %v1810_v47, %v1151_v3  ;;  %v1746_v3 = vsel %vm328_vm0, %v2798_v24, %v4385_v17 }
 0x1d3   : > { %1298 = vrot.lane.b32.xlu1 %v696_v28, %s2819_s10  ;;  %v1844_v55 = vsel %vm1828_vm5, %v1811_v4, %v1153_v35  ;;  %v669_v35 = vld [vmem:[#allocation2 + $0x171] sm:$0xff] }
 0x1d4   : > { %1426 = vrot.lane.b32.xlu0 %v634_v34, %s2820_s15  ;;  %v2800_v4 = vld [vmem:[#allocation2 + $0xd8] sm:$0xff] }
 0x1d5   : > { %v1659_v49 = vpop.permute.xlu1 %1658 }
 0x1d6   : > { %v1973_v58 = vsel %vm1960_vm9, %v1940_v30, %v1659_v49  ;;  %v1661_v46 = vpop.permute.xlu0 %1660  ;;  %v1747_v30 = vsel %vm328_vm0, %v2799_v0, %v4387_v63  ;;  %v4388_v49 = vld [vmem:[#allocation59_spill] sm:$0xff] }
 0x1d7   : > { %1300 = vrot.lane.b32.xlu1 %v697_v37, %s2819_s10  ;;  %2745 = vmatprep.mubr.msk.f32.mxu0 %vm2003_vm10, %v1973_v58  ;;  %v1974_v1 = vsel %vm1960_vm9, %v1941_v41, %v1661_v46  ;;  %v4389_v41 = vld [vmem:[#allocation42_spill] sm:$0xff] }
 0x1d8   : > { %1428 = vrot.lane.b32.xlu0 %v635_v51, %s2820_s15  ;;  %2746 = vmatmul.mubr.msk.f32.gmra.mxu0 %vm2003_vm10, %v1974_v1  ;;  %v1780_v46 = vsel %vm1762_vm3, %v1747_v30, %v4389_v41 }
 0x1d9   : > { %v1279_v5 = vpop.permute.xlu1 %1278 }
 0x1da   : > { %v1407_v38 = vpop.permute.xlu0 %1406  ;;  %v1876_v12 = vsel %vm1861_vm6, %v1843_v57, %v1279_v5  ;;  %v4390_v5 = vld [vmem:[#allocation62_spill] sm:$0xff] }
 0x1db   : > { %1046 = vrot.lane.b32.xlu1 %v634_v34, %s2817_s8  ;;  %v1909_v14 = vsel %vm1894_vm7, %v1876_v12, %v1407_v38  ;;  %v4386_v34 = vld [vmem:[#allocation39_spill] sm:$0xff]  ;;  %v1813_v38 = vsel %vm1795_vm4, %v1780_v46, %v4390_v5  ;;  %v4391_v12 = vld [vmem:[#allocation13_spill] sm:$0xff] }
 0x1dc   : > { %1048 = vrot.lane.b32.xlu0 %v635_v51, %s2817_s8  ;;  %v1779_v25 = vsel %vm1762_vm3, %v1746_v3, %v4386_v34 }
 0x1dd   : > { %v1281_v42 = vpop.permute.xlu1 %1280  ;;  %v1812_v58 = vsel %vm1795_vm4, %v1779_v25, %v4388_v49  ;;  %v702_v49 = vld [vmem:[#allocation2 + $0x182] sm:$0xff] }
 0x1de   : > { %v1535_v18 = vpop.permute.xlu0 %1534  ;;  %v1877_v28 = vsel %vm1861_vm6, %v1844_v55, %v1281_v42 }
 0x1df   : > { %1554 = vrot.lane.b32.xlu1 %v666_v6, %s2821_s18  ;;  %v1942_v50 = vsel %vm1927_vm8, %v1909_v14, %v1535_v18  ;;  %v4393_v14 = vld [vmem:[#allocation18_spill] sm:$0xff] }
 0x1e0   : > { %1556 = vrot.lane.b32.xlu0 %v667_v45, %s2821_s18 }
 0x1e1   : > { %v1409_v19 = vpop.permute.xlu1 %1408 }
 0x1e2   : > { %v1537_v39 = vpop.permute.xlu0 %1536  ;;  %v1910_v62 = vsel %vm1894_vm7, %v1877_v28, %v1409_v19  ;;  %v700_v19 = vld [vmem:[#allocation2 + $0x16a] sm:$0xff] }
 0x1e3   : > { %1174 = vrot.lane.b32.xlu1 %v666_v6, %s2818_s9  ;;  %v1943_v2 = vsel %vm1927_vm8, %v1910_v62, %v1537_v39 }
 0x1e4   : > { %1176 = vrot.lane.b32.xlu0 %v667_v45, %s2818_s9 }
 0x1e5   : > { %v1155_v22 = vpop.permute.xlu1 %1154 }
 0x1e6   : > { %v1157_v31 = vpop.permute.xlu0 %1156  ;;  %v1845_v1 = vsel %vm1828_vm5, %v1812_v58, %v1155_v22  ;;  %v1748_v22 = vsel %vm328_vm0, %v2800_v4, %v4391_v12 }
 0x1e7   : > { %1682 = vrot.lane.b32.xlu1 %v698_v10, %s2822_s19  ;;  %v1846_v45 = vsel %vm1828_vm5, %v1813_v38, %v1157_v31  ;;  %v2801_v31 = vld [vmem:[#allocation2 + $0xe0] sm:$0xff] }
 0x1e8   : > { %1684 = vrot.lane.b32.xlu0 %v699_v32, %s2822_s19  ;;  %v1749_v62 = vsel %vm328_vm0, %v2801_v31, %v4393_v14 }
 0x1e9   : > { %v1663_v59 = vpop.permute.xlu1 %1662 }
 0x1ea   : > { %v1975_v37 = vsel %vm1960_vm9, %v1942_v50, %v1663_v59  ;;  %v1665_v27 = vpop.permute.xlu0 %1664  ;;  %v4394_v50 = vld [vmem:[#allocation61_spill] sm:$0xff] }
 0x1eb   : > { %1302 = vrot.lane.b32.xlu1 %v698_v10, %s2819_s10  ;;  %2748 = vmatprep.mubr.msk.f32.mxu0 %vm2003_vm10, %v1975_v37  ;;  %v1976_v48 = vsel %vm1960_vm9, %v1943_v2, %v1665_v27  ;;  %v639_v10 = vld [vmem:[#allocation2 + $0x188] sm:$0xff] }
 0x1ec   : > { %1430 = vrot.lane.b32.xlu0 %v636_v21, %s2820_s15  ;;  %2749 = vmatmul.mubr.msk.f32.gmra.mxu0 %vm2003_vm10, %v1976_v48  ;;  %v670_v48 = vld [vmem:[#allocation2 + $0x181] sm:$0xff] }
 0x1ed   : > { %v1283_v26 = vpop.permute.xlu1 %1282 }
 0x1ee   : > { %v1411_v53 = vpop.permute.xlu0 %1410  ;;  %v1878_v6 = vsel %vm1861_vm6, %v1845_v1, %v1283_v26  ;;  %v4396_v26 = vld [vmem:[#allocation64_spill] sm:$0xff] }
 0x1ef   : > { %1304 = vrot.lane.b32.xlu1 %v699_v32, %s2819_s10  ;;  %v1911_v40 = vsel %vm1894_vm7, %v1878_v6, %v1411_v53  ;;  %v4392_v32 = vld [vmem:[#allocation41_spill] sm:$0xff]  ;;  %v640_v1 = vld [vmem:[#allocation2 + $0x198] sm:$0xff] }
 0x1f0   : > { %1432 = vrot.lane.b32.xlu0 %v637_v56, %s2820_s15  ;;  %v1781_v28 = vsel %vm1762_vm3, %v1748_v22, %v4392_v32  ;;  %v672_v6 = vld [vmem:[#allocation2 + $0x199] sm:$0xff]  ;;  %v673_v32 = vld [vmem:[#allocation2 + $0x1a1] sm:$0xff] }
 0x1f1   : > { %v1285_v23 = vpop.permute.xlu1 %1284  ;;  %v1814_v59 = vsel %vm1795_vm4, %v1781_v28, %v4394_v50  ;;  %v4402_v28 = vld [vmem:[#allocation65_spill] sm:$0xff] }
 0x1f2   : > { %v1539_v7 = vpop.permute.xlu0 %1538  ;;  %v1879_v18 = vsel %vm1861_vm6, %v1846_v45, %v1285_v23  ;;  %v3948_v45 = vld [vmem:[%s4288_s4] ss:$0 sm:$0xff] }
 0x1f3   : > { %1050 = vrot.lane.b32.xlu1 %v636_v21, %s2817_s8  ;;  %v1944_v29 = vsel %vm1927_vm8, %v1911_v40, %v1539_v7  ;;  %v4395_v21 = vld [vmem:[#allocation44_spill] sm:$0xff]  ;;  %v4397_v40 = vld [vmem:[#allocation17_spill] sm:$0xff] }
 0x1f4   : > { %1052 = vrot.lane.b32.xlu0 %v637_v56, %s2817_s8  ;;  %v1782_v2 = vsel %vm1762_vm3, %v1749_v62, %v4395_v21 }
 0x1f5   : > { %v1413_v9 = vpop.permute.xlu1 %1412  ;;  %v1815_v56 = vsel %vm1795_vm4, %v1782_v2, %v4396_v26 }
 0x1f6   : > { %v1541_v51 = vpop.permute.xlu0 %1540  ;;  %v1912_v13 = vsel %vm1894_vm7, %v1879_v18, %v1413_v9  ;;  %v641_v18 = vld [vmem:[#allocation2 + $0x1a0] sm:$0xff] }
 0x1f7   : > { %1558 = vrot.lane.b32.xlu1 %v668_v15, %s2821_s18  ;;  %v1945_v44 = vsel %vm1927_vm8, %v1912_v13, %v1541_v51  ;;  %v703_v51 = vld [vmem:[#allocation2 + $0x18a] sm:$0xff] }
 0x1f8   : > { %1560 = vrot.lane.b32.xlu0 %v669_v35, %s2821_s18 }
 0x1f9   : > { %v1159_v42 = vpop.permute.xlu1 %1158 }
 0x1fa   : > { %v1161_v20 = vpop.permute.xlu0 %1160  ;;  %v1847_v27 = vsel %vm1828_vm5, %v1814_v59, %v1159_v42 }
 0x1fb   : > { %1178 = vrot.lane.b32.xlu1 %v668_v15, %s2818_s9  ;;  %v1848_v7 = vsel %vm1828_vm5, %v1815_v56, %v1161_v20  ;;  %v671_v15 = vld [vmem:[#allocation2 + $0x189] sm:$0xff] }
 0x1fc   : > { %1180 = vrot.lane.b32.xlu0 %v669_v35, %s2818_s9  ;;  %v2802_v20 = vld [vmem:[#allocation2 + $0xf0] sm:$0xff] }
 0x1fd   : > { %v1667_v43 = vpop.permute.xlu1 %1666  ;;  %v1750_v13 = vsel %vm328_vm0, %v2802_v20, %v4397_v40  ;;  %v4404_v40 = vld [vmem:[#allocation45_spill] sm:$0xff] }
 0x1fe   : > { %v1977_v61 = vsel %vm1960_vm9, %v1944_v29, %v1667_v43  ;;  %v1669_v8 = vpop.permute.xlu0 %1668  ;;  %v4398_v43 = vld [vmem:[#allocation43_spill] sm:$0xff] }
 0x1ff   : > { %1686 = vrot.lane.b32.xlu1 %v700_v19, %s2822_s19  ;;  %2751 = vmatprep.mubr.msk.f32.mxu1 %vm2003_vm10, %v1977_v61  ;;  %v1978_v47 = vsel %vm1960_vm9, %v1945_v44, %v1669_v8  ;;  %v1783_v61 = vsel %vm1762_vm3, %v1750_v13, %v4398_v43  ;;  %v704_v44 = vld [vmem:[#allocation2 + $0x19a] sm:$0xff] }
 0x200   : > { %1688 = vrot.lane.b32.xlu0 %v701_v16, %s2822_s19  ;;  %2752 = vmatmul.mubr.msk.f32.vlgmr.msra.gmra.mxu1 %vm2003_vm10, %v1978_v47  ;;  %v2803_v8 = vld [vmem:[#allocation2 + $0xf8] sm:$0xff]  ;;  %v4399_v47 = vld [vmem:[#allocation21_spill] sm:$0xff] }
 0x201   : > { %v1287_v39 = vpop.permute.xlu1 %1286 }
 0x202   : > { %v1415_v33 = vpop.permute.xlu0 %1414  ;;  %v1880_v53 = vsel %vm1861_vm6, %v1847_v27, %v1287_v39  ;;  %v1751_v39 = vsel %vm328_vm0, %v2803_v8, %v4399_v47 }
 0x203   : > { %1306 = vrot.lane.b32.xlu1 %v700_v19, %s2819_s10  ;;  %v1913_v3 = vsel %vm1894_vm7, %v1880_v53, %v1415_v33 }
 0x204   : > { %1434 = vrot.lane.b32.xlu0 %v638_v54, %s2820_s15 }
 0x205   : > { %v1289_v57 = vpop.permute.xlu1 %1288 }
 0x206   : > { %v1543_v60 = vpop.permute.xlu0 %1542  ;;  %v1881_v24 = vsel %vm1861_vm6, %v1848_v7, %v1289_v57 }
 0x207   : > { %1308 = vrot.lane.b32.xlu1 %v701_v16, %s2819_s10  ;;  %v1946_v34 = vsel %vm1927_vm8, %v1913_v3, %v1543_v60  ;;  %v4401_v60 = vld [vmem:[#allocation46_spill] sm:$0xff] }
 0x208   : > { %1436 = vrot.lane.b32.xlu0 %v639_v10, %s2820_s15  ;;  %v1784_v4 = vsel %vm1762_vm3, %v1751_v39, %v4401_v60 }
 0x209   : > { %v1417_v55 = vpop.permute.xlu1 %1416  ;;  %v1817_v31 = vsel %vm1795_vm4, %v1784_v4, %v4402_v28 }
 0x20a   : > { %v1545_v37 = vpop.permute.xlu0 %1544  ;;  %v1914_v9 = vsel %vm1894_vm7, %v1881_v24, %v1417_v55 }
 0x20b   : > { %1054 = vrot.lane.b32.xlu1 %v638_v54, %s2817_s8  ;;  %v1947_v0 = vsel %vm1927_vm8, %v1914_v9, %v1545_v37  ;;  %v4400_v54 = vld [vmem:[#allocation63_spill] sm:$0xff] }
 0x20c   : > { %1056 = vrot.lane.b32.xlu0 %v639_v10, %s2817_s8  ;;  %v1816_v33 = vsel %vm1795_vm4, %v1783_v61, %v4400_v54  ;;  %v2805_v61 = vld [vmem:[#allocation2 + $0x110] sm:$0xff]  ;;  %v4406_v54 = vld [vmem:[#allocation48_spill] sm:$0xff] }
 0x20d   : > { %v1163_v23 = vpop.permute.xlu1 %1162 }
 0x20e   : > { %v1165_v17 = vpop.permute.xlu0 %1164  ;;  %v1849_v12 = vsel %vm1828_vm5, %v1816_v33, %v1163_v23  ;;  %v705_v23 = vld [vmem:[#allocation2 + $0x1a2] sm:$0xff] }
 0x20f   : > { %1562 = vrot.lane.b32.xlu1 %v670_v48, %s2821_s18  ;;  %v1850_v50 = vsel %vm1828_vm5, %v1817_v31, %v1165_v17 }
 0x210   : > { %1564 = vrot.lane.b32.xlu0 %v671_v15, %s2821_s18 }
 0x211   : > { %v1671_v25 = vpop.permute.xlu1 %1670 }
 0x212   : > { %v1979_v35 = vsel %vm1960_vm9, %v1946_v34, %v1671_v25  ;;  %v1673_v63 = vpop.permute.xlu0 %1672 }
 0x213   : > { %1182 = vrot.lane.b32.xlu1 %v670_v48, %s2818_s9  ;;  %2754 = vmatprep.mubr.msk.f32.mxu1 %vm2003_vm10, %v1979_v35  ;;  %v1980_v30 = vsel %vm1960_vm9, %v1947_v0, %v1673_v63 }
 0x214   : > { %1184 = vrot.lane.b32.xlu0 %v671_v15, %s2818_s9  ;;  %2755 = vmatmul.mubr.msk.f32.gmra.mxu1 %vm2003_vm10, %v1980_v30 }
 0x215   : > { %v1291_v58 = vpop.permute.xlu1 %1290 }
 0x216   : > { %v1419_v41 = vpop.permute.xlu0 %1418  ;;  %v1882_v14 = vsel %vm1861_vm6, %v1849_v12, %v1291_v58 }
 0x217   : > { %1690 = vrot.lane.b32.xlu1 %v702_v49, %s2822_s19  ;;  %v1915_v26 = vsel %vm1894_vm7, %v1882_v14, %v1419_v41 }
 0x218   : > { %1692 = vrot.lane.b32.xlu0 %v703_v51, %s2822_s19 }
 0x219   : > { %v1293_v46 = vpop.permute.xlu1 %1292 }
 0x21a   : > { %v1421_v5 = vpop.permute.xlu0 %1420  ;;  %v1883_v2 = vsel %vm1861_vm6, %v1850_v50, %v1293_v46 }
 0x21b   : > { %1310 = vrot.lane.b32.xlu1 %v702_v49, %s2819_s10  ;;  %v1916_v17 = vsel %vm1894_vm7, %v1883_v2, %v1421_v5  ;;  %v2804_v5 = vld [vmem:[#allocation2 + $0x108] sm:$0xff] }
 0x21c   : > { %1438 = vrot.lane.b32.xlu0 %v640_v1, %s2820_s15 }
 0x21d   : > { %v3940_v38 = vpop.permute.xlu1 %1038 }
 0x21e   : > { %v3942_v42 = vpop.permute.xlu0 %1040 }
 0x21f   : > { %1312 = vrot.lane.b32.xlu1 %v703_v51, %s2819_s10 }
 0x220   : > { %1566 = vrot.lane.b32.xlu0 %v672_v6, %s2821_s18  ;;  %v2729_v19 = vpop.f32.mrf.mxu0  ;;  %v4403_v6 = vld [vmem:[#allocation20_spill] sm:$0xff] }
 0x221   : > { %v1547_v29 = vpop.permute.xlu1 %1546  ;;  %v2176_v16 = vadd.f32 %v2729_v19, %v3948_v45 }
 0x222   : > { %v1549_v57 = vpop.permute.xlu0 %1548  ;;  %v2170_v10 = vpop.f32.mrf.mxu0  ;;  %v1948_v7 = vsel %vm1927_vm8, %v1915_v26, %v1547_v29 }
 0x223   : > { %1440 = vrot.lane.b32.xlu1 %v641_v18, %s2820_s15  ;;  %2330 = vst.msk [vmem:[%s3958_s2 + $0x8] sm:$0xff] %vm1828_vm5, %v2176_v16  ;;  %v2433_v22 = vmul.f32 %v2176_v16, %v2176_v16  ;;  %v2171_v55 = vadd.f32 %v3948_v45, %v2170_v10  ;;  %v2362_v59 = vsel %vm1828_vm5, %v2176_v16, 0.0  ;;  %v1949_v9 = vsel %vm1927_vm8, %v1916_v17, %v1549_v57  ;;  %v4405_v16 = vld [vmem:[#allocation23_spill] sm:$0xff] }
 0x224   : > { %1694 = vrot.lane.b32.xlu0 %v704_v44, %s2822_s19  ;;  %v1752_v18 = vsel %vm328_vm0, %v2804_v5, %v4403_v6  ;;  %v1753_v44 = vsel %vm328_vm0, %v2805_v61, %v4405_v16  ;;  %v4408_v6 = vld [vmem:[#allocation47_spill] sm:$0xff]  ;;  %v4410_v61 = vld [vmem:[#allocation50_spill] sm:$0xff] }
 0x225   : > { %v1167_v62 = vpop.permute.xlu1 %1166  ;;  %2329 = vst.msk [vmem:[%s3958_s2] sm:$0xff] %vm1828_vm5, %v2171_v55  ;;  %v2361_v37 = vsel %vm1828_vm5, %v2171_v55, 0.0  ;;  %v2432_v21 = vmul.f32 %v2171_v55, %v2171_v55  ;;  %v2465_v56 = vsel %vm1828_vm5, %v2433_v22, 0.0  ;;  %v1785_v13 = vsel %vm1762_vm3, %v1752_v18, %v4404_v40  ;;  %v4409_v40 = vld [vmem:[#allocation25_spill] sm:$0xff] }
 0x226   : > { %v2363_v27 = vadd.f32 %v2362_v59, %v2361_v37  ;;  %v1169_v48 = vpop.permute.xlu0 %1168  ;;  %v1818_v8 = vsel %vm1795_vm4, %v1785_v13, %v3940_v38  ;;  %v1786_v33 = vsel %vm1762_vm3, %v1753_v44, %v4406_v54  ;;  %v1755_v13 = vsel %vm328_vm0, %v3731_v36, %v4409_v40 }
 0x227   : > { %1568 = vrot.lane.b32.xlu1 %v673_v32, %s2821_s18  ;;  %v2464_v53 = vsel %vm1828_vm5, %v2432_v21, 0.0  ;;  %v1851_v57 = vsel %vm1828_vm5, %v1818_v8, %v1167_v62  ;;  %v1819_v4 = vsel %vm1795_vm4, %v1786_v33, %v3942_v42 }
 0x228   : > { %v2466_v15 = vadd.f32 %v2465_v56, %v2464_v53  ;;  %v1852_v38 = vsel %vm1828_vm5, %v1819_v4, %v1169_v48 }
 0x229   : > { %v1675_v24 = vpop.permute.xlu1 %1674 }
 0x22a   : > { %v1981_v3 = vsel %vm1960_vm9, %v1948_v7, %v1675_v24  ;;  %v1677_v34 = vpop.permute.xlu0 %1676 }
 0x22b   : > { %1696 = vrot.lane.b32.xlu1 %v705_v23, %s2822_s19  ;;  %2757 = vmatprep.mubr.msk.f32.mxu1 %vm2003_vm10, %v1981_v3  ;;  %v1982_v25 = vsel %vm1960_vm9, %v1949_v9, %v1677_v34 }
 0x22c   : > { %2758 = vmatmul.mubr.msk.f32.gmra.mxu1 %vm2003_vm10, %v1982_v25 }
 0x22d   : > { %v1295_v35 = vpop.permute.xlu1 %1294 }
 0x22e   : > { %v1423_v0 = vpop.permute.xlu0 %1422  ;;  %v1884_v12 = vsel %vm1861_vm6, %v1851_v57, %v1295_v35 }
 0x22f   : > { %v1917_v50 = vsel %vm1894_vm7, %v1884_v12, %v1423_v0 }
 0x231   : > { %v1297_v63 = vpop.permute.xlu1 %1296 }
 0x232   : > { %v1425_v30 = vpop.permute.xlu0 %1424  ;;  %v1885_v31 = vsel %vm1861_vm6, %v1852_v38, %v1297_v63 }
 0x233   : > { %v1918_v42 = vsel %vm1894_vm7, %v1885_v31, %v1425_v30 }
 0x234   : > { %v2732_v58 = vpop.f32.mrf.mxu0 }
 0x235   : > { %v3996_v49 = vpop.permute.xlu1 %1042  ;;  %v2186_v51 = vadd.f32 %v2732_v58, %v3948_v45  ;;  %v4407_v58 = vld [vmem:[#allocation22_spill] sm:$0xff] }
 0x236   : > { %v3999_v41 = vpop.permute.xlu0 %1044  ;;  %v2180_v46 = vpop.f32.mrf.mxu0 }
 0x237   : > { %2332 = vst.msk [vmem:[%s3958_s2 + $0x18] sm:$0xff] %vm1828_vm5, %v2186_v51  ;;  %v2181_v1 = vadd.f32 %v3948_v45, %v2180_v46  ;;  %v2435_v19 = vmul.f32 %v2186_v51, %v2186_v51  ;;  %v2366_v10 = vsel %vm1828_vm5, %v2186_v51, 0.0  ;;  %v1754_v51 = vsel %vm328_vm0, %v3716_v52, %v4407_v58  ;;  %v4414_v58 = vld [vmem:[#allocation52_spill] sm:$0xff] }
 0x238   : > { %v1787_v18 = vsel %vm1762_vm3, %v1754_v51, %v4408_v6  ;;  %v1788_v52 = vsel %vm1762_vm3, %v1755_v13, %v4410_v61 }
 0x239   : > { %v1551_v20 = vpop.permute.xlu1 %1550  ;;  %2331 = vst.msk [vmem:[%s3958_s2 + $0x10] sm:$0xff] %vm1828_vm5, %v2181_v1  ;;  %v2364_v29 = vsel %vm1828_vm5, %v2181_v1, 0.0  ;;  %v2434_v43 = vmul.f32 %v2181_v1, %v2181_v1  ;;  %v2469_v28 = vsel %vm1828_vm5, %v2435_v19, 0.0  ;;  %v1820_v19 = vsel %vm1795_vm4, %v1787_v18, %v3996_v49 }
 0x23a   : > { %v2365_v47 = vadd.f32 %v2364_v29, %v2363_v27  ;;  %v1553_v39 = vpop.permute.xlu0 %1552  ;;  %v1950_v59 = vsel %vm1927_vm8, %v1917_v50, %v1551_v20  ;;  %v1821_v44 = vsel %vm1795_vm4, %v1788_v52, %v3999_v41 }
 0x23b   : > { %v2467_v60 = vsel %vm1828_vm5, %v2434_v43, 0.0  ;;  %v1951_v2 = vsel %vm1927_vm8, %v1918_v42, %v1553_v39 }
 0x23c   : > { %v2468_v22 = vadd.f32 %v2467_v60, %v2466_v15  ;;  %v2367_v32 = vadd.f32 %v2366_v10, %v2365_v47 }
 0x23d   : > { %v1171_v55 = vpop.permute.xlu1 %1170 }
 0x23e   : > { %v1173_v14 = vpop.permute.xlu0 %1172  ;;  %v2470_v62 = vadd.f32 %v2469_v28, %v2468_v22  ;;  %v1853_v16 = vsel %vm1828_vm5, %v1820_v19, %v1171_v55 }
 0x23f   : > { %v1854_v39 = vsel %vm1828_vm5, %v1821_v44, %v1173_v14 }
 0x241   : > { %v1679_v37 = vpop.permute.xlu1 %1678 }
 0x242   : > { %v1983_v21 = vsel %vm1960_vm9, %v1950_v59, %v1679_v37  ;;  %v1681_v27 = vpop.permute.xlu0 %1680 }
 0x243   : > { %2760 = vmatprep.mubr.msk.f32.mxu1 %vm2003_vm10, %v1983_v21  ;;  %v1984_v48 = vsel %vm1960_vm9, %v1951_v2, %v1681_v27 }
 0x244   : > { %2761 = vmatmul.mubr.msk.f32.gmra.mxu1 %vm2003_vm10, %v1984_v48 }
 0x245   : > { %v1299_v26 = vpop.permute.xlu1 %1298 }
 0x246   : > { %v1427_v56 = vpop.permute.xlu0 %1426  ;;  %v1886_v8 = vsel %vm1861_vm6, %v1853_v16, %v1299_v26 }
 0x247   : > { %v1919_v49 = vsel %vm1894_vm7, %v1886_v8, %v1427_v56  ;;  %v443_v56 = vld [vmem:[#allocation2 + $0x138] sm:$0xff] }
 0x248   : > { %v2735_v23 = vpop.f32.mrf.mxu0 }
 0x249   : > { %v1301_v53 = vpop.permute.xlu1 %1300  ;;  %v2196_v7 = vadd.f32 %v2735_v23, %v3948_v45 }
 0x24a   : > { %v1429_v15 = vpop.permute.xlu0 %1428  ;;  %v2190_v24 = vpop.f32.mrf.mxu0  ;;  %v1887_v36 = vsel %vm1861_vm6, %v1854_v39, %v1301_v53 }
 0x24b   : > { %2334 = vst.msk [vmem:[%s3958_s2 + $0x28] sm:$0xff] %vm1828_vm5, %v2196_v7  ;;  %v2191_v17 = vadd.f32 %v3948_v45, %v2190_v24  ;;  %v2437_v9 = vmul.f32 %v2196_v7, %v2196_v7  ;;  %v2370_v63 = vsel %vm1828_vm5, %v2196_v7, 0.0  ;;  %v1920_v10 = vsel %vm1894_vm7, %v1887_v36, %v1429_v15  ;;  %v4411_v15 = vld [vmem:[#allocation24_spill] sm:$0xff] }
 0x24c   : > { %v1756_v24 = vsel %vm328_vm0, %v443_v56, %v4411_v15 }
 0x24d   : > { %v4038_v3 = vpop.permute.xlu1 %1046  ;;  %2333 = vst.msk [vmem:[%s3958_s2 + $0x20] sm:$0xff] %vm1828_vm5, %v2191_v17  ;;  %v2368_v34 = vsel %vm1828_vm5, %v2191_v17, 0.0  ;;  %v2436_v25 = vmul.f32 %v2191_v17, %v2191_v17  ;;  %v2473_v20 = vsel %vm1828_vm5, %v2437_v9, 0.0  ;;  %v4412_v9 = vld [vmem:[#allocation49_spill] sm:$0xff] }
 0x24e   : > { %v2369_v35 = vadd.f32 %v2368_v34, %v2367_v32  ;;  %v4043_v0 = vpop.permute.xlu0 %1048  ;;  %v1789_v34 = vsel %vm1762_vm3, %v1756_v24, %v4412_v9 }
 0x24f   : > { %v2471_v30 = vsel %vm1828_vm5, %v2436_v25, 0.0  ;;  %v4413_v25 = vld [vmem:[#allocation27_spill] sm:$0xff] }
 0x250   : > { %v2472_v46 = vadd.f32 %v2471_v30, %v2470_v62  ;;  %v2371_v5 = vadd.f32 %v2370_v63, %v2369_v35  ;;  %v1757_v35 = vsel %vm328_vm0, %v3782_v11, %v4413_v25  ;;  %v1822_v63 = vsel %vm1795_vm4, %v1789_v34, %v4038_v3 }
 0x251   : > { %v1555_v1 = vpop.permute.xlu1 %1554  ;;  %v1790_v51 = vsel %vm1762_vm3, %v1757_v35, %v4414_v58 }
 0x252   : > { %v1557_v29 = vpop.permute.xlu0 %1556  ;;  %v2474_v43 = vadd.f32 %v2473_v20, %v2472_v46  ;;  %v1952_v33 = vsel %vm1927_vm8, %v1919_v49, %v1555_v1  ;;  %v1823_v1 = vsel %vm1795_vm4, %v1790_v51, %v4043_v0 }
 0x253   : > { %v1953_v41 = vsel %vm1927_vm8, %v1920_v10, %v1557_v29 }
 0x255   : > { %v1175_v47 = vpop.permute.xlu1 %1174 }
 0x256   : > { %v1177_v54 = vpop.permute.xlu0 %1176  ;;  %v1855_v46 = vsel %vm1828_vm5, %v1822_v63, %v1175_v47 }
 0x257   : > { %v1856_v18 = vsel %vm1828_vm5, %v1823_v1, %v1177_v54 }
 0x259   : > { %v1683_v57 = vpop.permute.xlu1 %1682 }
 0x25a   : > { %v1985_v60 = vsel %vm1960_vm9, %v1952_v33, %v1683_v57  ;;  %v1685_v4 = vpop.permute.xlu0 %1684 }
 0x25b   : > { %2763 = vmatprep.mubr.msk.f32.mxu1 %vm2003_vm10, %v1985_v60  ;;  %v1986_v12 = vsel %vm1960_vm9, %v1953_v41, %v1685_v4 }
 0x25c   : > { %2764 = vmatmul.mubr.msk.f32.gmra.mxu1 %vm2003_vm10, %v1986_v12  ;;  %v2738_v55 = vpop.f32.mrf.mxu0 }
 0x25d   : > { %v1303_v22 = vpop.permute.xlu1 %1302  ;;  %v2206_v32 = vadd.f32 %v2738_v55, %v3948_v45 }
 0x25e   : > { %v1431_v38 = vpop.permute.xlu0 %1430  ;;  %v2200_v28 = vpop.f32.mrf.mxu0 }
 0x25f   : > { %2336 = vst.msk [vmem:[%s3958_s2 + $0x38] sm:$0xff] %vm1828_vm5, %v2206_v32  ;;  %v2201_v31 = vadd.f32 %v3948_v45, %v2200_v28  ;;  %v2439_v62 = vmul.f32 %v2206_v32, %v2206_v32  ;;  %v2374_v21 = vsel %vm1828_vm5, %v2206_v32, 0.0  ;;  %v446_v28 = vld [vmem:[#allocation2 + $0x158] sm:$0xff] }
 0x261   : > { %v1305_v14 = vpop.permute.xlu1 %1304  ;;  %2335 = vst.msk [vmem:[%s3958_s2 + $0x30] sm:$0xff] %vm1828_vm5, %v2201_v31  ;;  %v2372_v50 = vsel %vm1828_vm5, %v2201_v31, 0.0  ;;  %v2438_v59 = vmul.f32 %v2201_v31, %v2201_v31  ;;  %v2477_v53 = vsel %vm1828_vm5, %v2439_v62, 0.0 }
 0x262   : > { %v2373_v37 = vadd.f32 %v2372_v50, %v2371_v5  ;;  %v1433_v42 = vpop.permute.xlu0 %1432  ;;  %v1888_v5 = vsel %vm1861_vm6, %v1855_v46, %v1303_v22  ;;  %v1889_v11 = vsel %vm1861_vm6, %v1856_v18, %v1305_v14  ;;  %v4415_v14 = vld [vmem:[#allocation26_spill] sm:$0xff] }
 0x263   : > { %v2475_v2 = vsel %vm1828_vm5, %v2438_v59, 0.0  ;;  %v1921_v3 = vsel %vm1894_vm7, %v1888_v5, %v1431_v38  ;;  %v1922_v29 = vsel %vm1894_vm7, %v1889_v11, %v1433_v42  ;;  %v445_v38 = vld [vmem:[#allocation2 + $0x150] sm:$0xff]  ;;  %v4416_v59 = vld [vmem:[#allocation30_spill] sm:$0xff] }
 0x264   : > { %v2476_v27 = vadd.f32 %v2475_v2, %v2474_v43  ;;  %v2375_v26 = vadd.f32 %v2374_v21, %v2373_v37  ;;  %v1758_v62 = vsel %vm328_vm0, %v445_v38, %v4415_v14  ;;  %v1759_v37 = vsel %vm328_vm0, %v446_v28, %v4416_v59  ;;  %v4417_v42 = vld [vmem:[#allocation51_spill] sm:$0xff]  ;;  %v4418_v2 = vld [vmem:[#allocation54_spill] sm:$0xff] }
 0x265   : > { %v1051_v48 = vpop.permute.xlu1 %1050  ;;  %v1791_v21 = vsel %vm1762_vm3, %v1758_v62, %v4417_v42  ;;  %v4422_v38 = vld [vmem:[#allocation55_spill] sm:$0xff] }
 0x266   : > { %v1053_v23 = vpop.permute.xlu0 %1052  ;;  %v2478_v7 = vadd.f32 %v2477_v53, %v2476_v27  ;;  %v1792_v27 = vsel %vm1762_vm3, %v1759_v37, %v4418_v2 }
 0x267   : > { %v1825_v53 = vsel %vm1795_vm4, %v1792_v27, %v1053_v23 }
 0x269   : > { %v1559_v17 = vpop.permute.xlu1 %1558 }
 0x26a   : > { %v1561_v30 = vpop.permute.xlu0 %1560  ;;  %v1954_v40 = vsel %vm1927_vm8, %v1921_v3, %v1559_v17  ;;  %v447_v3 = vld [vmem:[#allocation2 + $0x168] sm:$0xff] }
 0x26b   : > { %v1955_v61 = vsel %vm1927_vm8, %v1922_v29, %v1561_v30 }
 0x26d   : > { %v1179_v6 = vpop.permute.xlu1 %1178 }
 0x26e   : > { %v1181_v20 = vpop.permute.xlu0 %1180 }
 0x26f   : > { %v1858_v15 = vsel %vm1828_vm5, %v1825_v53, %v1181_v20 }
 0x270   : > { %v2741_v19 = vpop.f32.mrf.mxu0 }
 0x271   : > { %v1687_v13 = vpop.permute.xlu1 %1686  ;;  %v2216_v43 = vadd.f32 %v2741_v19, %v3948_v45 }
 0x272   : > { %v1987_v0 = vsel %vm1960_vm9, %v1954_v40, %v1687_v13  ;;  %v1689_v52 = vpop.permute.xlu0 %1688  ;;  %v2210_v16 = vpop.f32.mrf.mxu0 }
 0x273   : > { %2766 = vmatprep.mubr.msk.f32.mxu1 %vm2003_vm10, %v1987_v0  ;;  %2338 = vst.msk [vmem:[%s3958_s2 + $0x48] sm:$0xff] %vm1828_vm5, %v2216_v43  ;;  %v1988_v44 = vsel %vm1960_vm9, %v1955_v61, %v1689_v52  ;;  %v2211_v8 = vadd.f32 %v3948_v45, %v2210_v16  ;;  %v2441_v39 = vmul.f32 %v2216_v43, %v2216_v43  ;;  %v2378_v57 = vsel %vm1828_vm5, %v2216_v43, 0.0  ;;  %v4419_v52 = vld [vmem:[#allocation29_spill] sm:$0xff] }
 0x274   : > { %2767 = vmatmul.mubr.msk.f32.gmra.mxu1 %vm2003_vm10, %v1988_v44  ;;  %v1760_v16 = vsel %vm328_vm0, %v447_v3, %v4419_v52 }
 0x275   : > { %v1307_v47 = vpop.permute.xlu1 %1306  ;;  %2337 = vst.msk [vmem:[%s3958_s2 + $0x40] sm:$0xff] %vm1828_vm5, %v2211_v8  ;;  %v2376_v36 = vsel %vm1828_vm5, %v2211_v8, 0.0  ;;  %v2440_v54 = vmul.f32 %v2211_v8, %v2211_v8  ;;  %v2481_v12 = vsel %vm1828_vm5, %v2441_v39, 0.0 }
 0x276   : > { %v2377_v49 = vadd.f32 %v2376_v36, %v2375_v26  ;;  %v1435_v33 = vpop.permute.xlu0 %1434  ;;  %v1824_v26 = vsel %vm1795_vm4, %v1791_v21, %v1051_v48 }
 0x277   : > { %v2479_v10 = vsel %vm1828_vm5, %v2440_v54, 0.0 }
 0x278   : > { %v2480_v60 = vadd.f32 %v2479_v10, %v2478_v7  ;;  %v2379_v4 = vadd.f32 %v2378_v57, %v2377_v49  ;;  %v1857_v7 = vsel %vm1828_vm5, %v1824_v26, %v1179_v6  ;;  %v448_v10 = vld [vmem:[#allocation2 + $0x170] sm:$0xff] }
 0x279   : > { %v1309_v41 = vpop.permute.xlu1 %1308  ;;  %v1890_v24 = vsel %vm1861_vm6, %v1857_v7, %v1307_v47  ;;  %v4420_v47 = vld [vmem:[#allocation53_spill] sm:$0xff] }
 0x27a   : > { %v1437_v22 = vpop.permute.xlu0 %1436  ;;  %v2482_v55 = vadd.f32 %v2481_v12, %v2480_v60  ;;  %v1891_v34 = vsel %vm1861_vm6, %v1858_v15, %v1309_v41  ;;  %v1923_v48 = vsel %vm1894_vm7, %v1890_v24, %v1435_v33  ;;  %v1793_v39 = vsel %vm1762_vm3, %v1760_v16, %v4420_v47 }
 0x27b   : > { %v1924_v30 = vsel %vm1894_vm7, %v1891_v34, %v1437_v22 }
 0x27d   : > { %v1055_v32 = vpop.permute.xlu1 %1054 }
 0x27e   : > { %v1057_v31 = vpop.permute.xlu0 %1056  ;;  %v1826_v36 = vsel %vm1795_vm4, %v1793_v39, %v1055_v32 }
 0x281   : > { %v1563_v50 = vpop.permute.xlu1 %1562 }
 0x282   : > { %v1565_v56 = vpop.permute.xlu0 %1564  ;;  %v1956_v58 = vsel %vm1927_vm8, %v1923_v48, %v1563_v50 }
 0x283   : > { %v1957_v18 = vsel %vm1927_vm8, %v1924_v30, %v1565_v56 }
 0x284   : > { %v2744_v9 = vpop.f32.mrf.mxu0 }
 0x285   : > { %v1183_v17 = vpop.permute.xlu1 %1182  ;;  %v2226_v25 = vadd.f32 %v2744_v9, %v3948_v45 }
 0x286   : > { %v1185_v35 = vpop.permute.xlu0 %1184  ;;  %v2220_v63 = vpop.f32.mrf.mxu0  ;;  %v1859_v49 = vsel %vm1828_vm5, %v1826_v36, %v1183_v17 }
 0x287   : > { %2340 = vst.msk [vmem:[%s3958_s2 + $0x58] sm:$0xff] %vm1828_vm5, %v2226_v25  ;;  %v2221_v23 = vadd.f32 %v3948_v45, %v2220_v63  ;;  %v2443_v46 = vmul.f32 %v2226_v25, %v2226_v25  ;;  %v2382_v40 = vsel %vm1828_vm5, %v2226_v25, 0.0 }
 0x289   : > { %v1691_v51 = vpop.permute.xlu1 %1690  ;;  %2339 = vst.msk [vmem:[%s3958_s2 + $0x50] sm:$0xff] %vm1828_vm5, %v2221_v23  ;;  %v2380_v1 = vsel %vm1828_vm5, %v2221_v23, 0.0  ;;  %v2442_v5 = vmul.f32 %v2221_v23, %v2221_v23  ;;  %v2485_v61 = vsel %vm1828_vm5, %v2443_v46, 0.0 }
 0x28a   : > { %v1989_v6 = vsel %vm1960_vm9, %v1956_v58, %v1691_v51  ;;  %v2381_v11 = vadd.f32 %v2380_v1, %v2379_v4  ;;  %v1693_v20 = vpop.permute.xlu0 %1692  ;;  %v4421_v4 = vld [vmem:[#allocation31_spill] sm:$0xff] }
 0x28b   : > { %2769 = vmatprep.mubr.msk.f32.mxu1 %vm2003_vm10, %v1989_v6  ;;  %v2483_v13 = vsel %vm1828_vm5, %v2442_v5, 0.0  ;;  %v1990_v19 = vsel %vm1960_vm9, %v1957_v18, %v1693_v20  ;;  %v1761_v12 = vsel %vm328_vm0, %v448_v10, %v4421_v4 }
 0x28c   : > { %v2484_v29 = vadd.f32 %v2483_v13, %v2482_v55  ;;  %2770 = vmatmul.mubr.msk.f32.gmra.mxu1 %vm2003_vm10, %v1990_v19  ;;  %v2383_v43 = vadd.f32 %v2382_v40, %v2381_v11  ;;  %v1794_v32 = vsel %vm1762_vm3, %v1761_v12, %v4422_v38 }
 0x28d   : > { %v1311_v0 = vpop.permute.xlu1 %1310  ;;  %v1827_v14 = vsel %vm1795_vm4, %v1794_v32, %v1057_v31 }
 0x28e   : > { %v1439_v44 = vpop.permute.xlu0 %1438  ;;  %v2486_v8 = vadd.f32 %v2485_v61, %v2484_v29  ;;  %v1892_v33 = vsel %vm1861_vm6, %v1859_v49, %v1311_v0  ;;  %v1860_v59 = vsel %vm1828_vm5, %v1827_v14, %v1185_v35 }
 0x28f   : > { %v1925_v41 = vsel %vm1894_vm7, %v1892_v33, %v1439_v44 }
 0x291   : > { %v1313_v54 = vpop.permute.xlu1 %1312 }
 0x292   : > { %v1567_v57 = vpop.permute.xlu0 %1566  ;;  %v1893_v42 = vsel %vm1861_vm6, %v1860_v59, %v1313_v54 }
 0x293   : > { %v1958_v22 = vsel %vm1927_vm8, %v1925_v41, %v1567_v57 }
 0x295   : > { %v1441_v60 = vpop.permute.xlu1 %1440 }
 0x296   : > { %v1695_v55 = vpop.permute.xlu0 %1694  ;;  %v1926_v2 = vsel %vm1894_vm7, %v1893_v42, %v1441_v60 }
 0x297   : > { %v1991_v28 = vsel %vm1960_vm9, %v1958_v22, %v1695_v55 }
 0x298   : > { %2772 = vmatprep.mubr.msk.f32.mxu1 %vm2003_vm10, %v1991_v28  ;;  %v2747_v50 = vpop.f32.mrf.mxu0 }
 0x299   : > { %v1569_v62 = vpop.permute.xlu1 %1568  ;;  %v2236_v37 = vadd.f32 %v2747_v50, %v3948_v45 }
 0x29a   : > { %v2230_v21 = vpop.f32.mrf.mxu0  ;;  %v1959_v26 = vsel %vm1927_vm8, %v1926_v2, %v1569_v62 }
 0x29b   : > { %2342 = vst.msk [vmem:[%s3958_s2 + $0x68] sm:$0xff] %vm1828_vm5, %v2236_v37  ;;  %v2231_v27 = vadd.f32 %v3948_v45, %v2230_v21  ;;  %v2445_v56 = vmul.f32 %v2236_v37, %v2236_v37  ;;  %v2386_v17 = vsel %vm1828_vm5, %v2236_v37, 0.0 }
 0x29d   : > { %v1697_v31 = vpop.permute.xlu1 %1696  ;;  %2341 = vst.msk [vmem:[%s3958_s2 + $0x60] sm:$0xff] %vm1828_vm5, %v2231_v27  ;;  %v2384_v53 = vsel %vm1828_vm5, %v2231_v27, 0.0  ;;  %v2444_v7 = vmul.f32 %v2231_v27, %v2231_v27  ;;  %v2489_v35 = vsel %vm1828_vm5, %v2445_v56, 0.0 }
 0x29e   : > { %v1992_v15 = vsel %vm1960_vm9, %v1959_v26, %v1697_v31  ;;  %v2385_v24 = vadd.f32 %v2384_v53, %v2383_v43 }
 0x29f   : > { %2773 = vmatmul.mubr.msk.f32.gmra.mxu1 %vm2003_vm10, %v1992_v15  ;;  %v2487_v9 = vsel %vm1828_vm5, %v2444_v7, 0.0 }
 0x2a0   : > { %v2488_v34 = vadd.f32 %v2487_v9, %v2486_v8  ;;  %v2387_v25 = vadd.f32 %v2386_v17, %v2385_v24 }
 0x2a2   : > { %v2490_v63 = vadd.f32 %v2489_v35, %v2488_v34 }
 0x2ac   : > { %v2750_v48 = vpop.f32.mrf.mxu0 }
 0x2ad   : > { %v2246_v23 = vadd.f32 %v2750_v48, %v3948_v45 }
 0x2ae   : > { %v2240_v30 = vpop.f32.mrf.mxu0 }
 0x2af   : > { %2344 = vst.msk [vmem:[%s3958_s2 + $0x78] sm:$0xff] %vm1828_vm5, %v2246_v23  ;;  %v2241_v58 = vadd.f32 %v3948_v45, %v2240_v30  ;;  %v2447_v51 = vmul.f32 %v2246_v23, %v2246_v23  ;;  %v2390_v6 = vsel %vm1828_vm5, %v2246_v23, 0.0 }
 0x2b1   : > { %2343 = vst.msk [vmem:[%s3958_s2 + $0x70] sm:$0xff] %vm1828_vm5, %v2241_v58  ;;  %v2388_v46 = vsel %vm1828_vm5, %v2241_v58, 0.0  ;;  %v2446_v1 = vmul.f32 %v2241_v58, %v2241_v58  ;;  %v2493_v3 = vsel %vm1828_vm5, %v2447_v51, 0.0 }
 0x2b2   : > { %v2389_v5 = vadd.f32 %v2388_v46, %v2387_v25 }
 0x2b3   : > { %v2491_v18 = vsel %vm1828_vm5, %v2446_v1, 0.0 }
 0x2b4   : > { %v2492_v11 = vadd.f32 %v2491_v18, %v2490_v63  ;;  %v2391_v20 = vadd.f32 %v2390_v6, %v2389_v5 }
 0x2b6   : > { %v2494_v40 = vadd.f32 %v2493_v3, %v2492_v11 }
 0x2c0   : > { %v2753_v13 = vpop.f32.mrf.mxu1 }
 0x2c1   : > { %v2256_v19 = vadd.f32 %v2753_v13, %v3948_v45 }
 0x2c2   : > { %v2250_v29 = vpop.f32.mrf.mxu1 }
 0x2c3   : > { %2346 = vst.msk [vmem:[%s3958_s2 + $0x88] sm:$0xff] %vm1828_vm5, %v2256_v19  ;;  %v2251_v0 = vadd.f32 %v3948_v45, %v2250_v29  ;;  %v2449_v43 = vmul.f32 %v2256_v19, %v2256_v19  ;;  %v2394_v44 = vsel %vm1828_vm5, %v2256_v19, 0.0 }
 0x2c5   : > { %2345 = vst.msk [vmem:[%s3958_s2 + $0x80] sm:$0xff] %vm1828_vm5, %v2251_v0  ;;  %v2392_v61 = vsel %vm1828_vm5, %v2251_v0, 0.0  ;;  %v2448_v52 = vmul.f32 %v2251_v0, %v2251_v0  ;;  %v2497_v36 = vsel %vm1828_vm5, %v2449_v43, 0.0 }
 0x2c6   : > { %v2393_v16 = vadd.f32 %v2392_v61, %v2391_v20 }
 0x2c7   : > { %v2495_v8 = vsel %vm1828_vm5, %v2448_v52, 0.0 }
 0x2c8   : > { %v2496_v47 = vadd.f32 %v2495_v8, %v2494_v40  ;;  %v2395_v39 = vadd.f32 %v2394_v44, %v2393_v16 }
 0x2ca   : > { %v2498_v54 = vadd.f32 %v2497_v36, %v2496_v47 }
 0x2d4   : > { %v2756_v49 = vpop.f32.mrf.mxu1 }
 0x2d5   : > { %v2266_v33 = vadd.f32 %v2756_v49, %v3948_v45 }
 0x2d6   : > { %v2260_v57 = vpop.f32.mrf.mxu1 }
 0x2d7   : > { %2348 = vst.msk [vmem:[%s3958_s2 + $0x98] sm:$0xff] %vm1828_vm5, %v2266_v33  ;;  %v2261_v10 = vadd.f32 %v3948_v45, %v2260_v57  ;;  %v2451_v60 = vmul.f32 %v2266_v33, %v2266_v33  ;;  %v2398_v22 = vsel %vm1828_vm5, %v2266_v33, 0.0 }
 0x2d9   : > { %2347 = vst.msk [vmem:[%s3958_s2 + $0x90] sm:$0xff] %vm1828_vm5, %v2261_v10  ;;  %v2396_v41 = vsel %vm1828_vm5, %v2261_v10, 0.0  ;;  %v2450_v4 = vmul.f32 %v2261_v10, %v2261_v10  ;;  %v2501_v28 = vsel %vm1828_vm5, %v2451_v60, 0.0 }
 0x2da   : > { %v2397_v12 = vadd.f32 %v2396_v41, %v2395_v39 }
 0x2db   : > { %v2499_v55 = vsel %vm1828_vm5, %v2450_v4, 0.0 }
 0x2dc   : > { %v2500_v38 = vadd.f32 %v2499_v55, %v2498_v54  ;;  %v2399_v32 = vadd.f32 %v2398_v22, %v2397_v12 }
 0x2de   : > { %v2502_v14 = vadd.f32 %v2501_v28, %v2500_v38 }
 0x2ec   : > { %v2759_v62 = vpop.f32.mrf.mxu1 }
 0x2ed   : > { %v2276_v50 = vadd.f32 %v2759_v62, %v3948_v45 }
 0x2ee   : > { %v2270_v59 = vpop.f32.mrf.mxu1 }
 0x2ef   : > { %2350 = vst.msk [vmem:[%s3958_s2 + $0xa8] sm:$0xff] %vm1828_vm5, %v2276_v50  ;;  %v2271_v37 = vadd.f32 %v3948_v45, %v2270_v59  ;;  %v2453_v42 = vmul.f32 %v2276_v50, %v2276_v50  ;;  %v2402_v26 = vsel %vm1828_vm5, %v2276_v50, 0.0 }
 0x2f1   : > { %2349 = vst.msk [vmem:[%s3958_s2 + $0xa0] sm:$0xff] %vm1828_vm5, %v2271_v37  ;;  %v2400_v21 = vsel %vm1828_vm5, %v2271_v37, 0.0  ;;  %v2452_v2 = vmul.f32 %v2271_v37, %v2271_v37  ;;  %v2505_v7 = vsel %vm1828_vm5, %v2453_v42, 0.0 }
 0x2f2   : > { %v2401_v27 = vadd.f32 %v2400_v21, %v2399_v32 }
 0x2f3   : > { %v2503_v31 = vsel %vm1828_vm5, %v2452_v2, 0.0 }
 0x2f4   : > { %v2504_v56 = vadd.f32 %v2503_v31, %v2502_v14  ;;  %v2403_v53 = vadd.f32 %v2402_v26, %v2401_v27 }
 0x2f6   : > { %v2506_v15 = vadd.f32 %v2505_v7, %v2504_v56 }
 0x304   : > { %v2762_v24 = vpop.f32.mrf.mxu1 }
 0x305   : > { %v2286_v17 = vadd.f32 %v2762_v24, %v3948_v45 }
 0x306   : > { %v2280_v9 = vpop.f32.mrf.mxu1 }
 0x307   : > { %2352 = vst.msk [vmem:[%s3958_s2 + $0xb8] sm:$0xff] %vm1828_vm5, %v2286_v17  ;;  %v2281_v34 = vadd.f32 %v3948_v45, %v2280_v9  ;;  %v2455_v25 = vmul.f32 %v2286_v17, %v2286_v17  ;;  %v2406_v23 = vsel %vm1828_vm5, %v2286_v17, 0.0 }
 0x309   : > { %2351 = vst.msk [vmem:[%s3958_s2 + $0xb0] sm:$0xff] %vm1828_vm5, %v2281_v34  ;;  %v2404_v35 = vsel %vm1828_vm5, %v2281_v34, 0.0  ;;  %v2454_v63 = vmul.f32 %v2281_v34, %v2281_v34  ;;  %v2509_v46 = vsel %vm1828_vm5, %v2455_v25, 0.0 }
 0x30a   : > { %v2405_v48 = vadd.f32 %v2404_v35, %v2403_v53 }
 0x30b   : > { %v2507_v30 = vsel %vm1828_vm5, %v2454_v63, 0.0 }
 0x30c   : > { %v2508_v58 = vadd.f32 %v2507_v30, %v2506_v15  ;;  %v2407_v51 = vadd.f32 %v2406_v23, %v2405_v48 }
 0x30e   : > { %v2510_v1 = vadd.f32 %v2509_v46, %v2508_v58 }
 0x31c   : > { %v2765_v5 = vpop.f32.mrf.mxu1 }
 0x31d   : > { %v2296_v6 = vadd.f32 %v2765_v5, %v3948_v45 }
 0x31e   : > { %v2290_v18 = vpop.f32.mrf.mxu1 }
 0x31f   : > { %2354 = vst.msk [vmem:[%s3958_s2 + $0xc8] sm:$0xff] %vm1828_vm5, %v2296_v6  ;;  %v2291_v11 = vadd.f32 %v3948_v45, %v2290_v18  ;;  %v2457_v8 = vmul.f32 %v2296_v6, %v2296_v6  ;;  %v2410_v36 = vsel %vm1828_vm5, %v2296_v6, 0.0 }
 0x321   : > { %2353 = vst.msk [vmem:[%s3958_s2 + $0xc0] sm:$0xff] %vm1828_vm5, %v2291_v11  ;;  %v2456_v29 = vmul.f32 %v2291_v11, %v2291_v11  ;;  %v2408_v61 = vsel %vm1828_vm5, %v2291_v11, 0.0  ;;  %v2513_v33 = vsel %vm1828_vm5, %v2457_v8, 0.0 }
 0x322   : > { %v2409_v44 = vadd.f32 %v2408_v61, %v2407_v51 }
 0x323   : > { %v2511_v16 = vsel %vm1828_vm5, %v2456_v29, 0.0 }
 0x324   : > { %v2512_v39 = vadd.f32 %v2511_v16, %v2510_v1  ;;  %v2411_v49 = vadd.f32 %v2410_v36, %v2409_v44 }
 0x326   : > { %v2514_v60 = vadd.f32 %v2513_v33, %v2512_v39 }
 0x334   : > { %v2768_v20 = vpop.f32.mrf.mxu1 }
 0x335   : > { %v2306_v3 = vadd.f32 %v2768_v20, %v3948_v45 }
 0x336   : > { %v2300_v40 = vpop.f32.mrf.mxu1 }
 0x337   : > { %2356 = vst.msk [vmem:[%s3958_s2 + $0xd8] sm:$0xff] %vm1828_vm5, %v2306_v3  ;;  %v2301_v13 = vadd.f32 %v3948_v45, %v2300_v40  ;;  %v2459_v41 = vmul.f32 %v2306_v3, %v2306_v3  ;;  %v2414_v22 = vsel %vm1828_vm5, %v2306_v3, 0.0 }
 0x339   : > { %2355 = vst.msk [vmem:[%s3958_s2 + $0xd0] sm:$0xff] %vm1828_vm5, %v2301_v13  ;;  %v2458_v47 = vmul.f32 %v2301_v13, %v2301_v13  ;;  %v2412_v54 = vsel %vm1828_vm5, %v2301_v13, 0.0  ;;  %v2517_v32 = vsel %vm1828_vm5, %v2459_v41, 0.0 }
 0x33a   : > { %v2413_v10 = vadd.f32 %v2412_v54, %v2411_v49 }
 0x33b   : > { %v2515_v57 = vsel %vm1828_vm5, %v2458_v47, 0.0 }
 0x33c   : > { %v2516_v12 = vadd.f32 %v2515_v57, %v2514_v60  ;;  %v2415_v38 = vadd.f32 %v2414_v22, %v2413_v10 }
 0x33e   : > { %v2518_v62 = vadd.f32 %v2517_v32, %v2516_v12 }
 0x34c   : > { %v2771_v19 = vpop.f32.mrf.mxu1 }
 0x34d   : > { %v2316_v0 = vadd.f32 %v2771_v19, %v3948_v45 }
 0x34e   : > { %v2310_v43 = vpop.f32.mrf.mxu1 }
 0x34f   : > { %2358 = vst.msk [vmem:[%s3958_s2 + $0xe8] sm:$0xff] %vm1828_vm5, %v2316_v0  ;;  %v2311_v52 = vadd.f32 %v3948_v45, %v2310_v43  ;;  %v2461_v59 = vmul.f32 %v2316_v0, %v2316_v0  ;;  %v2418_v2 = vsel %vm1828_vm5, %v2316_v0, 0.0 }
 0x351   : > { %2357 = vst.msk [vmem:[%s3958_s2 + $0xe0] sm:$0xff] %vm1828_vm5, %v2311_v52  ;;  %v2460_v4 = vmul.f32 %v2311_v52, %v2311_v52  ;;  %v2416_v55 = vsel %vm1828_vm5, %v2311_v52, 0.0  ;;  %v2521_v31 = vsel %vm1828_vm5, %v2461_v59, 0.0 }
 0x352   : > { %v2417_v14 = vadd.f32 %v2416_v55, %v2415_v38 }
 0x353   : > { %v2519_v28 = vsel %vm1828_vm5, %v2460_v4, 0.0 }
 0x354   : > { %v2520_v42 = vadd.f32 %v2519_v28, %v2518_v62  ;;  %v2419_v26 = vadd.f32 %v2418_v2, %v2417_v14 }
 0x356   : > { %v2522_v24 = vadd.f32 %v2521_v31, %v2520_v42 }
 0x35f   : > { %v2774_v50 = vpop.f32.mrf.mxu1 }
 0x360   : > { %v2326_v37 = vadd.f32 %v2774_v50, %v3948_v45 }
 0x361   : > { %v2320_v21 = vpop.f32.mrf.mxu1 }
 0x362   : > { %2360 = vst.msk [vmem:[%s3958_s2 + $0xf8] sm:$0xff] %vm1828_vm5, %v2326_v37  ;;  %v2321_v27 = vadd.f32 %v3948_v45, %v2320_v21  ;;  %v2463_v56 = vmul.f32 %v2326_v37, %v2326_v37  ;;  %v2422_v17 = vsel %vm1828_vm5, %v2326_v37, 0.0 }
 0x364   : > { %2359 = vst.msk [vmem:[%s3958_s2 + $0xf0] sm:$0xff] %vm1828_vm5, %v2321_v27  ;;  %v2420_v53 = vsel %vm1828_vm5, %v2321_v27, 0.0  ;;  %v2462_v7 = vmul.f32 %v2321_v27, %v2321_v27  ;;  %v2525_v45 = vsel %vm1828_vm5, %v2463_v56, 0.0 }
 0x365   : > { %v2421_v15 = vadd.f32 %v2420_v53, %v2419_v26 }
 0x366   : > { %v2523_v9 = vsel %vm1828_vm5, %v2462_v7, 0.0 }
 0x367   : > { %v2423_v34 = vadd.f32 %v2422_v17, %v2421_v15  ;;  %v2524_v25 = vadd.f32 %v2523_v9, %v2522_v24 }
 0x369   : > { %v2424_v35 = vrot.slane %v2423_v34, 4  ;;  %v2526_v63 = vadd.f32 %v2525_v45, %v2524_v25 }
 0x36b   : > { %v2425_v48 = vadd.f32 %v2424_v35, %v2423_v34  ;;  %v2527_v23 = vrot.slane %v2526_v63, 4 }
 0x36d   : > { %v2426_v30 = vrot.slane %v2425_v48, 2  ;;  %v2528_v58 = vadd.f32 %v2527_v23, %v2526_v63 }
 0x36f   : > { %v2427_v51 = vadd.f32 %v2426_v30, %v2425_v48  ;;  %v2529_v46 = vrot.slane %v2528_v58, 2 }
 0x371   : > { %v2428_v1 = vrot.slane %v2427_v51, 1  ;;  %v2530_v5 = vadd.f32 %v2529_v46, %v2528_v58 }
 0x373   : > { %v2429_v6 = vadd.f32 %v2428_v1, %v2427_v51  ;;  %v2531_v18 = vrot.slane %v2530_v5, 1 }
 0x375   : > { %2431 = vst.msk [vmem:[%s292_s27] sm:$0x1] %vm2430_vm11, %v2429_v6  ;;  %v2532_v11 = vadd.f32 %v2531_v18, %v2530_v5 }
 0x377   : > { %2533 = vst.msk [vmem:[%s295_s30] sm:$0x1] %vm2430_vm11, %v2532_v11 }
 0x378 PF: > { %s18_s24 = sadd.s32 1, %s2812_s24  }
 0x379   : > { %p15_p4 = scmp.ge.s32.totalorder %s18_s24, 4  }
 0x37b   :  { %17 = sbr.rel (!%p15_p4) target bundleno = 1 (0x1), region = 96 }

// kernel: seg_morph_unet_forward.8
= control target key start
LH: loop header
LB: loop body
LE: loop exit
PB: predicated region body
PF: predicated region fallthrough
CT: control target
= control target key end

     0   :  { %s3339_s24 = smov 0   ;;  %s4996_s0 = inlined_call_operand.vmem [shape: f32[2,16,16,24], index: 0, kind: input, shape index: {}]   ;;  %s4997_s1 = inlined_call_operand.vmem [shape: f32[1,24], index: 1, kind: input, shape index: {}]   ;;  %s4998_s2 = inlined_call_operand.vmem [shape: f32[1,24], index: 2, kind: input, shape index: {}]   ;;  %s4999_s3 = inlined_call_operand.vmem [shape: f32[216,8], index: 3, kind: input, shape index: {}]   ;;  %s5000_s4 = inlined_call_operand.vmem [shape: f32[1,8], index: 4, kind: input, shape index: {}]   ;;  %s5001_s5 = inlined_call_operand.vmem [shape: f32[2,256,8], index: 5, kind: output, shape index: {0}]   ;;  %s5002_s6 = inlined_call_operand.vmem [shape: f32[2,1,8], index: 6, kind: output, shape index: {1}]   ;;  %s5003_s7 = inlined_call_operand.vmem [shape: f32[2,1,8], index: 7, kind: output, shape index: {2}]  }
   0x1 LB: > { %s2834_s25 = sadd.s32 4294967295, %s3288_s24   ;;  %p2838_p0 = scmp.ge.s32.totalorder %s3288_s24, 1  ;;  %s3288_s24 = sphi %s3339_s24, %s18_s24  }
   0x2   : > { %p242_p1 = scmp.lt.s32.totalorder %s3288_s24, 3 }
   0x4   : > { %p243_p2 = pnand %p2838_p0, %p242_p1 }
   0x6   : > { %246 = sbr.rel (%p243_p2) target bundleno = 760 (0x2f8), region = 40 }
   0xb   : > { %vm502_vm0 = vcmask 195584   ;;  %vm505_vm1 = vcmask 189440   ;;  %p3349_p3 = scmp.lt.s32.totalorder %s2834_s25, 1  ;;  %v3290_v0 = vmov 0.0   ;;  %v3473_v1 = vld [vmem:[%s4997_s1] ss:$0 sm:$0xff] }
   0xc   : > { %503 = vst.msk [vmem:[#allocation2] sm:$0xff] %vm502_vm0, %v3290_v0  ;;  %504 = vst.msk [vmem:[#allocation2 + $0x8] sm:$0xff] %vm502_vm0, %v3290_v0  ;;  %2298 = vmatprep.subr.mxu0 %v3290_v0  ;;  %2882 = vmatprep.subr.mxu1 %v3290_v0  ;;  %v3485_v2 = vld [vmem:[%s4998_s2] ss:$0 sm:$0xff]  ;;  %s3291_s12 = smov 24   ;;  %s3292_s28 = smov 48  }
   0xd   : > { %506 = vst.msk [vmem:[#allocation2 + $0x10] sm:$0x3] %vm505_vm1, %v3290_v0  ;;  %509 = vst.msk [vmem:[#allocation2 + $0x28] sm:$0x3] %vm505_vm1, %v3290_v0  ;;  %s5042_s25 = smov (!%p3349_p3, %s2834_s25), 1  ;;  %s3293_s21 = smov 72  }
   0xe   : > { %507 = vst.msk [vmem:[#allocation2 + $0x18] sm:$0xff] %vm502_vm0, %v3290_v0  ;;  %508 = vst.msk [vmem:[#allocation2 + $0x20] sm:$0xff] %vm502_vm0, %v3290_v0  ;;  %s2880_s27 = sshll.u32 %s5042_s25, 8  ;;  %s3294_s13 = smov 120  }
   0xf   : > { %510 = vst.msk [vmem:[#allocation2 + $0x30] sm:$0xff] %vm502_vm0, %v3290_v0  ;;  %511 = vst.msk [vmem:[#allocation2 + $0x38] sm:$0xff] %vm502_vm0, %v3290_v0  ;;  %s3480_s9 = scalar_lea.vmem %s4996_s0, %s2880_s27  ;;  %s3295_s14 = smov 16  }
  0x10   : > { %512 = vst.msk [vmem:[#allocation2 + $0x40] sm:$0x3] %vm505_vm1, %v3290_v0  ;;  %515 = vst.msk [vmem:[#allocation2 + $0x58] sm:$0x3] %vm505_vm1, %v3290_v0  ;;  %v298_v3 = vld [vmem:[%s3480_s9 + $0x10] sm:$0xff]  ;;  %v299_v4 = vld [vmem:[%s3480_s9 + $0x18] sm:$0xff]  ;;  %s4666_s26 = scalar_lea.vmem %s5001_s5, %s2880_s27  ;;  %s292_s30 = scalar_lea.vmem %s5002_s6, %s5042_s25 }
  0x11   : > { %513 = vst.msk [vmem:[#allocation2 + $0x48] sm:$0xff] %vm502_vm0, %v3290_v0  ;;  %514 = vst.msk [vmem:[#allocation2 + $0x50] sm:$0xff] %vm502_vm0, %v3290_v0  ;;  %v296_v5 = vld [vmem:[%s3480_s9] sm:$0xff]  ;;  %v337_v6 = vmul.f32 %v3473_v1, %v298_v3  ;;  %v338_v7 = vmul.f32 %v3473_v1, %v299_v4  ;;  %v297_v8 = vld [vmem:[%s3480_s9 + $0x8] sm:$0xff]  ;;  %s3296_s15 = smov 40   ;;  %s3297_s16 = smov 96  }
  0x12   : > { %516 = vst.msk [vmem:[#allocation2 + $0x60] sm:$0xff] %vm502_vm0, %v3290_v0  ;;  %517 = vst.msk [vmem:[#allocation2 + $0x68] sm:$0xff] %vm502_vm0, %v3290_v0  ;;  %v335_v9 = vmul.f32 %v3473_v1, %v296_v5  ;;  %v300_v10 = vld [vmem:[%s3480_s9 + $0x20] sm:$0xff]  ;;  %v301_v11 = vld [vmem:[%s3480_s9 + $0x28] sm:$0xff]  ;;  %v336_v14 = vmul.f32 %v3473_v1, %v297_v8  ;;  %s3298_s17 = smov 64   ;;  %s295_s11 = scalar_lea.vmem %s5003_s7, %s5042_s25 }
  0x13   : > { %518 = vst.msk [vmem:[#allocation2 + $0x70] sm:$0x3] %vm505_vm1, %v3290_v0  ;;  %521 = vst.msk [vmem:[#allocation2 + $0x88] sm:$0x3] %vm505_vm1, %v3290_v0  ;;  %v623_v12 = vld [vmem:[#allocation2 + $0x1] sm:$0xff]  ;;  %v339_v15 = vmul.f32 %v3473_v1, %v300_v10  ;;  %v340_v16 = vmul.f32 %v3473_v1, %v301_v11  ;;  %v302_v17 = vld [vmem:[%s3480_s9 + $0x30] sm:$0xff]  ;;  %v376_v19 = vadd.f32 %v3485_v2, %v337_v6 }
  0x14   : > { %519 = vst.msk [vmem:[#allocation2 + $0x78] sm:$0xff] %vm502_vm0, %v3290_v0  ;;  %520 = vst.msk [vmem:[#allocation2 + $0x80] sm:$0xff] %vm502_vm0, %v3290_v0  ;;  %v624_v13 = vld [vmem:[#allocation2 + $0x9] sm:$0xff]  ;;  %v377_v20 = vadd.f32 %v3485_v2, %v338_v7  ;;  %v374_v21 = vadd.f32 %v3485_v2, %v335_v9  ;;  %v375_v22 = vadd.f32 %v3485_v2, %v336_v14  ;;  %v303_v25 = vld [vmem:[%s3480_s9 + $0x38] sm:$0xff] }
  0x15   : > { %522 = vst.msk [vmem:[#allocation2 + $0x90] sm:$0xff] %vm502_vm0, %v3290_v0  ;;  %523 = vst.msk [vmem:[#allocation2 + $0x98] sm:$0xff] %vm502_vm0, %v3290_v0  ;;  %v2953_v18 = vpack.i.bf16 %v624_v13, %v623_v12  ;;  %v378_v23 = vadd.f32 %v3485_v2, %v339_v15  ;;  %v379_v24 = vadd.f32 %v3485_v2, %v340_v16  ;;  %v304_v27 = vld [vmem:[%s3480_s9 + $0x40] sm:$0xff]  ;;  %v305_v28 = vld [vmem:[%s3480_s9 + $0x48] sm:$0xff]  ;;  %vm408_vm2 = vcmp.ge.f32.partialorder %v376_v19, 0.0 }
  0x16   : > { %524 = vst.msk [vmem:[#allocation2 + $0xa0] sm:$0x3] %vm505_vm1, %v3290_v0  ;;  %527 = vst.msk [vmem:[#allocation2 + $0xb8] sm:$0x3] %vm505_vm1, %v3290_v0  ;;  %v341_v26 = vmul.f32 %v3473_v1, %v302_v17  ;;  %vm409_vm3 = vcmp.ge.f32.partialorder %v377_v20, 0.0  ;;  %vm406_vm4 = vcmp.ge.f32.partialorder %v374_v21, 0.0  ;;  %v342_v41 = vmul.f32 %v3473_v1, %v303_v25 }
  0x17   : > { %525 = vst.msk [vmem:[#allocation2 + $0xa8] sm:$0xff] %vm502_vm0, %v3290_v0  ;;  %526 = vst.msk [vmem:[#allocation2 + $0xb0] sm:$0xff] %vm502_vm0, %v3290_v0  ;;  %2954 = vrot.lane.b32.xlu0 %v2953_v18, %s3291_s12  ;;  %v440_v29 = vmul.f32 0.2, %v376_v19  ;;  %v441_v30 = vmul.f32 0.2, %v377_v20  ;;  %v343_v43 = vmul.f32 %v3473_v1, %v304_v27  ;;  %v344_v44 = vmul.f32 %v3473_v1, %v305_v28 }
  0x18   : > { %528 = vst.msk [vmem:[#allocation2 + $0xc0] sm:$0xff] %vm502_vm0, %v3290_v0  ;;  %529 = vst.msk [vmem:[#allocation2 + $0xc8] sm:$0xff] %vm502_vm0, %v3290_v0  ;;  %vm407_vm5 = vcmp.ge.f32.partialorder %v375_v22, 0.0  ;;  %v438_v31 = vmul.f32 0.2, %v374_v21  ;;  %vm410_vm6 = vcmp.ge.f32.partialorder %v378_v23, 0.0  ;;  %v380_v42 = vadd.f32 %v3485_v2, %v341_v26 }
  0x19   : > { %530 = vst.msk [vmem:[#allocation2 + $0xd0] sm:$0x3] %vm505_vm1, %v3290_v0  ;;  %533 = vst.msk [vmem:[#allocation2 + $0xe8] sm:$0x3] %vm505_vm1, %v3290_v0  ;;  %v439_v32 = vmul.f32 0.2, %v375_v22  ;;  %v472_v33 = vsel %vm408_vm2, %v376_v19, %v440_v29  ;;  %v473_v34 = vsel %vm409_vm3, %v377_v20, %v441_v30  ;;  %v381_v50 = vadd.f32 %v3485_v2, %v342_v41 }
  0x1a   : > { %531 = vst.msk [vmem:[#allocation2 + $0xd8] sm:$0xff] %vm502_vm0, %v3290_v0  ;;  %532 = vst.msk [vmem:[#allocation2 + $0xe0] sm:$0xff] %vm502_vm0, %v3290_v0  ;;  %vm411_vm7 = vcmp.ge.f32.partialorder %v379_v24, 0.0  ;;  %v306_v35 = vld [vmem:[%s3480_s9 + $0x50] sm:$0xff]  ;;  %v307_v36 = vld [vmem:[%s3480_s9 + $0x58] sm:$0xff]  ;;  %v470_v37 = vsel %vm406_vm4, %v374_v21, %v438_v31  ;;  %vm412_vm8 = vcmp.ge.f32.partialorder %v380_v42, 0.0  ;;  %v382_v52 = vadd.f32 %v3485_v2, %v343_v43 }
  0x1b   : > { %534 = vst.msk [vmem:[#allocation2 + $0xf0] sm:$0xff] %vm502_vm0, %v3290_v0  ;;  %535 = vst.msk [vmem:[#allocation2 + $0xf8] sm:$0xff] %vm502_vm0, %v3290_v0  ;;  %v471_v38 = vsel %vm407_vm5, %v375_v22, %v439_v32  ;;  %v442_v39 = vmul.f32 0.2, %v378_v23  ;;  %v443_v40 = vmul.f32 0.2, %v379_v24  ;;  %v345_v48 = vmul.f32 %v3473_v1, %v306_v35 }
  0x1c   : > { %536 = vst.msk [vmem:[#allocation2 + $0x100] sm:$0x3] %vm505_vm1, %v3290_v0  ;;  %539 = vst.msk [vmem:[#allocation2 + $0x118] sm:$0x3] %vm505_vm1, %v3290_v0  ;;  %v308_v45 = vld [vmem:[%s3480_s9 + $0x60] sm:$0xff]  ;;  %v346_v49 = vmul.f32 %v3473_v1, %v307_v36  ;;  %v383_v53 = vadd.f32 %v3485_v2, %v344_v44  ;;  %v309_v56 = vld [vmem:[%s3480_s9 + $0x68] sm:$0xff] }
  0x1d   : > { %537 = vst.msk [vmem:[#allocation2 + $0x108] sm:$0xff] %vm502_vm0, %v3290_v0  ;;  %538 = vst.msk [vmem:[#allocation2 + $0x110] sm:$0xff] %vm502_vm0, %v3290_v0  ;;  %v474_v46 = vsel %vm410_vm6, %v378_v23, %v442_v39  ;;  %v475_v47 = vsel %vm411_vm7, %v379_v24, %v443_v40  ;;  %v444_v51 = vmul.f32 0.2, %v380_v42  ;;  %v384_v54 = vadd.f32 %v3485_v2, %v345_v48  ;;  %v310_v60 = vld [vmem:[%s3480_s9 + $0x70] sm:$0xff]  ;;  %v311_v61 = vld [vmem:[%s3480_s9 + $0x78] sm:$0xff] }
  0x1e   : > { %540 = vst.msk [vmem:[#allocation2 + $0x120] sm:$0xff] %vm502_vm0, %v3290_v0  ;;  %541 = vst.msk [vmem:[#allocation2 + $0x128] sm:$0xff] %vm502_vm0, %v3290_v0  ;;  %v385_v55 = vadd.f32 %v3485_v2, %v346_v49  ;;  %v347_v57 = vmul.f32 %v3473_v1, %v308_v45  ;;  %vm413_vm9 = vcmp.ge.f32.partialorder %v381_v50, 0.0  ;;  %v445_v58 = vmul.f32 0.2, %v381_v50  ;;  %v312_v8 = vld [vmem:[%s3480_s9 + $0x80] sm:$0xff] }
  0x1f   : > { %542 = vst.msk [vmem:[#allocation2 + $0x130] sm:$0x3] %vm505_vm1, %v3290_v0  ;;  %545 = vst.msk [vmem:[#allocation2 + $0x148] sm:$0x3] %vm505_vm1, %v3290_v0  ;;  %v476_v59 = vsel %vm412_vm8, %v380_v42, %v444_v51  ;;  %vm414_vm10 = vcmp.ge.f32.partialorder %v382_v52, 0.0  ;;  %vm415_vm11 = vcmp.ge.f32.partialorder %v383_v53, 0.0  ;;  %v348_v7 = vmul.f32 %v3473_v1, %v309_v56 }
  0x20   : > { %543 = vst.msk [vmem:[#allocation2 + $0x138] sm:$0xff] %vm502_vm0, %v3290_v0  ;;  %544 = vst.msk [vmem:[#allocation2 + $0x140] sm:$0xff] %vm502_vm0, %v3290_v0  ;;  %v446_v62 = vmul.f32 0.2, %v382_v52  ;;  %v447_v63 = vmul.f32 0.2, %v383_v53  ;;  %v477_v5 = vsel %vm413_vm9, %v381_v50, %v445_v58  ;;  %v386_v17 = vadd.f32 %v3485_v2, %v347_v57 }
  0x21   : > { %546 = vst.msk [vmem:[#allocation2 + $0x150] sm:$0xff] %vm502_vm0, %v3290_v0  ;;  %547 = vst.msk [vmem:[#allocation2 + $0x158] sm:$0xff] %vm502_vm0, %v3290_v0  ;;  %vm416_vm12 = vcmp.ge.f32.partialorder %v384_v54, 0.0  ;;  %vm417_vm13 = vcmp.ge.f32.partialorder %v385_v55, 0.0  ;;  %v448_v6 = vmul.f32 0.2, %v384_v54  ;;  %v387_v18 = vadd.f32 %v3485_v2, %v348_v7 }
  0x22   : > { %548 = vst.msk [vmem:[#allocation2 + $0x160] sm:$0x3] %vm505_vm1, %v3290_v0  ;;  %551 = vst.msk [vmem:[#allocation2 + $0x178] sm:$0x3] %vm505_vm1, %v3290_v0  ;;  %v478_v12 = vsel %vm414_vm10, %v382_v52, %v446_v62  ;;  %v479_v13 = vsel %vm415_vm11, %v383_v53, %v447_v63  ;;  %v449_v14 = vmul.f32 0.2, %v385_v55  ;;  %v349_v24 = vmul.f32 %v3473_v1, %v310_v60 }
  0x23   : > { %549 = vst.msk [vmem:[#allocation2 + $0x168] sm:$0xff] %vm502_vm0, %v3290_v0  ;;  %550 = vst.msk [vmem:[#allocation2 + $0x170] sm:$0xff] %vm502_vm0, %v3290_v0  ;;  %v480_v16 = vsel %vm416_vm12, %v384_v54, %v448_v6  ;;  %v313_v19 = vld [vmem:[%s3480_s9 + $0x88] sm:$0xff]  ;;  %v314_v20 = vld [vmem:[%s3480_s9 + $0x90] sm:$0xff]  ;;  %v350_v25 = vmul.f32 %v3473_v1, %v311_v61  ;;  %v351_v26 = vmul.f32 %v3473_v1, %v312_v8  ;;  %vm418_vm14 = vcmp.ge.f32.partialorder %v386_v17, 0.0 }
  0x24   : > { %552 = vst.msk [vmem:[#allocation2 + $0x180] sm:$0xff] %vm502_vm0, %v3290_v0  ;;  %553 = vst.msk [vmem:[#allocation2 + $0x188] sm:$0xff] %vm502_vm0, %v3290_v0  ;;  %v481_v23 = vsel %vm417_vm13, %v385_v55, %v449_v14  ;;  %v315_v27 = vld [vmem:[%s3480_s9 + $0x98] sm:$0xff]  ;;  %vm419_vm15 = vcmp.ge.f32.partialorder %v387_v18, 0.0  ;;  %v450_v29 = vmul.f32 0.2, %v386_v17  ;;  %v388_v31 = vadd.f32 %v3485_v2, %v349_v24 }
  0x25   : > { %554 = vst.msk [vmem:[#allocation2 + $0x190] sm:$0x3] %vm505_vm1, %v3290_v0  ;;  %557 = vst.msk [vmem:[#allocation2 + $0x1a8] sm:$0x3] %vm505_vm1, %v3290_v0  ;;  %v451_v30 = vmul.f32 0.2, %v387_v18  ;;  %v389_v32 = vadd.f32 %v3485_v2, %v350_v25  ;;  %v390_v36 = vadd.f32 %v3485_v2, %v351_v26 }
  0x26   : > { %555 = vst.msk [vmem:[#allocation2 + $0x198] sm:$0xff] %vm502_vm0, %v3290_v0  ;;  %556 = vst.msk [vmem:[#allocation2 + $0x1a0] sm:$0xff] %vm502_vm0, %v3290_v0  ;;  %v482_v35 = vsel %vm418_vm14, %v386_v17, %v450_v29  ;;  %vm420_vm1 = vcmp.ge.f32.partialorder %v388_v31, 0.0  ;;  %v452_v40 = vmul.f32 0.2, %v388_v31  ;;  %v316_v41 = vld [vmem:[%s3480_s9 + $0xa0] sm:$0xff] }
  0x27   : > { %561 = vst.msk [vmem:[#allocation2 + $0x31] sm:$0xff] %vm502_vm0, %v472_v33  ;;  %562 = vst.msk [vmem:[#allocation2 + $0x39] sm:$0xff] %vm502_vm0, %v473_v34  ;;  %v352_v33 = vmul.f32 %v3473_v1, %v313_v19  ;;  %v483_v39 = vsel %vm419_vm15, %v387_v18, %v451_v30  ;;  %vm421_vm2 = vcmp.ge.f32.partialorder %v389_v32, 0.0  ;;  %v453_v43 = vmul.f32 0.2, %v389_v32  ;;  %v318_v53 = vld [vmem:[%s3480_s9 + $0xb0] sm:$0xff] }
  0x28   : > { %559 = vst.msk [vmem:[#allocation2 + $0x19] sm:$0xff] %vm502_vm0, %v470_v37  ;;  %560 = vst.msk [vmem:[#allocation2 + $0x21] sm:$0xff] %vm502_vm0, %v471_v38  ;;  %v353_v37 = vmul.f32 %v3473_v1, %v314_v20  ;;  %v354_v38 = vmul.f32 %v3473_v1, %v315_v27  ;;  %vm422_vm3 = vcmp.ge.f32.partialorder %v390_v36, 0.0  ;;  %v454_v45 = vmul.f32 0.2, %v390_v36  ;;  %v319_v58 = vld [vmem:[%s3480_s9 + $0xb8] sm:$0xff] }
  0x29   : > { %563 = vst.msk [vmem:[#allocation2 + $0x49] sm:$0xff] %vm502_vm0, %v474_v46  ;;  %564 = vst.msk [vmem:[#allocation2 + $0x51] sm:$0xff] %vm502_vm0, %v475_v47  ;;  %v391_v44 = vadd.f32 %v3485_v2, %v352_v33  ;;  %v317_v46 = vld [vmem:[%s3480_s9 + $0xa8] sm:$0xff]  ;;  %v484_v50 = vsel %vm420_vm1, %v388_v31, %v452_v40  ;;  %v485_v56 = vsel %vm421_vm2, %v389_v32, %v453_v43  ;;  %v323_v40 = vld [vmem:[%s3480_s9 + $0xd8] sm:$0xff]  ;;  %vm1936_vm2 = vcmask 392192  }
  0x2a   : > { %565 = vst.msk [vmem:[#allocation2 + $0x61] sm:$0xff] %vm502_vm0, %v476_v59  ;;  %566 = vst.msk [vmem:[#allocation2 + $0x69] sm:$0xff] %vm502_vm0, %v477_v5  ;;  %v392_v51 = vadd.f32 %v3485_v2, %v353_v37  ;;  %v393_v52 = vadd.f32 %v3485_v2, %v354_v38  ;;  %v320_v59 = vld [vmem:[%s3480_s9 + $0xc0] sm:$0xff]  ;;  %v486_v61 = vsel %vm422_vm3, %v390_v36, %v454_v45  ;;  %v321_v63 = vld [vmem:[%s3480_s9 + $0xc8] sm:$0xff]  ;;  %vm2068_vm3 = vcmask 130048  }
  0x2b   : > { %567 = vst.msk [vmem:[#allocation2 + $0x79] sm:$0xff] %vm502_vm0, %v478_v12  ;;  %568 = vst.msk [vmem:[#allocation2 + $0x81] sm:$0xff] %vm502_vm0, %v479_v13  ;;  %vm423_vm4 = vcmp.ge.f32.partialorder %v391_v44, 0.0  ;;  %v455_v57 = vmul.f32 0.2, %v391_v44  ;;  %v355_v8 = vmul.f32 %v3473_v1, %v316_v41  ;;  %v356_v12 = vmul.f32 %v3473_v1, %v317_v46  ;;  %v324_v46 = vld [vmem:[%s3480_s9 + $0xe0] sm:$0xff] }
  0x2c   : > { %569 = vst.msk [vmem:[#allocation2 + $0x91] sm:$0xff] %vm502_vm0, %v480_v16  ;;  %570 = vst.msk [vmem:[#allocation2 + $0x99] sm:$0xff] %vm502_vm0, %v481_v23  ;;  %vm424_vm5 = vcmp.ge.f32.partialorder %v392_v51, 0.0  ;;  %vm425_vm6 = vcmp.ge.f32.partialorder %v393_v52, 0.0  ;;  %v456_v62 = vmul.f32 0.2, %v392_v51  ;;  %v357_v13 = vmul.f32 %v3473_v1, %v318_v53 }
  0x2d   : > { %571 = vst.msk [vmem:[#allocation2 + $0xa9] sm:$0xff] %vm502_vm0, %v482_v35  ;;  %572 = vst.msk [vmem:[#allocation2 + $0xb1] sm:$0xff] %vm502_vm0, %v483_v39  ;;  %v487_v6 = vsel %vm423_vm4, %v391_v44, %v455_v57  ;;  %v457_v7 = vmul.f32 0.2, %v393_v52  ;;  %v358_v14 = vmul.f32 %v3473_v1, %v319_v58  ;;  %v394_v18 = vadd.f32 %v3485_v2, %v355_v8 }
  0x2e   : > { %v3538_v3 = vld [vmem:[#allocation2 + $0x31] sm:$0xff]  ;;  %v3540_v4 = vld [vmem:[#allocation2 + $0x39] sm:$0xff]  ;;  %573 = vst.msk [vmem:[#allocation2 + $0xc1] sm:$0xff] %vm502_vm0, %v484_v50  ;;  %574 = vst.msk [vmem:[#allocation2 + $0xc9] sm:$0xff] %vm502_vm0, %v485_v56  ;;  %v359_v19 = vmul.f32 %v3473_v1, %v320_v59  ;;  %v360_v20 = vmul.f32 %v3473_v1, %v321_v63  ;;  %v395_v24 = vadd.f32 %v3485_v2, %v356_v12  ;;  %vm2101_vm4 = vcmask 326656  }
  0x2f   : > { %v3546_v9 = vpack.i.bf16 %v3540_v4, %v3538_v3  ;;  %v625_v10 = vld [vmem:[#allocation2 + $0x19] sm:$0xff]  ;;  %v626_v11 = vld [vmem:[#allocation2 + $0x21] sm:$0xff]  ;;  %575 = vst.msk [vmem:[#allocation2 + $0xd9] sm:$0xff] %vm502_vm0, %v486_v61  ;;  %576 = vst.msk [vmem:[#allocation2 + $0xe1] sm:$0xff] %vm502_vm0, %v487_v6  ;;  %v489_v17 = vsel %vm425_vm6, %v393_v52, %v457_v7  ;;  %v396_v25 = vadd.f32 %v3485_v2, %v357_v13  ;;  %vm426_vm7 = vcmp.ge.f32.partialorder %v394_v18, 0.0 }
  0x30   : > { %v3551_v15 = vpack.i.bf16 %v626_v11, %v625_v10  ;;  %v3562_v21 = vld [vmem:[#allocation2 + $0x49] sm:$0xff]  ;;  %v3564_v22 = vld [vmem:[#allocation2 + $0x51] sm:$0xff]  ;;  %v488_v11 = vsel %vm424_vm5, %v392_v51, %v456_v62  ;;  %578 = vst.msk [vmem:[#allocation2 + $0xf9] sm:$0xff] %vm502_vm0, %v489_v17  ;;  %v397_v26 = vadd.f32 %v3485_v2, %v358_v14  ;;  %v458_v30 = vmul.f32 0.2, %v394_v18 }
  0x31   : > { %2964 = vrot.lane.b32.xlu1 %v3546_v9, %s3291_s12  ;;  %v3576_v28 = vpack.i.bf16 %v3564_v22, %v3562_v21  ;;  %v3582_v34 = vld [vmem:[#allocation2 + $0x61] sm:$0xff]  ;;  %v3591_v42 = vld [vmem:[#allocation2 + $0x69] sm:$0xff]  ;;  %577 = vst.msk [vmem:[#allocation2 + $0xf1] sm:$0xff] %vm502_vm0, %v488_v11  ;;  %v398_v31 = vadd.f32 %v3485_v2, %v359_v19  ;;  %vm427_vm8 = vcmp.ge.f32.partialorder %v395_v24, 0.0  ;;  %v459_v33 = vmul.f32 0.2, %v395_v24 }
  0x32   : > { %2959 = vrot.lane.b32.xlu0 %v3551_v15, %s3291_s12  ;;  %v3598_v47 = vpack.i.bf16 %v3591_v42, %v3582_v34  ;;  %v3600_v48 = vld [vmem:[#allocation2 + $0x79] sm:$0xff]  ;;  %v3602_v49 = vld [vmem:[#allocation2 + $0x81] sm:$0xff]  ;;  %v322_v10 = vld [vmem:[%s3480_s9 + $0xd0] sm:$0xff]  ;;  %vm428_vm9 = vcmp.ge.f32.partialorder %v396_v25, 0.0  ;;  %vm429_vm10 = vcmp.ge.f32.partialorder %v397_v26, 0.0  ;;  %v490_v36 = vsel %vm426_vm7, %v394_v18, %v458_v30 }
  0x33   : > { %v2978_v54 = vpack.i.bf16 %v3602_v49, %v3600_v48  ;;  %v3609_v55 = vld [vmem:[#allocation2 + $0x91] sm:$0xff]  ;;  %v636_v60 = vld [vmem:[#allocation2 + $0x99] sm:$0xff]  ;;  %v361_v27 = vmul.f32 %v3473_v1, %v322_v10  ;;  %v460_v37 = vmul.f32 0.2, %v396_v25  ;;  %v461_v38 = vmul.f32 0.2, %v397_v26 }
  0x34   : > { %v2983_v5 = vpack.i.bf16 %v636_v60, %v3609_v55  ;;  %v637_v16 = vld [vmem:[#allocation2 + $0xa9] sm:$0xff]  ;;  %v638_v23 = vld [vmem:[#allocation2 + $0xb1] sm:$0xff]  ;;  %v399_v39 = vadd.f32 %v3485_v2, %v360_v20  ;;  %v491_v44 = vsel %vm427_vm8, %v395_v24, %v459_v33  ;;  %579 = vst.msk [vmem:[#allocation2 + $0x109] sm:$0xff] %vm502_vm0, %v490_v36  ;;  %vm430_vm11 = vcmp.ge.f32.partialorder %v398_v31, 0.0 }
  0x35   : > { %2969 = vrot.lane.b32.xlu1 %v3576_v28, %s3291_s12  ;;  %v2988_v29 = vpack.i.bf16 %v638_v23, %v637_v16  ;;  %v639_v32 = vld [vmem:[#allocation2 + $0xc1] sm:$0xff]  ;;  %v640_v35 = vld [vmem:[#allocation2 + $0xc9] sm:$0xff]  ;;  %v462_v45 = vmul.f32 0.2, %v398_v31  ;;  %580 = vst.msk [vmem:[#allocation2 + $0x111] sm:$0xff] %vm502_vm0, %v491_v44  ;;  %v492_v52 = vsel %vm428_vm9, %v396_v25, %v460_v37  ;;  %v493_v53 = vsel %vm429_vm10, %v397_v26, %v461_v38  ;;  %v2182_v30 = vld [vmem:[%s4999_s3 + $0x78] sm:$0xff] }
  0x36   : > { %2974 = vrot.lane.b32.xlu0 %v3598_v47, %s3291_s12  ;;  %v2993_v41 = vpack.i.bf16 %v640_v35, %v639_v32  ;;  %v3644_v43 = vld [vmem:[#allocation2 + $0xd9] sm:$0xff]  ;;  %v325_v50 = vld [vmem:[%s3480_s9 + $0xe8] sm:$0xff]  ;;  %vm431_vm12 = vcmp.ge.f32.partialorder %v399_v39, 0.0  ;;  %581 = vst.msk [vmem:[#allocation2 + $0x121] sm:$0xff] %vm502_vm0, %v492_v52  ;;  %582 = vst.msk [vmem:[#allocation2 + $0x129] sm:$0xff] %vm502_vm0, %v493_v53  ;;  %v362_v59 = vmul.f32 %v3473_v1, %v323_v40  ;;  %2299 = vmatpush1.msra.mxu0 %v2182_v30  ;;  %vm1969_vm5 = vcmask 588800  }
  0x37   : > { %v642_v51 = vld [vmem:[#allocation2 + $0xe1] sm:$0xff]  ;;  %v494_v58 = vsel %vm430_vm11, %v398_v31, %v462_v45  ;;  %v400_v60 = vadd.f32 %v3485_v2, %v361_v27  ;;  %v644_v61 = vld [vmem:[#allocation2 + $0xf9] sm:$0xff]  ;;  %v363_v63 = vmul.f32 %v3473_v1, %v324_v46  ;;  %v2181_v31 = vld [vmem:[%s4999_s3 + $0x70] sm:$0xff]  ;;  %2909 = vmatpush1.msra.mxu1 %v2182_v30  ;;  %2300 = vmatprep.subr.mxu0 %v3290_v0  ;;  %vm2002_vm6 = vcmask 785408  }
  0x38   : > { %v2998_v56 = vpack.i.bf16 %v642_v51, %v3644_v43  ;;  %v3654_v57 = vld [vmem:[#allocation2 + $0xf1] sm:$0xff]  ;;  %583 = vst.msk [vmem:[#allocation2 + $0x139] sm:$0xff] %vm502_vm0, %v494_v58  ;;  %v401_v7 = vadd.f32 %v3485_v2, %v362_v59  ;;  %v2180_v33 = vld [vmem:[%s4999_s3 + $0x68] sm:$0xff]  ;;  %2301 = vmatpush1.msra.mxu0 %v2181_v31  ;;  %2883 = vmatprep.subr.mxu1 %v3290_v0  ;;  %v3704_v53 = vld [vmem:[#allocation2 + $0x3a] sm:$0xff]  ;;  %vm2134_vm7 = vcmask 523264   ;;  %vm2035_vm8 = vcmask 982016  }
  0x39   : > { %2979 = vrot.lane.b32.xlu1 %v2978_v54, %s3291_s12  ;;  %v463_v54 = vmul.f32 0.2, %v399_v39  ;;  %v3003_v6 = vpack.i.bf16 %v644_v61, %v3654_v57  ;;  %vm432_vm13 = vcmp.ge.f32.partialorder %v400_v60, 0.0  ;;  %v464_v8 = vmul.f32 0.2, %v400_v60  ;;  %v655_v36 = vld [vmem:[#allocation2 + $0x2] sm:$0xff]  ;;  %2302 = vmatprep.subr.mxu0 %v3290_v0 }
  0x3a   : > { %2984 = vrot.lane.b32.xlu0 %v2983_v5, %s3291_s12  ;;  %v364_v5 = vmul.f32 %v3473_v1, %v325_v50  ;;  %v402_v10 = vadd.f32 %v3485_v2, %v363_v63  ;;  %vm433_vm14 = vcmp.ge.f32.partialorder %v401_v7, 0.0  ;;  %v465_v12 = vmul.f32 0.2, %v401_v7  ;;  %v656_v37 = vld [vmem:[#allocation2 + $0xa] sm:$0xff]  ;;  %2910 = vmatpush1.msra.mxu1 %v2181_v31  ;;  %v3691_v44 = vld [vmem:[#allocation2 + $0x22] sm:$0xff]  ;;  %v2178_v51 = vld [vmem:[%s4999_s3 + $0x58] sm:$0xff] }
  0x3b   : > { %v495_v62 = vsel %vm431_vm12, %v399_v39, %v463_v54  ;;  %v496_v13 = vsel %vm432_vm13, %v400_v60, %v464_v8  ;;  %v645_v1 = vld [vmem:[#allocation2 + $0x109] sm:$0xff]  ;;  %2303 = vmatpush1.msra.mxu0 %v2180_v33  ;;  %2884 = vmatprep.subr.mxu1 %v3290_v0  ;;  %v3033_v46 = vpack.i.bf16 %v656_v37, %v655_v36  ;;  %v2179_v50 = vld [vmem:[%s4999_s3 + $0x60] sm:$0xff]  ;;  %v3702_v52 = vld [vmem:[#allocation2 + $0x32] sm:$0xff]  ;;  %vm2201_vm9 = vcmask 719872  }
  0x3c   : > { %584 = vst.msk [vmem:[#allocation2 + $0x141] sm:$0xff] %vm502_vm0, %v495_v62  ;;  %v403_v11 = vadd.f32 %v3485_v2, %v364_v5  ;;  %585 = vst.msk [vmem:[#allocation2 + $0x151] sm:$0xff] %vm502_vm0, %v496_v13  ;;  %vm434_vm15 = vcmp.ge.f32.partialorder %v402_v10, 0.0  ;;  %v466_v14 = vmul.f32 0.2, %v402_v10  ;;  %v646_v16 = vld [vmem:[#allocation2 + $0x111] sm:$0xff]  ;;  %v497_v17 = vsel %vm433_vm14, %v401_v7, %v465_v12  ;;  %2304 = vmatprep.subr.mxu0 %v3290_v0 }
  0x3d   : > { %2989 = vrot.lane.b32.xlu1 %v2988_v29, %s3291_s12  ;;  %v3008_v19 = vpack.i.bf16 %v646_v16, %v645_v1  ;;  %v647_v20 = vld [vmem:[#allocation2 + $0x121] sm:$0xff]  ;;  %v648_v23 = vld [vmem:[#allocation2 + $0x129] sm:$0xff]  ;;  %586 = vst.msk [vmem:[#allocation2 + $0x159] sm:$0xff] %vm502_vm0, %v497_v17  ;;  %2305 = vmatpush1.msra.mxu0 %v2179_v50  ;;  %v3715_v59 = vld [vmem:[#allocation2 + $0x52] sm:$0xff]  ;;  %v3043_v60 = vpack.i.bf16 %v3704_v53, %v3702_v52  ;;  %vm2523_vm12 = vcmask 64512  }
  0x3e   : > { %2994 = vrot.lane.b32.xlu0 %v2993_v41, %s3291_s12  ;;  %vm435_vm1 = vcmp.ge.f32.partialorder %v403_v11, 0.0  ;;  %v467_v18 = vmul.f32 0.2, %v403_v11  ;;  %v498_v2 = vsel %vm434_vm15, %v402_v10, %v466_v14  ;;  %v3013_v24 = vpack.i.bf16 %v648_v23, %v647_v20  ;;  %v3689_v41 = vld [vmem:[#allocation2 + $0x1a] sm:$0xff]  ;;  %2911 = vmatpush1.msra.mxu1 %v2180_v33  ;;  %v3713_v58 = vld [vmem:[#allocation2 + $0x4a] sm:$0xff]  ;;  %v3725_v62 = vld [vmem:[#allocation2 + $0x62] sm:$0xff] }
  0x3f   : > { %v649_v25 = vld [vmem:[#allocation2 + $0x139] sm:$0xff]  ;;  %587 = vst.msk [vmem:[#allocation2 + $0x169] sm:$0xff] %vm502_vm0, %v498_v2  ;;  %v3038_v54 = vpack.i.bf16 %v3691_v44, %v3689_v41  ;;  %2306 = vmatprep.subr.mxu0 %v3290_v0  ;;  %2885 = vmatprep.subr.mxu1 %v3290_v0  ;;  %v2176_v61 = vld [vmem:[%s4999_s3 + $0x48] sm:$0xff]  ;;  %v3048_v5 = vpack.i.bf16 %v3715_v59, %v3713_v58  ;;  %v3761_v14 = vld [vmem:[%s4999_s3 + $0x30] sm:$0xff] }
  0x40   : > { %v499_v26 = vsel %vm435_vm1, %v403_v11, %v467_v18  ;;  %2307 = vmatpush1.msra.mxu0 %v2178_v51  ;;  %v3727_v63 = vld [vmem:[#allocation2 + $0x6a] sm:$0xff]  ;;  %2912 = vmatpush1.msra.mxu1 %v2179_v50  ;;  %v3736_v7 = vld [vmem:[#allocation2 + $0x7a] sm:$0xff]  ;;  %v3738_v8 = vld [vmem:[#allocation2 + $0x82] sm:$0xff] }
  0x41   : > { %2999 = vrot.lane.b32.xlu1 %v2998_v56, %s3291_s12  ;;  %588 = vst.msk [vmem:[#allocation2 + $0x171] sm:$0xff] %vm502_vm0, %v499_v26  ;;  %v2177_v56 = vld [vmem:[%s4999_s3 + $0x50] sm:$0xff]  ;;  %2308 = vmatprep.subr.mxu0 %v3290_v0  ;;  %v3053_v10 = vpack.i.bf16 %v3727_v63, %v3725_v62  ;;  %v3748_v11 = vld [vmem:[%s4999_s3 + $0x38] sm:$0xff]  ;;  %v3058_v1 = vpack.i.bf16 %v3738_v8, %v3736_v7  ;;  %v671_v20 = vld [vmem:[#allocation2 + $0xc2] sm:$0xff] }
  0x42   : > { %3004 = vrot.lane.b32.xlu0 %v3003_v6, %s3291_s12  ;;  %2309 = vmatpush1.msra.mxu0 %v2177_v56  ;;  %v2175_v6 = vld [vmem:[%s4999_s3 + $0x40] sm:$0xff]  ;;  %v3750_v12 = vld [vmem:[#allocation2 + $0x92] sm:$0xff]  ;;  %v3763_v16 = vld [vmem:[#allocation2 + $0xaa] sm:$0xff] }
  0x43   : > { %v650_v27 = vld [vmem:[#allocation2 + $0x141] sm:$0xff]  ;;  %v651_v32 = vld [vmem:[#allocation2 + $0x151] sm:$0xff]  ;;  %2310 = vmatprep.subr.mxu0 %v3290_v0  ;;  %2886 = vmatprep.subr.mxu1 %v3290_v0 }
  0x44   : > { %v3018_v29 = vpack.i.bf16 %v650_v27, %v649_v25  ;;  %v652_v35 = vld [vmem:[#allocation2 + $0x159] sm:$0xff]  ;;  %2311 = vmatpush1.msra.mxu0 %v2176_v61  ;;  %2913 = vmatpush1.msra.mxu1 %v2178_v51  ;;  %v672_v23 = vld [vmem:[#allocation2 + $0xca] sm:$0xff]  ;;  %v3787_v26 = vld [vmem:[#allocation2 + $0xe2] sm:$0xff] }
  0x45   : > { %3009 = vrot.lane.b32.xlu1 %v3008_v19, %s3291_s12  ;;  %v3023_v38 = vpack.i.bf16 %v652_v35, %v651_v32  ;;  %2312 = vmatprep.subr.mxu0 %v3290_v0  ;;  %v3752_v13 = vld [vmem:[#allocation2 + $0x9a] sm:$0xff]  ;;  %v670_v17 = vld [vmem:[#allocation2 + $0xb2] sm:$0xff]  ;;  %v3774_v19 = vld [vmem:[%s4999_s3 + $0x28] sm:$0xff]  ;;  %v3073_v27 = vpack.i.bf16 %v672_v23, %v671_v20 }
  0x46   : > { %3014 = vrot.lane.b32.xlu0 %v3013_v24, %s3291_s12  ;;  %v653_v39 = vld [vmem:[#allocation2 + $0x169] sm:$0xff]  ;;  %2313 = vmatpush1.msra.mxu0 %v2175_v6  ;;  %v3063_v18 = vpack.i.bf16 %v3752_v13, %v3750_v12  ;;  %v3068_v2 = vpack.i.bf16 %v670_v17, %v3763_v16  ;;  %v3783_v24 = vld [vmem:[%s4999_s3 + $0x20] sm:$0xff]  ;;  %v3798_v30 = vld [vmem:[#allocation2 + $0xf2] sm:$0xff] }
  0x47   : > { %2314 = vmatprep.subr.mxu0 %v3290_v0  ;;  %2887 = vmatprep.subr.mxu1 %v3290_v0  ;;  %v3785_v25 = vld [vmem:[#allocation2 + $0xda] sm:$0xff]  ;;  %v3810_v33 = vld [vmem:[%s4999_s3 + $0x10] sm:$0xff]  ;;  %v682_v51 = vld [vmem:[#allocation2 + $0x142] sm:$0xff] }
  0x48   : > { %v654_v40 = vld [vmem:[#allocation2 + $0x171] sm:$0xff]  ;;  %2315 = vmatpush1.msra.mxu0 %v3748_v11  ;;  %2914 = vmatpush1.msra.mxu1 %v2177_v56  ;;  %v3800_v31 = vld [vmem:[#allocation2 + $0xfa] sm:$0xff]  ;;  %v3078_v32 = vpack.i.bf16 %v3787_v26, %v3785_v25 }
  0x49   : > { %3019 = vrot.lane.b32.xlu1 %v3018_v29, %s3291_s12  ;;  %v3028_v45 = vpack.i.bf16 %v654_v40, %v653_v39  ;;  %2316 = vmatprep.subr.mxu0 %v3290_v0  ;;  %v3796_v29 = vld [vmem:[%s4999_s3 + $0x18] sm:$0xff]  ;;  %v3812_v35 = vld [vmem:[#allocation2 + $0x10a] sm:$0xff]  ;;  %v3083_v37 = vpack.i.bf16 %v3800_v31, %v3798_v30  ;;  %v679_v39 = vld [vmem:[#allocation2 + $0x122] sm:$0xff] }
  0x4a   : > { %3024 = vrot.lane.b32.xlu0 %v3023_v38, %s3291_s12  ;;  %2317 = vmatpush1.msra.mxu0 %v3761_v14  ;;  %v678_v36 = vld [vmem:[#allocation2 + $0x112] sm:$0xff]  ;;  %v3823_v38 = vld [vmem:[%s4999_s3 + $0x8] sm:$0xff]  ;;  %v681_v50 = vld [vmem:[#allocation2 + $0x13a] sm:$0xff] }
  0x4b   : > { %2318 = vmatprep.subr.mxu0 %v3290_v0  ;;  %2888 = vmatprep.subr.mxu1 %v3290_v0  ;;  %v680_v40 = vld [vmem:[#allocation2 + $0x12a] sm:$0xff]  ;;  %v3863_v20 = vld [vmem:[#allocation2 + $0x20] sm:$0xff] }
  0x4c   : > { %2319 = vmatpush1.msra.mxu0 %v3774_v19  ;;  %2915 = vmatpush1.msra.mxu1 %v2176_v61  ;;  %v3841_v56 = vld [vmem:[%s4999_s3 + $0xd0] sm:$0xff]  ;;  %v684_v61 = vld [vmem:[#allocation2 + $0x15a] sm:$0xff] }
  0x4d   : > { %3029 = vrot.lane.b32.xlu1 %v3028_v45, %s3291_s12  ;;  %2320 = vmatprep.subr.mxu0 %v3290_v0  ;;  %v3088_v45 = vpack.i.bf16 %v678_v36, %v3812_v35  ;;  %v3887_v36 = vld [vmem:[%s4999_s3 + $0xb0] sm:$0xff] }
  0x4e   : > { %3034 = vrot.lane.b32.xlu0 %v3033_v46, %s3292_s28  ;;  %2321 = vmatpush1.msra.mxu0 %v3783_v24  ;;  %v3832_v46 = vld [vmem:[%s4999_s3] sm:$0xff] }
  0x4f   : > { %2322 = vmatprep.subr.mxu0 %v3290_v0  ;;  %2889 = vmatprep.subr.mxu1 %v3290_v0 }
  0x50   : > { %2323 = vmatpush1.msra.mxu0 %v3796_v29  ;;  %2916 = vmatpush1.msra.mxu1 %v2175_v6  ;;  %v3850_v6 = vld [vmem:[%s4999_s3 + $0xc8] sm:$0xff] }
  0x51   : > { %3039 = vrot.lane.b32.xlu1 %v3038_v54, %s3292_s28  ;;  %2324 = vmatprep.subr.mxu0 %v3290_v0  ;;  %v3093_v54 = vpack.i.bf16 %v680_v40, %v679_v39  ;;  %v3891_v39 = vld [vmem:[#allocation2 + $0x50] sm:$0xff] }
  0x52   : > { %3044 = vrot.lane.b32.xlu0 %v3043_v60, %s3292_s28  ;;  %2325 = vmatpush1.msra.mxu0 %v3810_v33  ;;  %v683_v60 = vld [vmem:[#allocation2 + $0x152] sm:$0xff] }
  0x53   : > { %2326 = vmatprep.subr.mxu0 %v3290_v0  ;;  %2890 = vmatprep.subr.mxu1 %v3290_v0  ;;  %v3103_v17 = vpack.i.bf16 %v684_v61, %v683_v60  ;;  %v3917_v60 = vld [vmem:[#allocation2 + $0x78] sm:$0xff] }
  0x54   : > { %2327 = vmatpush1.msra.mxu0 %v3823_v38  ;;  %2917 = vmatpush1.msra.mxu1 %v3748_v11  ;;  %v3859_v11 = vld [vmem:[%s4999_s3 + $0xc0] sm:$0xff]  ;;  %v703_v61 = vld [vmem:[#allocation2 + $0xd8] sm:$0xff] }
  0x55   : > { %3049 = vrot.lane.b32.xlu1 %v3048_v5, %s3292_s28  ;;  %2328 = vmatprep.subr.mxu0 %v3290_v0  ;;  %v3098_v5 = vpack.i.bf16 %v682_v51, %v681_v50  ;;  %v3904_v50 = vld [vmem:[#allocation2 + $0x60] sm:$0xff]  ;;  %v3906_v51 = vld [vmem:[#allocation2 + $0x68] sm:$0xff] }
  0x56   : > { %3054 = vrot.lane.b32.xlu0 %v3053_v10, %s3292_s28  ;;  %2329 = vmatpush1.msra.mxu0 %v3832_v46  ;;  %v685_v10 = vld [vmem:[#allocation2 + $0x16a] sm:$0xff] }
  0x57   : > { %2340 = vmatprep.subr.mxu0 %v3290_v0  ;;  %2891 = vmatprep.subr.mxu1 %v3290_v0 }
  0x58   : > { %2341 = vmatpush2.msra.mxu0 %v3841_v56  ;;  %2918 = vmatpush1.msra.mxu1 %v3761_v14 }
  0x59   : > { %3059 = vrot.lane.b32.xlu1 %v3058_v1, %s3292_s28  ;;  %v686_v1 = vld [vmem:[#allocation2 + $0x172] sm:$0xff]  ;;  %2342 = vmatprep.subr.mxu0 %v3290_v0 }
  0x5a   : > { %3064 = vrot.lane.b32.xlu0 %v3063_v18, %s3292_s28  ;;  %v3861_v18 = vld [vmem:[#allocation2 + $0x18] sm:$0xff]  ;;  %2343 = vmatpush2.msra.mxu0 %v3850_v6  ;;  %v3108_v23 = vpack.i.bf16 %v686_v1, %v685_v10  ;;  %v3133_v1 = vpack.i.bf16 %v703_v61, %v3917_v60 }
  0x5b   : > { %2344 = vmatprep.subr.mxu0 %v3290_v0  ;;  %2892 = vmatprep.subr.mxu1 %v3290_v0  ;;  %v3113_v14 = vpack.i.bf16 %v3863_v20, %v3861_v18  ;;  %v2186_v10 = vld [vmem:[%s4999_s3 + $0x98] sm:$0xff] }
  0x5c   : > { %2345 = vmatpush2.msra.mxu0 %v3859_v11  ;;  %2919 = vmatpush1.msra.mxu1 %v3774_v19 }
  0x5d   : > { %3069 = vrot.lane.b32.xlu1 %v3068_v2, %s3292_s28  ;;  %v3872_v2 = vld [vmem:[%s4999_s3 + $0xb8] sm:$0xff]  ;;  %2346 = vmatprep.subr.mxu0 %v3290_v0 }
  0x5e   : > { %3074 = vrot.lane.b32.xlu0 %v3073_v27, %s3292_s28  ;;  %v3874_v27 = vld [vmem:[#allocation2 + $0x30] sm:$0xff]  ;;  %2347 = vmatpush2.msra.mxu0 %v3872_v2 }
  0x5f   : > { %2348 = vmatprep.subr.mxu0 %v3290_v0  ;;  %2893 = vmatprep.subr.mxu1 %v3290_v0 }
  0x60   : > { %2349 = vmatpush2.msra.mxu0 %v3887_v36  ;;  %2920 = vmatpush1.msra.mxu1 %v3783_v24  ;;  %v2185_v24 = vld [vmem:[%s4999_s3 + $0x90] sm:$0xff] }
  0x61   : > { %3079 = vrot.lane.b32.xlu1 %v3078_v32, %s3292_s28  ;;  %v3876_v32 = vld [vmem:[#allocation2 + $0x38] sm:$0xff]  ;;  %2350 = vmatprep.subr.mxu0 %v3290_v0 }
  0x62   : > { %3084 = vrot.lane.b32.xlu0 %v3083_v37, %s3292_s28  ;;  %v3889_v37 = vld [vmem:[#allocation2 + $0x48] sm:$0xff]  ;;  %v3118_v40 = vpack.i.bf16 %v3876_v32, %v3874_v27  ;;  %2894 = vmatprep.subr.mxu1 %v3290_v0 }
  0x63   : > { %v3123_v19 = vpack.i.bf16 %v3891_v39, %v3889_v37  ;;  %2921 = vmatpush1.msra.mxu1 %v3796_v29 }
  0x64   : > { %2895 = vmatprep.subr.mxu1 %v3290_v0 }
  0x65   : > { %3089 = vrot.lane.b32.xlu1 %v3088_v45, %s3292_s28  ;;  %v3902_v45 = vld [vmem:[%s4999_s3 + $0xa8] sm:$0xff]  ;;  %2922 = vmatpush1.msra.mxu1 %v3810_v33  ;;  %v727_v33 = vld [vmem:[#allocation2 + $0x79] sm:$0xff] }
  0x66   : > { %3094 = vrot.lane.b32.xlu0 %v3093_v54, %s3292_s28  ;;  %v2187_v54 = vld [vmem:[%s4999_s3 + $0xa0] sm:$0xff]  ;;  %2351 = vmatpush2.msra.mxu0 %v3902_v45 }
  0x67   : > { %2352 = vmatprep.subr.mxu0 %v3290_v0  ;;  %2896 = vmatprep.subr.mxu1 %v3290_v0 }
  0x68   : > { %2353 = vmatpush2.msra.mxu0 %v2187_v54  ;;  %2923 = vmatpush1.msra.mxu1 %v3823_v38 }
  0x69   : > { %3099 = vrot.lane.b32.xlu1 %v3098_v5, %s3292_s28  ;;  %v3128_v5 = vpack.i.bf16 %v3906_v51, %v3904_v50  ;;  %2354 = vmatprep.subr.mxu0 %v3290_v0 }
  0x6a   : > { %3104 = vrot.lane.b32.xlu0 %v3103_v17, %s3292_s28  ;;  %2355 = vmatpush2.msra.mxu0 %v2186_v10  ;;  %v2184_v17 = vld [vmem:[%s4999_s3 + $0x88] sm:$0xff] }
  0x6b   : > { %2356 = vmatprep.subr.mxu0 %v3290_v0  ;;  %2897 = vmatprep.subr.mxu1 %v3290_v0 }
  0x6c   : > { %2357 = vmatpush2.msra.mxu0 %v2185_v24  ;;  %2924 = vmatpush1.msra.mxu1 %v3832_v46 }
  0x6d   : > { %3109 = vrot.lane.b32.xlu1 %v3108_v23, %s3292_s28  ;;  %2358 = vmatprep.subr.mxu0 %v3290_v0  ;;  %v2183_v23 = vld [vmem:[%s4999_s3 + $0x80] sm:$0xff] }
  0x6e   : > { %3114 = vrot.lane.b32.xlu0 %v3113_v14, %s3293_s21  ;;  %2359 = vmatpush2.msra.mxu0 %v2184_v17 }
  0x6f   : > { %2360 = vmatprep.subr.mxu0 %v3290_v0  ;;  %2898 = vmatprep.subr.mxu1 %v3290_v0 }
  0x70   : > { %2361 = vmatpush2.msra.mxu0 %v2183_v23  ;;  %2925 = vmatpush2.msra.mxu1 %v3841_v56 }
  0x71   : > { %3119 = vrot.lane.b32.xlu1 %v3118_v40, %s3293_s21  ;;  %2899 = vmatprep.subr.mxu1 %v3290_v0 }
  0x72   : > { %3124 = vrot.lane.b32.xlu0 %v3123_v19, %s3293_s21  ;;  %2926 = vmatpush2.msra.mxu1 %v3850_v6  ;;  %v4142_v19 = vld [vmem:[#allocation2 + $0xe1] sm:$0xff] }
  0x73   : > { %2900 = vmatprep.subr.mxu1 %v3290_v0 }
  0x74   : > { %2927 = vmatpush2.msra.mxu1 %v3859_v11 }
  0x75   : > { %3129 = vrot.lane.b32.xlu1 %v3128_v5, %s3293_s21  ;;  %2901 = vmatprep.subr.mxu1 %v3290_v0 }
  0x76   : > { %3134 = vrot.lane.b32.xlu0 %v3133_v1, %s3293_s21  ;;  %2928 = vmatpush2.msra.mxu1 %v3872_v2  ;;  %v4126_v2 = vld [vmem:[#allocation2 + $0xe0] sm:$0xff] }
  0x77   : > { %2902 = vmatprep.subr.mxu1 %v3290_v0 }
  0x78   : > { %2929 = vmatpush2.msra.mxu1 %v3887_v36 }
  0x79   : > { %1424 = vrot.lane.b32.xlu1 %v3689_v41, %s3294_s13  ;;  %2903 = vmatprep.subr.mxu1 %v3290_v0 }
  0x7a   : > { %1552 = vrot.lane.b32.xlu0 %v3874_v27, %s3295_s14  ;;  %2930 = vmatpush2.msra.mxu1 %v3902_v45  ;;  %v728_v45 = vld [vmem:[#allocation2 + $0x81] sm:$0xff] }
  0x7b   : > { %2904 = vmatprep.subr.mxu1 %v3290_v0  ;;  %v3168_v5 = vpack.i.bf16 %v4142_v19, %v728_v45  ;;  %v591_v45 = vld [vmem:[#allocation2] sm:$0xff] }
  0x7c   : > { %2931 = vmatpush2.msra.mxu1 %v2187_v54 }
  0x7d   : > { %1680 = vrot.lane.b32.xlu1 %v3538_v3, %s3296_s15  ;;  %2905 = vmatprep.subr.mxu1 %v3290_v0 }
  0x7e   : > { %3139 = vrot.lane.b32.xlu0 %v3551_v15, %s3297_s16  ;;  %2932 = vmatpush2.msra.mxu1 %v2186_v10 }
  0x7f   : > { %2906 = vmatprep.subr.mxu1 %v3290_v0 }
  0x80   : > { %2933 = vmatpush2.msra.mxu1 %v2185_v24 }
  0x81   : > { %1808 = vrot.lane.b32.xlu1 %v3702_v52, %s3298_s17  ;;  %2907 = vmatprep.subr.mxu1 %v3290_v0 }
  0x82   : > { %1426 = vrot.lane.b32.xlu0 %v3691_v44, %s3294_s13  ;;  %2934 = vmatpush2.msra.mxu1 %v2184_v17 }
  0x83   : > { %2908 = vmatprep.subr.mxu1 %v3290_v0 }
  0x84   : > { %2935 = vmatpush2.msra.mxu1 %v2183_v23 }
  0x85   : > { %1554 = vrot.lane.b32.xlu1 %v3876_v32, %s3295_s14 }
  0x86   : > { %1682 = vrot.lane.b32.xlu0 %v3540_v4, %s3296_s15 }
  0x89   : > { %1810 = vrot.lane.b32.xlu1 %v3704_v53, %s3298_s17  ;;  %v4000_v3 = vpop.permute.xlu0 %2954 }
  0x8a   : > { %1428 = vrot.lane.b32.xlu0 %v3702_v52, %s3294_s13 }
  0x8d   : > { %1556 = vrot.lane.b32.xlu1 %v3889_v37, %s3295_s14 }
  0x8e   : > { %1684 = vrot.lane.b32.xlu0 %v3562_v21, %s3296_s15 }
  0x91   : > { %3144 = vrot.lane.b32.xlu1 %v3546_v9, %s3297_s16 }
  0x92   : > { %1812 = vrot.lane.b32.xlu0 %v3713_v58, %s3298_s17 }
  0x95   : > { %1430 = vrot.lane.b32.xlu1 %v3704_v53, %s3294_s13 }
  0x96   : > { %1558 = vrot.lane.b32.xlu0 %v3891_v39, %s3295_s14 }
  0x99   : > { %1686 = vrot.lane.b32.xlu1 %v3564_v22, %s3296_s15 }
  0x9a   : > { %1814 = vrot.lane.b32.xlu0 %v3715_v59, %s3298_s17 }
  0x9d   : > { %1432 = vrot.lane.b32.xlu1 %v3713_v58, %s3294_s13  ;;  %v4064_v58 = vld [vmem:[#allocation2 + $0x80] sm:$0xff] }
  0x9e   : > { %1560 = vrot.lane.b32.xlu0 %v3904_v50, %s3295_s14  ;;  %v3163_v36 = vpack.i.bf16 %v4126_v2, %v4064_v58 }
  0xa1   : > { %1688 = vrot.lane.b32.xlu1 %v3582_v34, %s3296_s15 }
  0xa2   : > { %3149 = vrot.lane.b32.xlu0 %v3576_v28, %s3297_s16 }
  0xa3   : > { %v4006_v4 = vpop.permute.xlu1 %2964 }
  0xa4   : > { %v4010_v0 = vpop.permute.xlu0 %2959 }
  0xa5   : > { %1816 = vrot.lane.b32.xlu1 %v3725_v62, %s3298_s17 }
  0xa6   : > { %1434 = vrot.lane.b32.xlu0 %v3715_v59, %s3294_s13 }
  0xa7   : > { %v4014_v9 = vpop.permute.xlu1 %2969 }
  0xa8   : > { %v4020_v15 = vpop.permute.xlu0 %2974 }
  0xa9   : > { %1562 = vrot.lane.b32.xlu1 %v3906_v51, %s3295_s14 }
  0xaa   : > { %1690 = vrot.lane.b32.xlu0 %v3591_v42, %s3296_s15 }
  0xab   : > { %v4024_v21 = vpop.permute.xlu1 %2979 }
  0xac   : > { %v4028_v22 = vpop.permute.xlu0 %2984 }
  0xad   : > { %1818 = vrot.lane.b32.xlu1 %v3727_v63, %s3298_s17 }
  0xae   : > { %1436 = vrot.lane.b32.xlu0 %v3725_v62, %s3294_s13 }
  0xaf   : > { %v4034_v41 = vpop.permute.xlu1 %2989 }
  0xb0   : > { %5017 = vst [vmem:[#allocation3_spill] sm:$0xff] %v4034_v41  ;;  %v4038_v34 = vpop.permute.xlu0 %2994  ;;  %v592_v41 = vld [vmem:[#allocation2 + $0x8] sm:$0xff] }
  0xb1   : > { %1564 = vrot.lane.b32.xlu1 %v3917_v60, %s3295_s14  ;;  %v4147_v60 = vld [vmem:[#allocation2 + $0xf9] sm:$0xff] }
  0xb2   : > { %1692 = vrot.lane.b32.xlu0 %v3600_v48, %s3296_s15 }
  0xb3   : > { %v4044_v28 = vpop.permute.xlu1 %2999 }
  0xb4   : > { %v4048_v44 = vpop.permute.xlu0 %3004 }
  0xb5   : > { %3154 = vrot.lane.b32.xlu1 %v3598_v47, %s3297_s16 }
  0xb6   : > { %1820 = vrot.lane.b32.xlu0 %v3736_v7, %s3298_s17 }
  0xb7   : > { %v4054_v42 = vpop.permute.xlu1 %3009 }
  0xb8   : > { %5018 = vst [vmem:[#allocation4_spill] sm:$0xff] %v4054_v42  ;;  %v4058_v52 = vpop.permute.xlu0 %3014 }
  0xb9   : > { %5019 = vst [vmem:[#allocation5_spill] sm:$0xff] %v4058_v52  ;;  %1438 = vrot.lane.b32.xlu1 %v3727_v63, %s3294_s13  ;;  %v4084_v63 = vld [vmem:[#allocation2 + $0x90] sm:$0xff] }
  0xba   : > { %1566 = vrot.lane.b32.xlu0 %v4064_v58, %s3295_s14 }
  0xbb   : > { %v4062_v53 = vpop.permute.xlu1 %3019 }
  0xbc   : > { %5020 = vst [vmem:[#allocation6_spill] sm:$0xff] %v4062_v53  ;;  %v4068_v48 = vpop.permute.xlu0 %3024 }
  0xbd   : > { %5021 = vst [vmem:[#allocation7_spill] sm:$0xff] %v4068_v48  ;;  %1694 = vrot.lane.b32.xlu1 %v3602_v49, %s3296_s15  ;;  %v4090_v49 = vld [vmem:[#allocation2 + $0xf0] sm:$0xff] }
  0xbe   : > { %1822 = vrot.lane.b32.xlu0 %v3738_v8, %s3298_s17 }
  0xbf   : > { %v4074_v47 = vpop.permute.xlu1 %3029 }
  0xc0   : > { %5022 = vst [vmem:[#allocation8_spill] sm:$0xff] %v4074_v47  ;;  %v4076_v59 = vpop.permute.xlu0 %3034  ;;  %v729_v47 = vld [vmem:[#allocation2 + $0x91] sm:$0xff] }
  0xc1   : > { %1440 = vrot.lane.b32.xlu1 %v3736_v7, %s3294_s13 }
  0xc2   : > { %1456 = vrot.lane.b32.xlu0 %v3785_v25, %s3294_s13  ;;  %v3158_v25 = vpack.i.bf16 %v3644_v43, %v727_v33 }
  0xc3   : > { %v4082_v62 = vpop.permute.xlu1 %3039 }
  0xc4   : > { %v4086_v29 = vpop.permute.xlu0 %3044 }
  0xc5   : > { %1568 = vrot.lane.b32.xlu1 %v4084_v63, %s3295_s14 }
  0xc6   : > { %1584 = vrot.lane.b32.xlu0 %v4090_v49, %s3295_s14 }
  0xc7   : > { %v4094_v38 = vpop.permute.xlu1 %3049 }
  0xc8   : > { %v4096_v7 = vpop.permute.xlu0 %3054 }
  0xc9   : > { %1696 = vrot.lane.b32.xlu1 %v3609_v55, %s3296_s15 }
  0xca   : > { %1712 = vrot.lane.b32.xlu0 %v3654_v57, %s3296_s15  ;;  %v4124_v57 = vld [vmem:[#allocation2 + $0x98] sm:$0xff] }
  0xcb   : > { %v4103_v46 = vpop.permute.xlu1 %3059 }
  0xcc   : > { %v4105_v56 = vpop.permute.xlu0 %3064 }
  0xcd   : > { %3159 = vrot.lane.b32.xlu1 %v3158_v25, %s3297_s16  ;;  %v4177_v25 = vld [vmem:[#allocation2 + $0xa8] sm:$0xff] }
  0xce   : > { %1824 = vrot.lane.b32.xlu0 %v3750_v12, %s3298_s17 }
  0xcf   : > { %v4110_v6 = vpop.permute.xlu1 %3069 }
  0xd0   : > { %5023 = vst [vmem:[#allocation9_spill] sm:$0xff] %v4110_v6  ;;  %v4112_v11 = vpop.permute.xlu0 %3074  ;;  %v2957_v6 = vunpack.i.h.bf16 %v4000_v3 }
  0xd1   : > { %1840 = vrot.lane.b32.xlu1 %v3798_v30, %s3298_s17 }
  0xd2   : > { %1442 = vrot.lane.b32.xlu0 %v3738_v8, %s3294_s13  ;;  %v4134_v8 = vld [vmem:[#allocation2 + $0xf8] sm:$0xff] }
  0xd3   : > { %v4118_v55 = vpop.permute.xlu1 %3079 }
  0xd4   : > { %v4120_v43 = vpop.permute.xlu0 %3084 }
  0xd5   : > { %1458 = vrot.lane.b32.xlu1 %v3787_v26, %s3294_s13  ;;  %v4140_v26 = vld [vmem:[#allocation2 + $0x99] sm:$0xff] }
  0xd6   : > { %1570 = vrot.lane.b32.xlu0 %v4124_v57, %s3295_s14 }
  0xd7   : > { %v4130_v14 = vpop.permute.xlu1 %3089 }
  0xd8   : > { %5024 = vst [vmem:[#allocation10_spill] sm:$0xff] %v4130_v14  ;;  %v4136_v40 = vpop.permute.xlu0 %3094 }
  0xd9   : > { %5025 = vst [vmem:[#allocation11_spill] sm:$0xff] %v4136_v40  ;;  %1586 = vrot.lane.b32.xlu1 %v4134_v8, %s3295_s14 }
  0xda   : > { %3164 = vrot.lane.b32.xlu0 %v3163_v36, %s3293_s21  ;;  %v3173_v36 = vpack.i.bf16 %v4090_v49, %v4084_v63  ;;  %v4193_v49 = vld [vmem:[#allocation2 + $0x109] sm:$0xff] }
  0xdb   : > { %v4145_v54 = vpop.permute.xlu1 %3099 }
  0xdc   : > { %5026 = vst [vmem:[#allocation12_spill] sm:$0xff] %v4145_v54  ;;  %v4149_v61 = vpop.permute.xlu0 %3104 }
  0xdd   : > { %5027 = vst [vmem:[#allocation13_spill] sm:$0xff] %v4149_v61  ;;  %1698 = vrot.lane.b32.xlu1 %v4140_v26, %s3296_s15  ;;  %v737_v61 = vld [vmem:[#allocation2 + $0xf1] sm:$0xff] }
  0xde   : > { %1714 = vrot.lane.b32.xlu0 %v4147_v60, %s3296_s15  ;;  %v3178_v40 = vpack.i.bf16 %v737_v61, %v729_v47  ;;  %v3037_v47 = vunpack.i.h.bf16 %v4076_v59 }
  0xdf   : > { %v4156_v10 = vpop.permute.xlu1 %3109 }
  0xe0   : > { %5028 = vst [vmem:[#allocation14_spill] sm:$0xff] %v4156_v10  ;;  %v4158_v1 = vpop.permute.xlu0 %3114  ;;  %v4189_v10 = vld [vmem:[#allocation2 + $0xa9] sm:$0xff] }
  0xe1   : > { %3169 = vrot.lane.b32.xlu1 %v3168_v5, %s3297_s16  ;;  %v3116_v48 = vunpack.i.l.bf16 %v4158_v1 }
  0xe2   : > { %1826 = vrot.lane.b32.xlu0 %v3752_v13, %s3298_s17 }
  0xe3   : > { %v4163_v24 = vpop.permute.xlu1 %3119 }
  0xe4   : > { %v4165_v17 = vpop.permute.xlu0 %3124 }
  0xe5   : > { %1842 = vrot.lane.b32.xlu1 %v3800_v31, %s3298_s17  ;;  %v4183_v31 = vld [vmem:[#allocation2 + $0x108] sm:$0xff] }
  0xe6   : > { %1444 = vrot.lane.b32.xlu0 %v3750_v12, %s3294_s13  ;;  %v2956_v12 = vunpack.i.l.bf16 %v4000_v3 }
  0xe7   : > { %v4171_v23 = vpop.permute.xlu1 %3129 }
  0xe8   : > { %v4173_v33 = vpop.permute.xlu0 %3134  ;;  %v1904_v54 = vsel %vm502_vm0, %v591_v45, %v2956_v12 }
  0xe9   : > { %1460 = vrot.lane.b32.xlu1 %v3798_v30, %s3294_s13  ;;  %v3036_v30 = vunpack.i.l.bf16 %v4076_v59 }
  0xea   : > { %1572 = vrot.lane.b32.xlu0 %v4177_v25, %s3295_s14 }
  0xeb   : > { %v1425_v13 = vpop.permute.xlu1 %1424  ;;  %v1937_v52 = vsel %vm1936_vm2, %v1904_v54, %v3036_v30 }
  0xec   : > { %v1553_v5 = vpop.permute.xlu0 %1552  ;;  %v1970_v45 = vsel %vm1969_vm5, %v1937_v52, %v3116_v48  ;;  %v1905_v52 = vsel %vm502_vm0, %v592_v41, %v2957_v6  ;;  %v326_v6 = vld [vmem:[%s3480_s9 + $0xf0] sm:$0xff] }
  0xed   : > { %1588 = vrot.lane.b32.xlu1 %v4183_v31, %s3295_s14  ;;  %v2069_v14 = vsel %vm2068_vm3, %v1425_v13, %v1553_v5  ;;  %v3117_v5 = vunpack.i.h.bf16 %v4158_v1  ;;  %v1938_v48 = vsel %vm1936_vm2, %v1905_v52, %v3037_v47  ;;  %v762_v1 = vld [vmem:[#allocation2 + $0x9a] sm:$0xff]  ;;  %v3183_v52 = vpack.i.bf16 %v4134_v8, %v4124_v57 }
  0xee   : > { %3174 = vrot.lane.b32.xlu0 %v3173_v36, %s3293_s21 }
  0xef   : > { %v1681_v63 = vpop.permute.xlu1 %1680 }
  0xf0   : > { %v3140_v53 = vpop.permute.xlu0 %3139  ;;  %v2102_v42 = vsel %vm2101_vm4, %v2069_v14, %v1681_v63 }
  0xf1   : > { %1700 = vrot.lane.b32.xlu1 %v4189_v10, %s3296_s15  ;;  %v3141_v36 = vunpack.i.l.bf16 %v3140_v53  ;;  %v3142_v14 = vunpack.i.h.bf16 %v3140_v53  ;;  %v770_v53 = vld [vmem:[#allocation2 + $0xfa] sm:$0xff] }
  0xf2   : > { %1716 = vrot.lane.b32.xlu0 %v4193_v49, %s3296_s15 }
  0xf3   : > { %v1809_v12 = vpop.permute.xlu1 %1808  ;;  %v2003_v54 = vsel %vm2002_vm6, %v1970_v45, %v3141_v36 }
  0xf4   : > { %v2135_v61 = vsel %vm2134_vm7, %v2102_v42, %v1809_v12  ;;  %v1427_v30 = vpop.permute.xlu0 %1426  ;;  %v2036_v3 = vsel %vm2035_vm8, %v2003_v54, %v1425_v13  ;;  %v3268_v12 = vld [vmem:[%s4997_s1] ss:$0 sm:$0xff] }
  0xf5   : > { %3179 = vrot.lane.b32.xlu1 %v3178_v40, %s3297_s16  ;;  %2846 = vmatprep.mubr.msk.f32.mxu0 %vm2201_vm9, %v2135_v61  ;;  %v1971_v40 = vsel %vm1969_vm5, %v1938_v48, %v3117_v5  ;;  %v365_v45 = vmul.f32 %v3268_v12, %v326_v6  ;;  %v4231_v61 = vld [vmem:[#allocation2 + $0xb0] sm:$0xff]  ;;  %v3269_v54 = vld [vmem:[%s4998_s2] ss:$0 sm:$0xff] }
  0xf6   : > { %2363 = vmatmul.mubr.f32.vlgmr.msra.gmra.mxu0 %v2036_v3  ;;  %1828 = vrot.lane.b32.xlu0 %v3763_v16, %s3298_s17  ;;  %v2004_v13 = vsel %vm2002_vm6, %v1971_v40, %v3142_v14  ;;  %v2961_v3 = vunpack.i.l.bf16 %v4010_v0  ;;  %v4248_v40 = vld [vmem:[#allocation2 + $0xb1] sm:$0xff] }
  0xf7   : > { %v1555_v42 = vpop.permute.xlu1 %1554  ;;  %v404_v5 = vadd.f32 %v3269_v54, %v365_v45  ;;  %v4256_v6 = vld [vmem:[#allocation2 + $0x111] sm:$0xff]  ;;  %v2962_v45 = vunpack.i.h.bf16 %v4010_v0  ;;  %v3122_v0 = vunpack.i.h.bf16 %v4163_v24 }
  0xf8   : > { %v2070_v59 = vsel %vm2068_vm3, %v1427_v30, %v1555_v42  ;;  %v1683_v63 = vpop.permute.xlu0 %1682  ;;  %v4241_v42 = vld [vmem:[#allocation2 + $0x110] sm:$0xff]  ;;  %v1906_v57 = vsel %vm502_vm0, %v3861_v18, %v2961_v3  ;;  %v3188_v3 = vpack.i.bf16 %v4147_v60, %v4140_v26 }
  0xf9   : > { %1844 = vrot.lane.b32.xlu1 %v3812_v35, %s3298_s17  ;;  %v2103_v41 = vsel %vm2101_vm4, %v2070_v59, %v1683_v63  ;;  %v2037_v35 = vsel %vm2035_vm8, %v2004_v13, %v1427_v30  ;;  %v3041_v30 = vunpack.i.l.bf16 %v4082_v62  ;;  %v468_v48 = vmul.f32 0.2, %v404_v5  ;;  %v327_v13 = vld [vmem:[%s3480_s9 + $0xf8] sm:$0xff] }
  0xfa   : > { %1446 = vrot.lane.b32.xlu0 %v762_v1, %s3294_s13  ;;  %v3121_v59 = vunpack.i.l.bf16 %v4163_v24  ;;  %vm436_vm10 = vcmp.ge.f32.partialorder %v404_v5, 0.0  ;;  %v4273_v26 = vld [vmem:[#allocation2 + $0xb2] sm:$0xff]  ;;  %v1907_v60 = vsel %vm502_vm0, %v3863_v20, %v2962_v45  ;;  %v771_v45 = vld [vmem:[#allocation2 + $0x10a] sm:$0xff] }
  0xfb   : > { %v1811_v16 = vpop.permute.xlu1 %1810 }
  0xfc   : > { %v2136_v36 = vsel %vm2134_vm7, %v2103_v41, %v1811_v16  ;;  %v1429_v47 = vpop.permute.xlu0 %1428  ;;  %v1939_v41 = vsel %vm1936_vm2, %v1906_v57, %v3041_v30 }
  0xfd   : > { %1462 = vrot.lane.b32.xlu1 %v770_v53, %s3294_s13  ;;  %2847 = vmatprep.mubr.msk.f32.mxu0 %vm2201_vm9, %v2136_v36  ;;  %v500_v53 = vsel %vm436_vm10, %v404_v5, %v468_v48  ;;  %v366_v36 = vmul.f32 %v3268_v12, %v327_v13  ;;  %v1972_v18 = vsel %vm1969_vm5, %v1939_v41, %v3121_v59  ;;  %v763_v13 = vld [vmem:[#allocation2 + $0xaa] sm:$0xff] }
  0xfe   : > { %2368 = vmatmul.mubr.f32.gmra.mxu0 %v2037_v35  ;;  %1574 = vrot.lane.b32.xlu0 %v4231_v61, %s3295_s14  ;;  %589 = vst.msk [vmem:[#allocation2 + $0x181] sm:$0xff] %vm502_vm0, %v500_v53 }
  0xff   : > { %v1557_v14 = vpop.permute.xlu1 %1556  ;;  %v405_v12 = vadd.f32 %v3269_v54, %v366_v36  ;;  %v4279_v54 = vld [vmem:[#allocation2 + $0x112] sm:$0xff] }
 0x100   : > { %v1685_v1 = vpop.permute.xlu0 %1684  ;;  %v2071_v63 = vsel %vm2068_vm3, %v1429_v47, %v1557_v14  ;;  %v3042_v14 = vunpack.i.h.bf16 %v4082_v62 }
 0x101   : > { %1590 = vrot.lane.b32.xlu1 %v4241_v42, %s3295_s14  ;;  %v2104_v35 = vsel %vm2101_vm4, %v2071_v63, %v1685_v1  ;;  %v469_v62 = vmul.f32 0.2, %v405_v12  ;;  %vm437_vm11 = vcmp.ge.f32.partialorder %v405_v12, 0.0 }
 0x102   : > { %3184 = vrot.lane.b32.xlu0 %v3183_v52, %s3293_s21  ;;  %v1940_v24 = vsel %vm1936_vm2, %v1907_v60, %v3042_v14  ;;  %v4296_v14 = vld [vmem:[#allocation2 + $0xc0] sm:$0xff] }
 0x103   : > { %v3145_v8 = vpop.permute.xlu1 %3144  ;;  %v501_v53 = vsel %vm437_vm11, %v405_v12, %v469_v62 }
 0x104   : > { %v3146_v16 = vunpack.i.l.bf16 %v3145_v8  ;;  %v1813_v5 = vpop.permute.xlu0 %1812  ;;  %v3147_v1 = vunpack.i.h.bf16 %v3145_v8  ;;  %v1973_v8 = vsel %vm1969_vm5, %v1940_v24, %v3122_v0  ;;  %590 = vst.msk [vmem:[#allocation2 + $0x189] sm:$0xff] %vm502_vm0, %v501_v53  ;;  %v3193_v0 = vpack.i.bf16 %v4183_v31, %v4177_v25  ;;  %v4309_v24 = vld [vmem:[#allocation2 + $0xc1] sm:$0xff] }
 0x105   : > { %1702 = vrot.lane.b32.xlu1 %v4248_v40, %s3296_s15  ;;  %v2137_v52 = vsel %vm2134_vm7, %v2104_v35, %v1813_v5  ;;  %v2967_v53 = vunpack.i.h.bf16 %v4006_v4 }
 0x106   : > { %v2005_v30 = vsel %vm2002_vm6, %v1972_v18, %v3146_v16  ;;  %1718 = vrot.lane.b32.xlu0 %v4256_v6, %s3296_s15  ;;  %2848 = vmatprep.mubr.msk.f32.mxu0 %vm2201_vm9, %v2137_v52  ;;  %v2006_v41 = vsel %vm2002_vm6, %v1973_v8, %v3147_v1  ;;  %v2966_v18 = vunpack.i.l.bf16 %v4006_v4  ;;  %v3046_v52 = vunpack.i.l.bf16 %v4086_v29  ;;  %v4317_v8 = vld [vmem:[#allocation2 + $0x121] sm:$0xff] }
 0x107   : > { %v1431_v48 = vpop.permute.xlu1 %1430  ;;  %v2038_v59 = vsel %vm2035_vm8, %v2005_v30, %v1429_v47  ;;  %v3126_v30 = vunpack.i.l.bf16 %v4165_v17 }
 0x108   : > { %2373 = vmatmul.mubr.f32.gmra.mxu0 %v2038_v59  ;;  %v1559_v63 = vpop.permute.xlu0 %1558  ;;  %v2039_v5 = vsel %vm2035_vm8, %v2006_v41, %v1431_v48  ;;  %v1908_v59 = vsel %vm502_vm0, %v3874_v27, %v2966_v18  ;;  %v3047_v27 = vunpack.i.h.bf16 %v4086_v29  ;;  %v4333_v18 = vld [vmem:[#allocation2 + $0xc2] sm:$0xff] }
 0x109   : > { %3189 = vrot.lane.b32.xlu1 %v3188_v3, %s3297_s16  ;;  %v2072_v57 = vsel %vm2068_vm3, %v1431_v48, %v1559_v63  ;;  %v615_v48 = vld [vmem:[#allocation2 + $0x120] sm:$0xff]  ;;  %v1941_v62 = vsel %vm1936_vm2, %v1908_v59, %v3046_v52 }
 0x10a   : > { %1830 = vrot.lane.b32.xlu0 %v4273_v26, %s3298_s17  ;;  %v1974_v31 = vsel %vm1969_vm5, %v1941_v62, %v3126_v30  ;;  %v3131_v62 = vunpack.i.l.bf16 %v4171_v23 }
 0x10b   : > { %v1687_v47 = vpop.permute.xlu1 %1686 }
 0x10c   : > { %v2105_v20 = vsel %vm2101_vm4, %v2072_v57, %v1687_v47  ;;  %v1815_v16 = vpop.permute.xlu0 %1814 }
 0x10d   : > { %1846 = vrot.lane.b32.xlu1 %v4279_v54, %s3298_s17  ;;  %v2138_v36 = vsel %vm2134_vm7, %v2105_v20, %v1815_v16  ;;  %v3198_v16 = vpack.i.bf16 %v4193_v49, %v4189_v10  ;;  %v4337_v49 = vld [vmem:[#allocation2 + $0x122] sm:$0xff] }
 0x10e   : > { %1448 = vrot.lane.b32.xlu0 %v763_v13, %s3294_s13  ;;  %2849 = vmatprep.mubr.msk.f32.mxu0 %vm2201_vm9, %v2138_v36  ;;  %v3127_v13 = vunpack.i.h.bf16 %v4165_v17  ;;  %v1909_v36 = vsel %vm502_vm0, %v3876_v32, %v2967_v53 }
 0x10f   : > { %v1433_v35 = vpop.permute.xlu1 %1432  ;;  %2378 = vmatmul.mubr.f32.gmra.mxu0 %v2039_v5 }
 0x110   : > { %v1561_v3 = vpop.permute.xlu0 %1560 }
 0x111   : > { %1464 = vrot.lane.b32.xlu1 %v771_v45, %s3294_s13  ;;  %v2073_v60 = vsel %vm2068_vm3, %v1433_v35, %v1561_v3  ;;  %v1942_v45 = vsel %vm1936_vm2, %v1909_v36, %v3047_v27 }
 0x112   : > { %1576 = vrot.lane.b32.xlu0 %v4296_v14, %s3295_s14  ;;  %v1975_v10 = vsel %vm1969_vm5, %v1942_v45, %v3127_v13 }
 0x113   : > { %v1689_v12 = vpop.permute.xlu1 %1688 }
 0x114   : > { %v3150_v1 = vpop.permute.xlu0 %3149  ;;  %v2106_v57 = vsel %vm2101_vm4, %v2073_v60, %v1689_v12 }
 0x115   : > { %1592 = vrot.lane.b32.xlu1 %v615_v48, %s3295_s14  ;;  %v3151_v63 = vunpack.i.l.bf16 %v3150_v1  ;;  %v3152_v29 = vunpack.i.h.bf16 %v3150_v1  ;;  %v2971_v48 = vunpack.i.l.bf16 %v4014_v9  ;;  %v3051_v1 = vunpack.i.l.bf16 %v4094_v38 }
 0x116   : > { %3194 = vrot.lane.b32.xlu0 %v3193_v0, %s3293_s21 }
 0x117   : > { %v1817_v25 = vpop.permute.xlu1 %1816  ;;  %v2007_v20 = vsel %vm2002_vm6, %v1974_v31, %v3151_v63  ;;  %v4355_v63 = vld [vmem:[#allocation2 + $0xc8] sm:$0xff] }
 0x118   : > { %v2139_v47 = vsel %vm2134_vm7, %v2106_v57, %v1817_v25  ;;  %v1435_v41 = vpop.permute.xlu0 %1434  ;;  %v2040_v4 = vsel %vm2035_vm8, %v2007_v20, %v1433_v35  ;;  %v2008_v35 = vsel %vm2002_vm6, %v1975_v10, %v3152_v29  ;;  %v1910_v57 = vsel %vm502_vm0, %v3889_v37, %v2971_v48  ;;  %v616_v31 = vld [vmem:[#allocation2 + $0x128] sm:$0xff] }
 0x119   : > { %1704 = vrot.lane.b32.xlu1 %v4309_v24, %s3296_s15  ;;  %2850 = vmatprep.mubr.msk.f32.mxu0 %vm2201_vm9, %v2139_v47  ;;  %v2041_v0 = vsel %vm2035_vm8, %v2008_v35, %v1435_v41  ;;  %v3203_v25 = vpack.i.bf16 %v4241_v42, %v4231_v61  ;;  %v1943_v27 = vsel %vm1936_vm2, %v1910_v57, %v3051_v1  ;;  %v4372_v61 = vld [vmem:[#allocation2 + $0xc9] sm:$0xff]  ;;  %v3132_v42 = vunpack.i.h.bf16 %v4171_v23  ;;  %v798_v1 = vld [vmem:[#allocation2 + $0xd8] sm:$0xff] }
 0x11a   : > { %2383 = vmatmul.mubr.f32.gmra.mxu0 %v2040_v4  ;;  %1720 = vrot.lane.b32.xlu0 %v4317_v8, %s3296_s15  ;;  %v1976_v37 = vsel %vm1969_vm5, %v1943_v27, %v3131_v62  ;;  %v3208_v23 = vpack.i.bf16 %v4256_v6, %v4248_v40  ;;  %v4397_v6 = vld [vmem:[#allocation2 + $0x12a] sm:$0xff]  ;;  %v701_v62 = vld [vmem:[#allocation2 + $0xc0] sm:$0xff]  ;;  %v2976_v57 = vunpack.i.l.bf16 %v4020_v15 }
 0x11b   : > { %v1563_v17 = vpop.permute.xlu1 %1562 }
 0x11c   : > { %v2074_v5 = vsel %vm2068_vm3, %v1435_v41, %v1563_v17  ;;  %v1691_v3 = vpop.permute.xlu0 %1690  ;;  %v3052_v41 = vunpack.i.h.bf16 %v4094_v38  ;;  %v4378_v17 = vld [vmem:[#allocation2 + $0x129] sm:$0xff] }
 0x11d   : > { %3199 = vrot.lane.b32.xlu1 %v3198_v16, %s3297_s16  ;;  %v2107_v32 = vsel %vm2101_vm4, %v2074_v5, %v1691_v3 }
 0x11e   : > { %1832 = vrot.lane.b32.xlu0 %v4333_v18, %s3298_s17 }
 0x11f   : > { %v1819_v52 = vpop.permute.xlu1 %1818 }
 0x120   : > { %v2140_v30 = vsel %vm2134_vm7, %v2107_v32, %v1819_v52  ;;  %v1437_v12 = vpop.permute.xlu0 %1436 }
 0x121   : > { %1848 = vrot.lane.b32.xlu1 %v4337_v49, %s3298_s17  ;;  %2851 = vmatprep.mubr.msk.f32.mxu0 %vm2201_vm9, %v2140_v30 }
 0x122   : > { %2388 = vmatmul.mubr.f32.gmra.mxu0 %v2041_v0  ;;  %1450 = vrot.lane.b32.xlu0 %v4273_v26, %s3294_s13 }
 0x123   : > { %v1565_v59 = vpop.permute.xlu1 %1564 }
 0x124   : > { %v1693_v60 = vpop.permute.xlu0 %1692  ;;  %v2075_v53 = vsel %vm2068_vm3, %v1437_v12, %v1565_v59 }
 0x125   : > { %1466 = vrot.lane.b32.xlu1 %v4279_v54, %s3294_s13  ;;  %v2972_v54 = vunpack.i.h.bf16 %v4014_v9  ;;  %v2108_v20 = vsel %vm2101_vm4, %v2075_v53, %v1693_v60  ;;  %v709_v60 = vld [vmem:[#allocation2 + $0x120] sm:$0xff] }
 0x126   : > { %1578 = vrot.lane.b32.xlu0 %v4355_v63, %s3295_s14 }
 0x127   : > { %v3155_v26 = vpop.permute.xlu1 %3154  ;;  %v1911_v38 = vsel %vm502_vm0, %v3891_v39, %v2972_v54  ;;  %v4392_v39 = vld [vmem:[#allocation2 + $0xca] sm:$0xff]  ;;  %v3137_v54 = vunpack.i.h.bf16 %v4173_v33 }
 0x128   : > { %v3156_v47 = vunpack.i.l.bf16 %v3155_v26  ;;  %v1821_v13 = vpop.permute.xlu0 %1820  ;;  %v3157_v36 = vunpack.i.h.bf16 %v3155_v26  ;;  %v1944_v5 = vsel %vm1936_vm2, %v1911_v38, %v3052_v41  ;;  %v4410_v26 = vld [vmem:[#allocation2 + $0x138] sm:$0xff] }
 0x129   : > { %1594 = vrot.lane.b32.xlu1 %v616_v31, %s3295_s14  ;;  %v2141_v4 = vsel %vm2134_vm7, %v2108_v20, %v1821_v13  ;;  %v1977_v35 = vsel %vm1969_vm5, %v1944_v5, %v3132_v42  ;;  %v3056_v31 = vunpack.i.l.bf16 %v4096_v7  ;;  %v3136_v20 = vunpack.i.l.bf16 %v4173_v33 }
 0x12a   : > { %v2009_v16 = vsel %vm2002_vm6, %v1976_v37, %v3156_v47  ;;  %3204 = vrot.lane.b32.xlu0 %v3203_v25, %s3293_s21  ;;  %2852 = vmatprep.mubr.msk.f32.mxu0 %vm2201_vm9, %v2141_v4  ;;  %v2010_v52 = vsel %vm2002_vm6, %v1977_v35, %v3157_v36  ;;  %v2996_v25 = vunpack.i.l.bf16 %v4038_v34  ;;  %v3076_v47 = vunpack.i.l.bf16 %v4112_v11  ;;  %v830_v37 = vld [vmem:[#allocation2 + $0xd9] sm:$0xff] }
 0x12b   : > { %v1439_v9 = vpop.permute.xlu1 %1438  ;;  %v2042_v29 = vsel %vm2035_vm8, %v2009_v16, %v1437_v12  ;;  %v4428_v36 = vld [vmem:[#allocation2 + $0x139] sm:$0xff] }
 0x12c   : > { %2393 = vmatmul.mubr.f32.gmra.mxu0 %v2042_v29  ;;  %v1567_v45 = vpop.permute.xlu0 %1566  ;;  %v2043_v0 = vsel %vm2035_vm8, %v2010_v52, %v1439_v9  ;;  %v1920_v41 = vsel %vm502_vm0, %v4296_v14, %v2996_v25 }
 0x12d   : > { %1706 = vrot.lane.b32.xlu1 %v4372_v61, %s3296_s15  ;;  %v2076_v3 = vsel %vm2068_vm3, %v1439_v9, %v1567_v45  ;;  %v1953_v42 = vsel %vm1936_vm2, %v1920_v41, %v3076_v47  ;;  %v3218_v45 = vpack.i.bf16 %v4317_v8, %v4309_v24  ;;  %v862_v8 = vld [vmem:[#allocation2 + $0xda] sm:$0xff] }
 0x12e   : > { %1722 = vrot.lane.b32.xlu0 %v4378_v17, %s3296_s15 }
 0x12f   : > { %v1695_v10 = vpop.permute.xlu1 %1694 }
 0x130   : > { %v2109_v32 = vsel %vm2101_vm4, %v2076_v3, %v1695_v10  ;;  %v1823_v30 = vpop.permute.xlu0 %1822 }
 0x131   : > { %3209 = vrot.lane.b32.xlu1 %v3208_v23, %s3297_s16  ;;  %v2142_v40 = vsel %vm2134_vm7, %v2109_v32, %v1823_v30  ;;  %v1986_v23 = vsel %vm1969_vm5, %v1953_v42, %v3137_v54 }
 0x132   : > { %1834 = vrot.lane.b32.xlu0 %v4392_v39, %s3298_s17  ;;  %2853 = vmatprep.mubr.msk.f32.mxu0 %vm2201_vm9, %v2142_v40 }
 0x133   : > { %v1441_v12 = vpop.permute.xlu1 %1440  ;;  %2398 = vmatmul.mubr.f32.gmra.mxu0 %v2043_v0 }
 0x134   : > { %v1457_v48 = vpop.permute.xlu0 %1456 }
 0x135   : > { %1850 = vrot.lane.b32.xlu1 %v4397_v6, %s3298_s17 }
 0x136   : > { %1452 = vrot.lane.b32.xlu0 %v4333_v18, %s3294_s13  ;;  %v3213_v18 = vpack.i.bf16 %v709_v60, %v701_v62  ;;  %v799_v60 = vld [vmem:[#allocation2 + $0xe0] sm:$0xff] }
 0x137   : > { %v1569_v59 = vpop.permute.xlu1 %1568 }
 0x138   : > { %v1585_v53 = vpop.permute.xlu0 %1584  ;;  %v2077_v33 = vsel %vm2068_vm3, %v1441_v12, %v1569_v59  ;;  %v870_v59 = vld [vmem:[#allocation2 + $0x13a] sm:$0xff] }
 0x139   : > { %1468 = vrot.lane.b32.xlu1 %v4337_v49, %s3294_s13  ;;  %v1912_v49 = vsel %vm502_vm0, %v3904_v50, %v2976_v57  ;;  %v2085_v5 = vsel %vm2068_vm3, %v1457_v48, %v1585_v53  ;;  %v702_v53 = vld [vmem:[#allocation2 + $0xc8] sm:$0xff] }
 0x13a   : > { %1580 = vrot.lane.b32.xlu0 %v798_v1, %s3295_s14  ;;  %v1945_v4 = vsel %vm1936_vm2, %v1912_v49, %v3056_v31  ;;  %v710_v57 = vld [vmem:[#allocation2 + $0x128] sm:$0xff]  ;;  %v807_v31 = vld [vmem:[#allocation2 + $0x140] sm:$0xff] }
 0x13b   : > { %v1697_v27 = vpop.permute.xlu1 %1696  ;;  %v1978_v14 = vsel %vm1969_vm5, %v1945_v4, %v3136_v20  ;;  %v3223_v54 = vpack.i.bf16 %v710_v57, %v702_v53 }
 0x13c   : > { %v1713_v13 = vpop.permute.xlu0 %1712  ;;  %v2110_v38 = vsel %vm2101_vm4, %v2077_v33, %v1697_v27  ;;  %v2997_v27 = vunpack.i.h.bf16 %v4038_v34 }
 0x13d   : > { %1596 = vrot.lane.b32.xlu1 %v4410_v26, %s3295_s14  ;;  %v2118_v32 = vsel %vm2101_vm4, %v2085_v5, %v1713_v13 }
 0x13e   : > { %3214 = vrot.lane.b32.xlu0 %v3213_v18, %s3293_s21  ;;  %v3057_v18 = vunpack.i.h.bf16 %v4096_v7 }
 0x13f   : > { %v3160_v16 = vpop.permute.xlu1 %3159 }
 0x140   : > { %v3162_v9 = vunpack.i.h.bf16 %v3160_v16  ;;  %v3161_v29 = vunpack.i.l.bf16 %v3160_v16  ;;  %v1825_v50 = vpop.permute.xlu0 %1824  ;;  %v839_v16 = vld [vmem:[#allocation2 + $0x141] sm:$0xff] }
 0x141   : > { %1708 = vrot.lane.b32.xlu1 %v830_v37, %s3296_s15  ;;  %v2143_v3 = vsel %vm2134_vm7, %v2110_v38, %v1825_v50 }
 0x142   : > { %v2011_v10 = vsel %vm2002_vm6, %v1978_v14, %v3161_v29  ;;  %v2019_v35 = vsel %vm2002_vm6, %v1986_v23, %v3162_v9  ;;  %1724 = vrot.lane.b32.xlu0 %v4428_v36, %s3296_s15  ;;  %2854 = vmatprep.mubr.msk.f32.mxu0 %vm2201_vm9, %v2143_v3 }
 0x143   : > { %v1841_v52 = vpop.permute.xlu1 %1840  ;;  %v2044_v24 = vsel %vm2035_vm8, %v2011_v10, %v1441_v12  ;;  %v2052_v0 = vsel %vm2035_vm8, %v2019_v35, %v1457_v48  ;;  %v2977_v48 = vunpack.i.h.bf16 %v4020_v15  ;;  %v1921_v15 = vsel %vm502_vm0, %v4355_v63, %v2997_v27  ;;  %v871_v10 = vld [vmem:[#allocation2 + $0x142] sm:$0xff]  ;;  %v3271_v27 = vld [vmem:[#allocation2 + $0xd8] sm:$0xff] }
 0x144   : > { %2403 = vmatmul.mubr.f32.gmra.mxu0 %v2044_v24  ;;  %v2151_v30 = vsel %vm2134_vm7, %v2118_v32, %v1841_v52  ;;  %v1443_v40 = vpop.permute.xlu0 %1442  ;;  %v3228_v63 = vpack.i.bf16 %v4378_v17, %v4372_v61  ;;  %v863_v17 = vld [vmem:[#allocation2 + $0xe2] sm:$0xff]  ;;  %v4490_v52 = vld [vmem:[#allocation2 + $0x150] sm:$0xff] }
 0x145   : > { %3219 = vrot.lane.b32.xlu1 %v3218_v45, %s3297_s16  ;;  %2862 = vmatprep.mubr.msk.f32.mxu1 %vm2201_vm9, %v2151_v30 }
 0x146   : > { %2443 = vmatmul.mubr.f32.vlgmr.msra.gmra.mxu1 %v2052_v0  ;;  %1836 = vrot.lane.b32.xlu0 %v862_v8, %s3298_s17  ;;  %v3233_v8 = vpack.i.bf16 %v807_v31, %v4410_v26  ;;  %v4497_v0 = vld [vmem:[#allocation2 + $0x151] sm:$0xff] }
 0x147   : > { %v1459_v1 = vpop.permute.xlu1 %1458 }
 0x148   : > { %v1571_v62 = vpop.permute.xlu0 %1570 }
 0x149   : > { %1852 = vrot.lane.b32.xlu1 %v870_v59, %s3298_s17 }
 0x14a   : > { %1454 = vrot.lane.b32.xlu0 %v4392_v39, %s3294_s13  ;;  %v3077_v39 = vunpack.i.h.bf16 %v4112_v11  ;;  %v2078_v11 = vsel %vm2068_vm3, %v1443_v40, %v1571_v62  ;;  %v3061_v62 = vunpack.i.l.bf16 %v4103_v46 }
 0x14b   : > { %v1587_v12 = vpop.permute.xlu1 %1586 }
 0x14c   : > { %v3165_v25 = vpop.permute.xlu0 %3164  ;;  %v1954_v37 = vsel %vm1936_vm2, %v1921_v15, %v3077_v39  ;;  %v2086_v29 = vsel %vm2068_vm3, %v1459_v1, %v1587_v12 }
 0x14d   : > { %1470 = vrot.lane.b32.xlu1 %v4397_v6, %s3294_s13  ;;  %v3167_v20 = vunpack.i.h.bf16 %v3165_v25  ;;  %v3166_v13 = vunpack.i.l.bf16 %v3165_v25  ;;  %v1913_v6 = vsel %vm502_vm0, %v3906_v51, %v2977_v48  ;;  %v3270_v25 = vld [vmem:[#allocation2 + $0x78] sm:$0xff] }
 0x14e   : > { %1582 = vrot.lane.b32.xlu0 %v799_v60, %s3295_s14  ;;  %v1946_v34 = vsel %vm1936_vm2, %v1913_v6, %v3057_v18  ;;  %v3081_v60 = vunpack.i.l.bf16 %v4118_v55 }
 0x14f   : > { %v1699_v47 = vpop.permute.xlu1 %1698  ;;  %v1979_v51 = vsel %vm1969_vm5, %v1946_v34, %v3166_v13  ;;  %v1987_v9 = vsel %vm1969_vm5, %v1954_v37, %v3167_v20 }
 0x150   : > { %v1715_v49 = vpop.permute.xlu0 %1714  ;;  %v2111_v42 = vsel %vm2101_vm4, %v2078_v11, %v1699_v47 }
 0x151   : > { %1598 = vrot.lane.b32.xlu1 %v807_v31, %s3295_s14  ;;  %v2119_v45 = vsel %vm2101_vm4, %v2086_v29, %v1715_v49  ;;  %v872_v31 = vld [vmem:[#allocation2 + $0x152] sm:$0xff] }
 0x152   : > { %3224 = vrot.lane.b32.xlu0 %v3223_v54, %s3293_s21 }
 0x153   : > { %v3170_v7 = vpop.permute.xlu1 %3169 }
 0x154   : > { %v3172_v41 = vunpack.i.h.bf16 %v3170_v7  ;;  %v3171_v4 = vunpack.i.l.bf16 %v3170_v7  ;;  %v1827_v33 = vpop.permute.xlu0 %1826 }
 0x155   : > { %1710 = vrot.lane.b32.xlu1 %v4142_v19, %s3296_s15  ;;  %v2144_v38 = vsel %vm2134_vm7, %v2111_v42, %v1827_v33 }
 0x156   : > { %v2012_v50 = vsel %vm2002_vm6, %v1979_v51, %v3171_v4  ;;  %v2020_v14 = vsel %vm2002_vm6, %v1987_v9, %v3172_v41  ;;  %1726 = vrot.lane.b32.xlu0 %v839_v16, %s3296_s15  ;;  %2855 = vmatprep.mubr.msk.f32.mxu0 %vm2201_vm9, %v2144_v38  ;;  %v809_v41 = vld [vmem:[#allocation2 + $0x158] sm:$0xff] }
 0x157   : > { %v1843_v19 = vpop.permute.xlu1 %1842  ;;  %v2045_v23 = vsel %vm2035_vm8, %v2012_v50, %v1443_v40  ;;  %v2053_v3 = vsel %vm2035_vm8, %v2020_v14, %v1459_v1  ;;  %v2981_v40 = vunpack.i.l.bf16 %v4024_v21  ;;  %v3001_v1 = vunpack.i.l.bf16 %v4044_v28  ;;  %v873_v38 = vld [vmem:[#allocation2 + $0x15a] sm:$0xff] }
 0x158   : > { %v2152_v61 = vsel %vm2134_vm7, %v2119_v45, %v1843_v19  ;;  %2408 = vmatmul.mubr.f32.gmra.mxu0 %v2045_v23  ;;  %v1445_v5 = vpop.permute.xlu0 %1444  ;;  %v4530_v45 = vld [vmem:[#allocation2 + $0x168] sm:$0xff]  ;;  %v3243_v23 = vpack.i.bf16 %v809_v41, %v4490_v52 }
 0x159   : > { %3229 = vrot.lane.b32.xlu1 %v3228_v63, %s3297_s16  ;;  %2863 = vmatprep.mubr.msk.f32.mxu1 %vm2201_vm9, %v2152_v61  ;;  %v1914_v48 = vsel %vm502_vm0, %v3270_v25, %v2981_v40  ;;  %v1922_v18 = vsel %vm502_vm0, %v3271_v27, %v3001_v1  ;;  %v841_v63 = vld [vmem:[#allocation2 + $0x159] sm:$0xff]  ;;  %v874_v40 = vld [vmem:[#allocation2 + $0x16a] sm:$0xff] }
 0x15a   : > { %2448 = vmatmul.mubr.f32.gmra.mxu1 %v2053_v3  ;;  %1838 = vrot.lane.b32.xlu0 %v863_v17, %s3298_s17  ;;  %v1947_v47 = vsel %vm1936_vm2, %v1914_v48, %v3061_v62  ;;  %v1955_v54 = vsel %vm1936_vm2, %v1922_v18, %v3081_v60  ;;  %v2982_v17 = vunpack.i.h.bf16 %v4024_v21  ;;  %v3002_v3 = vunpack.i.h.bf16 %v4044_v28  ;;  %v811_v25 = vld [vmem:[#allocation2 + $0x170] sm:$0xff] }
 0x15b   : > { %v1461_v35 = vpop.permute.xlu1 %1460 }
 0x15c   : > { %v1573_v32 = vpop.permute.xlu0 %1572  ;;  %v1915_v21 = vsel %vm502_vm0, %v4064_v58, %v2982_v17  ;;  %v1923_v28 = vsel %vm502_vm0, %v4126_v2, %v3002_v3 }
 0x15d   : > { %1854 = vrot.lane.b32.xlu1 %v871_v10, %s3298_s17  ;;  %v2079_v39 = vsel %vm2068_vm3, %v1445_v5, %v1573_v32  ;;  %v3248_v32 = vpack.i.bf16 %v841_v63, %v4497_v0 }
 0x15e   : > { %1472 = vrot.lane.b32.xlu0 %v870_v59, %s3294_s13  ;;  %v3238_v59 = vpack.i.bf16 %v839_v16, %v4428_v36 }
 0x15f   : > { %v1589_v24 = vpop.permute.xlu1 %1588 }
 0x160   : > { %v3175_v30 = vpop.permute.xlu0 %3174  ;;  %v2087_v7 = vsel %vm2068_vm3, %v1461_v35, %v1589_v24  ;;  %v3082_v24 = vunpack.i.h.bf16 %v4118_v55 }
 0x161   : > { %1600 = vrot.lane.b32.xlu1 %v4490_v52, %s3295_s14  ;;  %v3177_v26 = vunpack.i.h.bf16 %v3175_v30  ;;  %v3176_v53 = vunpack.i.l.bf16 %v3175_v30 }
 0x162   : > { %3234 = vrot.lane.b32.xlu0 %v3233_v8, %s3293_s21  ;;  %v1956_v55 = vsel %vm1936_vm2, %v1923_v28, %v3082_v24 }
 0x163   : > { %v1701_v12 = vpop.permute.xlu1 %1700  ;;  %v1980_v15 = vsel %vm1969_vm5, %v1947_v47, %v3176_v53  ;;  %v1988_v34 = vsel %vm1969_vm5, %v1955_v54, %v3177_v26 }
 0x164   : > { %v1717_v57 = vpop.permute.xlu0 %1716  ;;  %v2112_v49 = vsel %vm2101_vm4, %v2079_v39, %v1701_v12 }
 0x165   : > { %1728 = vrot.lane.b32.xlu1 %v4497_v0, %s3296_s15  ;;  %v2120_v16 = vsel %vm2101_vm4, %v2087_v7, %v1717_v57 }
 0x166   : > { %3239 = vrot.lane.b32.xlu0 %v3238_v59, %s3297_s16 }
 0x167   : > { %v3180_v36 = vpop.permute.xlu1 %3179 }
 0x168   : > { %v3182_v20 = vunpack.i.h.bf16 %v3180_v36  ;;  %v3181_v13 = vunpack.i.l.bf16 %v3180_v36  ;;  %v1829_v6 = vpop.permute.xlu0 %1828  ;;  %v843_v36 = vld [vmem:[#allocation2 + $0x171] sm:$0xff] }
 0x169   : > { %1856 = vrot.lane.b32.xlu1 %v872_v31, %s3298_s17  ;;  %v2145_v37 = vsel %vm2134_vm7, %v2112_v49, %v1829_v6  ;;  %v4572_v6 = vld [vmem:[#allocation2 + $0x180] sm:$0xff] }
 0x16a   : > { %v2013_v11 = vsel %vm2002_vm6, %v1980_v15, %v3181_v13  ;;  %v2021_v4 = vsel %vm2002_vm6, %v1988_v34, %v3182_v20  ;;  %1474 = vrot.lane.b32.xlu0 %v871_v10, %s3294_s13  ;;  %2856 = vmatprep.mubr.msk.f32.mxu0 %vm2201_vm9, %v2145_v37  ;;  %v3062_v10 = vunpack.i.h.bf16 %v4103_v46  ;;  %v875_v20 = vld [vmem:[#allocation2 + $0x172] sm:$0xff]  ;;  %v3253_v34 = vpack.i.bf16 %v811_v25, %v4530_v45 }
 0x16b   : > { %v1845_v42 = vpop.permute.xlu1 %1844  ;;  %v2046_v33 = vsel %vm2035_vm8, %v2013_v11, %v1445_v5  ;;  %v2054_v29 = vsel %vm2035_vm8, %v2021_v4, %v1461_v35  ;;  %v4537_v5 = vld [vmem:[#allocation2 + $0x169] sm:$0xff]  ;;  %v2986_v37 = vunpack.i.l.bf16 %v4028_v22  ;;  %v4579_v11 = vld [vmem:[#allocation2 + $0x181] sm:$0xff]  ;;  %v3066_v4 = vunpack.i.l.bf16 %v4105_v56 }
 0x16c   : > { %v2153_v51 = vsel %vm2134_vm7, %v2120_v16, %v1845_v42  ;;  %2413 = vmatmul.mubr.f32.gmra.mxu0 %v2046_v33  ;;  %v1447_v9 = vpop.permute.xlu0 %1446  ;;  %v1948_v46 = vsel %vm1936_vm2, %v1915_v21, %v3062_v10  ;;  %v3258_v42 = vpack.i.bf16 %v843_v36, %v4537_v5  ;;  %v3086_v33 = vunpack.i.l.bf16 %v4120_v43  ;;  %v813_v21 = vld [vmem:[#allocation2 + $0x188] sm:$0xff] }
 0x16d   : > { %1602 = vrot.lane.b32.xlu1 %v809_v41, %s3295_s14  ;;  %2864 = vmatprep.mubr.msk.f32.mxu1 %vm2201_vm9, %v2153_v51  ;;  %v3006_v41 = vunpack.i.l.bf16 %v4048_v44 }
 0x16e   : > { %2453 = vmatmul.mubr.f32.gmra.mxu1 %v2054_v29  ;;  %1730 = vrot.lane.b32.xlu0 %v841_v63, %s3296_s15  ;;  %v3272_v29 = vld [vmem:[#allocation2 + $0x90] sm:$0xff] }
 0x16f   : > { %v1463_v50 = vpop.permute.xlu1 %1462 }
 0x170   : > { %v1575_v14 = vpop.permute.xlu0 %1574 }
 0x171   : > { %1858 = vrot.lane.b32.xlu1 %v873_v38, %s3298_s17  ;;  %v2080_v1 = vsel %vm2068_vm3, %v1447_v9, %v1575_v14  ;;  %v3273_v14 = vld [vmem:[#allocation2 + $0xf0] sm:$0xff] }
 0x172   : > { %1476 = vrot.lane.b32.xlu0 %v872_v31, %s3294_s13 }
 0x173   : > { %v1591_v19 = vpop.permute.xlu1 %1590 }
 0x174   : > { %v3185_v61 = vpop.permute.xlu0 %3184  ;;  %v2088_v26 = vsel %vm2068_vm3, %v1463_v50, %v1591_v19 }
 0x175   : > { %1604 = vrot.lane.b32.xlu1 %v4530_v45, %s3295_s14  ;;  %v3187_v52 = vunpack.i.h.bf16 %v3185_v61  ;;  %v3186_v8 = vunpack.i.l.bf16 %v3185_v61  ;;  %v1924_v45 = vsel %vm502_vm0, %v3273_v14, %v3006_v41  ;;  %v847_v14 = vld [vmem:[#allocation2 + $0x1a1] sm:$0xff] }
 0x176   : > { %3244 = vrot.lane.b32.xlu0 %v3243_v23, %s3293_s21  ;;  %v1957_v61 = vsel %vm1936_vm2, %v1924_v45, %v3086_v33 }
 0x177   : > { %v1703_v35 = vpop.permute.xlu1 %1702  ;;  %v1981_v58 = vsel %vm1969_vm5, %v1948_v46, %v3186_v8  ;;  %v1989_v2 = vsel %vm1969_vm5, %v1956_v55, %v3187_v52 }
 0x178   : > { %v1719_v30 = vpop.permute.xlu0 %1718  ;;  %v2113_v59 = vsel %vm2101_vm4, %v2080_v1, %v1703_v35  ;;  %v4607_v1 = vld [vmem:[#allocation2 + $0x189] sm:$0xff] }
 0x179   : > { %1732 = vrot.lane.b32.xlu1 %v4537_v5, %s3296_s15  ;;  %v2121_v31 = vsel %vm2101_vm4, %v2088_v26, %v1719_v30 }
 0x17a   : > { %3249 = vrot.lane.b32.xlu0 %v3248_v32, %s3297_s16 }
 0x17b   : > { %v3190_v0 = vpop.permute.xlu1 %3189 }
 0x17c   : > { %v3192_v62 = vunpack.i.h.bf16 %v3190_v0  ;;  %v3191_v12 = vunpack.i.l.bf16 %v3190_v0  ;;  %v1831_v60 = vpop.permute.xlu0 %1830 }
 0x17d   : > { %1860 = vrot.lane.b32.xlu1 %v874_v40, %s3298_s17  ;;  %v2146_v53 = vsel %vm2134_vm7, %v2113_v59, %v1831_v60  ;;  %v877_v59 = vld [vmem:[#allocation2 + $0x18a] sm:$0xff] }
 0x17e   : > { %v2014_v57 = vsel %vm2002_vm6, %v1981_v58, %v3191_v12  ;;  %v2022_v48 = vsel %vm2002_vm6, %v1989_v2, %v3192_v62  ;;  %1478 = vrot.lane.b32.xlu0 %v873_v38, %s3294_s13  ;;  %2857 = vmatprep.mubr.msk.f32.mxu0 %vm2201_vm9, %v2146_v53  ;;  %v1916_v38 = vsel %vm502_vm0, %v3272_v29, %v2986_v37  ;;  %v814_v2 = vld [vmem:[#allocation2 + $0x198] sm:$0xff] }
 0x17f   : > { %v1847_v27 = vpop.permute.xlu1 %1846  ;;  %v2047_v18 = vsel %vm2035_vm8, %v2014_v57, %v1447_v9  ;;  %v2055_v39 = vsel %vm2035_vm8, %v2022_v48, %v1463_v50  ;;  %v876_v50 = vld [vmem:[#allocation2 + $0x182] sm:$0xff]  ;;  %v1949_v19 = vsel %vm1936_vm2, %v1916_v38, %v3066_v4  ;;  %v3263_v53 = vpack.i.bf16 %v813_v21, %v4572_v6  ;;  %v846_v48 = vld [vmem:[#allocation2 + $0x199] sm:$0xff] }
 0x180   : > { %v2154_v47 = vsel %vm2134_vm7, %v2121_v31, %v1847_v27  ;;  %2418 = vmatmul.mubr.f32.gmra.mxu0 %v2047_v18  ;;  %v1449_v54 = vpop.permute.xlu0 %1448  ;;  %v3007_v31 = vunpack.i.h.bf16 %v4048_v44  ;;  %v3067_v27 = vunpack.i.h.bf16 %v4105_v56 }
 0x181   : > { %1606 = vrot.lane.b32.xlu1 %v811_v25, %s3295_s14  ;;  %2865 = vmatprep.mubr.msk.f32.mxu1 %vm2201_vm9, %v2154_v47  ;;  %v2987_v25 = vunpack.i.h.bf16 %v4028_v22  ;;  %v3087_v47 = vunpack.i.h.bf16 %v4120_v43  ;;  %v3275_v22 = vld [vmem:[#allocation2 + $0xf8] sm:$0xff] }
 0x182   : > { %2458 = vmatmul.mubr.f32.gmra.mxu1 %v2055_v39  ;;  %1734 = vrot.lane.b32.xlu0 %v843_v36, %s3296_s15 }
 0x183   : > { %v1465_v13 = vpop.permute.xlu1 %1464 }
 0x184   : > { %v1577_v49 = vpop.permute.xlu0 %1576 }
 0x185   : > { %1862 = vrot.lane.b32.xlu1 %v875_v20, %s3298_s17  ;;  %v2081_v17 = vsel %vm2068_vm3, %v1449_v54, %v1577_v49  ;;  %v878_v49 = vld [vmem:[#allocation2 + $0x19a] sm:$0xff] }
 0x186   : > { %1480 = vrot.lane.b32.xlu0 %v874_v40, %s3294_s13 }
 0x187   : > { %v1593_v15 = vpop.permute.xlu1 %1592 }
 0x188   : > { %v3195_v7 = vpop.permute.xlu0 %3194  ;;  %v2089_v52 = vsel %vm2068_vm3, %v1465_v13, %v1593_v15 }
 0x189   : > { %1608 = vrot.lane.b32.xlu1 %v4572_v6, %s3295_s14  ;;  %v3197_v51 = vunpack.i.h.bf16 %v3195_v7  ;;  %v3196_v63 = vunpack.i.l.bf16 %v3195_v7  ;;  %v1925_v6 = vsel %vm502_vm0, %v3275_v22, %v3007_v31 }
 0x18a   : > { %3254 = vrot.lane.b32.xlu0 %v3253_v34, %s3293_s21  ;;  %v1958_v43 = vsel %vm1936_vm2, %v1925_v6, %v3087_v47 }
 0x18b   : > { %v1705_v16 = vpop.permute.xlu1 %1704  ;;  %v1982_v32 = vsel %vm1969_vm5, %v1949_v19, %v3196_v63  ;;  %v1990_v24 = vsel %vm1969_vm5, %v1957_v61, %v3197_v51  ;;  %v815_v51 = vld [vmem:[#allocation2 + $0x1a0] sm:$0xff] }
 0x18c   : > { %v1721_v9 = vpop.permute.xlu0 %1720  ;;  %v2114_v10 = vsel %vm2101_vm4, %v2081_v17, %v1705_v16  ;;  %v879_v61 = vld [vmem:[#allocation2 + $0x1a2] sm:$0xff] }
 0x18d   : > { %1736 = vrot.lane.b32.xlu1 %v4579_v11, %s3296_s15  ;;  %v2122_v28 = vsel %vm2101_vm4, %v2089_v52, %v1721_v9  ;;  %v5031_v52 = vld [vmem:[#allocation9_spill] sm:$0xff] }
 0x18e   : > { %3259 = vrot.lane.b32.xlu0 %v3258_v42, %s3297_s16 }
 0x18f   : > { %v3200_v23 = vpop.permute.xlu1 %3199 }
 0x190   : > { %v3202_v5 = vunpack.i.h.bf16 %v3200_v23  ;;  %v3201_v3 = vunpack.i.l.bf16 %v3200_v23  ;;  %v1833_v35 = vpop.permute.xlu0 %1832 }
 0x191   : > { %1864 = vrot.lane.b32.xlu1 %v876_v50, %s3298_s17  ;;  %v2147_v8 = vsel %vm2134_vm7, %v2114_v10, %v1833_v35  ;;  %v5029_v10 = vld [vmem:[#allocation3_spill] sm:$0xff] }
 0x192   : > { %v2015_v30 = vsel %vm2002_vm6, %v1982_v32, %v3201_v3  ;;  %v2023_v40 = vsel %vm2002_vm6, %v1990_v24, %v3202_v5  ;;  %1482 = vrot.lane.b32.xlu0 %v875_v20, %s3294_s13  ;;  %2858 = vmatprep.mubr.msk.f32.mxu0 %vm2201_vm9, %v2147_v8  ;;  %v3274_v20 = vld [vmem:[#allocation2 + $0x98] sm:$0xff]  ;;  %v2991_v35 = vunpack.i.l.bf16 %v5029_v10  ;;  %v3071_v8 = vunpack.i.l.bf16 %v5031_v52 }
 0x193   : > { %v1849_v46 = vpop.permute.xlu1 %1848  ;;  %v2048_v0 = vsel %vm2035_vm8, %v2015_v30, %v1449_v54  ;;  %v2056_v12 = vsel %vm2035_vm8, %v2023_v40, %v1465_v13  ;;  %v1917_v13 = vsel %vm502_vm0, %v3274_v20, %v2987_v25  ;;  %v5030_v32 = vld [vmem:[#allocation4_spill] sm:$0xff] }
 0x194   : > { %v2155_v55 = vsel %vm2134_vm7, %v2122_v28, %v1849_v46  ;;  %2423 = vmatmul.mubr.f32.gmra.mxu0 %v2048_v0  ;;  %v1451_v62 = vpop.permute.xlu0 %1450  ;;  %v1950_v44 = vsel %vm1936_vm2, %v1917_v13, %v3067_v27  ;;  %v3011_v24 = vunpack.i.l.bf16 %v5030_v32  ;;  %v4658_v28 = vld [vmem:[%s5000_s4] ss:$0 sm:$0xff] }
 0x195   : > { %1610 = vrot.lane.b32.xlu1 %v813_v21, %s3295_s14  ;;  %2866 = vmatprep.mubr.msk.f32.mxu1 %vm2201_vm9, %v2155_v55  ;;  %v5032_v21 = vld [vmem:[#allocation10_spill] sm:$0xff] }
 0x196   : > { %2463 = vmatmul.mubr.f32.gmra.mxu1 %v2056_v12  ;;  %1738 = vrot.lane.b32.xlu0 %v4607_v1, %s3296_s15  ;;  %v3091_v40 = vunpack.i.l.bf16 %v5032_v21 }
 0x197   : > { %v1467_v60 = vpop.permute.xlu1 %1466 }
 0x198   : > { %v1579_v58 = vpop.permute.xlu0 %1578 }
 0x199   : > { %1866 = vrot.lane.b32.xlu1 %v877_v59, %s3298_s17  ;;  %v2082_v15 = vsel %vm2068_vm3, %v1451_v62, %v1579_v58 }
 0x19a   : > { %1484 = vrot.lane.b32.xlu0 %v876_v50, %s3294_s13 }
 0x19b   : > { %v1595_v26 = vpop.permute.xlu1 %1594 }
 0x19c   : > { %v3205_v57 = vpop.permute.xlu0 %3204  ;;  %v2090_v42 = vsel %vm2068_vm3, %v1467_v60, %v1595_v26 }
 0x19d   : > { %1612 = vrot.lane.b32.xlu1 %v814_v2, %s3295_s14  ;;  %v3207_v36 = vunpack.i.h.bf16 %v3205_v57  ;;  %v3206_v54 = vunpack.i.l.bf16 %v3205_v57 }
 0x19e   : > { %3264 = vrot.lane.b32.xlu0 %v3263_v53, %s3293_s21 }
 0x19f   : > { %v1707_v18 = vpop.permute.xlu1 %1706  ;;  %v1983_v4 = vsel %vm1969_vm5, %v1950_v44, %v3206_v54  ;;  %v1991_v16 = vsel %vm1969_vm5, %v1958_v43, %v3207_v36 }
 0x1a0   : > { %v1723_v39 = vpop.permute.xlu0 %1722  ;;  %v2115_v37 = vsel %vm2101_vm4, %v2082_v15, %v1707_v18 }
 0x1a1   : > { %1740 = vrot.lane.b32.xlu1 %v846_v48, %s3296_s15  ;;  %v2123_v9 = vsel %vm2101_vm4, %v2090_v42, %v1723_v39 }
 0x1a2   : > { %1356 = vrot.lane.b32.xlu0 %v4579_v11, %s3297_s16 }
 0x1a3   : > { %v3210_v56 = vpop.permute.xlu1 %3209 }
 0x1a4   : > { %v3212_v34 = vunpack.i.h.bf16 %v3210_v56  ;;  %v3211_v7 = vunpack.i.l.bf16 %v3210_v56  ;;  %v1835_v41 = vpop.permute.xlu0 %1834 }
 0x1a5   : > { %1868 = vrot.lane.b32.xlu1 %v878_v49, %s3298_s17  ;;  %v2148_v11 = vsel %vm2134_vm7, %v2115_v37, %v1835_v41 }
 0x1a6   : > { %v2016_v33 = vsel %vm2002_vm6, %v1983_v4, %v3211_v7  ;;  %v2024_v63 = vsel %vm2002_vm6, %v1991_v16, %v3212_v34  ;;  %1486 = vrot.lane.b32.xlu0 %v877_v59, %s3294_s13  ;;  %2859 = vmatprep.mubr.msk.f32.mxu0 %vm2201_vm9, %v2148_v11  ;;  %v3277_v59 = vld [vmem:[#allocation2 + $0x108] sm:$0xff] }
 0x1a7   : > { %v1851_v29 = vpop.permute.xlu1 %1850  ;;  %v2049_v38 = vsel %vm2035_vm8, %v2016_v33, %v1451_v62  ;;  %v2057_v19 = vsel %vm2035_vm8, %v2024_v63, %v1467_v60  ;;  %v1926_v60 = vsel %vm502_vm0, %v3277_v59, %v3011_v24 }
 0x1a8   : > { %v2156_v50 = vsel %vm2134_vm7, %v2123_v9, %v1851_v29  ;;  %2428 = vmatmul.mubr.f32.gmra.mxu0 %v2049_v38  ;;  %v1453_v45 = vpop.permute.xlu0 %1452  ;;  %v1959_v53 = vsel %vm1936_vm2, %v1926_v60, %v3091_v40  ;;  %v2992_v38 = vunpack.i.h.bf16 %v5029_v10 }
 0x1a9   : > { %1614 = vrot.lane.b32.xlu1 %v815_v51, %s3295_s14  ;;  %2867 = vmatprep.mubr.msk.f32.mxu1 %vm2201_vm9, %v2156_v50 }
 0x1aa   : > { %2468 = vmatmul.mubr.f32.gmra.mxu1 %v2057_v19  ;;  %1742 = vrot.lane.b32.xlu0 %v847_v14, %s3296_s15  ;;  %v3012_v14 = vunpack.i.h.bf16 %v5030_v32  ;;  %v3092_v19 = vunpack.i.h.bf16 %v5032_v21 }
 0x1ab   : > { %v1469_v23 = vpop.permute.xlu1 %1468 }
 0x1ac   : > { %v1581_v17 = vpop.permute.xlu0 %1580 }
 0x1ad   : > { %1358 = vrot.lane.b32.xlu1 %v4607_v1, %s3297_s16  ;;  %v3276_v1 = vld [vmem:[#allocation2 + $0xa8] sm:$0xff]  ;;  %v2083_v57 = vsel %vm2068_vm3, %v1453_v45, %v1581_v17  ;;  %v3278_v17 = vld [vmem:[#allocation2 + $0xb0] sm:$0xff] }
 0x1ae   : > { %1870 = vrot.lane.b32.xlu0 %v879_v61, %s3298_s17  ;;  %v1918_v62 = vsel %vm502_vm0, %v3276_v1, %v2991_v35 }
 0x1af   : > { %v1597_v5 = vpop.permute.xlu1 %1596  ;;  %v1951_v58 = vsel %vm1936_vm2, %v1918_v62, %v3071_v8 }
 0x1b0   : > { %v3215_v3 = vpop.permute.xlu0 %3214  ;;  %v2091_v54 = vsel %vm2068_vm3, %v1469_v23, %v1597_v5  ;;  %v1919_v5 = vsel %vm502_vm0, %v3278_v17, %v2992_v38 }
 0x1b1   : > { %v3217_v46 = vunpack.i.h.bf16 %v3215_v3  ;;  %v3216_v0 = vunpack.i.l.bf16 %v3215_v3 }
 0x1b3   : > { %v1709_v30 = vpop.permute.xlu1 %1708  ;;  %v1984_v47 = vsel %vm1969_vm5, %v1951_v58, %v3216_v0  ;;  %v1992_v36 = vsel %vm1969_vm5, %v1959_v53, %v3217_v46 }
 0x1b4   : > { %v1725_v55 = vpop.permute.xlu0 %1724  ;;  %v2116_v27 = vsel %vm2101_vm4, %v2083_v57, %v1709_v30  ;;  %v3279_v30 = vld [vmem:[#allocation2 + $0x110] sm:$0xff] }
 0x1b5   : > { %v2124_v49 = vsel %vm2101_vm4, %v2091_v54, %v1725_v55  ;;  %v1927_v10 = vsel %vm502_vm0, %v3279_v30, %v3012_v14 }
 0x1b6   : > { %v2364_v12 = vpop.f32.mrf.mxu0 }
 0x1b7   : > { %v2365_v2 = vadd.f32 %v4658_v28, %v2364_v12  ;;  %v3220_v26 = vpop.permute.xlu1 %3219 }
 0x1b8   : > { %v3222_v25 = vunpack.i.h.bf16 %v3220_v26  ;;  %v3221_v48 = vunpack.i.l.bf16 %v3220_v26  ;;  %v2366_v31 = vpop.f32.mrf.mxu0  ;;  %v1837_v18 = vpop.permute.xlu0 %1836 }
 0x1b9   : > { %2524 = vst.msk [vmem:[%s4666_s26] sm:$0xff] %vm2523_vm12, %v2365_v2  ;;  %v2149_v39 = vsel %vm2134_vm7, %v2116_v27, %v1837_v18  ;;  %v2627_v34 = vmul.f32 %v2365_v2, %v2365_v2  ;;  %v2556_v4 = vsel %vm2523_vm12, %v2365_v2, 0.0 }
 0x1ba   : > { %v2017_v20 = vsel %vm2002_vm6, %v1984_v47, %v3221_v48  ;;  %v2025_v13 = vsel %vm2002_vm6, %v1992_v36, %v3222_v25  ;;  %2860 = vmatprep.mubr.msk.f32.mxu0 %vm2201_vm9, %v2149_v39 }
 0x1bb   : > { %v1853_v22 = vpop.permute.xlu1 %1852  ;;  %v2050_v6 = vsel %vm2035_vm8, %v2017_v20, %v1453_v45  ;;  %v2058_v43 = vsel %vm2035_vm8, %v2025_v13, %v1469_v23  ;;  %v2659_v51 = vsel %vm2523_vm12, %v2627_v34, 0.0  ;;  %v3072_v45 = vunpack.i.h.bf16 %v5031_v52 }
 0x1bc   : > { %v2157_v44 = vsel %vm2134_vm7, %v2124_v49, %v1853_v22  ;;  %2433 = vmatmul.mubr.f32.gmra.mxu0 %v2050_v6  ;;  %v1455_v56 = vpop.permute.xlu0 %1454  ;;  %v1960_v52 = vsel %vm1936_vm2, %v1927_v10, %v3092_v19 }
 0x1bd   : > { %2868 = vmatprep.mubr.msk.f32.mxu1 %vm2201_vm9, %v2157_v44  ;;  %v1952_v32 = vsel %vm1936_vm2, %v1919_v5, %v3072_v45 }
 0x1be   : > { %v2369_v15 = vpop.f32.mrf.mxu0  ;;  %2473 = vmatmul.mubr.f32.gmra.mxu1 %v2058_v43  ;;  %v5033_v43 = vld [vmem:[#allocation5_spill] sm:$0xff] }
 0x1bf   : > { %v2370_v7 = vadd.f32 %v4658_v28, %v2369_v15  ;;  %v1471_v37 = vpop.permute.xlu1 %1470  ;;  %v3016_v15 = vunpack.i.l.bf16 %v5033_v43 }
 0x1c0   : > { %v2371_v41 = vpop.f32.mrf.mxu0  ;;  %v1583_v11 = vpop.permute.xlu0 %1582 }
 0x1c1   : > { %2525 = vst.msk [vmem:[%s4666_s26 + $0x8] sm:$0xff] %vm2523_vm12, %v2370_v7  ;;  %v2557_v16 = vsel %vm2523_vm12, %v2370_v7, 0.0  ;;  %v2628_v42 = vmul.f32 %v2370_v7, %v2370_v7  ;;  %v2084_v21 = vsel %vm2068_vm3, %v1455_v56, %v1583_v11  ;;  %v5034_v41 = vld [vmem:[#allocation11_spill] sm:$0xff] }
 0x1c2   : > { %v2558_v33 = vadd.f32 %v2557_v16, %v2556_v4  ;;  %v3096_v4 = vunpack.i.l.bf16 %v5034_v41 }
 0x1c3   : > { %v2660_v63 = vsel %vm2523_vm12, %v2628_v42, 0.0  ;;  %v1599_v9 = vpop.permute.xlu1 %1598 }
 0x1c4   : > { %v2661_v29 = vadd.f32 %v2660_v63, %v2659_v51  ;;  %v3225_v50 = vpop.permute.xlu0 %3224  ;;  %v2092_v1 = vsel %vm2068_vm3, %v1471_v37, %v1599_v9 }
 0x1c5   : > { %v3227_v3 = vunpack.i.h.bf16 %v3225_v50  ;;  %v3226_v35 = vunpack.i.l.bf16 %v3225_v50  ;;  %v3017_v50 = vunpack.i.h.bf16 %v5033_v43 }
 0x1c7   : > { %v1711_v23 = vpop.permute.xlu1 %1710  ;;  %v1985_v26 = vsel %vm1969_vm5, %v1952_v32, %v3226_v35  ;;  %v1993_v53 = vsel %vm1969_vm5, %v1960_v52, %v3227_v3  ;;  %v3281_v52 = vld [vmem:[#allocation2 + $0x128] sm:$0xff] }
 0x1c8   : > { %v2374_v61 = vpop.f32.mrf.mxu0  ;;  %v1727_v24 = vpop.permute.xlu0 %1726  ;;  %v2117_v60 = vsel %vm2101_vm4, %v2084_v21, %v1711_v23  ;;  %v1929_v21 = vsel %vm502_vm0, %v3281_v52, %v3017_v50 }
 0x1c9   : > { %v2375_v8 = vadd.f32 %v4658_v28, %v2374_v61  ;;  %v2125_v27 = vsel %vm2101_vm4, %v2092_v1, %v1727_v24  ;;  %v3097_v61 = vunpack.i.h.bf16 %v5034_v41 }
 0x1ca   : > { %v2376_v40 = vpop.f32.mrf.mxu0 }
 0x1cb   : > { %2526 = vst.msk [vmem:[%s4666_s26 + $0x10] sm:$0xff] %vm2523_vm12, %v2375_v8  ;;  %v2559_v46 = vsel %vm2523_vm12, %v2375_v8, 0.0  ;;  %v2629_v0 = vmul.f32 %v2375_v8, %v2375_v8  ;;  %v3230_v55 = vpop.permute.xlu1 %3229 }
 0x1cc   : > { %v2560_v62 = vadd.f32 %v2559_v46, %v2558_v33  ;;  %v3232_v12 = vunpack.i.h.bf16 %v3230_v55  ;;  %v3231_v59 = vunpack.i.l.bf16 %v3230_v55  ;;  %v1839_v2 = vpop.permute.xlu0 %1838  ;;  %v1962_v55 = vsel %vm1936_vm2, %v1929_v21, %v3097_v61 }
 0x1cd   : > { %v2662_v58 = vsel %vm2523_vm12, %v2629_v0, 0.0  ;;  %v2150_v25 = vsel %vm2134_vm7, %v2117_v60, %v1839_v2 }
 0x1ce   : > { %v2663_v57 = vadd.f32 %v2662_v58, %v2661_v29  ;;  %v2018_v48 = vsel %vm2002_vm6, %v1985_v26, %v3231_v59  ;;  %v2026_v31 = vsel %vm2002_vm6, %v1993_v53, %v3232_v12  ;;  %2861 = vmatprep.mubr.msk.f32.mxu0 %vm2201_vm9, %v2150_v25 }
 0x1cf   : > { %v1855_v18 = vpop.permute.xlu1 %1854  ;;  %v2051_v47 = vsel %vm2035_vm8, %v2018_v48, %v1455_v56  ;;  %v2379_v54 = vpop.f32.mrf.mxu0  ;;  %v2059_v13 = vsel %vm2035_vm8, %v2026_v31, %v1471_v37  ;;  %v3280_v37 = vld [vmem:[#allocation2 + $0x120] sm:$0xff] }
 0x1d0   : > { %v2158_v36 = vsel %vm2134_vm7, %v2125_v27, %v1855_v18  ;;  %2438 = vmatmul.mubr.f32.gmra.mxu0 %v2051_v47  ;;  %v1473_v39 = vpop.permute.xlu0 %1472  ;;  %v2380_v20 = vadd.f32 %v4658_v28, %v2379_v54  ;;  %v1928_v33 = vsel %vm502_vm0, %v3280_v37, %v3016_v15 }
 0x1d1   : > { %2869 = vmatprep.mubr.msk.f32.mxu1 %vm2201_vm9, %v2158_v36  ;;  %v2381_v49 = vpop.f32.mrf.mxu0  ;;  %v1961_v63 = vsel %vm1936_vm2, %v1928_v33, %v3096_v4 }
 0x1d2   : > { %2478 = vmatmul.mubr.f32.gmra.mxu1 %v2059_v13  ;;  %2527 = vst.msk [vmem:[%s4666_s26 + $0x18] sm:$0xff] %vm2523_vm12, %v2380_v20  ;;  %v2561_v22 = vsel %vm2523_vm12, %v2380_v20, 0.0  ;;  %v2630_v6 = vmul.f32 %v2380_v20, %v2380_v20  ;;  %v5035_v20 = vld [vmem:[#allocation6_spill] sm:$0xff] }
 0x1d3   : > { %v1601_v44 = vpop.permute.xlu1 %1600  ;;  %v2562_v56 = vadd.f32 %v2561_v22, %v2560_v62  ;;  %v3021_v13 = vunpack.i.l.bf16 %v5035_v20  ;;  %v617_v22 = vld [vmem:[#allocation2 + $0x138] sm:$0xff]  ;;  %v3022_v4 = vunpack.i.h.bf16 %v5035_v20 }
 0x1d4   : > { %v2664_v34 = vsel %vm2523_vm12, %v2630_v6, 0.0  ;;  %v3235_v7 = vpop.permute.xlu0 %3234  ;;  %v2093_v9 = vsel %vm2068_vm3, %v1473_v39, %v1601_v44  ;;  %v5036_v6 = vld [vmem:[#allocation12_spill] sm:$0xff] }
 0x1d5   : > { %v2665_v16 = vadd.f32 %v2664_v34, %v2663_v57  ;;  %v3236_v42 = vunpack.i.l.bf16 %v3235_v7  ;;  %v3237_v35 = vunpack.i.h.bf16 %v3235_v7  ;;  %v3101_v44 = vunpack.i.l.bf16 %v5036_v6 }
 0x1d6   : > { %v1930_v34 = vsel %vm502_vm0, %v617_v22, %v3021_v13  ;;  %v3102_v50 = vunpack.i.h.bf16 %v5036_v6 }
 0x1d7   : > { %v1729_v11 = vpop.permute.xlu1 %1728  ;;  %v1994_v23 = vsel %vm1969_vm5, %v1961_v63, %v3236_v42  ;;  %v1995_v59 = vsel %vm1969_vm5, %v1962_v55, %v3237_v35 }
 0x1d8   : > { %v3240_v51 = vpop.permute.xlu0 %3239  ;;  %v2126_v14 = vsel %vm2101_vm4, %v2093_v9, %v1729_v11 }
 0x1d9   : > { %v3241_v29 = vunpack.i.l.bf16 %v3240_v51  ;;  %v3242_v32 = vunpack.i.h.bf16 %v3240_v51 }
 0x1da   : > { %v2384_v38 = vpop.f32.mrf.mxu0 }
 0x1db   : > { %v2385_v45 = vadd.f32 %v4658_v28, %v2384_v38  ;;  %v1857_v19 = vpop.permute.xlu1 %1856  ;;  %v2027_v3 = vsel %vm2002_vm6, %v1994_v23, %v3241_v29  ;;  %v2028_v58 = vsel %vm2002_vm6, %v1995_v59, %v3242_v32  ;;  %v618_v38 = vld [vmem:[#allocation2 + $0x140] sm:$0xff] }
 0x1dc   : > { %v2159_v17 = vsel %vm2134_vm7, %v2126_v14, %v1857_v19  ;;  %v2386_v5 = vpop.f32.mrf.mxu0  ;;  %v1475_v30 = vpop.permute.xlu0 %1474  ;;  %v2060_v10 = vsel %vm2035_vm8, %v2027_v3, %v1473_v39 }
 0x1dd   : > { %2528 = vst.msk [vmem:[%s4666_s26 + $0x20] sm:$0xff] %vm2523_vm12, %v2385_v45  ;;  %v2563_v24 = vsel %vm2523_vm12, %v2385_v45, 0.0  ;;  %v2631_v8 = vmul.f32 %v2385_v45, %v2385_v45  ;;  %2870 = vmatprep.mubr.msk.f32.mxu1 %vm2201_vm9, %v2159_v17  ;;  %v2061_v18 = vsel %vm2035_vm8, %v2028_v58, %v1475_v30 }
 0x1de   : > { %v2564_v40 = vadd.f32 %v2563_v24, %v2562_v56  ;;  %2483 = vmatmul.mubr.f32.gmra.mxu1 %v2060_v10  ;;  %v1931_v24 = vsel %vm502_vm0, %v618_v38, %v3022_v4 }
 0x1df   : > { %v2666_v46 = vsel %vm2523_vm12, %v2631_v8, 0.0  ;;  %v1603_v0 = vpop.permute.xlu1 %1602 }
 0x1e0   : > { %v2667_v1 = vadd.f32 %v2666_v46, %v2665_v16  ;;  %v2094_v62 = vsel %vm2068_vm3, %v1475_v30, %v1603_v0  ;;  %v1731_v12 = vpop.permute.xlu0 %1730  ;;  %v1963_v16 = vsel %vm1936_vm2, %v1930_v34, %v3101_v44  ;;  %v1964_v30 = vsel %vm1936_vm2, %v1931_v24, %v3102_v50 }
 0x1e1   : > { %v2127_v2 = vsel %vm2101_vm4, %v2094_v62, %v1731_v12 }
 0x1e2   : > { %v2389_v60 = vpop.f32.mrf.mxu0 }
 0x1e3   : > { %v2390_v26 = vadd.f32 %v4658_v28, %v2389_v60  ;;  %v1859_v53 = vpop.permute.xlu1 %1858 }
 0x1e4   : > { %v2160_v57 = vsel %vm2134_vm7, %v2127_v2, %v1859_v53  ;;  %v2391_v25 = vpop.f32.mrf.mxu0  ;;  %v1477_v27 = vpop.permute.xlu0 %1476 }
 0x1e5   : > { %2529 = vst.msk [vmem:[%s4666_s26 + $0x28] sm:$0xff] %vm2523_vm12, %v2390_v26  ;;  %v2565_v48 = vsel %vm2523_vm12, %v2390_v26, 0.0  ;;  %v2632_v31 = vmul.f32 %v2390_v26, %v2390_v26  ;;  %2871 = vmatprep.mubr.msk.f32.mxu1 %vm2201_vm9, %v2160_v57  ;;  %v5037_v25 = vld [vmem:[#allocation7_spill] sm:$0xff] }
 0x1e6   : > { %v2566_v47 = vadd.f32 %v2565_v48, %v2564_v40  ;;  %2488 = vmatmul.mubr.f32.gmra.mxu1 %v2061_v18  ;;  %v3026_v48 = vunpack.i.l.bf16 %v5037_v25  ;;  %v5038_v18 = vld [vmem:[#allocation13_spill] sm:$0xff]  ;;  %v3027_v6 = vunpack.i.h.bf16 %v5037_v25 }
 0x1e7   : > { %v2668_v36 = vsel %vm2523_vm12, %v2632_v31, 0.0  ;;  %v1605_v54 = vpop.permute.xlu1 %1604  ;;  %v3107_v34 = vunpack.i.h.bf16 %v5038_v18 }
 0x1e8   : > { %v2669_v39 = vadd.f32 %v2668_v36, %v2667_v1  ;;  %v3245_v49 = vpop.permute.xlu0 %3244  ;;  %v2095_v42 = vsel %vm2068_vm3, %v1477_v27, %v1605_v54 }
 0x1e9   : > { %v3246_v56 = vunpack.i.l.bf16 %v3245_v49  ;;  %v3247_v23 = vunpack.i.h.bf16 %v3245_v49 }
 0x1eb   : > { %v1733_v43 = vpop.permute.xlu1 %1732  ;;  %v1996_v29 = vsel %vm1969_vm5, %v1963_v16, %v3246_v56  ;;  %v1997_v21 = vsel %vm1969_vm5, %v1964_v30, %v3247_v23 }
 0x1ec   : > { %v2394_v15 = vpop.f32.mrf.mxu0  ;;  %v3250_v7 = vpop.permute.xlu0 %3249  ;;  %v2128_v33 = vsel %vm2101_vm4, %v2095_v42, %v1733_v43 }
 0x1ed   : > { %v2395_v41 = vadd.f32 %v4658_v28, %v2394_v15  ;;  %v3251_v11 = vunpack.i.l.bf16 %v3250_v7  ;;  %v3252_v3 = vunpack.i.h.bf16 %v3250_v7  ;;  %v620_v15 = vld [vmem:[#allocation2 + $0x158] sm:$0xff] }
 0x1ee   : > { %v2396_v37 = vpop.f32.mrf.mxu0 }
 0x1ef   : > { %2530 = vst.msk [vmem:[%s4666_s26 + $0x30] sm:$0xff] %vm2523_vm12, %v2395_v41  ;;  %v2567_v51 = vsel %vm2523_vm12, %v2395_v41, 0.0  ;;  %v2633_v63 = vmul.f32 %v2395_v41, %v2395_v41  ;;  %v1861_v9 = vpop.permute.xlu1 %1860  ;;  %v2029_v19 = vsel %vm2002_vm6, %v1996_v29, %v3251_v11  ;;  %v2030_v0 = vsel %vm2002_vm6, %v1997_v21, %v3252_v3 }
 0x1f0   : > { %v2568_v14 = vadd.f32 %v2567_v51, %v2566_v47  ;;  %v2161_v45 = vsel %vm2134_vm7, %v2128_v33, %v1861_v9  ;;  %v1479_v17 = vpop.permute.xlu0 %1478  ;;  %v2062_v5 = vsel %vm2035_vm8, %v2029_v19, %v1477_v27  ;;  %v619_v27 = vld [vmem:[#allocation2 + $0x150] sm:$0xff]  ;;  %v3106_v47 = vunpack.i.l.bf16 %v5038_v18 }
 0x1f1   : > { %v2670_v61 = vsel %vm2523_vm12, %v2633_v63, 0.0  ;;  %2872 = vmatprep.mubr.msk.f32.mxu1 %vm2201_vm9, %v2161_v45  ;;  %v2063_v26 = vsel %vm2035_vm8, %v2030_v0, %v1479_v17  ;;  %v1933_v9 = vsel %vm502_vm0, %v620_v15, %v3027_v6  ;;  %v5040_v0 = vld [vmem:[#allocation14_spill] sm:$0xff] }
 0x1f2   : > { %v2671_v35 = vadd.f32 %v2670_v61, %v2669_v39  ;;  %2493 = vmatmul.mubr.f32.gmra.mxu1 %v2062_v5  ;;  %v1932_v39 = vsel %vm502_vm0, %v619_v27, %v3026_v48  ;;  %v1966_v45 = vsel %vm1936_vm2, %v1933_v9, %v3107_v34 }
 0x1f3   : > { %v1607_v8 = vpop.permute.xlu1 %1606  ;;  %v2399_v32 = vpop.f32.mrf.mxu0  ;;  %v1965_v13 = vsel %vm1936_vm2, %v1932_v39, %v3106_v47  ;;  %v622_v39 = vld [vmem:[#allocation2 + $0x170] sm:$0xff] }
 0x1f4   : > { %v2096_v10 = vsel %vm2068_vm3, %v1479_v17, %v1607_v8  ;;  %v1735_v40 = vpop.permute.xlu0 %1734  ;;  %v2400_v52 = vadd.f32 %v4658_v28, %v2399_v32 }
 0x1f5   : > { %v2401_v46 = vpop.f32.mrf.mxu0  ;;  %v2129_v55 = vsel %vm2101_vm4, %v2096_v10, %v1735_v40 }
 0x1f6   : > { %2531 = vst.msk [vmem:[%s4666_s26 + $0x38] sm:$0xff] %vm2523_vm12, %v2400_v52  ;;  %v2569_v1 = vsel %vm2523_vm12, %v2400_v52, 0.0  ;;  %v2634_v62 = vmul.f32 %v2400_v52, %v2400_v52  ;;  %v5039_v52 = vld [vmem:[#allocation8_spill] sm:$0xff]  ;;  %v621_v46 = vld [vmem:[#allocation2 + $0x168] sm:$0xff] }
 0x1f7   : > { %v1863_v12 = vpop.permute.xlu1 %1862  ;;  %v2570_v59 = vadd.f32 %v2569_v1, %v2568_v14  ;;  %v3031_v21 = vunpack.i.l.bf16 %v5039_v52  ;;  %v3032_v18 = vunpack.i.h.bf16 %v5039_v52 }
 0x1f8   : > { %v2162_v60 = vsel %vm2134_vm7, %v2129_v55, %v1863_v12  ;;  %v2672_v58 = vsel %vm2523_vm12, %v2634_v62, 0.0  ;;  %v1481_v2 = vpop.permute.xlu0 %1480  ;;  %v3111_v55 = vunpack.i.l.bf16 %v5040_v0 }
 0x1f9   : > { %2873 = vmatprep.mubr.msk.f32.mxu1 %vm2201_vm9, %v2162_v60  ;;  %v2673_v53 = vadd.f32 %v2672_v58, %v2671_v35  ;;  %v1934_v12 = vsel %vm502_vm0, %v621_v46, %v3031_v21 }
 0x1fa   : > { %2498 = vmatmul.mubr.f32.gmra.mxu1 %v2063_v26  ;;  %v1967_v58 = vsel %vm1936_vm2, %v1934_v12, %v3111_v55 }
 0x1fb   : > { %v1609_v57 = vpop.permute.xlu1 %1608 }
 0x1fc   : > { %v3255_v31 = vpop.permute.xlu0 %3254  ;;  %v2097_v49 = vsel %vm2068_vm3, %v1481_v2, %v1609_v57 }
 0x1fd   : > { %v3256_v36 = vunpack.i.l.bf16 %v3255_v31  ;;  %v3257_v16 = vunpack.i.h.bf16 %v3255_v31 }
 0x1ff   : > { %v1737_v54 = vpop.permute.xlu1 %1736  ;;  %v1998_v43 = vsel %vm1969_vm5, %v1965_v13, %v3256_v36  ;;  %v1999_v3 = vsel %vm1969_vm5, %v1966_v45, %v3257_v16 }
 0x200   : > { %v3260_v20 = vpop.permute.xlu0 %3259  ;;  %v2130_v44 = vsel %vm2101_vm4, %v2097_v49, %v1737_v54 }
 0x201   : > { %v3261_v22 = vunpack.i.l.bf16 %v3260_v20  ;;  %v3262_v33 = vunpack.i.h.bf16 %v3260_v20  ;;  %v3112_v20 = vunpack.i.h.bf16 %v5040_v0 }
 0x203   : > { %v1865_v56 = vpop.permute.xlu1 %1864  ;;  %v2031_v4 = vsel %vm2002_vm6, %v1998_v43, %v3261_v22  ;;  %v2032_v24 = vsel %vm2002_vm6, %v1999_v3, %v3262_v33 }
 0x204   : > { %v2163_v7 = vsel %vm2134_vm7, %v2130_v44, %v1865_v56  ;;  %v2404_v41 = vpop.f32.mrf.mxu0  ;;  %v1483_v42 = vpop.permute.xlu0 %1482  ;;  %v2064_v37 = vsel %vm2035_vm8, %v2031_v4, %v1481_v2 }
 0x205   : > { %v2405_v11 = vadd.f32 %v4658_v28, %v2404_v41  ;;  %2874 = vmatprep.mubr.msk.f32.mxu1 %vm2201_vm9, %v2163_v7  ;;  %v2065_v40 = vsel %vm2035_vm8, %v2032_v24, %v1483_v42  ;;  %v1935_v7 = vsel %vm502_vm0, %v622_v39, %v3032_v18  ;;  %vm2625_vm0 = vcmask 57344  }
 0x206   : > { %v2406_v51 = vpop.f32.mrf.mxu0  ;;  %v2444_v63 = vpop.f32.mrf.mxu1  ;;  %2503 = vmatmul.mubr.f32.gmra.mxu1 %v2064_v37 }
 0x207   : > { %2532 = vst.msk [vmem:[%s4666_s26 + $0x40] sm:$0xff] %vm2523_vm12, %v2405_v11  ;;  %v2571_v29 = vsel %vm2523_vm12, %v2405_v11, 0.0  ;;  %v2635_v38 = vmul.f32 %v2405_v11, %v2405_v11  ;;  %v4810_v50 = vadd.f32 %v4658_v28, %v2444_v63  ;;  %v1611_v14 = vpop.permute.xlu1 %1610  ;;  %v1968_v11 = vsel %vm1936_vm2, %v1935_v7, %v3112_v20 }
 0x208   : > { %v2572_v19 = vadd.f32 %v2571_v29, %v2570_v59  ;;  %v2098_v23 = vsel %vm2068_vm3, %v1483_v42, %v1611_v14  ;;  %v2446_v61 = vpop.f32.mrf.mxu1  ;;  %v1739_v5 = vpop.permute.xlu0 %1738 }
 0x209   : > { %v2674_v17 = vsel %vm2523_vm12, %v2635_v38, 0.0  ;;  %2540 = vst.msk [vmem:[%s4666_s26 + $0x80] sm:$0xff] %vm2523_vm12, %v4810_v50  ;;  %v2131_v8 = vsel %vm2101_vm4, %v2098_v23, %v1739_v5 }
 0x20a   : > { %v2675_v35 = vadd.f32 %v2674_v17, %v2673_v53 }
 0x20b   : > { %v1867_v30 = vpop.permute.xlu1 %1866 }
 0x20c   : > { %v2164_v10 = vsel %vm2134_vm7, %v2131_v8, %v1867_v30  ;;  %v1485_v32 = vpop.permute.xlu0 %1484 }
 0x20d   : > { %2875 = vmatprep.mubr.msk.f32.mxu1 %vm2201_vm9, %v2164_v10 }
 0x20e   : > { %2508 = vmatmul.mubr.f32.gmra.mxu1 %v2065_v40 }
 0x20f   : > { %v1613_v1 = vpop.permute.xlu1 %1612 }
 0x210   : > { %v3265_v62 = vpop.permute.xlu0 %3264  ;;  %v2099_v53 = vsel %vm2068_vm3, %v1485_v32, %v1613_v1 }
 0x211   : > { %v3266_v59 = vunpack.i.l.bf16 %v3265_v62  ;;  %v3267_v22 = vunpack.i.h.bf16 %v3265_v62 }
 0x213   : > { %v1741_v60 = vpop.permute.xlu1 %1740  ;;  %v2000_v2 = vsel %vm1969_vm5, %v1967_v58, %v3266_v59  ;;  %v2001_v33 = vsel %vm1969_vm5, %v1968_v11, %v3267_v22 }
 0x214   : > { %v1357_v26 = vpop.permute.xlu0 %1356  ;;  %v2132_v25 = vsel %vm2101_vm4, %v2099_v53, %v1741_v60 }
 0x215   : > { %v2033_v57 = vsel %vm2002_vm6, %v2000_v2, %v1357_v26 }
 0x216   : > { %v2066_v54 = vsel %vm2035_vm8, %v2033_v57, %v1485_v32 }
 0x217   : > { %v1869_v48 = vpop.permute.xlu1 %1868 }
 0x218   : > { %v2165_v31 = vsel %vm2134_vm7, %v2132_v25, %v1869_v48  ;;  %v2409_v27 = vpop.f32.mrf.mxu0  ;;  %v1487_v47 = vpop.permute.xlu0 %1486 }
 0x219   : > { %v2410_v36 = vadd.f32 %v4658_v28, %v2409_v27  ;;  %2876 = vmatprep.mubr.msk.f32.mxu1 %vm2201_vm9, %v2165_v31 }
 0x21a   : > { %v2411_v13 = vpop.f32.mrf.mxu0  ;;  %v2449_v49 = vpop.f32.mrf.mxu1  ;;  %2513 = vmatmul.mubr.f32.gmra.mxu1 %v2066_v54 }
 0x21b   : > { %2533 = vst.msk [vmem:[%s4666_s26 + $0x48] sm:$0xff] %vm2523_vm12, %v2410_v36  ;;  %v2573_v6 = vsel %vm2523_vm12, %v2410_v36, 0.0  ;;  %v2636_v44 = vmul.f32 %v2410_v36, %v2410_v36  ;;  %v4842_v56 = vadd.f32 %v4658_v28, %v2449_v49  ;;  %v1615_v43 = vpop.permute.xlu1 %1614 }
 0x21c   : > { %v2574_v15 = vadd.f32 %v2573_v6, %v2572_v19  ;;  %v2451_v34 = vpop.f32.mrf.mxu1  ;;  %v1743_v4 = vpop.permute.xlu0 %1742  ;;  %v2100_v42 = vsel %vm2068_vm3, %v1487_v47, %v1615_v43 }
 0x21d   : > { %v2676_v41 = vsel %vm2523_vm12, %v2636_v44, 0.0  ;;  %2541 = vst.msk [vmem:[%s4666_s26 + $0x88] sm:$0xff] %vm2523_vm12, %v4842_v56  ;;  %v2133_v63 = vsel %vm2101_vm4, %v2100_v42, %v1743_v4 }
 0x21e   : > { %v2677_v16 = vadd.f32 %v2676_v41, %v2675_v35 }
 0x21f   : > { %v1359_v37 = vpop.permute.xlu1 %1358 }
 0x220   : > { %v2034_v51 = vsel %vm2002_vm6, %v2001_v33, %v1359_v37  ;;  %v1871_v9 = vpop.permute.xlu0 %1870 }
 0x221   : > { %v2067_v29 = vsel %vm2035_vm8, %v2034_v51, %v1487_v47  ;;  %v2166_v38 = vsel %vm2134_vm7, %v2133_v63, %v1871_v9 }
 0x222   : > { %2877 = vmatprep.mubr.msk.f32.mxu1 %vm2201_vm9, %v2166_v38 }
 0x223   : > { %2518 = vmatmul.mubr.f32.gmra.mxu1 %v2067_v29  ;;  %v2643_v29 = vmul.f32 %v4810_v50, %v4810_v50 }
 0x22c   : > { %v2414_v14 = vpop.f32.mrf.mxu0 }
 0x22d   : > { %v2415_v45 = vadd.f32 %v4658_v28, %v2414_v14 }
 0x22e   : > { %v2416_v19 = vpop.f32.mrf.mxu0  ;;  %v2454_v23 = vpop.f32.mrf.mxu1 }
 0x22f   : > { %2534 = vst.msk [vmem:[%s4666_s26 + $0x50] sm:$0xff] %vm2523_vm12, %v2415_v45  ;;  %v2575_v61 = vsel %vm2523_vm12, %v2415_v45, 0.0  ;;  %v2637_v17 = vmul.f32 %v2415_v45, %v2415_v45  ;;  %v4862_v5 = vadd.f32 %v4658_v28, %v2454_v23 }
 0x230   : > { %v2576_v3 = vadd.f32 %v2575_v61, %v2574_v15  ;;  %v2456_v35 = vpop.f32.mrf.mxu1  ;;  %v2587_v61 = vsel %vm2523_vm12, %v4810_v50, 0.0 }
 0x231   : > { %v2678_v24 = vsel %vm2523_vm12, %v2637_v17, 0.0  ;;  %2542 = vst.msk [vmem:[%s4666_s26 + $0x90] sm:$0xff] %vm2523_vm12, %v4862_v5  ;;  %v2644_v17 = vmul.f32 %v4842_v56, %v4842_v56 }
 0x232   : > { %v2679_v8 = vadd.f32 %v2678_v24, %v2677_v16 }
 0x233   : > { %v2692_v50 = vsel %vm2523_vm12, %v2644_v17, 0.0 }
 0x240   : > { %v2419_v30 = vpop.f32.mrf.mxu0 }
 0x241   : > { %v2420_v10 = vadd.f32 %v4658_v28, %v2419_v30  ;;  %v2589_v30 = vsel %vm2523_vm12, %v4842_v56, 0.0 }
 0x242   : > { %v2421_v32 = vpop.f32.mrf.mxu0  ;;  %v2459_v40 = vpop.f32.mrf.mxu1 }
 0x243   : > { %2535 = vst.msk [vmem:[%s4666_s26 + $0x58] sm:$0xff] %vm2523_vm12, %v2420_v10  ;;  %v2577_v52 = vsel %vm2523_vm12, %v2420_v10, 0.0  ;;  %v2638_v21 = vmul.f32 %v2420_v10, %v2420_v10  ;;  %v4873_v46 = vadd.f32 %v4658_v28, %v2459_v40  ;;  %v2645_v10 = vmul.f32 %v4862_v5, %v4862_v5 }
 0x244   : > { %v2578_v0 = vadd.f32 %v2577_v52, %v2576_v3  ;;  %v2461_v55 = vpop.f32.mrf.mxu1  ;;  %v2591_v52 = vsel %vm2523_vm12, %v4862_v5, 0.0 }
 0x245   : > { %v2680_v1 = vsel %vm2523_vm12, %v2638_v21, 0.0  ;;  %2543 = vst.msk [vmem:[%s4666_s26 + $0x98] sm:$0xff] %vm2523_vm12, %v4873_v46  ;;  %v2646_v21 = vmul.f32 %v4873_v46, %v4873_v46  ;;  %v2593_v56 = vsel %vm2523_vm12, %v4873_v46, 0.0 }
 0x246   : > { %v2681_v62 = vadd.f32 %v2680_v1, %v2679_v8  ;;  %v2690_v8 = vsel %vm2523_vm12, %v2643_v29, 0.0  ;;  %v2694_v1 = vsel %vm2523_vm12, %v2645_v10, 0.0 }
 0x254   : > { %v2424_v12 = vpop.f32.mrf.mxu0 }
 0x255   : > { %v2425_v59 = vadd.f32 %v4658_v28, %v2424_v12 }
 0x256   : > { %v2426_v60 = vpop.f32.mrf.mxu0  ;;  %v2464_v58 = vpop.f32.mrf.mxu1 }
 0x257   : > { %2536 = vst.msk [vmem:[%s4666_s26 + $0x60] sm:$0xff] %vm2523_vm12, %v2425_v59  ;;  %v2579_v2 = vsel %vm2523_vm12, %v2425_v59, 0.0  ;;  %v2639_v26 = vmul.f32 %v2425_v59, %v2425_v59  ;;  %v4884_v53 = vadd.f32 %v4658_v28, %v2464_v58  ;;  %v2696_v60 = vsel %vm2523_vm12, %v2646_v21, 0.0 }
 0x258   : > { %v2580_v57 = vadd.f32 %v2579_v2, %v2578_v0  ;;  %v2466_v25 = vpop.f32.mrf.mxu1 }
 0x259   : > { %v2682_v48 = vsel %vm2523_vm12, %v2639_v26, 0.0  ;;  %2544 = vst.msk [vmem:[%s4666_s26 + $0xa0] sm:$0xff] %vm2523_vm12, %v4884_v53  ;;  %v2595_v5 = vsel %vm2523_vm12, %v4884_v53, 0.0 }
 0x25a   : > { %v2683_v31 = vadd.f32 %v2682_v48, %v2681_v62  ;;  %v2647_v62 = vmul.f32 %v4884_v53, %v4884_v53 }
 0x25c   : > { %v2698_v25 = vsel %vm2523_vm12, %v2647_v62, 0.0 }
 0x268   : > { %v2429_v27 = vpop.f32.mrf.mxu0 }
 0x269   : > { %v2430_v18 = vadd.f32 %v4658_v28, %v2429_v27 }
 0x26a   : > { %v2431_v47 = vpop.f32.mrf.mxu0  ;;  %v2469_v36 = vpop.f32.mrf.mxu1 }
 0x26b   : > { %2537 = vst.msk [vmem:[%s4666_s26 + $0x68] sm:$0xff] %vm2523_vm12, %v2430_v18  ;;  %v2581_v54 = vsel %vm2523_vm12, %v2430_v18, 0.0  ;;  %v2640_v39 = vmul.f32 %v2430_v18, %v2430_v18  ;;  %v2470_v20 = vadd.f32 %v4658_v28, %v2469_v36 }
 0x26c   : > { %v2582_v13 = vadd.f32 %v2581_v54, %v2580_v57  ;;  %v2471_v49 = vpop.f32.mrf.mxu1 }
 0x26d   : > { %v2684_v22 = vsel %vm2523_vm12, %v2640_v39, 0.0  ;;  %2545 = vst.msk [vmem:[%s4666_s26 + $0xa8] sm:$0xff] %vm2523_vm12, %v2470_v20  ;;  %v2648_v58 = vmul.f32 %v2470_v20, %v2470_v20  ;;  %v2597_v48 = vsel %vm2523_vm12, %v2470_v20, 0.0 }
 0x26e   : > { %v2685_v6 = vadd.f32 %v2684_v22, %v2683_v31 }
 0x26f   : > { %v2700_v36 = vsel %vm2523_vm12, %v2648_v58, 0.0 }
 0x27c   : > { %v2434_v44 = vpop.f32.mrf.mxu0 }
 0x27d   : > { %v2435_v43 = vadd.f32 %v4658_v28, %v2434_v44 }
 0x27e   : > { %v2436_v15 = vpop.f32.mrf.mxu0  ;;  %v2474_v34 = vpop.f32.mrf.mxu1 }
 0x27f   : > { %2538 = vst.msk [vmem:[%s4666_s26 + $0x70] sm:$0xff] %vm2523_vm12, %v2435_v43  ;;  %v2583_v7 = vsel %vm2523_vm12, %v2435_v43, 0.0  ;;  %v2641_v41 = vmul.f32 %v2435_v43, %v2435_v43  ;;  %v2475_v4 = vadd.f32 %v4658_v28, %v2474_v34 }
 0x280   : > { %v2584_v16 = vadd.f32 %v2583_v7, %v2582_v13  ;;  %v2476_v42 = vpop.f32.mrf.mxu1 }
 0x281   : > { %v2686_v11 = vsel %vm2523_vm12, %v2641_v41, 0.0  ;;  %2546 = vst.msk [vmem:[%s4666_s26 + $0xb0] sm:$0xff] %vm2523_vm12, %v2475_v4  ;;  %v2649_v46 = vmul.f32 %v2475_v4, %v2475_v4  ;;  %v2599_v54 = vsel %vm2523_vm12, %v2475_v4, 0.0 }
 0x282   : > { %v2687_v37 = vadd.f32 %v2686_v11, %v2685_v6 }
 0x283   : > { %v2702_v49 = vsel %vm2523_vm12, %v2649_v46, 0.0 }
 0x290   : > { %v2439_v33 = vpop.f32.mrf.mxu0 }
 0x291   : > { %v2440_v51 = vadd.f32 %v4658_v28, %v2439_v33 }
 0x292   : > { %v2441_v63 = vpop.f32.mrf.mxu0  ;;  %v2479_v9 = vpop.f32.mrf.mxu1 }
 0x293   : > { %2539 = vst.msk [vmem:[%s4666_s26 + $0x78] sm:$0xff] %vm2523_vm12, %v2440_v51  ;;  %v2585_v38 = vsel %vm2523_vm12, %v2440_v51, 0.0  ;;  %v2642_v14 = vmul.f32 %v2440_v51, %v2440_v51  ;;  %v2480_v45 = vadd.f32 %v4658_v28, %v2479_v9 }
 0x294   : > { %v2586_v19 = vadd.f32 %v2585_v38, %v2584_v16  ;;  %v2481_v23 = vpop.f32.mrf.mxu1 }
 0x295   : > { %v2688_v3 = vsel %vm2523_vm12, %v2642_v14, 0.0  ;;  %2547 = vst.msk [vmem:[%s4666_s26 + $0xb8] sm:$0xff] %vm2523_vm12, %v2480_v45  ;;  %v2650_v53 = vmul.f32 %v2480_v45, %v2480_v45  ;;  %v2601_v20 = vsel %vm2523_vm12, %v2480_v45, 0.0 }
 0x296   : > { %v2588_v35 = vadd.f32 %v2587_v61, %v2586_v19  ;;  %v2689_v24 = vadd.f32 %v2688_v3, %v2687_v37 }
 0x297   : > { %v2704_v44 = vsel %vm2523_vm12, %v2650_v53, 0.0 }
 0x298   : > { %v2590_v32 = vadd.f32 %v2589_v30, %v2588_v35  ;;  %v2691_v40 = vadd.f32 %v2690_v8, %v2689_v24 }
 0x29a   : > { %v2592_v0 = vadd.f32 %v2591_v52, %v2590_v32  ;;  %v2693_v55 = vadd.f32 %v2692_v50, %v2691_v40 }
 0x29c   : > { %v2695_v12 = vadd.f32 %v2694_v1, %v2693_v55  ;;  %v2594_v59 = vadd.f32 %v2593_v56, %v2592_v0 }
 0x29e   : > { %v2596_v2 = vadd.f32 %v2595_v5, %v2594_v59  ;;  %v2697_v26 = vadd.f32 %v2696_v60, %v2695_v12  ;;  %v2484_v57 = vpop.f32.mrf.mxu1 }
 0x29f   : > { %v2485_v31 = vadd.f32 %v4658_v28, %v2484_v57 }
 0x2a0   : > { %v2598_v27 = vadd.f32 %v2597_v48, %v2596_v2  ;;  %v2699_v18 = vadd.f32 %v2698_v25, %v2697_v26  ;;  %v2486_v47 = vpop.f32.mrf.mxu1 }
 0x2a1   : > { %2548 = vst.msk [vmem:[%s4666_s26 + $0xc0] sm:$0xff] %vm2523_vm12, %v2485_v31  ;;  %v2651_v14 = vmul.f32 %v2485_v31, %v2485_v31  ;;  %v2603_v19 = vsel %vm2523_vm12, %v2485_v31, 0.0 }
 0x2a2   : > { %v2600_v39 = vadd.f32 %v2599_v54, %v2598_v27  ;;  %v2701_v13 = vadd.f32 %v2700_v36, %v2699_v18 }
 0x2a3   : > { %v2706_v3 = vsel %vm2523_vm12, %v2651_v14, 0.0 }
 0x2a4   : > { %v2602_v22 = vadd.f32 %v2601_v20, %v2600_v39  ;;  %v2703_v6 = vadd.f32 %v2702_v49, %v2701_v13 }
 0x2a6   : > { %v2705_v43 = vadd.f32 %v2704_v44, %v2703_v6  ;;  %v2489_v15 = vpop.f32.mrf.mxu1  ;;  %v2604_v17 = vadd.f32 %v2603_v19, %v2602_v22 }
 0x2a7   : > { %v2490_v34 = vadd.f32 %v4658_v28, %v2489_v15 }
 0x2a8   : > { %v2491_v7 = vpop.f32.mrf.mxu1  ;;  %v2707_v32 = vadd.f32 %v2706_v3, %v2705_v43 }
 0x2a9   : > { %2549 = vst.msk [vmem:[%s4666_s26 + $0xc8] sm:$0xff] %vm2523_vm12, %v2490_v34  ;;  %v2652_v45 = vmul.f32 %v2490_v34, %v2490_v34  ;;  %v2605_v23 = vsel %vm2523_vm12, %v2490_v34, 0.0 }
 0x2aa   : > { %v2606_v40 = vadd.f32 %v2605_v23, %v2604_v17 }
 0x2ab   : > { %v2708_v24 = vsel %vm2523_vm12, %v2652_v45, 0.0 }
 0x2ac   : > { %v2709_v55 = vadd.f32 %v2708_v24, %v2707_v32 }
 0x2b2   : > { %v2494_v41 = vpop.f32.mrf.mxu1 }
 0x2b3   : > { %v2495_v4 = vadd.f32 %v4658_v28, %v2494_v41 }
 0x2b4   : > { %v2496_v16 = vpop.f32.mrf.mxu1 }
 0x2b5   : > { %2550 = vst.msk [vmem:[%s4666_s26 + $0xd0] sm:$0xff] %vm2523_vm12, %v2495_v4  ;;  %v2653_v61 = vmul.f32 %v2495_v4, %v2495_v4  ;;  %v2607_v8 = vsel %vm2523_vm12, %v2495_v4, 0.0 }
 0x2b6   : > { %v2608_v1 = vadd.f32 %v2607_v8, %v2606_v40 }
 0x2b7   : > { %v2710_v52 = vsel %vm2523_vm12, %v2653_v61, 0.0 }
 0x2b8   : > { %v2711_v59 = vadd.f32 %v2710_v52, %v2709_v55 }
 0x2ba   : > { %v2499_v42 = vpop.f32.mrf.mxu1 }
 0x2bb   : > { %v2500_v11 = vadd.f32 %v4658_v28, %v2499_v42 }
 0x2bc   : > { %v2501_v37 = vpop.f32.mrf.mxu1 }
 0x2bd   : > { %2551 = vst.msk [vmem:[%s4666_s26 + $0xd8] sm:$0xff] %vm2523_vm12, %v2500_v11  ;;  %v2654_v30 = vmul.f32 %v2500_v11, %v2500_v11  ;;  %v2609_v21 = vsel %vm2523_vm12, %v2500_v11, 0.0 }
 0x2be   : > { %v2610_v60 = vadd.f32 %v2609_v21, %v2608_v1 }
 0x2bf   : > { %v2712_v56 = vsel %vm2523_vm12, %v2654_v30, 0.0 }
 0x2c0   : > { %v2713_v26 = vadd.f32 %v2712_v56, %v2711_v59 }
 0x2c6   : > { %v2504_v33 = vpop.f32.mrf.mxu1 }
 0x2c7   : > { %v2505_v51 = vadd.f32 %v4658_v28, %v2504_v33 }
 0x2c8   : > { %v2506_v63 = vpop.f32.mrf.mxu1 }
 0x2c9   : > { %2552 = vst.msk [vmem:[%s4666_s26 + $0xe0] sm:$0xff] %vm2523_vm12, %v2505_v51  ;;  %v2655_v0 = vmul.f32 %v2505_v51, %v2505_v51  ;;  %v2611_v62 = vsel %vm2523_vm12, %v2505_v51, 0.0 }
 0x2ca   : > { %v2612_v57 = vadd.f32 %v2611_v62, %v2610_v60 }
 0x2cb   : > { %v2714_v5 = vsel %vm2523_vm12, %v2655_v0, 0.0 }
 0x2cc   : > { %v2715_v46 = vadd.f32 %v2714_v5, %v2713_v26 }
 0x2ce   : > { %v2509_v9 = vpop.f32.mrf.mxu1 }
 0x2cf   : > { %v2510_v29 = vadd.f32 %v4658_v28, %v2509_v9 }
 0x2d0   : > { %v2511_v38 = vpop.f32.mrf.mxu1 }
 0x2d1   : > { %2553 = vst.msk [vmem:[%s4666_s26 + $0xe8] sm:$0xff] %vm2523_vm12, %v2510_v29  ;;  %v2656_v12 = vmul.f32 %v2510_v29, %v2510_v29  ;;  %v2613_v58 = vsel %vm2523_vm12, %v2510_v29, 0.0 }
 0x2d2   : > { %v2614_v31 = vadd.f32 %v2613_v58, %v2612_v57 }
 0x2d3   : > { %v2716_v25 = vsel %vm2523_vm12, %v2656_v12, 0.0 }
 0x2d4   : > { %v2717_v36 = vadd.f32 %v2716_v25, %v2715_v46 }
 0x2da   : > { %v2514_v35 = vpop.f32.mrf.mxu1 }
 0x2db   : > { %v2515_v10 = vadd.f32 %v4658_v28, %v2514_v35 }
 0x2dc   : > { %v2516_v50 = vpop.f32.mrf.mxu1 }
 0x2dd   : > { %2554 = vst.msk [vmem:[%s4666_s26 + $0xf0] sm:$0xff] %vm2523_vm12, %v2515_v10  ;;  %v2657_v2 = vmul.f32 %v2515_v10, %v2515_v10  ;;  %v2615_v48 = vsel %vm2523_vm12, %v2515_v10, 0.0 }
 0x2de   : > { %v2616_v54 = vadd.f32 %v2615_v48, %v2614_v31 }
 0x2df   : > { %v2718_v18 = vsel %vm2523_vm12, %v2657_v2, 0.0 }
 0x2e0   : > { %v2719_v49 = vadd.f32 %v2718_v18, %v2717_v36 }
 0x2e3   : > { %v2519_v27 = vpop.f32.mrf.mxu1 }
 0x2e4   : > { %v2520_v47 = vadd.f32 %v4658_v28, %v2519_v27 }
 0x2e5   : > { %v2521_v53 = vpop.f32.mrf.mxu1 }
 0x2e6   : > { %2555 = vst.msk [vmem:[%s4666_s26 + $0xf8] sm:$0xff] %vm2523_vm12, %v2520_v47  ;;  %v2617_v39 = vsel %vm2523_vm12, %v2520_v47, 0.0  ;;  %v2658_v13 = vmul.f32 %v2520_v47, %v2520_v47 }
 0x2e7   : > { %v2618_v20 = vadd.f32 %v2617_v39, %v2616_v54 }
 0x2e8   : > { %v2720_v22 = vsel %vm2523_vm12, %v2658_v13, 0.0 }
 0x2e9   : > { %v2619_v6 = vrot.slane %v2618_v20, 4  ;;  %v2721_v44 = vadd.f32 %v2720_v22, %v2719_v49 }
 0x2eb   : > { %v2620_v43 = vadd.f32 %v2619_v6, %v2618_v20  ;;  %v2722_v15 = vrot.slane %v2721_v44, 4 }
 0x2ed   : > { %v2621_v34 = vrot.slane %v2620_v43, 2  ;;  %v2723_v28 = vadd.f32 %v2722_v15, %v2721_v44 }
 0x2ef   : > { %v2622_v7 = vadd.f32 %v2621_v34, %v2620_v43  ;;  %v2724_v41 = vrot.slane %v2723_v28, 2 }
 0x2f1   : > { %v2623_v4 = vrot.slane %v2622_v7, 1  ;;  %v2725_v16 = vadd.f32 %v2724_v41, %v2723_v28 }
 0x2f3   : > { %v2624_v42 = vadd.f32 %v2623_v4, %v2622_v7  ;;  %v2726_v11 = vrot.slane %v2725_v16, 1 }
 0x2f5   : > { %2626 = vst.msk [vmem:[%s292_s30] sm:$0x1] %vm2625_vm0, %v2624_v42  ;;  %v2727_v37 = vadd.f32 %v2726_v11, %v2725_v16 }
 0x2f7   : > { %2728 = vst.msk [vmem:[%s295_s11] sm:$0x1] %vm2625_vm0, %v2727_v37 }
 0x2f8 PF: > { %s18_s24 = sadd.s32 1, %s3288_s24  }
 0x2f9   : > { %p15_p4 = scmp.ge.s32.totalorder %s18_s24, 4  }
 0x2fb   :  { %17 = sbr.rel (!%p15_p4) target bundleno = 1 (0x1), region = 96 }

// kernel: seg_morph_unet_forward.9
= control target key start
LH: loop header
LB: loop body
LE: loop exit
PB: predicated region body
PF: predicated region fallthrough
CT: control target
= control target key end

     0   :  { %13 = vsyncpa [#allocation4], 0  ;;  %s5318_s0 = inlined_call_operand.vmem [shape: f32[2,16,16,8], index: 0, kind: input, shape index: {}]   ;;  %s5319_s1 = inlined_call_operand.vmem [shape: f32[1,8], index: 1, kind: input, shape index: {}]   ;;  %s5320_s2 = inlined_call_operand.vmem [shape: f32[1,8], index: 2, kind: input, shape index: {}]   ;;  %s5321_s3 = inlined_call_operand.vmem [shape: f32[72,4], index: 3, kind: input, shape index: {}]   ;;  %s5322_s4 = inlined_call_operand.vmem [shape: f32[1,4], index: 4, kind: input, shape index: {}]   ;;  %s5323_s5 = inlined_call_operand.vmem [shape: f32[2,256,4], index: 5, kind: output, shape index: {0}]   ;;  %s5324_s6 = inlined_call_operand.hbm [shape: f32[2,1,4], index: 6, kind: output, shape index: {1}]   ;;  %s5325_s7 = inlined_call_operand.hbm [shape: f32[2,1,4], index: 7, kind: output, shape index: {2}]  }
   0x1   :  { %15 = vsyncpa [#allocation4 + $0x1], 0 }
   0x2   :  { %16 = vsyncpa [#allocation6], 0 }
   0x3   :  { %18 = vsyncpa [#allocation6 + $0x1], 0  ;;  %s3587_s24 = smov 0   ;;  %s3589_s25 = smov 0  }
   0x4   :  { %s3591_s26 = smov 0   ;;  %s3593_s27 = smov 0  }
   0x5 LB: > { %s3608_s28 = sadd.s32 4294967295, %s3534_s27   ;;  %s3086_s29 = sadd.s32 4294967294, %s3534_s27   ;;  %s3534_s27 = sphi %s3593_s27, %s5415_s27   ;;  %s3530_s26 = sphi %s3591_s26, %s5414_s26   ;;  %s3526_s25 = sphi %s3589_s25, %s5413_s25   ;;  %s3522_s24 = sphi %s3587_s24, %s5412_s24  }
   0x6   : > { %s3612_s30 = sadd.s32 1, %s3534_s27   ;;  %s167_s8 = sadd.s32 1, %s3530_s26 }
   0x7   : > { %s164_s9 = ssub.s32 %s3534_s27, %s3612_s30  ;;  %p177_p0 = scmp.ne.s32.totalorder %s3530_s26, %s3526_s25 }
   0x8   : > { %p165_p1 = scmp.eq.s32.totalorder %s164_s9, 0  ;;  %p178_p2 = scmp.eq.s32.totalorder %s3608_s28, 1 }
   0x9   : > { %p183_p3 = scmp.ne.s32.totalorder %s3526_s25, %s3522_s24  ;;  %p184_p4 = scmp.eq.s32.totalorder %s3086_s29, 1 }
   0xa   : > { %s3623_s10 = scalar_select %p165_p1, %s3530_s26, %s167_s8  }
   0xb   : > { %p3625_p5 = por %p178_p2, %p177_p0  ;;  %p3629_p6 = por %p184_p4, %p183_p3 }
   0xc   : > { %p3089_p7 = scmp.ge.s32.totalorder %s3534_s27, 1  ;;  %p248_p8 = scmp.lt.s32.totalorder %s3534_s27, 3 }
   0xe   : > { %p249_p9 = pnand %p3089_p7, %p248_p8 }
  0x10   : > { %252 = sbr.rel (%p249_p9) target bundleno = 966 (0x3c6), region = 40 }
  0x15   : > { %vm504_vm0 = vcmask 64512   ;;  %vm507_vm1 = vcmask 58368   ;;  %p288_p10 = scmp.lt.s32.totalorder %s3608_s28, 1  ;;  %v3536_v0 = vmov 0.0   ;;  %v3699_v1 = vld [vmem:[%s5319_s1] ss:$0 sm:$0xff] }
  0x16   : > { %505 = vst.msk [vmem:[#allocation2] sm:$0xff] %vm504_vm0, %v3536_v0  ;;  %506 = vst.msk [vmem:[#allocation2 + $0x8] sm:$0xff] %vm504_vm0, %v3536_v0  ;;  %v3711_v2 = vld [vmem:[%s5320_s2] ss:$0 sm:$0xff]  ;;  %s3537_s22 = smov 8   ;;  %s3538_s23 = smov 16  }
  0x17   : > { %509 = vst.msk [vmem:[#allocation2 + $0x18] sm:$0xff] %vm504_vm0, %v3536_v0  ;;  %510 = vst.msk [vmem:[#allocation2 + $0x20] sm:$0xff] %vm504_vm0, %v3536_v0  ;;  %s3693_s13 = scalar_select %p288_p10, %s3608_s28, 1 }
  0x18   : > { %512 = vst.msk [vmem:[#allocation2 + $0x30] sm:$0xff] %vm504_vm0, %v3536_v0  ;;  %513 = vst.msk [vmem:[#allocation2 + $0x38] sm:$0xff] %vm504_vm0, %v3536_v0  ;;  %s3539_s29 = smov 24   ;;  %s3540_s20 = smov 32  }
  0x19   : > { %515 = vst.msk [vmem:[#allocation2 + $0x48] sm:$0xff] %vm504_vm0, %v3536_v0  ;;  %516 = vst.msk [vmem:[#allocation2 + $0x50] sm:$0xff] %vm504_vm0, %v3536_v0  ;;  %s3133_s14 = sshll.u32 %s3693_s13, 8  ;;  %s3541_s9 = smov 40  }
  0x1a   : > { %518 = vst.msk [vmem:[#allocation2 + $0x60] sm:$0xff] %vm504_vm0, %v3536_v0  ;;  %519 = vst.msk [vmem:[#allocation2 + $0x68] sm:$0xff] %vm504_vm0, %v3536_v0  ;;  %s3706_s19 = scalar_lea.vmem %s5318_s0, %s3133_s14  ;;  %s3542_s17 = smov 48  }
  0x1b   : > { %521 = vst.msk [vmem:[#allocation2 + $0x78] sm:$0xff] %vm504_vm0, %v3536_v0  ;;  %522 = vst.msk [vmem:[#allocation2 + $0x80] sm:$0xff] %vm504_vm0, %v3536_v0  ;;  %v300_v3 = vld [vmem:[%s3706_s19 + $0x10] sm:$0xff]  ;;  %v298_v4 = vld [vmem:[%s3706_s19] sm:$0xff]  ;;  %s3543_s8 = smov 56   ;;  %s3544_s18 = smov 64  }
  0x1c   : > { %524 = vst.msk [vmem:[#allocation2 + $0x90] sm:$0xff] %vm504_vm0, %v3536_v0  ;;  %525 = vst.msk [vmem:[#allocation2 + $0x98] sm:$0xff] %vm504_vm0, %v3536_v0  ;;  %v302_v5 = vld [vmem:[%s3706_s19 + $0x20] sm:$0xff]  ;;  %v339_v6 = vmul.f32 %v3699_v1, %v300_v3  ;;  %v337_v7 = vmul.f32 %v3699_v1, %v298_v4  ;;  %v299_v9 = vld [vmem:[%s3706_s19 + $0x8] sm:$0xff]  ;;  %s4783_s21 = scalar_lea.vmem %s5323_s5, %s3133_s14  ;;  %s3545_s14 = smov [#allocation3]  }
  0x1d   : > { %527 = vst.msk [vmem:[#allocation2 + $0xa8] sm:$0xff] %vm504_vm0, %v3536_v0  ;;  %528 = vst.msk [vmem:[#allocation2 + $0xb0] sm:$0xff] %vm504_vm0, %v3536_v0  ;;  %v341_v8 = vmul.f32 %v3699_v1, %v302_v5  ;;  %v304_v10 = vld [vmem:[%s3706_s19 + $0x30] sm:$0xff]  ;;  %v301_v11 = vld [vmem:[%s3706_s19 + $0x18] sm:$0xff]  ;;  %v338_v13 = vmul.f32 %v3699_v1, %v299_v9  ;;  %s3448_s15 = sshll.u32 %s3545_s14, 4  ;;  %s3449_s15 = int_to_ptr.vmem [resolvable:$false] %s3448_s15 }
  0x1e   : > { %530 = vst.msk [vmem:[#allocation2 + $0xc0] sm:$0xff] %vm504_vm0, %v3536_v0  ;;  %531 = vst.msk [vmem:[#allocation2 + $0xc8] sm:$0xff] %vm504_vm0, %v3536_v0  ;;  %v625_v12 = vld [vmem:[#allocation2 + $0x1] sm:$0xff]  ;;  %v343_v14 = vmul.f32 %v3699_v1, %v304_v10  ;;  %v340_v15 = vmul.f32 %v3699_v1, %v301_v11  ;;  %v378_v17 = vadd.f32 %v3711_v2, %v339_v6  ;;  %v308_v27 = vld [vmem:[%s3706_s19 + $0x50] sm:$0xff] }
  0x1f   : > { %533 = vst.msk [vmem:[#allocation2 + $0xd8] sm:$0xff] %vm504_vm0, %v3536_v0  ;;  %534 = vst.msk [vmem:[#allocation2 + $0xe0] sm:$0xff] %vm504_vm0, %v3536_v0  ;;  %v306_v16 = vld [vmem:[%s3706_s19 + $0x40] sm:$0xff]  ;;  %914 = vrot.lane.b32.xlu0 %v625_v12, %s3537_s22  ;;  %v376_v18 = vadd.f32 %v3711_v2, %v337_v7  ;;  %v380_v19 = vadd.f32 %v3711_v2, %v341_v8  ;;  %v303_v21 = vld [vmem:[%s3706_s19 + $0x28] sm:$0xff]  ;;  %v377_v23 = vadd.f32 %v3711_v2, %v338_v13 }
  0x20   : > { %536 = vst.msk [vmem:[#allocation2 + $0xf0] sm:$0xff] %vm504_vm0, %v3536_v0  ;;  %537 = vst.msk [vmem:[#allocation2 + $0xf8] sm:$0xff] %vm504_vm0, %v3536_v0  ;;  %v345_v20 = vmul.f32 %v3699_v1, %v306_v16  ;;  %v382_v24 = vadd.f32 %v3711_v2, %v343_v14  ;;  %v379_v25 = vadd.f32 %v3711_v2, %v340_v15  ;;  %vm410_vm2 = vcmp.ge.f32.partialorder %v378_v17, 0.0  ;;  %v305_v35 = vld [vmem:[%s3706_s19 + $0x38] sm:$0xff]  ;;  %v310_v36 = vld [vmem:[%s3706_s19 + $0x60] sm:$0xff] }
  0x21   : > { %539 = vst.msk [vmem:[#allocation2 + $0x108] sm:$0xff] %vm504_vm0, %v3536_v0  ;;  %540 = vst.msk [vmem:[#allocation2 + $0x110] sm:$0xff] %vm504_vm0, %v3536_v0  ;;  %v342_v26 = vmul.f32 %v3699_v1, %v303_v21  ;;  %v442_v28 = vmul.f32 0.2, %v378_v17  ;;  %vm408_vm3 = vcmp.ge.f32.partialorder %v376_v18, 0.0  ;;  %vm412_vm4 = vcmp.ge.f32.partialorder %v380_v19, 0.0 }
  0x22   : > { %542 = vst.msk [vmem:[#allocation2 + $0x120] sm:$0xff] %vm504_vm0, %v3536_v0  ;;  %543 = vst.msk [vmem:[#allocation2 + $0x128] sm:$0xff] %vm504_vm0, %v3536_v0  ;;  %v440_v29 = vmul.f32 0.2, %v376_v18  ;;  %v444_v30 = vmul.f32 0.2, %v380_v19  ;;  %v384_v42 = vadd.f32 %v3711_v2, %v345_v20  ;;  %v347_v44 = vmul.f32 %v3699_v1, %v308_v27 }
  0x23   : > { %545 = vst.msk [vmem:[#allocation2 + $0x138] sm:$0xff] %vm504_vm0, %v3536_v0  ;;  %546 = vst.msk [vmem:[#allocation2 + $0x140] sm:$0xff] %vm504_vm0, %v3536_v0  ;;  %vm409_vm5 = vcmp.ge.f32.partialorder %v377_v23, 0.0  ;;  %v441_v31 = vmul.f32 0.2, %v377_v23  ;;  %v474_v32 = vsel %vm410_vm2, %v378_v17, %v442_v28  ;;  %vm414_vm6 = vcmp.ge.f32.partialorder %v382_v24, 0.0 }
  0x24   : > { %548 = vst.msk [vmem:[#allocation2 + $0x150] sm:$0xff] %vm504_vm0, %v3536_v0  ;;  %549 = vst.msk [vmem:[#allocation2 + $0x158] sm:$0xff] %vm504_vm0, %v3536_v0  ;;  %v472_v33 = vsel %vm408_vm3, %v376_v18, %v440_v29  ;;  %v446_v34 = vmul.f32 0.2, %v382_v24  ;;  %v307_v37 = vld [vmem:[%s3706_s19 + $0x48] sm:$0xff]  ;;  %v476_v38 = vsel %vm412_vm4, %v380_v19, %v444_v30  ;;  %vm411_vm7 = vcmp.ge.f32.partialorder %v379_v25, 0.0 }
  0x25   : > { %551 = vst.msk [vmem:[#allocation2 + $0x168] sm:$0xff] %vm504_vm0, %v3536_v0  ;;  %552 = vst.msk [vmem:[#allocation2 + $0x170] sm:$0xff] %vm504_vm0, %v3536_v0  ;;  %v473_v39 = vsel %vm409_vm5, %v377_v23, %v441_v31  ;;  %v443_v40 = vmul.f32 0.2, %v379_v25  ;;  %v381_v43 = vadd.f32 %v3711_v2, %v342_v26  ;;  %v344_v46 = vmul.f32 %v3699_v1, %v305_v35  ;;  %v312_v49 = vld [vmem:[%s3706_s19 + $0x70] sm:$0xff]  ;;  %v309_v50 = vld [vmem:[%s3706_s19 + $0x58] sm:$0xff] }
  0x26   : > { %554 = vst.msk [vmem:[#allocation2 + $0x180] sm:$0xff] %vm504_vm0, %v3536_v0  ;;  %555 = vst.msk [vmem:[#allocation2 + $0x188] sm:$0xff] %vm504_vm0, %v3536_v0  ;;  %v478_v41 = vsel %vm414_vm6, %v382_v24, %v446_v34  ;;  %v349_v47 = vmul.f32 %v3699_v1, %v310_v36  ;;  %v346_v48 = vmul.f32 %v3699_v1, %v307_v37  ;;  %vm416_vm8 = vcmp.ge.f32.partialorder %v384_v42, 0.0  ;;  %v314_v61 = vld [vmem:[%s3706_s19 + $0x80] sm:$0xff]  ;;  %v311_v62 = vld [vmem:[%s3706_s19 + $0x68] sm:$0xff] }
  0x27   : > { %557 = vst.msk [vmem:[#allocation2 + $0x198] sm:$0xff] %vm504_vm0, %v3536_v0  ;;  %558 = vst.msk [vmem:[#allocation2 + $0x1a0] sm:$0xff] %vm504_vm0, %v3536_v0  ;;  %v475_v45 = vsel %vm411_vm7, %v379_v25, %v443_v40  ;;  %v448_v51 = vmul.f32 0.2, %v384_v42  ;;  %vm413_vm9 = vcmp.ge.f32.partialorder %v381_v43, 0.0  ;;  %v386_v53 = vadd.f32 %v3711_v2, %v347_v44  ;;  %v316_v11 = vld [vmem:[%s3706_s19 + $0x90] sm:$0xff] }
  0x28   : > { %508 = vst.msk [vmem:[#allocation2 + $0x10] sm:$0x3] %vm507_vm1, %v3536_v0  ;;  %511 = vst.msk [vmem:[#allocation2 + $0x28] sm:$0x3] %vm507_vm1, %v3536_v0  ;;  %v445_v52 = vmul.f32 0.2, %v381_v43  ;;  %v383_v54 = vadd.f32 %v3711_v2, %v344_v46  ;;  %v388_v55 = vadd.f32 %v3711_v2, %v349_v47  ;;  %v385_v56 = vadd.f32 %v3711_v2, %v346_v48 }
  0x29   : > { %514 = vst.msk [vmem:[#allocation2 + $0x40] sm:$0x3] %vm507_vm1, %v3536_v0  ;;  %517 = vst.msk [vmem:[#allocation2 + $0x58] sm:$0x3] %vm507_vm1, %v3536_v0  ;;  %v480_v57 = vsel %vm416_vm8, %v384_v42, %v448_v51  ;;  %v351_v59 = vmul.f32 %v3699_v1, %v312_v49  ;;  %v348_v60 = vmul.f32 %v3699_v1, %v309_v50  ;;  %vm418_vm10 = vcmp.ge.f32.partialorder %v386_v53, 0.0  ;;  %v313_v12 = vld [vmem:[%s3706_s19 + $0x78] sm:$0xff] }
  0x2a   : > { %520 = vst.msk [vmem:[#allocation2 + $0x70] sm:$0x3] %vm507_vm1, %v3536_v0  ;;  %523 = vst.msk [vmem:[#allocation2 + $0x88] sm:$0x3] %vm507_vm1, %v3536_v0  ;;  %v477_v58 = vsel %vm413_vm9, %v381_v43, %v445_v52  ;;  %v450_v63 = vmul.f32 0.2, %v386_v53  ;;  %v353_v17 = vmul.f32 %v3699_v1, %v314_v61  ;;  %v350_v21 = vmul.f32 %v3699_v1, %v311_v62 }
  0x2b   : > { %526 = vst.msk [vmem:[#allocation2 + $0xa0] sm:$0x3] %vm507_vm1, %v3536_v0  ;;  %529 = vst.msk [vmem:[#allocation2 + $0xb8] sm:$0x3] %vm507_vm1, %v3536_v0  ;;  %vm415_vm11 = vcmp.ge.f32.partialorder %v383_v54, 0.0  ;;  %vm420_vm12 = vcmp.ge.f32.partialorder %v388_v55, 0.0  ;;  %v390_v6 = vadd.f32 %v3711_v2, %v351_v59  ;;  %v387_v10 = vadd.f32 %v3711_v2, %v348_v60 }
  0x2c   : > { %532 = vst.msk [vmem:[#allocation2 + $0xd0] sm:$0x3] %vm507_vm1, %v3536_v0  ;;  %535 = vst.msk [vmem:[#allocation2 + $0xe8] sm:$0x3] %vm507_vm1, %v3536_v0  ;;  %v452_v5 = vmul.f32 0.2, %v388_v55  ;;  %v482_v7 = vsel %vm418_vm10, %v386_v53, %v450_v63  ;;  %v392_v23 = vadd.f32 %v3711_v2, %v353_v17  ;;  %v355_v24 = vmul.f32 %v3699_v1, %v316_v11 }
  0x2d   : > { %538 = vst.msk [vmem:[#allocation2 + $0x100] sm:$0x3] %vm507_vm1, %v3536_v0  ;;  %541 = vst.msk [vmem:[#allocation2 + $0x118] sm:$0x3] %vm507_vm1, %v3536_v0  ;;  %vm417_vm13 = vcmp.ge.f32.partialorder %v385_v56, 0.0  ;;  %vm422_vm14 = vcmp.ge.f32.partialorder %v390_v6, 0.0  ;;  %v352_v25 = vmul.f32 %v3699_v1, %v313_v12  ;;  %v389_v28 = vadd.f32 %v3711_v2, %v350_v21 }
  0x2e   : > { %544 = vst.msk [vmem:[#allocation2 + $0x130] sm:$0x3] %vm507_vm1, %v3536_v0  ;;  %547 = vst.msk [vmem:[#allocation2 + $0x148] sm:$0x3] %vm507_vm1, %v3536_v0  ;;  %v449_v9 = vmul.f32 0.2, %v385_v56  ;;  %v484_v15 = vsel %vm420_vm12, %v388_v55, %v452_v5 }
  0x2f   : > { %550 = vst.msk [vmem:[#allocation2 + $0x160] sm:$0x3] %vm507_vm1, %v3536_v0  ;;  %553 = vst.msk [vmem:[#allocation2 + $0x178] sm:$0x3] %vm507_vm1, %v3536_v0  ;;  %v626_v22 = vld [vmem:[#allocation2 + $0x9] sm:$0xff]  ;;  %v318_v18 = vld [vmem:[%s3706_s19 + $0xa0] sm:$0xff]  ;;  %v391_v34 = vadd.f32 %v3711_v2, %v352_v25 }
  0x30   : > { %556 = vst.msk [vmem:[#allocation2 + $0x190] sm:$0x3] %vm507_vm1, %v3536_v0  ;;  %559 = vst.msk [vmem:[#allocation2 + $0x1a8] sm:$0x3] %vm507_vm1, %v3536_v0  ;;  %916 = vrot.lane.b32.xlu0 %v626_v22, %s3537_s22  ;;  %v447_v0 = vmul.f32 0.2, %v383_v54  ;;  %v481_v19 = vsel %vm417_vm13, %v385_v56, %v449_v9  ;;  %v357_v29 = vmul.f32 %v3699_v1, %v318_v18 }
  0x31   : > { %563 = vst.msk [vmem:[#allocation2 + $0x31] sm:$0xff] %vm504_vm0, %v474_v32  ;;  %561 = vst.msk [vmem:[#allocation2 + $0x19] sm:$0xff] %vm504_vm0, %v472_v33  ;;  %v454_v16 = vmul.f32 0.2, %v390_v6  ;;  %vm419_vm15 = vcmp.ge.f32.partialorder %v387_v10, 0.0  ;;  %v315_v26 = vld [vmem:[%s3706_s19 + $0x88] sm:$0xff]  ;;  %v394_v33 = vadd.f32 %v3711_v2, %v355_v24 }
  0x32   : > { %565 = vst.msk [vmem:[#allocation2 + $0x49] sm:$0xff] %vm504_vm0, %v476_v38  ;;  %562 = vst.msk [vmem:[#allocation2 + $0x21] sm:$0xff] %vm504_vm0, %v473_v39  ;;  %v479_v8 = vsel %vm415_vm11, %v383_v54, %v447_v0  ;;  %v451_v20 = vmul.f32 0.2, %v387_v10  ;;  %vm424_vm1 = vcmp.ge.f32.partialorder %v392_v23, 0.0  ;;  %vm421_vm2 = vcmp.ge.f32.partialorder %v389_v28, 0.0 }
  0x33   : > { %567 = vst.msk [vmem:[#allocation2 + $0x61] sm:$0xff] %vm504_vm0, %v478_v41  ;;  %564 = vst.msk [vmem:[#allocation2 + $0x39] sm:$0xff] %vm504_vm0, %v475_v45  ;;  %v486_v22 = vsel %vm422_vm14, %v390_v6, %v454_v16  ;;  %v456_v32 = vmul.f32 0.2, %v392_v23  ;;  %v453_v35 = vmul.f32 0.2, %v389_v28  ;;  %v396_v36 = vadd.f32 %v3711_v2, %v357_v29 }
  0x34   : > { %569 = vst.msk [vmem:[#allocation2 + $0x79] sm:$0xff] %vm504_vm0, %v480_v57  ;;  %566 = vst.msk [vmem:[#allocation2 + $0x51] sm:$0xff] %vm504_vm0, %v477_v58  ;;  %v483_v27 = vsel %vm419_vm15, %v387_v10, %v451_v20  ;;  %v354_v37 = vmul.f32 %v3699_v1, %v315_v26  ;;  %v320_v38 = vld [vmem:[%s3706_s19 + $0xb0] sm:$0xff]  ;;  %v317_v39 = vld [vmem:[%s3706_s19 + $0x98] sm:$0xff]  ;;  %vm426_vm3 = vcmp.ge.f32.partialorder %v394_v33, 0.0  ;;  %vm423_vm4 = vcmp.ge.f32.partialorder %v391_v34, 0.0 }
  0x35   : > { %571 = vst.msk [vmem:[#allocation2 + $0x91] sm:$0xff] %vm504_vm0, %v482_v7  ;;  %568 = vst.msk [vmem:[#allocation2 + $0x69] sm:$0xff] %vm504_vm0, %v479_v8  ;;  %v488_v40 = vsel %vm424_vm1, %v392_v23, %v456_v32  ;;  %v458_v41 = vmul.f32 0.2, %v394_v33  ;;  %v322_v42 = vld [vmem:[%s3706_s19 + $0xc0] sm:$0xff]  ;;  %v485_v43 = vsel %vm421_vm2, %v389_v28, %v453_v35  ;;  %vm428_vm5 = vcmp.ge.f32.partialorder %v396_v36, 0.0 }
  0x36   : > { %573 = vst.msk [vmem:[#allocation2 + $0xa9] sm:$0xff] %vm504_vm0, %v484_v15  ;;  %570 = vst.msk [vmem:[#allocation2 + $0x81] sm:$0xff] %vm504_vm0, %v481_v19  ;;  %v455_v44 = vmul.f32 0.2, %v391_v34  ;;  %v393_v45 = vadd.f32 %v3711_v2, %v354_v37  ;;  %v319_v46 = vld [vmem:[%s3706_s19 + $0xa8] sm:$0xff]  ;;  %v359_v51 = vmul.f32 %v3699_v1, %v320_v38  ;;  %v356_v52 = vmul.f32 %v3699_v1, %v317_v39  ;;  %v324_v53 = vld [vmem:[%s3706_s19 + $0xd0] sm:$0xff] }
  0x37   : > { %575 = vst.msk [vmem:[#allocation2 + $0xc1] sm:$0xff] %vm504_vm0, %v486_v22  ;;  %572 = vst.msk [vmem:[#allocation2 + $0x99] sm:$0xff] %vm504_vm0, %v483_v27  ;;  %v490_v49 = vsel %vm426_vm3, %v394_v33, %v458_v41  ;;  %v460_v50 = vmul.f32 0.2, %v396_v36  ;;  %v361_v56 = vmul.f32 %v3699_v1, %v322_v42  ;;  %v358_v60 = vmul.f32 %v3699_v1, %v319_v46  ;;  %v321_v61 = vld [vmem:[%s3706_s19 + $0xb8] sm:$0xff]  ;;  %v326_v7 = vld [vmem:[%s3706_s19 + $0xe0] sm:$0xff] }
  0x38   : > { %v3765_v3 = vld [vmem:[#allocation2 + $0x31] sm:$0xff]  ;;  %v3767_v4 = vld [vmem:[#allocation2 + $0x19] sm:$0xff]  ;;  %577 = vst.msk [vmem:[#allocation2 + $0xd9] sm:$0xff] %vm504_vm0, %v488_v40  ;;  %574 = vst.msk [vmem:[#allocation2 + $0xb1] sm:$0xff] %vm504_vm0, %v485_v43  ;;  %v487_v54 = vsel %vm423_vm4, %v391_v34, %v455_v44  ;;  %vm425_vm6 = vcmp.ge.f32.partialorder %v393_v45, 0.0  ;;  %v398_v58 = vadd.f32 %v3711_v2, %v359_v51  ;;  %v395_v59 = vadd.f32 %v3711_v2, %v356_v52 }
  0x39   : > { %922 = vrot.lane.b32.xlu0 %v3765_v3, %s3537_s22  ;;  %918 = vrot.lane.b32.xlu1 %v3767_v4, %s3537_s22  ;;  %v3777_v13 = vld [vmem:[#allocation2 + $0x49] sm:$0xff]  ;;  %v3779_v14 = vld [vmem:[#allocation2 + $0x21] sm:$0xff]  ;;  %579 = vst.msk [vmem:[#allocation2 + $0xf1] sm:$0xff] %vm504_vm0, %v490_v49  ;;  %v457_v55 = vmul.f32 0.2, %v393_v45  ;;  %576 = vst.msk [vmem:[#allocation2 + $0xc9] sm:$0xff] %vm504_vm0, %v487_v54  ;;  %v492_v57 = vsel %vm428_vm5, %v396_v36, %v460_v50  ;;  %v400_v5 = vadd.f32 %v3711_v2, %v361_v56 }
  0x3a   : > { %v3801_v30 = vld [vmem:[#allocation2 + $0x61] sm:$0xff]  ;;  %v3803_v31 = vld [vmem:[#allocation2 + $0x39] sm:$0xff]  ;;  %581 = vst.msk [vmem:[#allocation2 + $0x109] sm:$0xff] %vm504_vm0, %v492_v57  ;;  %v363_v6 = vmul.f32 %v3699_v1, %v324_v53  ;;  %vm430_vm7 = vcmp.ge.f32.partialorder %v398_v58, 0.0  ;;  %v462_v8 = vmul.f32 0.2, %v398_v58  ;;  %v397_v11 = vadd.f32 %v3711_v2, %v358_v60 }
  0x3b   : > { %v635_v47 = vld [vmem:[#allocation2 + $0x79] sm:$0xff]  ;;  %v3820_v48 = vld [vmem:[#allocation2 + $0x51] sm:$0xff]  ;;  %v489_v0 = vsel %vm425_vm6, %v393_v45, %v457_v55  ;;  %vm427_vm8 = vcmp.ge.f32.partialorder %v395_v59, 0.0  ;;  %v459_v9 = vmul.f32 0.2, %v395_v59  ;;  %vm432_vm9 = vcmp.ge.f32.partialorder %v400_v5, 0.0 }
  0x3c   : > { %v637_v62 = vld [vmem:[#allocation2 + $0x91] sm:$0xff]  ;;  %v3838_v63 = vld [vmem:[#allocation2 + $0x69] sm:$0xff]  ;;  %578 = vst.msk [vmem:[#allocation2 + $0xe1] sm:$0xff] %vm504_vm0, %v489_v0  ;;  %v464_v10 = vmul.f32 0.2, %v400_v5  ;;  %v402_v12 = vadd.f32 %v3711_v2, %v363_v6  ;;  %v494_v16 = vsel %vm430_vm7, %v398_v58, %v462_v8  ;;  %v360_v18 = vmul.f32 %v3699_v1, %v321_v61 }
  0x3d   : > { %926 = vrot.lane.b32.xlu0 %v3777_v13, %s3537_s22  ;;  %920 = vrot.lane.b32.xlu1 %v3779_v14, %s3537_s22  ;;  %v323_v15 = vld [vmem:[%s3706_s19 + $0xc8] sm:$0xff]  ;;  %v491_v17 = vsel %vm427_vm8, %v395_v59, %v459_v9  ;;  %v365_v19 = vmul.f32 %v3699_v1, %v326_v7  ;;  %v325_v20 = vld [vmem:[%s3706_s19 + $0xd8] sm:$0xff]  ;;  %583 = vst.msk [vmem:[#allocation2 + $0x121] sm:$0xff] %vm504_vm0, %v494_v16  ;;  %vm429_vm10 = vcmp.ge.f32.partialorder %v397_v11, 0.0  ;;  %v461_v23 = vmul.f32 0.2, %v397_v11 }
  0x3e   : > { %v327_v21 = vld [vmem:[%s3706_s19 + $0xe8] sm:$0xff]  ;;  %580 = vst.msk [vmem:[#allocation2 + $0xf9] sm:$0xff] %vm504_vm0, %v491_v17  ;;  %v496_v22 = vsel %vm432_vm9, %v400_v5, %v464_v10  ;;  %vm434_vm11 = vcmp.ge.f32.partialorder %v402_v12, 0.0  ;;  %v466_v26 = vmul.f32 0.2, %v402_v12  ;;  %v399_v27 = vadd.f32 %v3711_v2, %v360_v18  ;;  %v3873_v41 = vld [vmem:[#allocation2 + $0x99] sm:$0xff] }
  0x3f   : > { %v639_v24 = vld [vmem:[#allocation2 + $0xa9] sm:$0xff]  ;;  %v3857_v25 = vld [vmem:[#allocation2 + $0x81] sm:$0xff]  ;;  %585 = vst.msk [vmem:[#allocation2 + $0x139] sm:$0xff] %vm504_vm0, %v496_v22  ;;  %v404_v28 = vadd.f32 %v3711_v2, %v365_v19  ;;  %v362_v29 = vmul.f32 %v3699_v1, %v323_v15  ;;  %v493_v32 = vsel %vm429_vm10, %v397_v11, %v461_v23  ;;  %v364_v33 = vmul.f32 %v3699_v1, %v325_v20  ;;  %v640_v49 = vld [vmem:[#allocation2 + $0xb1] sm:$0xff] }
  0x40   : > { %v366_v34 = vmul.f32 %v3699_v1, %v327_v21  ;;  %582 = vst.msk [vmem:[#allocation2 + $0x111] sm:$0xff] %vm504_vm0, %v493_v32  ;;  %v498_v35 = vsel %vm434_vm11, %v402_v12, %v466_v26  ;;  %vm431_vm12 = vcmp.ge.f32.partialorder %v399_v27, 0.0  ;;  %v463_v36 = vmul.f32 0.2, %v399_v27  ;;  %v641_v40 = vld [vmem:[#allocation2 + $0xc1] sm:$0xff]  ;;  %v645_v52 = vld [vmem:[#allocation2 + $0xf1] sm:$0xff] }
  0x41   : > { %930 = vrot.lane.b32.xlu0 %v3801_v30, %s3537_s22  ;;  %924 = vrot.lane.b32.xlu1 %v3803_v31, %s3537_s22  ;;  %vm436_vm13 = vcmp.ge.f32.partialorder %v404_v28, 0.0  ;;  %587 = vst.msk [vmem:[#allocation2 + $0x151] sm:$0xff] %vm504_vm0, %v498_v35  ;;  %v468_v37 = vmul.f32 0.2, %v404_v28  ;;  %v401_v38 = vadd.f32 %v3711_v2, %v362_v29  ;;  %v403_v39 = vadd.f32 %v3711_v2, %v364_v33  ;;  %v642_v53 = vld [vmem:[#allocation2 + $0xc9] sm:$0xff]  ;;  %v3899_v7 = vld [vmem:[#allocation2 + $0x1a] sm:$0xff] }
  0x42   : > { %v405_v1 = vadd.f32 %v3711_v2, %v366_v34  ;;  %v495_v42 = vsel %vm431_vm12, %v399_v27, %v463_v36  ;;  %v647_v54 = vld [vmem:[#allocation2 + $0x109] sm:$0xff]  ;;  %v3904_v9 = vld [vmem:[#allocation2 + $0x32] sm:$0xff]  ;;  %v3919_v16 = vld [vmem:[#allocation2 + $0x3a] sm:$0xff]  ;;  %vm1938_vm2 = vcmask 130048   ;;  %vm1971_vm3 = vcmask 195584  }
  0x43   : > { %584 = vst.msk [vmem:[#allocation2 + $0x129] sm:$0xff] %vm504_vm0, %v495_v42  ;;  %v500_v43 = vsel %vm436_vm13, %v404_v28, %v468_v37  ;;  %vm433_vm14 = vcmp.ge.f32.partialorder %v401_v38, 0.0  ;;  %v465_v44 = vmul.f32 0.2, %v401_v38  ;;  %vm435_vm15 = vcmp.ge.f32.partialorder %v403_v39, 0.0  ;;  %v644_v55 = vld [vmem:[#allocation2 + $0xe1] sm:$0xff] }
  0x44   : > { %589 = vst.msk [vmem:[#allocation2 + $0x169] sm:$0xff] %vm504_vm0, %v500_v43  ;;  %v467_v45 = vmul.f32 0.2, %v403_v39  ;;  %vm437_vm1 = vcmp.ge.f32.partialorder %v405_v1, 0.0  ;;  %v469_v46 = vmul.f32 0.2, %v405_v1 }
  0x45   : > { %934 = vrot.lane.b32.xlu0 %v635_v47, %s3537_s22  ;;  %928 = vrot.lane.b32.xlu1 %v3820_v48, %s3537_s22  ;;  %v497_v2 = vsel %vm433_vm14, %v401_v38, %v465_v44  ;;  %v643_v47 = vld [vmem:[#allocation2 + $0xd9] sm:$0xff]  ;;  %v649_v56 = vld [vmem:[#allocation2 + $0x121] sm:$0xff]  ;;  %v658_v10 = vld [vmem:[#allocation2 + $0xa] sm:$0xff]  ;;  %vm2004_vm4 = vcmask 261120   ;;  %vm2037_vm5 = vcmask 326656   ;;  %vm2070_vm6 = vcmask 392192  }
  0x46   : > { %586 = vst.msk [vmem:[#allocation2 + $0x141] sm:$0xff] %vm504_vm0, %v497_v2  ;;  %v499_v50 = vsel %vm435_vm15, %v403_v39, %v467_v45  ;;  %v501_v51 = vsel %vm437_vm1, %v405_v1, %v469_v46  ;;  %v646_v57 = vld [vmem:[#allocation2 + $0xf9] sm:$0xff]  ;;  %v657_v5 = vld [vmem:[#allocation2 + $0x2] sm:$0xff]  ;;  %v3909_v11 = vld [vmem:[#allocation2 + $0x4a] sm:$0xff]  ;;  %vm2103_vm7 = vcmask 457728   ;;  %vm2136_vm8 = vcmask 523264  }
  0x47   : > { %588 = vst.msk [vmem:[#allocation2 + $0x159] sm:$0xff] %vm504_vm0, %v499_v50  ;;  %590 = vst.msk [vmem:[#allocation2 + $0x171] sm:$0xff] %vm504_vm0, %v501_v51  ;;  %v651_v58 = vld [vmem:[#allocation2 + $0x139] sm:$0xff]  ;;  %v648_v59 = vld [vmem:[#allocation2 + $0x111] sm:$0xff]  ;;  %vm2185_vm9 = vcmask 588800   ;;  %vm2734_vm13 = vcmask 31744  }
  0x48   : > { %v653_v60 = vld [vmem:[#allocation2 + $0x151] sm:$0xff]  ;;  %v3911_v12 = vld [vmem:[#allocation2 + $0x22] sm:$0xff]  ;;  %v3925_v17 = vld [vmem:[#allocation2 + $0x7a] sm:$0xff] }
  0x49   : > { %938 = vrot.lane.b32.xlu0 %v637_v62, %s3537_s22  ;;  %932 = vrot.lane.b32.xlu1 %v3838_v63, %s3537_s22  ;;  %v3917_v15 = vld [vmem:[#allocation2 + $0x62] sm:$0xff]  ;;  %v3927_v18 = vld [vmem:[#allocation2 + $0x52] sm:$0xff]  ;;  %v3935_v20 = vld [vmem:[#allocation2 + $0x6a] sm:$0xff] }
  0x4a   : > { %v650_v61 = vld [vmem:[#allocation2 + $0x129] sm:$0xff]  ;;  %v3933_v19 = vld [vmem:[#allocation2 + $0x92] sm:$0xff]  ;;  %v675_v26 = vld [vmem:[#allocation2 + $0xda] sm:$0xff] }
  0x4b   : > { %v655_v62 = vld [vmem:[#allocation2 + $0x169] sm:$0xff]  ;;  %v3957_v27 = vld [vmem:[#allocation2 + $0xb2] sm:$0xff]  ;;  %v678_v35 = vld [vmem:[#allocation2 + $0xfa] sm:$0xff] }
  0x4c   : > { %v3941_v21 = vld [vmem:[#allocation2 + $0xaa] sm:$0xff]  ;;  %v3943_v22 = vld [vmem:[#allocation2 + $0x82] sm:$0xff]  ;;  %v677_v28 = vld [vmem:[#allocation2 + $0xf2] sm:$0xff] }
  0x4d   : > { %942 = vrot.lane.b32.xlu0 %v639_v24, %s3537_s22  ;;  %936 = vrot.lane.b32.xlu1 %v3857_v25, %s3537_s22  ;;  %v652_v0 = vld [vmem:[#allocation2 + $0x141] sm:$0xff]  ;;  %v3962_v29 = vld [vmem:[#allocation2 + $0xca] sm:$0xff]  ;;  %v680_v38 = vld [vmem:[#allocation2 + $0x112] sm:$0xff] }
  0x4e   : > { %v654_v6 = vld [vmem:[#allocation2 + $0x159] sm:$0xff]  ;;  %v656_v8 = vld [vmem:[#allocation2 + $0x171] sm:$0xff]  ;;  %v3949_v23 = vld [vmem:[#allocation2 + $0xc2] sm:$0xff] }
  0x4f   : > { %v3951_v24 = vld [vmem:[#allocation2 + $0x9a] sm:$0xff]  ;;  %v679_v32 = vld [vmem:[#allocation2 + $0x10a] sm:$0xff]  ;;  %v3967_v33 = vld [vmem:[#allocation2 + $0xe2] sm:$0xff] }
  0x50   : > { %v681_v34 = vld [vmem:[#allocation2 + $0x122] sm:$0xff]  ;;  %v683_v37 = vld [vmem:[#allocation2 + $0x13a] sm:$0xff]  ;;  %v685_v1 = vld [vmem:[#allocation2 + $0x152] sm:$0xff] }
  0x51   : > { %946 = vrot.lane.b32.xlu0 %v641_v40, %s3537_s22  ;;  %940 = vrot.lane.b32.xlu1 %v3873_v41, %s3537_s22  ;;  %v682_v40 = vld [vmem:[#allocation2 + $0x12a] sm:$0xff]  ;;  %v684_v43 = vld [vmem:[#allocation2 + $0x142] sm:$0xff]  ;;  %v686_v2 = vld [vmem:[#allocation2 + $0x15a] sm:$0xff] }
  0x52   : > { %v687_v42 = vld [vmem:[#allocation2 + $0x16a] sm:$0xff]  ;;  %v688_v50 = vld [vmem:[#allocation2 + $0x172] sm:$0xff] }
  0x55   : > { %950 = vrot.lane.b32.xlu0 %v643_v47, %s3537_s22  ;;  %944 = vrot.lane.b32.xlu1 %v640_v49, %s3537_s22  ;;  %v3992_v49 = vld [vmem:[#allocation2 + $0x18] sm:$0xff] }
  0x59   : > { %954 = vrot.lane.b32.xlu0 %v645_v52, %s3537_s22  ;;  %948 = vrot.lane.b32.xlu1 %v642_v53, %s3537_s22  ;;  %v2177_v53 = vld [vmem:[%s5321_s3 + $0x40] sm:$0xff] }
  0x5a   : > { %3176 = vmatprep.subr.mxu0 %v2177_v53  ;;  %3242 = vmatprep.subr.mxu1 %v2177_v53 }
  0x5b   : > { %3177 = vmatpush3.msra.mxu0 %v2177_v53  ;;  %3251 = vmatpush3.msra.mxu1 %v2177_v53 }
  0x5d   : > { %958 = vrot.lane.b32.xlu0 %v647_v54, %s3537_s22  ;;  %952 = vrot.lane.b32.xlu1 %v644_v55, %s3537_s22  ;;  %v4004_v54 = vld [vmem:[#allocation2 + $0x30] sm:$0xff]  ;;  %v2176_v55 = vld [vmem:[%s5321_s3 + $0x38] sm:$0xff] }
  0x5e   : > { %3178 = vmatprep.subr.mxu0 %v2176_v55  ;;  %3243 = vmatprep.subr.mxu1 %v2176_v55 }
  0x5f   : > { %3179 = vmatpush3.msra.mxu0 %v2176_v55  ;;  %3252 = vmatpush3.msra.mxu1 %v2176_v55 }
  0x61   : > { %962 = vrot.lane.b32.xlu0 %v649_v56, %s3537_s22  ;;  %956 = vrot.lane.b32.xlu1 %v646_v57, %s3537_s22 }
  0x65   : > { %966 = vrot.lane.b32.xlu0 %v651_v58, %s3537_s22  ;;  %960 = vrot.lane.b32.xlu1 %v648_v59, %s3537_s22  ;;  %v2175_v58 = vld [vmem:[%s5321_s3 + $0x30] sm:$0xff]  ;;  %v4019_v59 = vld [vmem:[#allocation2 + $0x20] sm:$0xff] }
  0x66   : > { %3180 = vmatprep.subr.mxu0 %v2175_v58  ;;  %3244 = vmatprep.subr.mxu1 %v2175_v58 }
  0x67   : > { %3181 = vmatpush3.msra.mxu0 %v2175_v58  ;;  %3253 = vmatpush3.msra.mxu1 %v2175_v58 }
  0x69   : > { %970 = vrot.lane.b32.xlu0 %v653_v60, %s3537_s22  ;;  %964 = vrot.lane.b32.xlu1 %v650_v61, %s3537_s22  ;;  %v2174_v60 = vld [vmem:[%s5321_s3 + $0x28] sm:$0xff] }
  0x6a   : > { %3182 = vmatprep.subr.mxu0 %v2174_v60  ;;  %3245 = vmatprep.subr.mxu1 %v2174_v60 }
  0x6b   : > { %3183 = vmatpush3.msra.mxu0 %v2174_v60  ;;  %3254 = vmatpush3.msra.mxu1 %v2174_v60 }
  0x6d   : > { %974 = vrot.lane.b32.xlu0 %v655_v62, %s3537_s22  ;;  %968 = vrot.lane.b32.xlu1 %v652_v0, %s3537_s22  ;;  %v4032_v0 = vld [vmem:[#allocation2 + $0x38] sm:$0xff] }
  0x71   : > { %1042 = vrot.lane.b32.xlu0 %v657_v5, %s3538_s23  ;;  %972 = vrot.lane.b32.xlu1 %v654_v6, %s3537_s22 }
  0x75   : > { %1046 = vrot.lane.b32.xlu0 %v3899_v7, %s3538_s23  ;;  %976 = vrot.lane.b32.xlu1 %v656_v8, %s3537_s22  ;;  %v2172_v8 = vld [vmem:[%s5321_s3 + $0x18] sm:$0xff] }
  0x79   : > { %1050 = vrot.lane.b32.xlu0 %v3904_v9, %s3538_s23  ;;  %1044 = vrot.lane.b32.xlu1 %v658_v10, %s3538_s23 }
  0x7d   : > { %1054 = vrot.lane.b32.xlu0 %v3909_v11, %s3538_s23  ;;  %1048 = vrot.lane.b32.xlu1 %v3911_v12, %s3538_s23 }
  0x81   : > { %1058 = vrot.lane.b32.xlu0 %v3917_v15, %s3538_s23  ;;  %1052 = vrot.lane.b32.xlu1 %v3919_v16, %s3538_s23 }
  0x85   : > { %1062 = vrot.lane.b32.xlu0 %v3925_v17, %s3538_s23  ;;  %1056 = vrot.lane.b32.xlu1 %v3927_v18, %s3538_s23 }
  0x89   : > { %1066 = vrot.lane.b32.xlu0 %v3933_v19, %s3538_s23  ;;  %1060 = vrot.lane.b32.xlu1 %v3935_v20, %s3538_s23 }
  0x8d   : > { %1070 = vrot.lane.b32.xlu0 %v3941_v21, %s3538_s23  ;;  %1064 = vrot.lane.b32.xlu1 %v3943_v22, %s3538_s23 }
  0x91   : > { %1074 = vrot.lane.b32.xlu0 %v3949_v23, %s3538_s23  ;;  %1068 = vrot.lane.b32.xlu1 %v3951_v24, %s3538_s23  ;;  %v3972_v36 = vpop.permute.xlu0 %914 }
  0x95   : > { %1078 = vrot.lane.b32.xlu0 %v675_v26, %s3538_s23  ;;  %1072 = vrot.lane.b32.xlu1 %v3957_v27, %s3538_s23 }
  0x99   : > { %1082 = vrot.lane.b32.xlu0 %v677_v28, %s3538_s23  ;;  %1076 = vrot.lane.b32.xlu1 %v3962_v29, %s3538_s23  ;;  %v2170_v28 = vld [vmem:[%s5321_s3 + $0x8] sm:$0xff] }
  0x9d   : > { %1086 = vrot.lane.b32.xlu0 %v679_v32, %s3538_s23  ;;  %1080 = vrot.lane.b32.xlu1 %v3967_v33, %s3538_s23 }
  0xa1   : > { %1090 = vrot.lane.b32.xlu0 %v681_v34, %s3538_s23  ;;  %1084 = vrot.lane.b32.xlu1 %v678_v35, %s3538_s23  ;;  %v2169_v34 = vld [vmem:[%s5321_s3] sm:$0xff] }
  0xa2   : > { %v3978_v39 = vpop.permute.xlu0 %916 }
  0xa5   : > { %1094 = vrot.lane.b32.xlu0 %v683_v37, %s3538_s23  ;;  %1088 = vrot.lane.b32.xlu1 %v680_v38, %s3538_s23 }
  0xa9   : > { %1098 = vrot.lane.b32.xlu0 %v685_v1, %s3538_s23  ;;  %1092 = vrot.lane.b32.xlu1 %v682_v40, %s3538_s23 }
  0xab   : > { %v3982_v44 = vpop.permute.xlu0 %922  ;;  %v3984_v45 = vpop.permute.xlu1 %918 }
  0xad   : > { %1102 = vrot.lane.b32.xlu0 %v687_v42, %s3538_s23  ;;  %1096 = vrot.lane.b32.xlu1 %v684_v43, %s3538_s23  ;;  %v4097_v42 = vld [vmem:[#allocation2 + $0x48] sm:$0xff]  ;;  %v4107_v43 = vld [vmem:[#allocation2 + $0x50] sm:$0xff] }
  0xaf   : > { %v3988_v46 = vpop.permute.xlu0 %926  ;;  %v3990_v47 = vpop.permute.xlu1 %920 }
  0xb1   : > { %1170 = vrot.lane.b32.xlu0 %v3992_v49, %s3539_s29  ;;  %1100 = vrot.lane.b32.xlu1 %v686_v2, %s3538_s23 }
  0xb3   : > { %v3997_v51 = vpop.permute.xlu0 %930  ;;  %v3999_v52 = vpop.permute.xlu1 %924 }
  0xb5   : > { %1174 = vrot.lane.b32.xlu0 %v4004_v54, %s3539_s29  ;;  %1104 = vrot.lane.b32.xlu1 %v688_v50, %s3538_s23 }
  0xb7   : > { %v4012_v56 = vpop.permute.xlu0 %934  ;;  %v4014_v57 = vpop.permute.xlu1 %928 }
  0xb9   : > { %1298 = vrot.lane.b32.xlu0 %v3767_v4, %s3540_s20  ;;  %1172 = vrot.lane.b32.xlu1 %v4019_v59, %s3539_s29  ;;  %v2173_v4 = vld [vmem:[%s5321_s3 + $0x20] sm:$0xff] }
  0xba   : > { %3184 = vmatprep.subr.mxu0 %v2173_v4  ;;  %3246 = vmatprep.subr.mxu1 %v2173_v4 }
  0xbb   : > { %v4028_v61 = vpop.permute.xlu0 %938  ;;  %v4030_v62 = vpop.permute.xlu1 %932  ;;  %3185 = vmatpush3.msra.mxu0 %v2173_v4  ;;  %3255 = vmatpush3.msra.mxu1 %v2173_v4 }
  0xbc   : > { %3186 = vmatprep.subr.mxu0 %v2172_v8  ;;  %3247 = vmatprep.subr.mxu1 %v2172_v8 }
  0xbd   : > { %1426 = vrot.lane.b32.xlu0 %v3899_v7, %s3541_s9  ;;  %1176 = vrot.lane.b32.xlu1 %v4032_v0, %s3539_s29  ;;  %v2171_v7 = vld [vmem:[%s5321_s3 + $0x10] sm:$0xff] }
  0xbe   : > { %3187 = vmatpush3.msra.mxu0 %v2172_v8  ;;  %3256 = vmatpush3.msra.mxu1 %v2172_v8 }
  0xbf   : > { %v4041_v5 = vpop.permute.xlu0 %942  ;;  %v4043_v6 = vpop.permute.xlu1 %936  ;;  %3188 = vmatprep.subr.mxu0 %v2171_v7  ;;  %3248 = vmatprep.subr.mxu1 %v2171_v7 }
  0xc0   : > { %5331 = vst [vmem:[#allocation9_spill] sm:$0xff] %v4041_v5  ;;  %3189 = vmatpush3.msra.mxu0 %v2171_v7  ;;  %3257 = vmatpush3.msra.mxu1 %v2171_v7  ;;  %v4149_v7 = vld [vmem:[#allocation2 + $0x60] sm:$0xff] }
  0xc1   : > { %1554 = vrot.lane.b32.xlu0 %v4004_v54, %s3542_s17  ;;  %1300 = vrot.lane.b32.xlu1 %v3779_v14, %s3540_s20 }
  0xc2   : > { %3190 = vmatprep.subr.mxu0 %v2170_v28  ;;  %3249 = vmatprep.subr.mxu1 %v2170_v28 }
  0xc3   : > { %v4055_v10 = vpop.permute.xlu0 %946  ;;  %v4057_v26 = vpop.permute.xlu1 %940  ;;  %3191 = vmatpush3.msra.mxu0 %v2170_v28  ;;  %3258 = vmatpush3.msra.mxu1 %v2170_v28  ;;  %v4159_v28 = vld [vmem:[#allocation2 + $0x68] sm:$0xff] }
  0xc4   : > { %5332 = vst [vmem:[#allocation10_spill] sm:$0xff] %v4055_v10  ;;  %3192 = vmatprep.subr.mxu0 %v2169_v34  ;;  %3250 = vmatprep.subr.mxu1 %v2169_v34  ;;  %v4295_v10 = vld [vmem:[#allocation2 + $0xb0] sm:$0xff] }
  0xc5   : > { %1682 = vrot.lane.b32.xlu0 %v3765_v3, %s3543_s8  ;;  %1428 = vrot.lane.b32.xlu1 %v3911_v12, %s3541_s9  ;;  %5370 = vst [vmem:[#allocation48_spill] sm:$0xff] %v4295_v10 }
  0xc6   : > { %3193 = vmatpush3.msra.mxu0 %v2169_v34  ;;  %3259 = vmatpush3.msra.mxu1 %v2169_v34 }
  0xc7   : > { %v4066_v14 = vpop.permute.xlu0 %950  ;;  %v4068_v32 = vpop.permute.xlu1 %944 }
  0xc8   : > { %5333 = vst [vmem:[#allocation11_spill] sm:$0xff] %v4066_v14  ;;  %5334 = vst [vmem:[#allocation12_spill] sm:$0xff] %v4068_v32 }
  0xc9   : > { %1684 = vrot.lane.b32.xlu0 %v3803_v31, %s3543_s8  ;;  %1556 = vrot.lane.b32.xlu1 %v4032_v0, %s3542_s17 }
  0xcb   : > { %v4077_v12 = vpop.permute.xlu0 %954  ;;  %v4079_v35 = vpop.permute.xlu1 %948 }
  0xcc   : > { %5335 = vst [vmem:[#allocation13_spill] sm:$0xff] %v4077_v12  ;;  %5336 = vst [vmem:[#allocation14_spill] sm:$0xff] %v4079_v35  ;;  %v594_v35 = vld [vmem:[#allocation2 + $0x8] sm:$0xff] }
  0xcd   : > { %1304 = vrot.lane.b32.xlu0 %v3803_v31, %s3540_s20  ;;  %1302 = vrot.lane.b32.xlu1 %v3765_v3, %s3540_s20 }
  0xcf   : > { %v4085_v37 = vpop.permute.xlu0 %958  ;;  %v4087_v38 = vpop.permute.xlu1 %952 }
  0xd0   : > { %5337 = vst [vmem:[#allocation15_spill] sm:$0xff] %v4085_v37  ;;  %5338 = vst [vmem:[#allocation16_spill] sm:$0xff] %v4087_v38 }
  0xd1   : > { %1812 = vrot.lane.b32.xlu0 %v3919_v16, %s3544_s18  ;;  %1810 = vrot.lane.b32.xlu1 %v3904_v9, %s3544_s18 }
  0xd3   : > { %v4093_v1 = vpop.permute.xlu0 %962  ;;  %v4095_v40 = vpop.permute.xlu1 %956 }
  0xd4   : > { %5339 = vst [vmem:[#allocation17_spill] sm:$0xff] %v4093_v1  ;;  %5340 = vst [vmem:[#allocation18_spill] sm:$0xff] %v4095_v40  ;;  %v4201_v1 = vld [vmem:[#allocation2 + $0x78] sm:$0xff] }
  0xd5   : > { %1558 = vrot.lane.b32.xlu0 %v4097_v42, %s3542_s17  ;;  %1430 = vrot.lane.b32.xlu1 %v3904_v9, %s3541_s9 }
  0xd7   : > { %v4103_v3 = vpop.permute.xlu0 %966  ;;  %v4105_v31 = vpop.permute.xlu1 %960 }
  0xd8   : > { %5341 = vst [vmem:[#allocation19_spill] sm:$0xff] %v4103_v3  ;;  %5342 = vst [vmem:[#allocation20_spill] sm:$0xff] %v4105_v31  ;;  %v4211_v31 = vld [vmem:[#allocation2 + $0x80] sm:$0xff] }
  0xd9   : > { %1560 = vrot.lane.b32.xlu0 %v4107_v43, %s3542_s17  ;;  %1432 = vrot.lane.b32.xlu1 %v3919_v16, %s3541_s9 }
  0xdb   : > { %v4113_v2 = vpop.permute.xlu0 %970  ;;  %v4115_v50 = vpop.permute.xlu1 %964 }
  0xdc   : > { %5343 = vst [vmem:[#allocation21_spill] sm:$0xff] %v4113_v2  ;;  %5344 = vst [vmem:[#allocation22_spill] sm:$0xff] %v4115_v50 }
  0xdd   : > { %1180 = vrot.lane.b32.xlu0 %v4107_v43, %s3539_s29  ;;  %1178 = vrot.lane.b32.xlu1 %v4097_v42, %s3539_s29 }
  0xdf   : > { %v4121_v9 = vpop.permute.xlu0 %974  ;;  %v4123_v53 = vpop.permute.xlu1 %968 }
  0xe0   : > { %5345 = vst [vmem:[#allocation23_spill] sm:$0xff] %v4121_v9  ;;  %5346 = vst [vmem:[#allocation24_spill] sm:$0xff] %v4123_v53 }
  0xe1   : > { %1688 = vrot.lane.b32.xlu0 %v3820_v48, %s3543_s8  ;;  %1686 = vrot.lane.b32.xlu1 %v3777_v13, %s3543_s8 }
  0xe3   : > { %v4129_v16 = vpop.permute.xlu0 %1042  ;;  %v4131_v55 = vpop.permute.xlu1 %972 }
  0xe4   : > { %5347 = vst [vmem:[#allocation25_spill] sm:$0xff] %v4131_v55 }
  0xe5   : > { %1308 = vrot.lane.b32.xlu0 %v3820_v48, %s3540_s20  ;;  %1306 = vrot.lane.b32.xlu1 %v3777_v13, %s3540_s20 }
  0xe7   : > { %v4137_v58 = vpop.permute.xlu0 %1046  ;;  %v4139_v60 = vpop.permute.xlu1 %976 }
  0xe8   : > { %5348 = vst [vmem:[#allocation26_spill] sm:$0xff] %v4139_v60 }
  0xe9   : > { %1816 = vrot.lane.b32.xlu0 %v3927_v18, %s3544_s18  ;;  %1814 = vrot.lane.b32.xlu1 %v3909_v11, %s3544_s18 }
  0xeb   : > { %v4145_v4 = vpop.permute.xlu0 %1050  ;;  %v4147_v8 = vpop.permute.xlu1 %1044 }
  0xed   : > { %1562 = vrot.lane.b32.xlu0 %v4149_v7, %s3542_s17  ;;  %1434 = vrot.lane.b32.xlu1 %v3909_v11, %s3541_s9 }
  0xef   : > { %v4155_v13 = vpop.permute.xlu0 %1054  ;;  %v4157_v48 = vpop.permute.xlu1 %1048 }
  0xf1   : > { %1564 = vrot.lane.b32.xlu0 %v4159_v28, %s3542_s17  ;;  %1436 = vrot.lane.b32.xlu1 %v3927_v18, %s3541_s9 }
  0xf3   : > { %v4165_v34 = vpop.permute.xlu0 %1058  ;;  %v4167_v60 = vpop.permute.xlu1 %1052 }
  0xf5   : > { %1184 = vrot.lane.b32.xlu0 %v4159_v28, %s3539_s29  ;;  %1182 = vrot.lane.b32.xlu1 %v4149_v7, %s3539_s29 }
  0xf7   : > { %v4173_v11 = vpop.permute.xlu0 %1062  ;;  %v4175_v9 = vpop.permute.xlu1 %1056 }
  0xf9   : > { %1692 = vrot.lane.b32.xlu0 %v3838_v63, %s3543_s8  ;;  %1690 = vrot.lane.b32.xlu1 %v3801_v30, %s3543_s8 }
  0xfb   : > { %v4181_v18 = vpop.permute.xlu0 %1066  ;;  %v4183_v55 = vpop.permute.xlu1 %1060 }
  0xfc   : > { %5349 = vst [vmem:[#allocation27_spill] sm:$0xff] %v4181_v18 }
  0xfd   : > { %1312 = vrot.lane.b32.xlu0 %v3838_v63, %s3540_s20  ;;  %1310 = vrot.lane.b32.xlu1 %v3801_v30, %s3540_s20 }
  0xff   : > { %v4189_v2 = vpop.permute.xlu0 %1070  ;;  %v4191_v53 = vpop.permute.xlu1 %1064 }
 0x100   : > { %5350 = vst [vmem:[#allocation28_spill] sm:$0xff] %v4189_v2  ;;  %v1907_v2 = vsel %vm504_vm0, %v594_v35, %v3978_v39  ;;  %v829_v35 = vld [vmem:[#allocation2 + $0xb1] sm:$0xff] }
 0x101   : > { %1820 = vrot.lane.b32.xlu0 %v3935_v20, %s3544_s18  ;;  %1818 = vrot.lane.b32.xlu1 %v3917_v15, %s3544_s18 }
 0x103   : > { %v4197_v3 = vpop.permute.xlu0 %1074  ;;  %v4199_v50 = vpop.permute.xlu1 %1068 }
 0x104   : > { %5351 = vst [vmem:[#allocation29_spill] sm:$0xff] %v4197_v3  ;;  %5352 = vst [vmem:[#allocation30_spill] sm:$0xff] %v4199_v50  ;;  %v4289_v3 = vld [vmem:[#allocation2 + $0xa8] sm:$0xff] }
 0x105   : > { %1566 = vrot.lane.b32.xlu0 %v4201_v1, %s3542_s17  ;;  %1438 = vrot.lane.b32.xlu1 %v3917_v15, %s3541_s9  ;;  %v824_v15 = vld [vmem:[#allocation2 + $0x79] sm:$0xff]  ;;  %5369 = vst [vmem:[#allocation47_spill] sm:$0xff] %v4289_v3 }
 0x107   : > { %v4207_v30 = vpop.permute.xlu0 %1078  ;;  %v4209_v63 = vpop.permute.xlu1 %1072 }
 0x108   : > { %5353 = vst [vmem:[#allocation31_spill] sm:$0xff] %v4207_v30  ;;  %5354 = vst [vmem:[#allocation32_spill] sm:$0xff] %v4209_v63  ;;  %v593_v63 = vld [vmem:[#allocation2] sm:$0xff] }
 0x109   : > { %1568 = vrot.lane.b32.xlu0 %v4211_v31, %s3542_s17  ;;  %1440 = vrot.lane.b32.xlu1 %v3935_v20, %s3541_s9  ;;  %v1906_v50 = vsel %vm504_vm0, %v593_v63, %v3972_v36 }
 0x10b   : > { %v4217_v37 = vpop.permute.xlu0 %1082  ;;  %v4219_v40 = vpop.permute.xlu1 %1076 }
 0x10c   : > { %5355 = vst [vmem:[#allocation33_spill] sm:$0xff] %v4217_v37  ;;  %5356 = vst [vmem:[#allocation34_spill] sm:$0xff] %v4219_v40 }
 0x10d   : > { %1188 = vrot.lane.b32.xlu0 %v4211_v31, %s3539_s29  ;;  %1186 = vrot.lane.b32.xlu1 %v4201_v1, %s3539_s29 }
 0x10f   : > { %v4225_v12 = vpop.permute.xlu0 %1086  ;;  %v4227_v30 = vpop.permute.xlu1 %1080 }
 0x110   : > { %5357 = vst [vmem:[#allocation35_spill] sm:$0xff] %v4225_v12  ;;  %5358 = vst [vmem:[#allocation36_spill] sm:$0xff] %v4227_v30 }
 0x111   : > { %1696 = vrot.lane.b32.xlu0 %v3857_v25, %s3543_s8  ;;  %1694 = vrot.lane.b32.xlu1 %v824_v15, %s3543_s8 }
 0x113   : > { %v4232_v20 = vpop.permute.xlu0 %1090  ;;  %v4234_v37 = vpop.permute.xlu1 %1084 }
 0x114   : > { %5359 = vst [vmem:[#allocation37_spill] sm:$0xff] %v4232_v20  ;;  %5360 = vst [vmem:[#allocation38_spill] sm:$0xff] %v4234_v37  ;;  %v4251_v37 = vld [vmem:[#allocation2 + $0x90] sm:$0xff] }
 0x115   : > { %1316 = vrot.lane.b32.xlu0 %v3857_v25, %s3540_s20  ;;  %1314 = vrot.lane.b32.xlu1 %v824_v15, %s3540_s20 }
 0x117   : > { %v4239_v14 = vpop.permute.xlu0 %1094  ;;  %v4241_v38 = vpop.permute.xlu1 %1088 }
 0x118   : > { %5361 = vst [vmem:[#allocation39_spill] sm:$0xff] %v4239_v14  ;;  %5362 = vst [vmem:[#allocation40_spill] sm:$0xff] %v4241_v38  ;;  %v4261_v14 = vld [vmem:[#allocation2 + $0x98] sm:$0xff] }
 0x119   : > { %1824 = vrot.lane.b32.xlu0 %v3943_v22, %s3544_s18  ;;  %1822 = vrot.lane.b32.xlu1 %v3925_v17, %s3544_s18 }
 0x11b   : > { %v4247_v12 = vpop.permute.xlu0 %1098  ;;  %v4249_v20 = vpop.permute.xlu1 %1092 }
 0x11c   : > { %5363 = vst [vmem:[#allocation41_spill] sm:$0xff] %v4247_v12  ;;  %5364 = vst [vmem:[#allocation42_spill] sm:$0xff] %v4249_v20 }
 0x11d   : > { %1570 = vrot.lane.b32.xlu0 %v4251_v37, %s3542_s17  ;;  %1442 = vrot.lane.b32.xlu1 %v3925_v17, %s3541_s9  ;;  %v826_v17 = vld [vmem:[#allocation2 + $0x91] sm:$0xff] }
 0x11f   : > { %v4257_v25 = vpop.permute.xlu0 %1102  ;;  %v4259_v15 = vpop.permute.xlu1 %1096 }
 0x120   : > { %5365 = vst [vmem:[#allocation43_spill] sm:$0xff] %v4257_v25  ;;  %5366 = vst [vmem:[#allocation44_spill] sm:$0xff] %v4259_v15 }
 0x121   : > { %1572 = vrot.lane.b32.xlu0 %v4261_v14, %s3542_s17  ;;  %1444 = vrot.lane.b32.xlu1 %v3943_v22, %s3541_s9 }
 0x123   : > { %v1171_v12 = vpop.permute.xlu0 %1170  ;;  %v4267_v20 = vpop.permute.xlu1 %1100 }
 0x124   : > { %5367 = vst [vmem:[#allocation45_spill] sm:$0xff] %v4267_v20 }
 0x125   : > { %1192 = vrot.lane.b32.xlu0 %v4261_v14, %s3539_s29  ;;  %1190 = vrot.lane.b32.xlu1 %v4251_v37, %s3539_s29 }
 0x127   : > { %v4273_v25 = vpop.permute.xlu0 %1174  ;;  %v4275_v15 = vpop.permute.xlu1 %1104 }
 0x128   : > { %5368 = vst [vmem:[#allocation46_spill] sm:$0xff] %v4275_v15 }
 0x129   : > { %1700 = vrot.lane.b32.xlu0 %v3873_v41, %s3543_s8  ;;  %1698 = vrot.lane.b32.xlu1 %v826_v17, %s3543_s8 }
 0x12b   : > { %v1299_v22 = vpop.permute.xlu0 %1298  ;;  %v1173_v38 = vpop.permute.xlu1 %1172 }
 0x12d   : > { %1320 = vrot.lane.b32.xlu0 %v3873_v41, %s3540_s20  ;;  %1318 = vrot.lane.b32.xlu1 %v826_v17, %s3540_s20 }
 0x12f   : > { %v1427_v20 = vpop.permute.xlu0 %1426  ;;  %v4283_v30 = vpop.permute.xlu1 %1176 }
 0x131   : > { %1828 = vrot.lane.b32.xlu0 %v3951_v24, %s3544_s18  ;;  %1826 = vrot.lane.b32.xlu1 %v3933_v19, %s3544_s18 }
 0x133   : > { %v1555_v15 = vpop.permute.xlu0 %1554  ;;  %v1301_v40 = vpop.permute.xlu1 %1300 }
 0x135   : > { %1574 = vrot.lane.b32.xlu0 %v4289_v3, %s3542_s17  ;;  %1446 = vrot.lane.b32.xlu1 %v3933_v19, %s3541_s9  ;;  %v1940_v19 = vsel %vm1938_vm2, %v1907_v2, %v4147_v8  ;;  %v828_v2 = vld [vmem:[#allocation2 + $0xa9] sm:$0xff] }
 0x136   : > { %v1973_v18 = vsel %vm1971_vm3, %v1940_v19, %v1173_v38 }
 0x137   : > { %v1683_v41 = vpop.permute.xlu0 %1682  ;;  %v1429_v17 = vpop.permute.xlu1 %1428  ;;  %v2006_v39 = vsel %vm2004_vm4, %v1973_v18, %v1301_v40 }
 0x138   : > { %v2039_v36 = vsel %vm2037_vm5, %v2006_v39, %v1429_v17  ;;  %v1908_v39 = vsel %vm504_vm0, %v3992_v49, %v3984_v45  ;;  %v831_v49 = vld [vmem:[#allocation2 + $0xc9] sm:$0xff] }
 0x139   : > { %1576 = vrot.lane.b32.xlu0 %v4295_v10, %s3542_s17  ;;  %1448 = vrot.lane.b32.xlu1 %v3951_v24, %s3541_s9  ;;  %v1939_v24 = vsel %vm1938_vm2, %v1906_v50, %v4129_v16 }
 0x13a   : > { %v1972_v8 = vsel %vm1971_vm3, %v1939_v24, %v1171_v12  ;;  %v4341_v24 = vld [vmem:[#allocation2 + $0xc8] sm:$0xff] }
 0x13b   : > { %v1685_v32 = vpop.permute.xlu0 %1684  ;;  %v1557_v5 = vpop.permute.xlu1 %1556  ;;  %v2005_v19 = vsel %vm2004_vm4, %v1972_v8, %v1299_v22  ;;  %v1941_v8 = vsel %vm1938_vm2, %v1908_v39, %v4137_v58 }
 0x13d   : > { %1196 = vrot.lane.b32.xlu0 %v4295_v10, %s3539_s29  ;;  %1194 = vrot.lane.b32.xlu1 %v4289_v3, %s3539_s29  ;;  %v2072_v10 = vsel %vm2070_vm6, %v2039_v36, %v1557_v5  ;;  %v2038_v3 = vsel %vm2037_vm5, %v2005_v19, %v1427_v20  ;;  %v1974_v19 = vsel %vm1971_vm3, %v1941_v8, %v4273_v25 }
 0x13e   : > { %v2071_v40 = vsel %vm2070_vm6, %v2038_v3, %v1555_v15  ;;  %v2105_v16 = vsel %vm2103_vm7, %v2072_v10, %v1685_v32  ;;  %v4335_v15 = vld [vmem:[#allocation2 + $0xc0] sm:$0xff] }
 0x13f   : > { %v1305_v38 = vpop.permute.xlu0 %1304  ;;  %v1303_v63 = vpop.permute.xlu1 %1302  ;;  %v2104_v12 = vsel %vm2103_vm7, %v2071_v40, %v1683_v41 }
 0x141   : > { %1704 = vrot.lane.b32.xlu0 %v829_v35, %s3543_s8  ;;  %1702 = vrot.lane.b32.xlu1 %v828_v2, %s3543_s8 }
 0x143   : > { %v1813_v50 = vpop.permute.xlu0 %1812  ;;  %v1811_v18 = vpop.permute.xlu1 %1810 }
 0x144   : > { %v2138_v22 = vsel %vm2136_vm8, %v2105_v16, %v1813_v50  ;;  %v2137_v5 = vsel %vm2136_vm8, %v2104_v12, %v1811_v18 }
 0x145   : > { %1324 = vrot.lane.b32.xlu0 %v829_v35, %s3540_s20  ;;  %1322 = vrot.lane.b32.xlu1 %v828_v2, %s3540_s20  ;;  %v1909_v35 = vsel %vm504_vm0, %v4019_v59, %v3990_v47  ;;  %v2007_v47 = vsel %vm2004_vm4, %v1974_v19, %v1303_v63  ;;  %v830_v59 = vld [vmem:[#allocation2 + $0xc1] sm:$0xff] }
 0x146   : > { %3194 = vmatprep.mubr.msk.f32.mxu0 %vm2185_vm9, %v2137_v5  ;;  %v1942_v36 = vsel %vm1938_vm2, %v1909_v35, %v4157_v48 }
 0x147   : > { %3195 = vmatmul.mubr.msk.f32.vlgmr.msra.gmra.mxu0 %vm2185_vm9, %v2138_v22  ;;  %v1559_v3 = vpop.permute.xlu0 %1558  ;;  %v1431_v20 = vpop.permute.xlu1 %1430 }
 0x148   : > { %v2040_v58 = vsel %vm2037_vm5, %v2007_v47, %v1431_v20 }
 0x149   : > { %1832 = vrot.lane.b32.xlu0 %v3957_v27, %s3544_s18  ;;  %1830 = vrot.lane.b32.xlu1 %v3941_v21, %s3544_s18  ;;  %v2073_v12 = vsel %vm2070_vm6, %v2040_v58, %v1559_v3 }
 0x14b   : > { %v1561_v10 = vpop.permute.xlu0 %1560  ;;  %v1433_v32 = vpop.permute.xlu1 %1432 }
 0x14d   : > { %1578 = vrot.lane.b32.xlu0 %v4335_v15, %s3542_s17  ;;  %1450 = vrot.lane.b32.xlu1 %v3941_v21, %s3541_s9 }
 0x14f   : > { %v1181_v41 = vpop.permute.xlu0 %1180  ;;  %v1179_v17 = vpop.permute.xlu1 %1178 }
 0x151   : > { %1580 = vrot.lane.b32.xlu0 %v4341_v24, %s3542_s17  ;;  %1452 = vrot.lane.b32.xlu1 %v3957_v27, %s3541_s9  ;;  %v1975_v27 = vsel %vm1971_vm3, %v1942_v36, %v4283_v30 }
 0x152   : > { %v2008_v45 = vsel %vm2004_vm4, %v1975_v27, %v1305_v38 }
 0x153   : > { %v1689_v2 = vpop.permute.xlu0 %1688  ;;  %v1687_v21 = vpop.permute.xlu1 %1686  ;;  %v2041_v48 = vsel %vm2037_vm5, %v2008_v45, %v1433_v32  ;;  %v4385_v32 = vld [vmem:[#allocation2 + $0xd8] sm:$0xff] }
 0x154   : > { %v2074_v30 = vsel %vm2070_vm6, %v2041_v48, %v1561_v10  ;;  %v2106_v63 = vsel %vm2103_vm7, %v2073_v12, %v1687_v21  ;;  %v1910_v21 = vsel %vm504_vm0, %v4004_v54, %v3982_v44  ;;  %v833_v54 = vld [vmem:[#allocation2 + $0xe1] sm:$0xff] }
 0x155   : > { %1200 = vrot.lane.b32.xlu0 %v4341_v24, %s3539_s29  ;;  %1198 = vrot.lane.b32.xlu1 %v4335_v15, %s3539_s29  ;;  %v2107_v38 = vsel %vm2103_vm7, %v2074_v30, %v1689_v2  ;;  %v4395_v2 = vld [vmem:[#allocation2 + $0xe0] sm:$0xff]  ;;  %v1943_v19 = vsel %vm1938_vm2, %v1910_v21, %v4145_v4  ;;  %v4449_v21 = vld [vmem:[#allocation2 + $0xf8] sm:$0xff] }
 0x156   : > { %v864_v12 = vld [vmem:[#allocation2 + $0xda] sm:$0xff] }
 0x157   : > { %v1309_v25 = vpop.permute.xlu0 %1308  ;;  %v1307_v40 = vpop.permute.xlu1 %1306 }
 0x159   : > { %1708 = vrot.lane.b32.xlu0 %v831_v49, %s3543_s8  ;;  %1706 = vrot.lane.b32.xlu1 %v830_v59, %s3543_s8 }
 0x15b   : > { %v1817_v50 = vpop.permute.xlu0 %1816  ;;  %v1815_v16 = vpop.permute.xlu1 %1814 }
 0x15c   : > { %v2140_v18 = vsel %vm2136_vm8, %v2107_v38, %v1817_v50  ;;  %v2139_v22 = vsel %vm2136_vm8, %v2106_v63, %v1815_v16 }
 0x15d   : > { %1328 = vrot.lane.b32.xlu0 %v831_v49, %s3540_s20  ;;  %1326 = vrot.lane.b32.xlu1 %v830_v59, %s3540_s20 }
 0x15e   : > { %3197 = vmatprep.mubr.msk.f32.mxu0 %vm2185_vm9, %v2139_v22  ;;  %v770_v22 = vld [vmem:[#allocation2 + $0xe2] sm:$0xff] }
 0x15f   : > { %3198 = vmatmul.mubr.msk.f32.gmra.mxu0 %vm2185_vm9, %v2140_v18  ;;  %v1563_v5 = vpop.permute.xlu0 %1562  ;;  %v1435_v3 = vpop.permute.xlu1 %1434  ;;  %v4436_v18 = vld [vmem:[#allocation2 + $0xf0] sm:$0xff] }
 0x161   : > { %1836 = vrot.lane.b32.xlu0 %v3962_v29, %s3544_s18  ;;  %1834 = vrot.lane.b32.xlu1 %v3949_v23, %s3544_s18 }
 0x163   : > { %v1565_v20 = vpop.permute.xlu0 %1564  ;;  %v1437_v10 = vpop.permute.xlu1 %1436 }
 0x165   : > { %1582 = vrot.lane.b32.xlu0 %v4385_v32, %s3542_s17  ;;  %1454 = vrot.lane.b32.xlu1 %v3949_v23, %s3541_s9  ;;  %v1911_v23 = vsel %vm504_vm0, %v4032_v0, %v3999_v52  ;;  %v832_v0 = vld [vmem:[#allocation2 + $0xd9] sm:$0xff] }
 0x166   : > { %v1944_v27 = vsel %vm1938_vm2, %v1911_v23, %v4167_v60  ;;  %v3442_v23 = vld [vmem:[%s5320_s2] ss:$0 sm:$0xff] }
 0x167   : > { %v4391_v39 = vpop.permute.xlu0 %1184  ;;  %v4393_v35 = vpop.permute.xlu1 %1182  ;;  %v1977_v45 = vsel %vm1971_vm3, %v1944_v27, %v1181_v41  ;;  %v1912_v27 = vsel %vm504_vm0, %v4097_v42, %v3988_v46 }
 0x168   : > { %v2010_v44 = vsel %vm2004_vm4, %v1977_v45, %v1309_v25 }
 0x169   : > { %1584 = vrot.lane.b32.xlu0 %v4395_v2, %s3542_s17  ;;  %1456 = vrot.lane.b32.xlu1 %v3962_v29, %s3541_s9  ;;  %v1976_v29 = vsel %vm1971_vm3, %v1943_v19, %v1179_v17  ;;  %v2043_v60 = vsel %vm2037_vm5, %v2010_v44, %v1437_v10  ;;  %v329_v19 = vld [vmem:[%s3706_s19 + $0xf8] sm:$0xff] }
 0x16a   : > { %v2009_v52 = vsel %vm2004_vm4, %v1976_v29, %v1307_v40  ;;  %v2076_v17 = vsel %vm2070_vm6, %v2043_v60, %v1565_v20  ;;  %v834_v60 = vld [vmem:[#allocation2 + $0xf1] sm:$0xff] }
 0x16b   : > { %v1693_v8 = vpop.permute.xlu0 %1692  ;;  %v1691_v36 = vpop.permute.xlu1 %1690  ;;  %v2042_v4 = vsel %vm2037_vm5, %v2009_v52, %v1435_v3 }
 0x16c   : > { %v2075_v49 = vsel %vm2070_vm6, %v2042_v4, %v1563_v5  ;;  %v2109_v59 = vsel %vm2103_vm7, %v2076_v17, %v1693_v8  ;;  %v328_v5 = vld [vmem:[%s3706_s19 + $0xf0] sm:$0xff]  ;;  %s3450_s19 = scalar_lea.vmem %s3449_s15, 32 }
 0x16d   : > { %1204 = vrot.lane.b32.xlu0 %v4395_v2, %s3539_s29  ;;  %1202 = vrot.lane.b32.xlu1 %v4385_v32, %s3539_s29  ;;  %v2108_v58 = vsel %vm2103_vm7, %v2075_v49, %v1691_v36  ;;  %v1913_v36 = vsel %vm504_vm0, %v4107_v43, %v4014_v57 }
 0x16e   : > { %v1946_v45 = vsel %vm1938_vm2, %v1913_v36, %v4175_v9  ;;  %v4501_v36 = vld [vmem:[#allocation2 + $0x110] sm:$0xff] }
 0x16f   : > { %v1313_v47 = vpop.permute.xlu0 %1312  ;;  %v1311_v41 = vpop.permute.xlu1 %1310  ;;  %v1979_v4 = vsel %vm1971_vm3, %v1946_v45, %v4391_v39 }
 0x170   : > { %v2012_v43 = vsel %vm2004_vm4, %v1979_v4, %v1313_v47 }
 0x171   : > { %1712 = vrot.lane.b32.xlu0 %v833_v54, %s3543_s8  ;;  %1710 = vrot.lane.b32.xlu1 %v832_v0, %s3543_s8 }
 0x173   : > { %v1821_v48 = vpop.permute.xlu0 %1820  ;;  %v1819_v25 = vpop.permute.xlu1 %1818 }
 0x174   : > { %v2142_v40 = vsel %vm2136_vm8, %v2109_v59, %v1821_v48  ;;  %v2141_v30 = vsel %vm2136_vm8, %v2108_v58, %v1819_v25 }
 0x175   : > { %1332 = vrot.lane.b32.xlu0 %v833_v54, %s3540_s20  ;;  %1330 = vrot.lane.b32.xlu1 %v832_v0, %s3540_s20  ;;  %v1945_v0 = vsel %vm1938_vm2, %v1912_v27, %v4155_v13  ;;  %v835_v13 = vld [vmem:[#allocation2 + $0xf9] sm:$0xff]  ;;  %v1915_v27 = vsel %vm504_vm0, %v4159_v28, %v4030_v62  ;;  %v836_v28 = vld [vmem:[#allocation2 + $0x109] sm:$0xff] }
 0x176   : > { %3200 = vmatprep.mubr.msk.f32.mxu0 %vm2185_vm9, %v2141_v30  ;;  %v1978_v57 = vsel %vm1971_vm3, %v1945_v0, %v4393_v35 }
 0x177   : > { %3201 = vmatmul.mubr.msk.f32.gmra.mxu0 %vm2185_vm9, %v2142_v40  ;;  %v1567_v38 = vpop.permute.xlu0 %1566  ;;  %v1439_v63 = vpop.permute.xlu1 %1438  ;;  %v2011_v9 = vsel %vm2004_vm4, %v1978_v57, %v1311_v41 }
 0x178   : > { %v2044_v39 = vsel %vm2037_vm5, %v2011_v9, %v1439_v63 }
 0x179   : > { %1840 = vrot.lane.b32.xlu0 %v3967_v33, %s3544_s18  ;;  %1838 = vrot.lane.b32.xlu1 %v864_v12, %s3544_s18  ;;  %v3441_v33 = vld [vmem:[%s5319_s1] ss:$0 sm:$0xff]  ;;  %v2077_v41 = vsel %vm2070_vm6, %v2044_v39, %v1567_v38  ;;  %v866_v38 = vld [vmem:[#allocation2 + $0xf2] sm:$0xff] }
 0x17a   : > { %v367_v10 = vmul.f32 %v3441_v33, %v328_v5  ;;  %v368_v54 = vmul.f32 %v3441_v33, %v329_v19  ;;  %v1914_v19 = vsel %vm504_vm0, %v4149_v7, %v3997_v51  ;;  %v837_v7 = vld [vmem:[#allocation2 + $0x111] sm:$0xff] }
 0x17b   : > { %v1569_v50 = vpop.permute.xlu0 %1568  ;;  %v1441_v16 = vpop.permute.xlu1 %1440  ;;  %v869_v39 = vld [vmem:[#allocation2 + $0x112] sm:$0xff] }
 0x17c   : > { %v406_v8 = vadd.f32 %v3442_v23, %v367_v10  ;;  %v407_v42 = vadd.f32 %v3442_v23, %v368_v54  ;;  %v2045_v35 = vsel %vm2037_vm5, %v2012_v43, %v1441_v16  ;;  %v4496_v10 = vld [vmem:[#allocation2 + $0x108] sm:$0xff] }
 0x17d   : > { %1586 = vrot.lane.b32.xlu0 %v4436_v18, %s3542_s17  ;;  %1458 = vrot.lane.b32.xlu1 %v864_v12, %s3541_s9  ;;  %v2078_v47 = vsel %vm2070_vm6, %v2045_v35, %v1569_v50  ;;  %v867_v50 = vld [vmem:[#allocation2 + $0xfa] sm:$0xff]  ;;  %v868_v35 = vld [vmem:[#allocation2 + $0x10a] sm:$0xff] }
 0x17e   : > { %v470_v52 = vmul.f32 0.2, %v406_v8  ;;  %vm438_vm10 = vcmp.ge.f32.partialorder %v406_v8, 0.0  ;;  %v471_v59 = vmul.f32 0.2, %v407_v42  ;;  %vm439_vm11 = vcmp.ge.f32.partialorder %v407_v42, 0.0 }
 0x17f   : > { %v4442_v3 = vpop.permute.xlu0 %1188  ;;  %v4444_v20 = vpop.permute.xlu1 %1186 }
 0x180   : > { %v502_v46 = vsel %vm438_vm10, %v406_v8, %v470_v52  ;;  %v503_v58 = vsel %vm439_vm11, %v407_v42, %v471_v59  ;;  %v1948_v52 = vsel %vm1938_vm2, %v1915_v27, %v4183_v55 }
 0x181   : > { %1588 = vrot.lane.b32.xlu0 %v4449_v21, %s3542_s17  ;;  %1460 = vrot.lane.b32.xlu1 %v770_v22, %s3541_s9  ;;  %591 = vst.msk [vmem:[#allocation2 + $0x181] sm:$0xff] %vm504_vm0, %v502_v46  ;;  %592 = vst.msk [vmem:[#allocation2 + $0x189] sm:$0xff] %vm504_vm0, %v503_v58  ;;  %v1981_v54 = vsel %vm1971_vm3, %v1948_v52, %v4442_v3 }
 0x183   : > { %v1697_v29 = vpop.permute.xlu0 %1696  ;;  %v1695_v44 = vpop.permute.xlu1 %1694 }
 0x184   : > { %v2111_v48 = vsel %vm2103_vm7, %v2078_v47, %v1697_v29  ;;  %v2110_v25 = vsel %vm2103_vm7, %v2077_v41, %v1695_v44  ;;  %v1947_v44 = vsel %vm1938_vm2, %v1914_v19, %v4165_v34  ;;  %v4542_v47 = vld [vmem:[#allocation2 + $0x120] sm:$0xff] }
 0x185   : > { %1208 = vrot.lane.b32.xlu0 %v4449_v21, %s3539_s29  ;;  %1206 = vrot.lane.b32.xlu1 %v4436_v18, %s3539_s29  ;;  %v1980_v0 = vsel %vm1971_vm3, %v1947_v44, %v4444_v20 }
 0x187   : > { %v1317_v17 = vpop.permute.xlu0 %1316  ;;  %v1315_v49 = vpop.permute.xlu1 %1314 }
 0x188   : > { %v2014_v51 = vsel %vm2004_vm4, %v1981_v54, %v1317_v17  ;;  %v2013_v62 = vsel %vm2004_vm4, %v1980_v0, %v1315_v49  ;;  %v871_v54 = vld [vmem:[#allocation2 + $0x12a] sm:$0xff]  ;;  %v870_v0 = vld [vmem:[#allocation2 + $0x122] sm:$0xff] }
 0x189   : > { %1716 = vrot.lane.b32.xlu0 %v835_v13, %s3543_s8  ;;  %1714 = vrot.lane.b32.xlu1 %v834_v60, %s3543_s8 }
 0x18b   : > { %v1825_v40 = vpop.permute.xlu0 %1824  ;;  %v1823_v30 = vpop.permute.xlu1 %1822 }
 0x18c   : > { %v2144_v12 = vsel %vm2136_vm8, %v2111_v48, %v1825_v40  ;;  %v2143_v63 = vsel %vm2136_vm8, %v2110_v25, %v1823_v30  ;;  %v4547_v25 = vld [vmem:[#allocation2 + $0x128] sm:$0xff]  ;;  %v1916_v40 = vsel %vm504_vm0, %v4201_v1, %v4012_v56  ;;  %v1917_v30 = vsel %vm504_vm0, %v4211_v31, %v4043_v6 }
 0x18d   : > { %1336 = vrot.lane.b32.xlu0 %v835_v13, %s3540_s20  ;;  %1334 = vrot.lane.b32.xlu1 %v834_v60, %s3540_s20  ;;  %v839_v1 = vld [vmem:[#allocation2 + $0x129] sm:$0xff]  ;;  %v838_v31 = vld [vmem:[#allocation2 + $0x121] sm:$0xff] }
 0x18e   : > { %3203 = vmatprep.mubr.msk.f32.mxu0 %vm2185_vm9, %v2143_v63 }
 0x18f   : > { %3204 = vmatmul.mubr.msk.f32.gmra.mxu0 %vm2185_vm9, %v2144_v12  ;;  %v1571_v16 = vpop.permute.xlu0 %1570  ;;  %v1443_v22 = vpop.permute.xlu1 %1442 }
 0x190   : > { %v2046_v55 = vsel %vm2037_vm5, %v2013_v62, %v1443_v22 }
 0x191   : > { %1844 = vrot.lane.b32.xlu0 %v867_v50, %s3544_s18  ;;  %1842 = vrot.lane.b32.xlu1 %v866_v38, %s3544_s18  ;;  %v2079_v57 = vsel %vm2070_vm6, %v2046_v55, %v1571_v16 }
 0x193   : > { %v1573_v5 = vpop.permute.xlu0 %1572  ;;  %v1445_v33 = vpop.permute.xlu1 %1444 }
 0x194   : > { %v2047_v34 = vsel %vm2037_vm5, %v2014_v51, %v1445_v33 }
 0x195   : > { %1590 = vrot.lane.b32.xlu0 %v4496_v10, %s3542_s17  ;;  %1462 = vrot.lane.b32.xlu1 %v866_v38, %s3541_s9  ;;  %v2080_v20 = vsel %vm2070_vm6, %v2047_v34, %v1573_v5  ;;  %v1950_v38 = vsel %vm1938_vm2, %v1917_v30, %v4191_v53  ;;  %v809_v34 = vld [vmem:[#allocation2 + $0x140] sm:$0xff] }
 0x197   : > { %v1193_v23 = vpop.permute.xlu0 %1192  ;;  %v1191_v8 = vpop.permute.xlu1 %1190 }
 0x198   : > { %v1983_v16 = vsel %vm1971_vm3, %v1950_v38, %v1193_v23 }
 0x199   : > { %1592 = vrot.lane.b32.xlu0 %v4501_v36, %s3542_s17  ;;  %1464 = vrot.lane.b32.xlu1 %v867_v50, %s3541_s9  ;;  %v1949_v50 = vsel %vm1938_vm2, %v1916_v40, %v4173_v11 }
 0x19a   : > { %v1982_v22 = vsel %vm1971_vm3, %v1949_v50, %v1191_v8 }
 0x19b   : > { %v1701_v45 = vpop.permute.xlu0 %1700  ;;  %v1699_v29 = vpop.permute.xlu1 %1698 }
 0x19c   : > { %v2113_v46 = vsel %vm2103_vm7, %v2080_v20, %v1701_v45  ;;  %v2112_v42 = vsel %vm2103_vm7, %v2079_v57, %v1699_v29  ;;  %v1918_v20 = vsel %vm504_vm0, %v4251_v37, %v4028_v61  ;;  %v1919_v57 = vsel %vm504_vm0, %v4261_v14, %v4057_v26  ;;  %v841_v14 = vld [vmem:[#allocation2 + $0x141] sm:$0xff]  ;;  %v840_v37 = vld [vmem:[#allocation2 + $0x139] sm:$0xff] }
 0x19d   : > { %1212 = vrot.lane.b32.xlu0 %v4501_v36, %s3539_s29  ;;  %1210 = vrot.lane.b32.xlu1 %v4496_v10, %s3539_s29 }
 0x19f   : > { %v1321_v3 = vpop.permute.xlu0 %1320  ;;  %v1319_v4 = vpop.permute.xlu1 %1318 }
 0x1a0   : > { %v2016_v56 = vsel %vm2004_vm4, %v1983_v16, %v1321_v3  ;;  %v2015_v6 = vsel %vm2004_vm4, %v1982_v22, %v1319_v4  ;;  %v873_v16 = vld [vmem:[#allocation2 + $0x142] sm:$0xff]  ;;  %v872_v22 = vld [vmem:[#allocation2 + $0x13a] sm:$0xff] }
 0x1a1   : > { %1720 = vrot.lane.b32.xlu0 %v837_v7, %s3543_s8  ;;  %1718 = vrot.lane.b32.xlu1 %v836_v28, %s3543_s8 }
 0x1a3   : > { %v1829_v43 = vpop.permute.xlu0 %1828  ;;  %v1827_v9 = vpop.permute.xlu1 %1826 }
 0x1a4   : > { %v2146_v13 = vsel %vm2136_vm8, %v2113_v46, %v1829_v43  ;;  %v2145_v60 = vsel %vm2136_vm8, %v2112_v42, %v1827_v9  ;;  %v5371_v43 = vld [vmem:[#allocation27_spill] sm:$0xff] }
 0x1a5   : > { %1340 = vrot.lane.b32.xlu0 %v837_v7, %s3540_s20  ;;  %1338 = vrot.lane.b32.xlu1 %v836_v28, %s3540_s20  ;;  %v808_v7 = vld [vmem:[#allocation2 + $0x138] sm:$0xff]  ;;  %v1951_v9 = vsel %vm1938_vm2, %v1918_v20, %v5371_v43 }
 0x1a6   : > { %3206 = vmatprep.mubr.msk.f32.mxu0 %vm2185_vm9, %v2145_v60  ;;  %v843_v20 = vld [vmem:[#allocation2 + $0x159] sm:$0xff] }
 0x1a7   : > { %3207 = vmatmul.mubr.msk.f32.gmra.mxu0 %vm2185_vm9, %v2146_v13  ;;  %v1575_v17 = vpop.permute.xlu0 %1574  ;;  %v1447_v49 = vpop.permute.xlu1 %1446  ;;  %v5372_v13 = vld [vmem:[#allocation30_spill] sm:$0xff] }
 0x1a8   : > { %v2048_v11 = vsel %vm2037_vm5, %v2015_v6, %v1447_v49  ;;  %v1952_v60 = vsel %vm1938_vm2, %v1919_v57, %v5372_v13  ;;  %v842_v57 = vld [vmem:[#allocation2 + $0x151] sm:$0xff] }
 0x1a9   : > { %1848 = vrot.lane.b32.xlu0 %v869_v39, %s3544_s18  ;;  %1846 = vrot.lane.b32.xlu1 %v868_v35, %s3544_s18  ;;  %v2081_v8 = vsel %vm2070_vm6, %v2048_v11, %v1575_v17 }
 0x1ab   : > { %v1577_v59 = vpop.permute.xlu0 %1576  ;;  %v1449_v58 = vpop.permute.xlu1 %1448 }
 0x1ac   : > { %v2049_v53 = vsel %vm2037_vm5, %v2016_v56, %v1449_v58 }
 0x1ad   : > { %1594 = vrot.lane.b32.xlu0 %v4542_v47, %s3542_s17  ;;  %1466 = vrot.lane.b32.xlu1 %v868_v35, %s3541_s9  ;;  %v2082_v23 = vsel %vm2070_vm6, %v2049_v53, %v1577_v59  ;;  %v811_v53 = vld [vmem:[#allocation2 + $0x158] sm:$0xff] }
 0x1af   : > { %v1197_v41 = vpop.permute.xlu0 %1196  ;;  %v1195_v48 = vpop.permute.xlu1 %1194 }
 0x1b0   : > { %v1984_v35 = vsel %vm1971_vm3, %v1951_v9, %v1195_v48 }
 0x1b1   : > { %1596 = vrot.lane.b32.xlu0 %v4547_v25, %s3542_s17  ;;  %1468 = vrot.lane.b32.xlu1 %v869_v39, %s3541_s9  ;;  %v1985_v39 = vsel %vm1971_vm3, %v1952_v60, %v1197_v41 }
 0x1b3   : > { %v1705_v12 = vpop.permute.xlu0 %1704  ;;  %v1703_v63 = vpop.permute.xlu1 %1702 }
 0x1b4   : > { %v2115_v19 = vsel %vm2103_vm7, %v2082_v23, %v1705_v12  ;;  %v2114_v27 = vsel %vm2103_vm7, %v2081_v8, %v1703_v63  ;;  %v5373_v23 = vld [vmem:[#allocation9_spill] sm:$0xff]  ;;  %v5374_v8 = vld [vmem:[#allocation47_spill] sm:$0xff] }
 0x1b5   : > { %1216 = vrot.lane.b32.xlu0 %v4547_v25, %s3539_s29  ;;  %1214 = vrot.lane.b32.xlu1 %v4542_v47, %s3539_s29 }
 0x1b7   : > { %v1325_v5 = vpop.permute.xlu0 %1324  ;;  %v1323_v33 = vpop.permute.xlu1 %1322 }
 0x1b8   : > { %v2018_v61 = vsel %vm2004_vm4, %v1985_v39, %v1325_v5  ;;  %v2017_v26 = vsel %vm2004_vm4, %v1984_v35, %v1323_v33 }
 0x1b9   : > { %1724 = vrot.lane.b32.xlu0 %v839_v1, %s3543_s8  ;;  %1722 = vrot.lane.b32.xlu1 %v838_v31, %s3543_s8 }
 0x1bb   : > { %v1833_v45 = vpop.permute.xlu0 %1832  ;;  %v1831_v29 = vpop.permute.xlu1 %1830 }
 0x1bc   : > { %v2148_v44 = vsel %vm2136_vm8, %v2115_v19, %v1833_v45  ;;  %v2147_v52 = vsel %vm2136_vm8, %v2114_v27, %v1831_v29  ;;  %v1920_v19 = vsel %vm504_vm0, %v5374_v8, %v5373_v23  ;;  %v5375_v27 = vld [vmem:[#allocation12_spill] sm:$0xff] }
 0x1bd   : > { %1344 = vrot.lane.b32.xlu0 %v839_v1, %s3540_s20  ;;  %1342 = vrot.lane.b32.xlu1 %v838_v31, %s3540_s20  ;;  %v810_v1 = vld [vmem:[#allocation2 + $0x150] sm:$0xff] }
 0x1be   : > { %3209 = vmatprep.mubr.msk.f32.mxu0 %vm2185_vm9, %v2147_v52  ;;  %v5376_v45 = vld [vmem:[#allocation48_spill] sm:$0xff] }
 0x1bf   : > { %3210 = vmatmul.mubr.msk.f32.gmra.mxu0 %vm2185_vm9, %v2148_v44  ;;  %v1579_v51 = vpop.permute.xlu0 %1578  ;;  %v1451_v62 = vpop.permute.xlu1 %1450  ;;  %v1921_v29 = vsel %vm504_vm0, %v5376_v45, %v5375_v27  ;;  %v845_v23 = vld [vmem:[#allocation2 + $0x171] sm:$0xff]  ;;  %v844_v8 = vld [vmem:[#allocation2 + $0x169] sm:$0xff] }
 0x1c0   : > { %v2050_v17 = vsel %vm2037_vm5, %v2017_v26, %v1451_v62 }
 0x1c1   : > { %1852 = vrot.lane.b32.xlu0 %v871_v54, %s3544_s18  ;;  %1850 = vrot.lane.b32.xlu1 %v870_v0, %s3544_s18  ;;  %v2083_v48 = vsel %vm2070_vm6, %v2050_v17, %v1579_v51  ;;  %v5378_v51 = vld [vmem:[#allocation32_spill] sm:$0xff] }
 0x1c2   : > { %v1954_v62 = vsel %vm1938_vm2, %v1921_v29, %v5378_v51 }
 0x1c3   : > { %v1581_v28 = vpop.permute.xlu0 %1580  ;;  %v1453_v55 = vpop.permute.xlu1 %1452 }
 0x1c4   : > { %v2051_v49 = vsel %vm2037_vm5, %v2018_v61, %v1453_v55 }
 0x1c5   : > { %1598 = vrot.lane.b32.xlu0 %v808_v7, %s3542_s17  ;;  %1470 = vrot.lane.b32.xlu1 %v870_v0, %s3541_s9  ;;  %v2084_v41 = vsel %vm2070_vm6, %v2051_v49, %v1581_v28 }
 0x1c7   : > { %v1201_v3 = vpop.permute.xlu0 %1200  ;;  %v1199_v4 = vpop.permute.xlu1 %1198 }
 0x1c9   : > { %1600 = vrot.lane.b32.xlu0 %v809_v34, %s3542_s17  ;;  %1472 = vrot.lane.b32.xlu1 %v871_v54, %s3541_s9  ;;  %v5377_v54 = vld [vmem:[#allocation28_spill] sm:$0xff] }
 0x1ca   : > { %v1953_v0 = vsel %vm1938_vm2, %v1920_v19, %v5377_v54 }
 0x1cb   : > { %v1709_v46 = vpop.permute.xlu0 %1708  ;;  %v1707_v42 = vpop.permute.xlu1 %1706  ;;  %v1986_v28 = vsel %vm1971_vm3, %v1953_v0, %v1199_v4 }
 0x1cc   : > { %v2117_v40 = vsel %vm2103_vm7, %v2084_v41, %v1709_v46  ;;  %v2116_v30 = vsel %vm2103_vm7, %v2083_v48, %v1707_v42  ;;  %v813_v48 = vld [vmem:[#allocation2 + $0x170] sm:$0xff] }
 0x1cd   : > { %1220 = vrot.lane.b32.xlu0 %v809_v34, %s3539_s29  ;;  %1218 = vrot.lane.b32.xlu1 %v808_v7, %s3539_s29  ;;  %v1987_v7 = vsel %vm1971_vm3, %v1954_v62, %v1201_v3 }
 0x1cf   : > { %v1329_v59 = vpop.permute.xlu0 %1328  ;;  %v1327_v58 = vpop.permute.xlu1 %1326 }
 0x1d0   : > { %v2020_v55 = vsel %vm2004_vm4, %v1987_v7, %v1329_v59  ;;  %v2019_v34 = vsel %vm2004_vm4, %v1986_v28, %v1327_v58  ;;  %v812_v59 = vld [vmem:[#allocation2 + $0x168] sm:$0xff]  ;;  %v4697_v7 = vld [vmem:[%s5322_s4] ss:$0 sm:$0xff]  ;;  %v877_v28 = vld [vmem:[#allocation2 + $0x172] sm:$0xff] }
 0x1d1   : > { %1728 = vrot.lane.b32.xlu0 %v841_v14, %s3543_s8  ;;  %1726 = vrot.lane.b32.xlu1 %v840_v37, %s3543_s8 }
 0x1d3   : > { %v1837_v12 = vpop.permute.xlu0 %1836  ;;  %v1835_v63 = vpop.permute.xlu1 %1834 }
 0x1d4   : > { %v2150_v50 = vsel %vm2136_vm8, %v2117_v40, %v1837_v12  ;;  %v2149_v38 = vsel %vm2136_vm8, %v2116_v30, %v1835_v63  ;;  %v5379_v12 = vld [vmem:[#allocation10_spill] sm:$0xff] }
 0x1d5   : > { %1348 = vrot.lane.b32.xlu0 %v841_v14, %s3540_s20  ;;  %1346 = vrot.lane.b32.xlu1 %v840_v37, %s3540_s20  ;;  %v875_v14 = vld [vmem:[#allocation2 + $0x15a] sm:$0xff]  ;;  %v874_v37 = vld [vmem:[#allocation2 + $0x152] sm:$0xff]  ;;  %v1922_v63 = vsel %vm504_vm0, %v4335_v15, %v5379_v12 }
 0x1d6   : > { %3212 = vmatprep.mubr.msk.f32.mxu0 %vm2185_vm9, %v2149_v38 }
 0x1d7   : > { %3213 = vmatmul.mubr.msk.f32.gmra.mxu0 %vm2185_vm9, %v2150_v50  ;;  %v1583_v56 = vpop.permute.xlu0 %1582  ;;  %v1455_v6 = vpop.permute.xlu1 %1454  ;;  %v5380_v50 = vld [vmem:[#allocation14_spill] sm:$0xff] }
 0x1d8   : > { %v2052_v46 = vsel %vm2037_vm5, %v2019_v34, %v1455_v6  ;;  %v1923_v38 = vsel %vm504_vm0, %v4341_v24, %v5380_v50 }
 0x1d9   : > { %1856 = vrot.lane.b32.xlu0 %v873_v16, %s3544_s18  ;;  %1854 = vrot.lane.b32.xlu1 %v872_v22, %s3544_s18  ;;  %v2085_v4 = vsel %vm2070_vm6, %v2052_v46, %v1583_v56  ;;  %v5381_v56 = vld [vmem:[#allocation29_spill] sm:$0xff] }
 0x1da   : > { %v1955_v6 = vsel %vm1938_vm2, %v1922_v63, %v5381_v56  ;;  %v5386_v63 = vld [vmem:[#allocation31_spill] sm:$0xff] }
 0x1db   : > { %v1585_v31 = vpop.permute.xlu0 %1584  ;;  %v1457_v11 = vpop.permute.xlu1 %1456 }
 0x1dc   : > { %v2053_v42 = vsel %vm2037_vm5, %v2020_v55, %v1457_v11  ;;  %v876_v55 = vld [vmem:[#allocation2 + $0x16a] sm:$0xff] }
 0x1dd   : > { %1602 = vrot.lane.b32.xlu0 %v810_v1, %s3542_s17  ;;  %1474 = vrot.lane.b32.xlu1 %v872_v22, %s3541_s9  ;;  %v2086_v3 = vsel %vm2070_vm6, %v2053_v42, %v1585_v31 }
 0x1df   : > { %v1205_v5 = vpop.permute.xlu0 %1204  ;;  %v1203_v33 = vpop.permute.xlu1 %1202 }
 0x1e1   : > { %1604 = vrot.lane.b32.xlu0 %v811_v53, %s3542_s17  ;;  %1476 = vrot.lane.b32.xlu1 %v873_v16, %s3541_s9 }
 0x1e3   : > { %v1713_v44 = vpop.permute.xlu0 %1712  ;;  %v1711_v52 = vpop.permute.xlu1 %1710 }
 0x1e4   : > { %v2119_v13 = vsel %vm2103_vm7, %v2086_v3, %v1713_v44  ;;  %v2118_v60 = vsel %vm2103_vm7, %v2085_v4, %v1711_v52  ;;  %v814_v3 = vld [vmem:[#allocation2 + $0x180] sm:$0xff] }
 0x1e5   : > { %1224 = vrot.lane.b32.xlu0 %v811_v53, %s3539_s29  ;;  %1222 = vrot.lane.b32.xlu1 %v810_v1, %s3539_s29  ;;  %v5382_v1 = vld [vmem:[#allocation34_spill] sm:$0xff]  ;;  %v1988_v53 = vsel %vm1971_vm3, %v1955_v6, %v1203_v33 }
 0x1e6   : > { %v1956_v31 = vsel %vm1938_vm2, %v1923_v38, %v5382_v1 }
 0x1e7   : > { %v1333_v43 = vpop.permute.xlu0 %1332  ;;  %v1331_v9 = vpop.permute.xlu1 %1330  ;;  %v1989_v11 = vsel %vm1971_vm3, %v1956_v31, %v1205_v5 }
 0x1e8   : > { %v2022_v15 = vsel %vm2004_vm4, %v1989_v11, %v1333_v43  ;;  %v2021_v24 = vsel %vm2004_vm4, %v1988_v53, %v1331_v9 }
 0x1e9   : > { %1732 = vrot.lane.b32.xlu0 %v843_v20, %s3543_s8  ;;  %1730 = vrot.lane.b32.xlu1 %v842_v57, %s3543_s8 }
 0x1eb   : > { %v1841_v39 = vpop.permute.xlu0 %1840  ;;  %v1839_v35 = vpop.permute.xlu1 %1838 }
 0x1ec   : > { %v2152_v61 = vsel %vm2136_vm8, %v2119_v13, %v1841_v39  ;;  %v2151_v26 = vsel %vm2136_vm8, %v2118_v60, %v1839_v35 }
 0x1ed   : > { %1352 = vrot.lane.b32.xlu0 %v843_v20, %s3540_s20  ;;  %1350 = vrot.lane.b32.xlu1 %v842_v57, %s3540_s20 }
 0x1ee   : > { %3215 = vmatprep.mubr.msk.f32.mxu0 %vm2185_vm9, %v2151_v26 }
 0x1ef   : > { %3216 = vmatmul.mubr.msk.f32.gmra.mxu0 %vm2185_vm9, %v2152_v61  ;;  %v1587_v17 = vpop.permute.xlu0 %1586  ;;  %v1459_v49 = vpop.permute.xlu1 %1458  ;;  %v815_v61 = vld [vmem:[#allocation2 + $0x188] sm:$0xff] }
 0x1f0   : > { %v2054_v19 = vsel %vm2037_vm5, %v2021_v24, %v1459_v49 }
 0x1f1   : > { %1860 = vrot.lane.b32.xlu0 %v875_v14, %s3544_s18  ;;  %1858 = vrot.lane.b32.xlu1 %v874_v37, %s3544_s18  ;;  %v2087_v33 = vsel %vm2070_vm6, %v2054_v19, %v1587_v17 }
 0x1f3   : > { %v1589_v58 = vpop.permute.xlu0 %1588  ;;  %v1461_v41 = vpop.permute.xlu1 %1460 }
 0x1f4   : > { %v2055_v27 = vsel %vm2037_vm5, %v2022_v15, %v1461_v41  ;;  %v5385_v41 = vld [vmem:[#allocation36_spill] sm:$0xff] }
 0x1f5   : > { %1606 = vrot.lane.b32.xlu0 %v812_v59, %s3542_s17  ;;  %1478 = vrot.lane.b32.xlu1 %v874_v37, %s3541_s9  ;;  %v2088_v5 = vsel %vm2070_vm6, %v2055_v27, %v1589_v58  ;;  %v5383_v37 = vld [vmem:[#allocation16_spill] sm:$0xff] }
 0x1f6   : > { %v1925_v17 = vsel %vm504_vm0, %v4395_v2, %v5383_v37  ;;  %v817_v37 = vld [vmem:[#allocation2 + $0x1a0] sm:$0xff] }
 0x1f7   : > { %v4660_v40 = vpop.permute.xlu0 %1208  ;;  %v4662_v30 = vpop.permute.xlu1 %1206 }
 0x1f9   : > { %1608 = vrot.lane.b32.xlu0 %v813_v48, %s3542_s17  ;;  %1480 = vrot.lane.b32.xlu1 %v875_v14, %s3541_s9 }
 0x1fb   : > { %v1717_v16 = vpop.permute.xlu0 %1716  ;;  %v1715_v22 = vpop.permute.xlu1 %1714 }
 0x1fc   : > { %v2121_v44 = vsel %vm2103_vm7, %v2088_v5, %v1717_v16  ;;  %v2120_v52 = vsel %vm2103_vm7, %v2087_v33, %v1715_v22  ;;  %v846_v22 = vld [vmem:[#allocation2 + $0x181] sm:$0xff]  ;;  %v879_v33 = vld [vmem:[#allocation2 + $0x18a] sm:$0xff] }
 0x1fd   : > { %1228 = vrot.lane.b32.xlu0 %v813_v48, %s3539_s29  ;;  %1226 = vrot.lane.b32.xlu1 %v812_v59, %s3539_s29  ;;  %v5384_v59 = vld [vmem:[#allocation11_spill] sm:$0xff]  ;;  %v1958_v48 = vsel %vm1938_vm2, %v1925_v17, %v5385_v41 }
 0x1fe   : > { %v1924_v58 = vsel %vm504_vm0, %v4385_v32, %v5384_v59  ;;  %v1991_v38 = vsel %vm1971_vm3, %v1958_v48, %v4660_v40  ;;  %v847_v32 = vld [vmem:[#allocation2 + $0x189] sm:$0xff] }
 0x1ff   : > { %v1337_v45 = vpop.permute.xlu0 %1336  ;;  %v1335_v29 = vpop.permute.xlu1 %1334  ;;  %v1957_v50 = vsel %vm1938_vm2, %v1924_v58, %v5386_v63  ;;  %v5388_v58 = vld [vmem:[#allocation18_spill] sm:$0xff] }
 0x200   : > { %v1990_v2 = vsel %vm1971_vm3, %v1957_v50, %v4662_v30  ;;  %v2024_v16 = vsel %vm2004_vm4, %v1991_v38, %v1337_v45  ;;  %v1927_v41 = vsel %vm504_vm0, %v4449_v21, %v5388_v58  ;;  %v5390_v50 = vld [vmem:[#allocation38_spill] sm:$0xff] }
 0x201   : > { %1736 = vrot.lane.b32.xlu0 %v845_v23, %s3543_s8  ;;  %1734 = vrot.lane.b32.xlu1 %v844_v8, %s3543_s8  ;;  %v2023_v56 = vsel %vm2004_vm4, %v1990_v2, %v1335_v29  ;;  %v1960_v38 = vsel %vm1938_vm2, %v1927_v41, %v5390_v50 }
 0x203   : > { %v1845_v54 = vpop.permute.xlu0 %1844  ;;  %v1843_v0 = vpop.permute.xlu1 %1842 }
 0x204   : > { %v2154_v51 = vsel %vm2136_vm8, %v2121_v44, %v1845_v54  ;;  %v2153_v62 = vsel %vm2136_vm8, %v2120_v52, %v1843_v0  ;;  %v878_v44 = vld [vmem:[#allocation2 + $0x182] sm:$0xff] }
 0x205   : > { %1356 = vrot.lane.b32.xlu0 %v845_v23, %s3540_s20  ;;  %1354 = vrot.lane.b32.xlu1 %v844_v8, %s3540_s20 }
 0x206   : > { %3218 = vmatprep.mubr.msk.f32.mxu1 %vm2185_vm9, %v2153_v62  ;;  %v2507_v62 = vlaneseq }
 0x207   : > { %v3196_v34 = vpop.f32.mrf.mxu0  ;;  %3219 = vmatmul.mubr.msk.f32.vlgmr.msra.gmra.mxu1 %vm2185_vm9, %v2154_v51  ;;  %v1591_v20 = vpop.permute.xlu0 %1590 }
 0x208   : > { %v4702_v57 = vadd.f32 %v3196_v34, %v4697_v7  ;;  %v1463_v46 = vpop.permute.xlu1 %1462 }
 0x209   : > { %v2348_v42 = vpop.f32.mrf.mxu0  ;;  %1864 = vrot.lane.b32.xlu0 %v877_v28, %s3544_s18  ;;  %1862 = vrot.lane.b32.xlu1 %v876_v55, %s3544_s18  ;;  %v2056_v31 = vsel %vm2037_vm5, %v2023_v56, %v1463_v46 }
 0x20a   : > { %v2510_v43 = vsub.f32 0.0, %v4702_v57  ;;  %v4708_v9 = vadd.f32 %v4697_v7, %v2348_v42  ;;  %v2089_v15 = vsel %vm2070_vm6, %v2056_v31, %v1591_v20  ;;  %v816_v20 = vld [vmem:[#allocation2 + $0x198] sm:$0xff]  ;;  %v849_v31 = vld [vmem:[#allocation2 + $0x1a1] sm:$0xff] }
 0x20b   : > { %v1593_v4 = vpop.permute.xlu0 %1592 }
 0x20c   : > { %v2543_v13 = vmul.f32 1.442695, %v2510_v43  ;;  %v2509_v60 = vsub.f32 0.0, %v4708_v9  ;;  %v1465_v39 = vpop.permute.xlu1 %1464 }
 0x20d   : > { %1610 = vrot.lane.b32.xlu0 %v814_v3, %s3542_s17  ;;  %1482 = vrot.lane.b32.xlu1 %v876_v55, %s3541_s9  ;;  %v2057_v6 = vsel %vm2037_vm5, %v2024_v16, %v1465_v39 }
 0x20e   : > { %3313 = vpow2.f32 %v2543_v13  ;;  %v2541_v35 = vmul.f32 1.442695, %v2509_v60  ;;  %v2090_v30 = vsel %vm2070_vm6, %v2057_v6, %v1593_v4  ;;  %v4767_v4 = vand.u32 127, %v2507_v62  ;;  %v848_v60 = vld [vmem:[#allocation2 + $0x199] sm:$0xff] }
 0x20f   : > { %v4713_v26 = vpop.permute.xlu0 %1212 }
 0x210   : > { %3315 = vpow2.f32 %v2541_v35  ;;  %v4715_v14 = vpop.permute.xlu1 %1210  ;;  %vm2701_vm12 = vcmp.ge.s32.totalorder %v4767_v4, 2  ;;  %v1993_v21 = vsel %vm1971_vm3, %v1960_v38, %v4713_v26 }
 0x211   : > { %1612 = vrot.lane.b32.xlu0 %v815_v61, %s3542_s17  ;;  %1484 = vrot.lane.b32.xlu1 %v877_v28, %s3541_s9 }
 0x213   : > { %v1721_v49 = vpop.permute.xlu0 %1720 }
 0x214   : > { %v1719_v12 = vpop.permute.xlu1 %1718  ;;  %v2123_v53 = vsel %vm2103_vm7, %v2090_v30, %v1721_v49  ;;  %v5387_v49 = vld [vmem:[#allocation13_spill] sm:$0xff] }
 0x215   : > { %1232 = vrot.lane.b32.xlu0 %v815_v61, %s3539_s29  ;;  %1230 = vrot.lane.b32.xlu1 %v814_v3, %s3539_s29  ;;  %v2122_v8 = vsel %vm2103_vm7, %v2089_v15, %v1719_v12  ;;  %v880_v61 = vld [vmem:[#allocation2 + $0x19a] sm:$0xff]  ;;  %v1926_v59 = vsel %vm504_vm0, %v4436_v18, %v5387_v49 }
 0x216   : > { %v5389_v12 = vld [vmem:[#allocation33_spill] sm:$0xff] }
 0x217   : > { %v4738_v1 = vpop.permute.xlu0 %1340  ;;  %v1959_v63 = vsel %vm1938_vm2, %v1926_v59, %v5389_v12 }
 0x218   : > { %v4741_v40 = vpop.permute.xlu1 %1338 }
 0x219   : > { %1740 = vrot.lane.b32.xlu0 %v847_v32, %s3543_s8  ;;  %1738 = vrot.lane.b32.xlu1 %v846_v22, %s3543_s8 }
 0x21b   : > { %v3314_v11 = vpop.eup %3313  ;;  %v1849_v24 = vpop.permute.xlu0 %1848 }
 0x21c   : > { %v2606_v23 = vadd.f32 1.0, %v3314_v11  ;;  %v2156_v19 = vsel %vm2136_vm8, %v2123_v53, %v1849_v24  ;;  %v1847_v27 = vpop.permute.xlu1 %1846 }
 0x21d   : > { %v3316_v45 = vpop.eup %3315  ;;  %v2155_v29 = vsel %vm2136_vm8, %v2122_v8, %v1847_v27  ;;  %1360 = vrot.lane.b32.xlu0 %v847_v32, %s3540_s20  ;;  %1358 = vrot.lane.b32.xlu1 %v846_v22, %s3540_s20  ;;  %v1992_v22 = vsel %vm1971_vm3, %v1959_v63, %v4715_v14  ;;  %v5392_v63 = vld [vmem:[#allocation20_spill] sm:$0xff] }
 0x21e   : > { %3317 = vrcp.f32 %v2606_v23  ;;  %v2605_v5 = vadd.f32 1.0, %v3316_v45  ;;  %3221 = vmatprep.mubr.msk.f32.mxu1 %vm2185_vm9, %v2155_v29  ;;  %v2025_v6 = vsel %vm2004_vm4, %v1992_v22, %v4741_v40  ;;  %v1929_v50 = vsel %vm504_vm0, %v4501_v36, %v5392_v63  ;;  %v5395_v63 = vld [vmem:[#allocation17_spill] sm:$0xff] }
 0x21f   : > { %v3199_v52 = vpop.f32.mrf.mxu0  ;;  %3222 = vmatmul.mubr.msk.f32.gmra.mxu1 %vm2185_vm9, %v2156_v19  ;;  %v4755_v54 = vpop.permute.xlu0 %1594  ;;  %v881_v19 = vld [vmem:[#allocation2 + $0x1a2] sm:$0xff] }
 0x220   : > { %3319 = vrcp.f32 %v2605_v5  ;;  %v4758_v0 = vadd.f32 %v3199_v52, %v4697_v7  ;;  %v1467_v51 = vpop.permute.xlu1 %1466 }
 0x221   : > { %v2358_v28 = vpop.f32.mrf.mxu0  ;;  %1868 = vrot.lane.b32.xlu0 %v879_v33, %s3544_s18  ;;  %1866 = vrot.lane.b32.xlu1 %v878_v44, %s3544_s18 }
 0x222   : > { %v2512_v55 = vsub.f32 0.0, %v4758_v0  ;;  %v4764_v34 = vadd.f32 %v4697_v7, %v2358_v28 }
 0x223   : > { %v1597_v46 = vpop.permute.xlu0 %1596 }
 0x224   : > { %v2547_v42 = vmul.f32 1.442695, %v2512_v55  ;;  %v2511_v43 = vsub.f32 0.0, %v4764_v34  ;;  %v1469_v3 = vpop.permute.xlu1 %1468 }
 0x225   : > { %1614 = vrot.lane.b32.xlu0 %v816_v20, %s3542_s17  ;;  %1486 = vrot.lane.b32.xlu1 %v878_v44, %s3541_s9 }
 0x226   : > { %3321 = vpow2.f32 %v2547_v42  ;;  %v2545_v13 = vmul.f32 1.442695, %v2511_v43 }
 0x227   : > { %v4771_v39 = vpop.permute.xlu0 %1216 }
 0x228   : > { %3323 = vpow2.f32 %v2545_v13  ;;  %v4773_v35 = vpop.permute.xlu1 %1214 }
 0x229   : > { %1742 = vrot.lane.b32.xlu0 %v848_v60, %s3543_s8  ;;  %1488 = vrot.lane.b32.xlu1 %v879_v33, %s3541_s9  ;;  %s5234_s9 = sand.u32 1, %s3526_s25  }
 0x22a   : > { %s5328_s22 = scalar_lea.vmem [#allocation5], %s5234_s9 }
 0x22b   : > { %v3318_v17 = vpop.eup %3317  ;;  %v1725_v48 = vpop.permute.xlu0 %1724  ;;  %s2978_s23 = sshll.u32 %s5328_s22, 4  ;;  %s5254_s23 = int_to_ptr.vmem [resolvable:$true] %s2978_s23 }
 0x22c   : > { %v2703_v2 = vsel %vm2701_vm12, %v3318_v17, %v4702_v57  ;;  %v1723_v16 = vpop.permute.xlu1 %1722  ;;  %v2026_v57 = vsel %vm2004_vm4, %v1993_v21, %v4738_v1 }
 0x22d   : > { %v3320_v32 = vpop.eup %3319  ;;  %2736 = vst.msk [vmem:[%s4783_s21 + $0x8] sm:$0xff] %vm2734_vm13, %v2703_v2  ;;  %v2839_v18 = vmul.f32 %v2703_v2, %v2703_v2  ;;  %1870 = vrot.lane.b32.xlu0 %v880_v61, %s3544_s18  ;;  %1616 = vrot.lane.b32.xlu1 %v817_v37, %s3542_s17  ;;  %v2768_v26 = vsel %vm2734_vm13, %v2703_v2, 0.0  ;;  %v2059_v11 = vsel %vm2037_vm5, %v2026_v57, %v1469_v3  ;;  %v5393_v2 = vld [vmem:[#allocation35_spill] sm:$0xff]  ;;  %s3129_s17 = sshll.u32 %s3608_s28, 4 }
 0x22e   : > { %v2702_v56 = vsel %vm2701_vm12, %v3320_v32, %v4708_v9  ;;  %v2058_v9 = vsel %vm2037_vm5, %v2025_v6, %v1467_v51  ;;  %v2092_v8 = vsel %vm2070_vm6, %v2059_v11, %v1597_v46  ;;  %v5394_v32 = vld [vmem:[#allocation40_spill] sm:$0xff]  ;;  %s5244_s16 = scalar_lea.hbm %s5324_s6, %s3129_s17  ;;  %s5252_s20 = scalar_lea.hbm %s5325_s7, %s3129_s17 }
 0x22f   : > { %2735 = vst.msk [vmem:[%s4783_s21] sm:$0xff] %vm2734_vm13, %v2702_v56  ;;  %v2767_v14 = vsel %vm2734_vm13, %v2702_v56, 0.0  ;;  %v2838_v30 = vmul.f32 %v2702_v56, %v2702_v56  ;;  %v1345_v53 = vpop.permute.xlu0 %1344  ;;  %v2871_v1 = vsel %vm2734_vm13, %v2839_v18, 0.0  ;;  %v2125_v45 = vsel %vm2103_vm7, %v2092_v8, %v1725_v48  ;;  %v5391_v48 = vld [vmem:[#allocation15_spill] sm:$0xff] }
 0x230   : > { %v2769_v15 = vadd.f32 %v2768_v26, %v2767_v14  ;;  %v1343_v24 = vpop.permute.xlu1 %1342  ;;  %v2091_v29 = vsel %vm2070_vm6, %v2058_v9, %v4755_v54  ;;  %v1928_v12 = vsel %vm504_vm0, %v4496_v10, %v5391_v48  ;;  %v1962_v18 = vsel %vm1938_vm2, %v1929_v50, %v5394_v32  ;;  %v5397_v32 = vld [vmem:[#allocation37_spill] sm:$0xff] }
 0x231   : > { %v2870_v23 = vsel %vm2734_vm13, %v2838_v30, 0.0  ;;  %1744 = vrot.lane.b32.xlu1 %v849_v31, %s3543_s8  ;;  %v2124_v44 = vsel %vm2103_vm7, %v2091_v29, %v1723_v16  ;;  %v1961_v16 = vsel %vm1938_vm2, %v1928_v12, %v5393_v2  ;;  %v1995_v10 = vsel %vm1971_vm3, %v1962_v18, %v4771_v39  ;;  %s281_s8 = scalar_lea.vmem [#allocation3], %s5234_s9 }
 0x232   : > { %v2872_v40 = vadd.f32 %v2871_v1, %v2870_v23  ;;  %v1994_v36 = vsel %vm1971_vm3, %v1961_v16, %v4773_v35  ;;  %v2028_v6 = vsel %vm2004_vm4, %v1995_v10, %v1345_v53  ;;  %v1930_v50 = vsel %vm504_vm0, %v4542_v47, %v5395_v63 }
 0x233   : > { %v3322_v27 = vpop.eup %3321  ;;  %v1853_v5 = vpop.permute.xlu0 %1852  ;;  %v2027_v31 = vsel %vm2004_vm4, %v1994_v36, %v1343_v24  ;;  %v1963_v18 = vsel %vm1938_vm2, %v1930_v50, %v5397_v32 }
 0x234   : > { %v2608_v33 = vadd.f32 1.0, %v3322_v27  ;;  %v2158_v52 = vsel %vm2136_vm8, %v2125_v45, %v1853_v5  ;;  %v1851_v51 = vpop.permute.xlu1 %1850 }
 0x235   : > { %v3324_v62 = vpop.eup %3323  ;;  %v2157_v28 = vsel %vm2136_vm8, %v2124_v44, %v1851_v51  ;;  %1872 = vrot.lane.b32.xlu1 %v881_v19, %s3544_s18  ;;  %s2965_s18 = sshll.u32 %s281_s8, 4  ;;  %s5246_s18 = int_to_ptr.vmem [resolvable:$true] %s2965_s18 }
 0x236   : > { %3325 = vrcp.f32 %v2608_v33  ;;  %v2607_v55 = vadd.f32 1.0, %v3324_v62  ;;  %3224 = vmatprep.mubr.msk.f32.mxu1 %vm2185_vm9, %v2157_v28  ;;  %s3444_s13 = scalar_lea.vmem %s5246_s18, 16  ;;  %p3451_p0 = scmp.lt.s32.totalorder %s5246_s18, %s3449_s15 }
 0x237   : > { %v3202_v20 = vpop.f32.mrf.mxu0  ;;  %3225 = vmatmul.mubr.msk.f32.gmra.mxu1 %vm2185_vm9, %v2158_v52  ;;  %v1599_v54 = vpop.permute.xlu0 %1598  ;;  %p3445_p11 = scmp.ne.s32.totalorder %s5246_s18, %s3444_s13  ;;  %p3452_p1 = scmp.lt.s32.totalorder %s3450_s19, %s3444_s13 }
 0x238   : > { %3327 = vrcp.f32 %v2607_v55  ;;  %v4833_v46 = vadd.f32 %v3202_v20, %v4697_v7  ;;  %v1471_v42 = vpop.permute.xlu1 %1470 }
 0x239   : > { %v2368_v43 = vpop.f32.mrf.mxu0  ;;  %v2060_v35 = vsel %vm2037_vm5, %v2027_v31, %v1471_v42  ;;  %p3446_p12 = pnand %p3445_p11, %p3625_p5  ;;  %p3453_p2 = por %p3452_p1, %p3451_p0 }
 0x23a   : > { %v2514_v3 = vsub.f32 0.0, %v4833_v46  ;;  %v4837_v13 = vadd.f32 %v4697_v7, %v2368_v43  ;;  %v2093_v45 = vsel %vm2070_vm6, %v2060_v35, %v1599_v54 }
 0x23b   : > { %v1601_v60 = vpop.permute.xlu0 %1600  ;;  %p3447_p13 = pneg %p3446_p12 }
 0x23c   : > { %v2551_v61 = vmul.f32 1.442695, %v2514_v3  ;;  %v2513_v37 = vsub.f32 0.0, %v4837_v13  ;;  %v1473_v17 = vpop.permute.xlu1 %1472 }
 0x23d   : > { %v2061_v30 = vsel %vm2037_vm5, %v2028_v6, %v1473_v17  ;;  %p3454_p3 = pnand %p3453_p2, %p3447_p13 }
 0x23e   : > { %3329 = vpow2.f32 %v2551_v61  ;;  %v2549_v49 = vmul.f32 1.442695, %v2513_v37  ;;  %v2094_v24 = vsel %vm2070_vm6, %v2061_v30, %v1601_v60 }
 0x23f   : > { %v4840_v59 = vpop.permute.xlu0 %1220 }
 0x240   : > { %3331 = vpow2.f32 %v2549_v49  ;;  %v4842_v58 = vpop.permute.xlu1 %1218 }
 0x243   : > { %v3326_v41 = vpop.eup %3325  ;;  %v1729_v38 = vpop.permute.xlu0 %1728 }
 0x244   : > { %v2705_v21 = vsel %vm2701_vm12, %v3326_v41, %v4758_v0  ;;  %v1727_v22 = vpop.permute.xlu1 %1726  ;;  %v2127_v27 = vsel %vm2103_vm7, %v2094_v24, %v1729_v38  ;;  %v5396_v38 = vld [vmem:[#allocation22_spill] sm:$0xff] }
 0x245   : > { %v3328_v56 = vpop.eup %3327  ;;  %2738 = vst.msk [vmem:[%s4783_s21 + $0x18] sm:$0xff] %vm2734_vm13, %v2705_v21  ;;  %v2841_v26 = vmul.f32 %v2705_v21, %v2705_v21  ;;  %v2772_v1 = vsel %vm2734_vm13, %v2705_v21, 0.0  ;;  %v2126_v33 = vsel %vm2103_vm7, %v2093_v45, %v1727_v22  ;;  %v1931_v2 = vsel %vm504_vm0, %v4547_v25, %v5396_v38  ;;  %v5398_v21 = vld [vmem:[#allocation42_spill] sm:$0xff]  ;;  %v5399_v38 = vld [vmem:[#allocation19_spill] sm:$0xff] }
 0x246   : > { %v2704_v57 = vsel %vm2701_vm12, %v3328_v56, %v4764_v34  ;;  %v1964_v22 = vsel %vm1938_vm2, %v1931_v2, %v5398_v21  ;;  %v1996_v25 = vsel %vm1971_vm3, %v1963_v18, %v4842_v58  ;;  %v5401_v21 = vld [vmem:[#allocation39_spill] sm:$0xff] }
 0x247   : > { %2737 = vst.msk [vmem:[%s4783_s21 + $0x10] sm:$0xff] %vm2734_vm13, %v2704_v57  ;;  %v2770_v0 = vsel %vm2734_vm13, %v2704_v57, 0.0  ;;  %v2840_v14 = vmul.f32 %v2704_v57, %v2704_v57  ;;  %v1349_v39 = vpop.permute.xlu0 %1348  ;;  %v2875_v19 = vsel %vm2734_vm13, %v2841_v26, 0.0  ;;  %v1997_v47 = vsel %vm1971_vm3, %v1964_v22, %v4840_v59 }
 0x248   : > { %v2771_v11 = vadd.f32 %v2770_v0, %v2769_v15  ;;  %v1347_v9 = vpop.permute.xlu1 %1346  ;;  %v2030_v6 = vsel %vm2004_vm4, %v1997_v47, %v1349_v39 }
 0x249   : > { %v2873_v34 = vsel %vm2734_vm13, %v2840_v14, 0.0  ;;  %v2029_v31 = vsel %vm2004_vm4, %v1996_v25, %v1347_v9 }
 0x24a   : > { %v2874_v53 = vadd.f32 %v2873_v34, %v2872_v40  ;;  %v2773_v23 = vadd.f32 %v2772_v1, %v2771_v11 }
 0x24b   : > { %v3330_v8 = vpop.eup %3329  ;;  %v1857_v29 = vpop.permute.xlu0 %1856 }
 0x24c   : > { %v2610_v15 = vadd.f32 1.0, %v3330_v8  ;;  %v2876_v5 = vadd.f32 %v2875_v19, %v2874_v53  ;;  %v2160_v44 = vsel %vm2136_vm8, %v2127_v27, %v1857_v29  ;;  %v1855_v52 = vpop.permute.xlu1 %1854 }
 0x24d   : > { %v3332_v51 = vpop.eup %3331  ;;  %v2159_v40 = vsel %vm2136_vm8, %v2126_v33, %v1855_v52 }
 0x24e   : > { %3333 = vrcp.f32 %v2610_v15  ;;  %v2609_v62 = vadd.f32 1.0, %v3332_v51  ;;  %3227 = vmatprep.mubr.msk.f32.mxu1 %vm2185_vm9, %v2159_v40 }
 0x24f   : > { %v3205_v28 = vpop.f32.mrf.mxu0  ;;  %3228 = vmatmul.mubr.msk.f32.gmra.mxu1 %vm2185_vm9, %v2160_v44  ;;  %v1603_v55 = vpop.permute.xlu0 %1602 }
 0x250   : > { %3335 = vrcp.f32 %v2609_v62  ;;  %v4885_v20 = vadd.f32 %v3205_v28, %v4697_v7  ;;  %v1475_v54 = vpop.permute.xlu1 %1474 }
 0x251   : > { %v2378_v42 = vpop.f32.mrf.mxu0  ;;  %v2062_v58 = vsel %vm2037_vm5, %v2029_v31, %v1475_v54 }
 0x252   : > { %v2516_v43 = vsub.f32 0.0, %v4885_v20  ;;  %v4889_v3 = vadd.f32 %v4697_v7, %v2378_v42  ;;  %v2095_v8 = vsel %vm2070_vm6, %v2062_v58, %v1603_v55 }
 0x253   : > { %v1605_v60 = vpop.permute.xlu0 %1604 }
 0x254   : > { %v2555_v61 = vmul.f32 1.442695, %v2516_v43  ;;  %v2515_v37 = vsub.f32 0.0, %v4889_v3  ;;  %v1477_v17 = vpop.permute.xlu1 %1476 }
 0x255   : > { %v2063_v14 = vsel %vm2037_vm5, %v2030_v6, %v1477_v17 }
 0x256   : > { %3337 = vpow2.f32 %v2555_v61  ;;  %v2553_v49 = vmul.f32 1.442695, %v2515_v37  ;;  %v2096_v9 = vsel %vm2070_vm6, %v2063_v14, %v1605_v60 }
 0x257   : > { %v4892_v41 = vpop.permute.xlu0 %1224 }
 0x258   : > { %3339 = vpow2.f32 %v2553_v49  ;;  %v4894_v48 = vpop.permute.xlu1 %1222  ;;  %v619_v49 = vld [vmem:[#allocation2 + $0x138] sm:$0xff] }
 0x259   : > { %v1932_v2 = vsel %vm504_vm0, %v619_v49, %v5399_v38 }
 0x25a   : > { %v1965_v22 = vsel %vm1938_vm2, %v1932_v2, %v5401_v21 }
 0x25b   : > { %v3334_v12 = vpop.eup %3333  ;;  %v1733_v16 = vpop.permute.xlu0 %1732  ;;  %v1998_v6 = vsel %vm1971_vm3, %v1965_v22, %v4894_v48 }
 0x25c   : > { %v2707_v56 = vsel %vm2701_vm12, %v3334_v12, %v4833_v46  ;;  %v1731_v10 = vpop.permute.xlu1 %1730  ;;  %v2129_v24 = vsel %vm2103_vm7, %v2096_v9, %v1733_v16  ;;  %v620_v12 = vld [vmem:[#allocation2 + $0x140] sm:$0xff]  ;;  %v5400_v16 = vld [vmem:[#allocation24_spill] sm:$0xff] }
 0x25d   : > { %v3336_v36 = vpop.eup %3335  ;;  %2740 = vst.msk [vmem:[%s4783_s21 + $0x28] sm:$0xff] %vm2734_vm13, %v2707_v56  ;;  %v2843_v26 = vmul.f32 %v2707_v56, %v2707_v56  ;;  %v2776_v35 = vsel %vm2734_vm13, %v2707_v56, 0.0  ;;  %v2128_v45 = vsel %vm2103_vm7, %v2095_v8, %v1731_v10  ;;  %v1933_v32 = vsel %vm504_vm0, %v620_v12, %v5400_v16  ;;  %v5402_v56 = vld [vmem:[#allocation44_spill] sm:$0xff]  ;;  %v5403_v16 = vld [vmem:[#allocation21_spill] sm:$0xff] }
 0x25e   : > { %v2706_v57 = vsel %vm2701_vm12, %v3336_v36, %v4837_v13  ;;  %v1966_v10 = vsel %vm1938_vm2, %v1933_v32, %v5402_v56  ;;  %v621_v12 = vld [vmem:[#allocation2 + $0x150] sm:$0xff] }
 0x25f   : > { %2739 = vst.msk [vmem:[%s4783_s21 + $0x20] sm:$0xff] %vm2734_vm13, %v2706_v57  ;;  %v2774_v46 = vsel %vm2734_vm13, %v2706_v57, 0.0  ;;  %v2842_v0 = vmul.f32 %v2706_v57, %v2706_v57  ;;  %v1353_v59 = vpop.permute.xlu0 %1352  ;;  %v2879_v53 = vsel %vm2734_vm13, %v2843_v26, 0.0  ;;  %v1999_v57 = vsel %vm1971_vm3, %v1966_v10, %v4892_v41  ;;  %v5405_v56 = vld [vmem:[#allocation41_spill] sm:$0xff] }
 0x260   : > { %v2775_v30 = vadd.f32 %v2774_v46, %v2773_v23  ;;  %v1351_v11 = vpop.permute.xlu1 %1350  ;;  %v2032_v26 = vsel %vm2004_vm4, %v1999_v57, %v1353_v59  ;;  %v1934_v32 = vsel %vm504_vm0, %v621_v12, %v5403_v16 }
 0x261   : > { %v2877_v13 = vsel %vm2734_vm13, %v2842_v0, 0.0  ;;  %v2031_v46 = vsel %vm2004_vm4, %v1998_v6, %v1351_v11  ;;  %v1967_v10 = vsel %vm1938_vm2, %v1934_v32, %v5405_v56  ;;  %v624_v56 = vld [vmem:[#allocation2 + $0x170] sm:$0xff] }
 0x262   : > { %v2878_v39 = vadd.f32 %v2877_v13, %v2876_v5  ;;  %v2777_v1 = vadd.f32 %v2776_v35, %v2775_v30 }
 0x263   : > { %v3338_v34 = vpop.eup %3337  ;;  %v1861_v19 = vpop.permute.xlu0 %1860 }
 0x264   : > { %v2612_v23 = vadd.f32 1.0, %v3338_v34  ;;  %v2880_v27 = vadd.f32 %v2879_v53, %v2878_v39  ;;  %v2162_v29 = vsel %vm2136_vm8, %v2129_v24, %v1861_v19  ;;  %v1859_v15 = vpop.permute.xlu1 %1858 }
 0x265   : > { %v3340_v33 = vpop.eup %3339  ;;  %v2161_v5 = vsel %vm2136_vm8, %v2128_v45, %v1859_v15 }
 0x266   : > { %3341 = vrcp.f32 %v2612_v23  ;;  %v2611_v44 = vadd.f32 1.0, %v3340_v33  ;;  %3230 = vmatprep.mubr.msk.f32.mxu1 %vm2185_vm9, %v2161_v5 }
 0x267   : > { %v3208_v52 = vpop.f32.mrf.mxu0  ;;  %3231 = vmatmul.mubr.msk.f32.gmra.mxu1 %vm2185_vm9, %v2162_v29  ;;  %v1607_v51 = vpop.permute.xlu0 %1606 }
 0x268   : > { %3343 = vrcp.f32 %v2611_v44  ;;  %v4937_v40 = vadd.f32 %v3208_v52, %v4697_v7  ;;  %v1479_v62 = vpop.permute.xlu1 %1478 }
 0x269   : > { %v2388_v28 = vpop.f32.mrf.mxu0  ;;  %v2064_v48 = vsel %vm2037_vm5, %v2031_v46, %v1479_v62 }
 0x26a   : > { %v2518_v55 = vsub.f32 0.0, %v4937_v40  ;;  %v4941_v54 = vadd.f32 %v4697_v7, %v2388_v28  ;;  %v2097_v24 = vsel %vm2070_vm6, %v2064_v48, %v1607_v51 }
 0x26b   : > { %v1609_v42 = vpop.permute.xlu0 %1608 }
 0x26c   : > { %v2559_v43 = vmul.f32 1.442695, %v2518_v55  ;;  %v2517_v60 = vsub.f32 0.0, %v4941_v54  ;;  %v1481_v61 = vpop.permute.xlu1 %1480 }
 0x26d   : > { %v2065_v30 = vsel %vm2037_vm5, %v2032_v26, %v1481_v61 }
 0x26e   : > { %3345 = vpow2.f32 %v2559_v43  ;;  %v2557_v37 = vmul.f32 1.442695, %v2517_v60  ;;  %v2098_v11 = vsel %vm2070_vm6, %v2065_v30, %v1609_v42 }
 0x26f   : > { %v4944_v17 = vpop.permute.xlu0 %1228 }
 0x270   : > { %3347 = vpow2.f32 %v2557_v37  ;;  %v4946_v63 = vpop.permute.xlu1 %1226 }
 0x271   : > { %v2000_v26 = vsel %vm1971_vm3, %v1967_v10, %v4946_v63 }
 0x273   : > { %v3342_v50 = vpop.eup %3341  ;;  %v1737_v18 = vpop.permute.xlu0 %1736 }
 0x274   : > { %v2709_v36 = vsel %vm2701_vm12, %v3342_v50, %v4885_v20  ;;  %v1735_v47 = vpop.permute.xlu1 %1734  ;;  %v2131_v53 = vsel %vm2103_vm7, %v2098_v11, %v1737_v18  ;;  %v622_v50 = vld [vmem:[#allocation2 + $0x158] sm:$0xff] }
 0x275   : > { %v3344_v25 = vpop.eup %3343  ;;  %2742 = vst.msk [vmem:[%s4783_s21 + $0x38] sm:$0xff] %vm2734_vm13, %v2709_v36  ;;  %v2845_v0 = vmul.f32 %v2709_v36, %v2709_v36  ;;  %v2780_v13 = vsel %vm2734_vm13, %v2709_v36, 0.0  ;;  %v2130_v23 = vsel %vm2103_vm7, %v2097_v24, %v1735_v47  ;;  %v5404_v18 = vld [vmem:[#allocation25_spill] sm:$0xff]  ;;  %v623_v24 = vld [vmem:[#allocation2 + $0x168] sm:$0xff] }
 0x276   : > { %v2708_v31 = vsel %vm2701_vm12, %v3344_v25, %v4889_v3  ;;  %v1935_v21 = vsel %vm504_vm0, %v622_v50, %v5404_v18  ;;  %v5406_v36 = vld [vmem:[#allocation45_spill] sm:$0xff] }
 0x277   : > { %2741 = vst.msk [vmem:[%s4783_s21 + $0x30] sm:$0xff] %vm2734_vm13, %v2708_v31  ;;  %v2778_v20 = vsel %vm2734_vm13, %v2708_v31, 0.0  ;;  %v2844_v14 = vmul.f32 %v2708_v31, %v2708_v31  ;;  %v1357_v41 = vpop.permute.xlu0 %1356  ;;  %v2883_v34 = vsel %vm2734_vm13, %v2845_v0, 0.0  ;;  %v1968_v47 = vsel %vm1938_vm2, %v1935_v21, %v5406_v36 }
 0x278   : > { %v2779_v58 = vadd.f32 %v2778_v20, %v2777_v1  ;;  %v1355_v35 = vpop.permute.xlu1 %1354  ;;  %v2001_v31 = vsel %vm1971_vm3, %v1968_v47, %v4944_v17 }
 0x279   : > { %v2881_v3 = vsel %vm2734_vm13, %v2844_v14, 0.0  ;;  %v2034_v0 = vsel %vm2004_vm4, %v2001_v31, %v1357_v41  ;;  %v2033_v20 = vsel %vm2004_vm4, %v2000_v26, %v1355_v35  ;;  %v5410_v26 = vld [vmem:[#allocation46_spill] sm:$0xff] }
 0x27a   : > { %v2882_v59 = vadd.f32 %v2881_v3, %v2880_v27  ;;  %v2781_v39 = vadd.f32 %v2780_v13, %v2779_v58 }
 0x27b   : > { %v3346_v9 = vpop.eup %3345  ;;  %v1865_v8 = vpop.permute.xlu0 %1864 }
 0x27c   : > { %v2614_v1 = vadd.f32 1.0, %v3346_v9  ;;  %v2884_v19 = vadd.f32 %v2883_v34, %v2882_v59  ;;  %v2164_v45 = vsel %vm2136_vm8, %v2131_v53, %v1865_v8  ;;  %v1863_v29 = vpop.permute.xlu1 %1862 }
 0x27d   : > { %v3348_v15 = vpop.eup %3347  ;;  %v2163_v27 = vsel %vm2136_vm8, %v2130_v23, %v1863_v29 }
 0x27e   : > { %3349 = vrcp.f32 %v2614_v1  ;;  %v2613_v33 = vadd.f32 1.0, %v3348_v15  ;;  %3233 = vmatprep.mubr.msk.f32.mxu1 %vm2185_vm9, %v2163_v27 }
 0x27f   : > { %v3211_v5 = vpop.f32.mrf.mxu0  ;;  %3234 = vmatmul.mubr.msk.f32.gmra.mxu1 %vm2185_vm9, %v2164_v45  ;;  %v1611_v44 = vpop.permute.xlu0 %1610 }
 0x280   : > { %3351 = vrcp.f32 %v2613_v33  ;;  %v4987_v52 = vadd.f32 %v3211_v5, %v4697_v7  ;;  %v1483_v51 = vpop.permute.xlu1 %1482  ;;  %v5407_v33 = vld [vmem:[#allocation23_spill] sm:$0xff] }
 0x281   : > { %v2398_v62 = vpop.f32.mrf.mxu0  ;;  %v2066_v63 = vsel %vm2037_vm5, %v2033_v20, %v1483_v51  ;;  %v1936_v5 = vsel %vm504_vm0, %v623_v24, %v5407_v33 }
 0x282   : > { %v2520_v28 = vsub.f32 0.0, %v4987_v52  ;;  %v4991_v55 = vadd.f32 %v4697_v7, %v2398_v62  ;;  %v2099_v53 = vsel %vm2070_vm6, %v2066_v63, %v1611_v44  ;;  %v5408_v62 = vld [vmem:[#allocation43_spill] sm:$0xff] }
 0x283   : > { %v1613_v42 = vpop.permute.xlu0 %1612 }
 0x284   : > { %v2563_v43 = vmul.f32 1.442695, %v2520_v28  ;;  %v2519_v60 = vsub.f32 0.0, %v4991_v55  ;;  %v1485_v61 = vpop.permute.xlu1 %1484  ;;  %v1969_v28 = vsel %vm1938_vm2, %v1936_v5, %v5408_v62 }
 0x285   : > { %v2067_v58 = vsel %vm2037_vm5, %v2034_v0, %v1485_v61 }
 0x286   : > { %3353 = vpow2.f32 %v2563_v43  ;;  %v2561_v37 = vmul.f32 1.442695, %v2519_v60  ;;  %v2100_v35 = vsel %vm2070_vm6, %v2067_v58, %v1613_v42 }
 0x287   : > { %v4994_v49 = vpop.permute.xlu0 %1232 }
 0x288   : > { %3355 = vpow2.f32 %v2561_v37  ;;  %v1231_v38 = vpop.permute.xlu1 %1230 }
 0x289   : > { %v2002_v60 = vsel %vm1971_vm3, %v1969_v28, %v1231_v38 }
 0x28b   : > { %v3350_v2 = vpop.eup %3349  ;;  %v1741_v22 = vpop.permute.xlu0 %1740 }
 0x28c   : > { %v2711_v25 = vsel %vm2701_vm12, %v3350_v2, %v4937_v40  ;;  %v1739_v57 = vpop.permute.xlu1 %1738  ;;  %v2133_v34 = vsel %vm2103_vm7, %v2100_v35, %v1741_v22 }
 0x28d   : > { %v3352_v6 = vpop.eup %3351  ;;  %2744 = vst.msk [vmem:[%s4783_s21 + $0x48] sm:$0xff] %vm2734_vm13, %v2711_v25  ;;  %v2847_v14 = vmul.f32 %v2711_v25, %v2711_v25  ;;  %v2784_v3 = vsel %vm2734_vm13, %v2711_v25, 0.0  ;;  %v2132_v23 = vsel %vm2103_vm7, %v2099_v53, %v1739_v57  ;;  %v5409_v57 = vld [vmem:[#allocation26_spill] sm:$0xff] }
 0x28e   : > { %v2710_v46 = vsel %vm2701_vm12, %v3352_v6, %v4941_v54  ;;  %v1937_v6 = vsel %vm504_vm0, %v624_v56, %v5409_v57  ;;  %vm2836_vm0 = vcmask 24576  }
 0x28f   : > { %2743 = vst.msk [vmem:[%s4783_s21 + $0x40] sm:$0xff] %vm2734_vm13, %v2710_v46  ;;  %v2782_v40 = vsel %vm2734_vm13, %v2710_v46, 0.0  ;;  %v2846_v30 = vmul.f32 %v2710_v46, %v2710_v46  ;;  %v1361_v17 = vpop.permute.xlu0 %1360  ;;  %v2887_v9 = vsel %vm2734_vm13, %v2847_v14, 0.0  ;;  %v1970_v46 = vsel %vm1938_vm2, %v1937_v6, %v5410_v26 }
 0x290   : > { %v2783_v48 = vadd.f32 %v2782_v40, %v2781_v39  ;;  %v1359_v13 = vpop.permute.xlu1 %1358  ;;  %v2003_v20 = vsel %vm1971_vm3, %v1970_v46, %v4994_v49 }
 0x291   : > { %v2885_v54 = vsel %vm2734_vm13, %v2846_v30, 0.0  ;;  %v2035_v37 = vsel %vm2004_vm4, %v2002_v60, %v1359_v13  ;;  %v2036_v30 = vsel %vm2004_vm4, %v2003_v20, %v1361_v17 }
 0x292   : > { %v2886_v41 = vadd.f32 %v2885_v54, %v2884_v19  ;;  %v5025_v59 = vadd.f32 %v2784_v3, %v2783_v48 }
 0x293   : > { %v3354_v11 = vpop.eup %3353  ;;  %v1869_v39 = vpop.permute.xlu0 %1868 }
 0x294   : > { %v2616_v8 = vadd.f32 1.0, %v3354_v11  ;;  %v2888_v1 = vadd.f32 %v2887_v9, %v2886_v41  ;;  %v2166_v45 = vsel %vm2136_vm8, %v2133_v34, %v1869_v39  ;;  %v1867_v19 = vpop.permute.xlu1 %1866 }
 0x295   : > { %v3356_v29 = vpop.eup %3355  ;;  %v2165_v15 = vsel %vm2136_vm8, %v2132_v23, %v1867_v19 }
 0x296   : > { %3357 = vrcp.f32 %v2616_v8  ;;  %v2615_v27 = vadd.f32 1.0, %v3356_v29  ;;  %3236 = vmatprep.mubr.msk.f32.mxu1 %vm2185_vm9, %v2165_v15 }
 0x297   : > { %v3214_v44 = vpop.f32.mrf.mxu0  ;;  %3237 = vmatmul.mubr.msk.f32.gmra.mxu1 %vm2185_vm9, %v2166_v45  ;;  %v1615_v51 = vpop.permute.xlu0 %1614 }
 0x298   : > { %3359 = vrcp.f32 %v2615_v27  ;;  %v5041_v42 = vadd.f32 %v3214_v44, %v4697_v7  ;;  %v1487_v43 = vpop.permute.xlu1 %1486 }
 0x299   : > { %v2408_v61 = vpop.f32.mrf.mxu0  ;;  %v2068_v2 = vsel %vm2037_vm5, %v2035_v37, %v1487_v43 }
 0x29a   : > { %v2522_v12 = vsub.f32 0.0, %v5041_v42  ;;  %v5047_v50 = vadd.f32 %v4697_v7, %v2408_v61  ;;  %v2101_v38 = vsel %vm2070_vm6, %v2068_v2, %v1615_v51 }
 0x29b   : > { %v1743_v16 = vpop.permute.xlu0 %1742 }
 0x29c   : > { %v2567_v32 = vmul.f32 1.442695, %v2522_v12  ;;  %v2521_v18 = vsub.f32 0.0, %v5047_v50  ;;  %v1489_v21 = vpop.permute.xlu1 %1488  ;;  %v2134_v10 = vsel %vm2103_vm7, %v2101_v38, %v1743_v16 }
 0x29d   : > { %v2069_v48 = vsel %vm2037_vm5, %v2036_v30, %v1489_v21 }
 0x29e   : > { %3361 = vpow2.f32 %v2567_v32  ;;  %v2565_v22 = vmul.f32 1.442695, %v2521_v18 }
 0x29f   : > { %v1871_v36 = vpop.permute.xlu0 %1870 }
 0x2a0   : > { %3363 = vpow2.f32 %v2565_v22  ;;  %v2167_v47 = vsel %vm2136_vm8, %v2134_v10, %v1871_v36  ;;  %v1617_v25 = vpop.permute.xlu1 %1616 }
 0x2a1   : > { %3239 = vmatprep.mubr.msk.f32.mxu1 %vm2185_vm9, %v2167_v47  ;;  %v2102_v49 = vsel %vm2070_vm6, %v2069_v48, %v1617_v25 }
 0x2a3   : > { %v3358_v31 = vpop.eup %3357 }
 0x2a4   : > { %v2713_v0 = vsel %vm2701_vm12, %v3358_v31, %v4987_v52  ;;  %v1745_v14 = vpop.permute.xlu1 %1744 }
 0x2a5   : > { %v3360_v40 = vpop.eup %3359  ;;  %2746 = vst.msk [vmem:[%s4783_s21 + $0x58] sm:$0xff] %vm2734_vm13, %v2713_v0  ;;  %v2849_v63 = vmul.f32 %v2713_v0, %v2713_v0  ;;  %v2135_v54 = vsel %vm2103_vm7, %v2102_v49, %v1745_v14  ;;  %v2788_v17 = vsel %vm2734_vm13, %v2713_v0, 0.0 }
 0x2a6   : > { %v2712_v58 = vsel %vm2701_vm12, %v3360_v40, %v4991_v55 }
 0x2a7   : > { %2745 = vst.msk [vmem:[%s4783_s21 + $0x50] sm:$0xff] %vm2734_vm13, %v2712_v58  ;;  %v2786_v52 = vsel %vm2734_vm13, %v2712_v58, 0.0  ;;  %v2848_v13 = vmul.f32 %v2712_v58, %v2712_v58  ;;  %v2891_v53 = vsel %vm2734_vm13, %v2849_v63, 0.0 }
 0x2a8   : > { %v2787_v3 = vadd.f32 %v2786_v52, %v5025_v59  ;;  %v1873_v41 = vpop.permute.xlu1 %1872 }
 0x2a9   : > { %v2889_v35 = vsel %vm2734_vm13, %v2848_v13, 0.0  ;;  %v2168_v55 = vsel %vm2136_vm8, %v2135_v54, %v1873_v41 }
 0x2aa   : > { %v2890_v11 = vadd.f32 %v2889_v35, %v2888_v1  ;;  %v2789_v9 = vadd.f32 %v2788_v17, %v2787_v3  ;;  %3240 = vmatmul.mubr.msk.f32.gmra.mxu1 %vm2185_vm9, %v2168_v55  ;;  %v5115_v35 = vld [vmem:[%s5322_s4] ss:$0 sm:$0xff] }
 0x2ab   : > { %v3362_v34 = vpop.eup %3361 }
 0x2ac   : > { %v2618_v39 = vadd.f32 1.0, %v3362_v34  ;;  %v2892_v24 = vadd.f32 %v2891_v53, %v2890_v11 }
 0x2ad   : > { %v3364_v8 = vpop.eup %3363 }
 0x2ae   : > { %3365 = vrcp.f32 %v2618_v39  ;;  %v2617_v59 = vadd.f32 1.0, %v3364_v8 }
 0x2af   : > { %v3217_v23 = vpop.f32.mrf.mxu0 }
 0x2b0   : > { %3367 = vrcp.f32 %v2617_v59  ;;  %v2424_v45 = vadd.f32 %v3217_v23, %v4697_v7 }
 0x2b1   : > { %v2418_v19 = vpop.f32.mrf.mxu0 }
 0x2b2   : > { %v2524_v29 = vsub.f32 0.0, %v2424_v45  ;;  %v2419_v1 = vadd.f32 %v4697_v7, %v2418_v19 }
 0x2b4   : > { %v2571_v15 = vmul.f32 1.442695, %v2524_v29  ;;  %v2523_v27 = vsub.f32 0.0, %v2419_v1 }
 0x2b6   : > { %3369 = vpow2.f32 %v2571_v15  ;;  %v2569_v33 = vmul.f32 1.442695, %v2523_v27 }
 0x2b8   : > { %3371 = vpow2.f32 %v2569_v33 }
 0x2bb   : > { %v3366_v5 = vpop.eup %3365 }
 0x2bc   : > { %v2715_v44 = vsel %vm2701_vm12, %v3366_v5, %v5041_v42 }
 0x2bd   : > { %v3368_v51 = vpop.eup %3367  ;;  %2748 = vst.msk [vmem:[%s4783_s21 + $0x68] sm:$0xff] %vm2734_vm13, %v2715_v44  ;;  %v2851_v28 = vmul.f32 %v2715_v44, %v2715_v44  ;;  %v2792_v37 = vsel %vm2734_vm13, %v2715_v44, 0.0 }
 0x2be   : > { %v2714_v62 = vsel %vm2701_vm12, %v3368_v51, %v5047_v50 }
 0x2bf   : > { %2747 = vst.msk [vmem:[%s4783_s21 + $0x60] sm:$0xff] %vm2734_vm13, %v2714_v62  ;;  %v2790_v43 = vsel %vm2734_vm13, %v2714_v62, 0.0  ;;  %v2850_v60 = vmul.f32 %v2714_v62, %v2714_v62  ;;  %v2895_v32 = vsel %vm2734_vm13, %v2851_v28, 0.0 }
 0x2c0   : > { %v2791_v61 = vadd.f32 %v2790_v43, %v2789_v9 }
 0x2c1   : > { %v2893_v12 = vsel %vm2734_vm13, %v2850_v60, 0.0 }
 0x2c2   : > { %v2894_v2 = vadd.f32 %v2893_v12, %v2892_v24  ;;  %v2793_v42 = vadd.f32 %v2792_v37, %v2791_v61 }
 0x2c3   : > { %v3370_v16 = vpop.eup %3369 }
 0x2c4   : > { %v2620_v18 = vadd.f32 1.0, %v3370_v16  ;;  %v2896_v21 = vadd.f32 %v2895_v32, %v2894_v2 }
 0x2c5   : > { %v3372_v22 = vpop.eup %3371 }
 0x2c6   : > { %3373 = vrcp.f32 %v2620_v18  ;;  %v2619_v50 = vadd.f32 1.0, %v3372_v22 }
 0x2c7   : > { %v3220_v38 = vpop.f32.mrf.mxu1 }
 0x2c8   : > { %3375 = vrcp.f32 %v2619_v50  ;;  %v2434_v56 = vadd.f32 %v3220_v38, %v4697_v7 }
 0x2c9   : > { %v2428_v10 = vpop.f32.mrf.mxu1 }
 0x2ca   : > { %v2526_v36 = vsub.f32 0.0, %v2434_v56  ;;  %v2429_v47 = vadd.f32 %v4697_v7, %v2428_v10 }
 0x2cc   : > { %v2575_v25 = vmul.f32 1.442695, %v2526_v36  ;;  %v2525_v57 = vsub.f32 0.0, %v2429_v47 }
 0x2ce   : > { %3377 = vpow2.f32 %v2575_v25  ;;  %v2573_v6 = vmul.f32 1.442695, %v2525_v57 }
 0x2d0   : > { %3379 = vpow2.f32 %v2573_v6 }
 0x2d3   : > { %v3374_v31 = vpop.eup %3373 }
 0x2d4   : > { %v2717_v26 = vsel %vm2701_vm12, %v3374_v31, %v2424_v45 }
 0x2d5   : > { %v3376_v46 = vpop.eup %3375  ;;  %2750 = vst.msk [vmem:[%s4783_s21 + $0x78] sm:$0xff] %vm2734_vm13, %v2717_v26  ;;  %v2853_v20 = vmul.f32 %v2717_v26, %v2717_v26  ;;  %v2796_v30 = vsel %vm2734_vm13, %v2717_v26, 0.0 }
 0x2d6   : > { %v2716_v0 = vsel %vm2701_vm12, %v3376_v46, %v2419_v1 }
 0x2d7   : > { %2749 = vst.msk [vmem:[%s4783_s21 + $0x70] sm:$0xff] %vm2734_vm13, %v2716_v0  ;;  %v2794_v7 = vsel %vm2734_vm13, %v2716_v0, 0.0  ;;  %v2852_v14 = vmul.f32 %v2716_v0, %v2716_v0  ;;  %v2899_v13 = vsel %vm2734_vm13, %v2853_v20, 0.0 }
 0x2d8   : > { %v2795_v40 = vadd.f32 %v2794_v7, %v2793_v42 }
 0x2d9   : > { %v2897_v58 = vsel %vm2734_vm13, %v2852_v14, 0.0 }
 0x2da   : > { %v2898_v48 = vadd.f32 %v2897_v58, %v2896_v21  ;;  %v2797_v63 = vadd.f32 %v2796_v30, %v2795_v40 }
 0x2db   : > { %v3378_v52 = vpop.eup %3377 }
 0x2dc   : > { %v2622_v49 = vadd.f32 1.0, %v3378_v52  ;;  %v2900_v3 = vadd.f32 %v2899_v13, %v2898_v48 }
 0x2dd   : > { %v3380_v54 = vpop.eup %3379 }
 0x2de   : > { %3381 = vrcp.f32 %v2622_v49  ;;  %v2621_v41 = vadd.f32 1.0, %v3380_v54 }
 0x2df   : > { %v3223_v17 = vpop.f32.mrf.mxu1 }
 0x2e0   : > { %3383 = vrcp.f32 %v2621_v41  ;;  %v2444_v55 = vadd.f32 %v5115_v35, %v3223_v17 }
 0x2e1   : > { %v2438_v11 = vpop.f32.mrf.mxu1 }
 0x2e2   : > { %v2528_v9 = vsub.f32 0.0, %v2444_v55  ;;  %v2439_v34 = vadd.f32 %v5115_v35, %v2438_v11 }
 0x2e4   : > { %v2579_v53 = vmul.f32 1.442695, %v2528_v9  ;;  %v2527_v39 = vsub.f32 0.0, %v2439_v34 }
 0x2e6   : > { %3385 = vpow2.f32 %v2579_v53  ;;  %v2577_v24 = vmul.f32 1.442695, %v2527_v39 }
 0x2e8   : > { %3387 = vpow2.f32 %v2577_v24 }
 0x2eb   : > { %v3382_v8 = vpop.eup %3381 }
 0x2ec   : > { %v2719_v59 = vsel %vm2701_vm12, %v3382_v8, %v2434_v56 }
 0x2ed   : > { %v3384_v23 = vpop.eup %3383  ;;  %2752 = vst.msk [vmem:[%s4783_s21 + $0x88] sm:$0xff] %vm2734_vm13, %v2719_v59  ;;  %v2855_v19 = vmul.f32 %v2719_v59, %v2719_v59  ;;  %v2800_v27 = vsel %vm2734_vm13, %v2719_v59, 0.0 }
 0x2ee   : > { %v2718_v45 = vsel %vm2701_vm12, %v3384_v23, %v2429_v47 }
 0x2ef   : > { %2751 = vst.msk [vmem:[%s4783_s21 + $0x80] sm:$0xff] %vm2734_vm13, %v2718_v45  ;;  %v2798_v29 = vsel %vm2734_vm13, %v2718_v45, 0.0  ;;  %v2854_v1 = vmul.f32 %v2718_v45, %v2718_v45  ;;  %v2903_v62 = vsel %vm2734_vm13, %v2855_v19, 0.0 }
 0x2f0   : > { %v2799_v15 = vadd.f32 %v2798_v29, %v2797_v63 }
 0x2f1   : > { %v2901_v33 = vsel %vm2734_vm13, %v2854_v1, 0.0 }
 0x2f2   : > { %v2902_v5 = vadd.f32 %v2901_v33, %v2900_v3  ;;  %v2801_v44 = vadd.f32 %v2800_v27, %v2799_v15 }
 0x2f3   : > { %v3386_v51 = vpop.eup %3385 }
 0x2f4   : > { %v2624_v28 = vadd.f32 1.0, %v3386_v51  ;;  %v2904_v43 = vadd.f32 %v2903_v62, %v2902_v5 }
 0x2f5   : > { %v3388_v60 = vpop.eup %3387 }
 0x2f6   : > { %3389 = vrcp.f32 %v2624_v28  ;;  %v2623_v61 = vadd.f32 1.0, %v3388_v60 }
 0x2f7   : > { %v3226_v37 = vpop.f32.mrf.mxu1 }
 0x2f8   : > { %3391 = vrcp.f32 %v2623_v61  ;;  %v2454_v12 = vadd.f32 %v5115_v35, %v3226_v37 }
 0x2f9   : > { %v2448_v2 = vpop.f32.mrf.mxu1 }
 0x2fa   : > { %v2530_v42 = vsub.f32 0.0, %v2454_v12  ;;  %v2449_v16 = vadd.f32 %v5115_v35, %v2448_v2 }
 0x2fc   : > { %v2583_v32 = vmul.f32 1.442695, %v2530_v42  ;;  %v2529_v18 = vsub.f32 0.0, %v2449_v16 }
 0x2fe   : > { %3393 = vpow2.f32 %v2583_v32  ;;  %v2581_v21 = vmul.f32 1.442695, %v2529_v18 }
 0x300   : > { %3395 = vpow2.f32 %v2581_v21 }
 0x303   : > { %v3390_v22 = vpop.eup %3389 }
 0x304   : > { %v2721_v50 = vsel %vm2701_vm12, %v3390_v22, %v2444_v55 }
 0x305   : > { %v3392_v38 = vpop.eup %3391  ;;  %2754 = vst.msk [vmem:[%s4783_s21 + $0x98] sm:$0xff] %vm2734_vm13, %v2721_v50  ;;  %v2857_v10 = vmul.f32 %v2721_v50, %v2721_v50  ;;  %v2804_v57 = vsel %vm2734_vm13, %v2721_v50, 0.0 }
 0x306   : > { %v2720_v56 = vsel %vm2701_vm12, %v3392_v38, %v2439_v34 }
 0x307   : > { %2753 = vst.msk [vmem:[%s4783_s21 + $0x90] sm:$0xff] %vm2734_vm13, %v2720_v56  ;;  %v2802_v36 = vsel %vm2734_vm13, %v2720_v56, 0.0  ;;  %v2856_v47 = vmul.f32 %v2720_v56, %v2720_v56  ;;  %v2907_v0 = vsel %vm2734_vm13, %v2857_v10, 0.0 }
 0x308   : > { %v2803_v25 = vadd.f32 %v2802_v36, %v2801_v44 }
 0x309   : > { %v2905_v6 = vsel %vm2734_vm13, %v2856_v47, 0.0 }
 0x30a   : > { %v2906_v31 = vadd.f32 %v2905_v6, %v2904_v43  ;;  %v2805_v26 = vadd.f32 %v2804_v57, %v2803_v25 }
 0x30b   : > { %v3394_v46 = vpop.eup %3393 }
 0x30c   : > { %v2626_v20 = vadd.f32 1.0, %v3394_v46  ;;  %v2908_v7 = vadd.f32 %v2907_v0, %v2906_v31 }
 0x30d   : > { %v3396_v14 = vpop.eup %3395 }
 0x30e   : > { %3397 = vrcp.f32 %v2626_v20  ;;  %v2625_v40 = vadd.f32 1.0, %v3396_v14 }
 0x30f   : > { %v3229_v30 = vpop.f32.mrf.mxu1 }
 0x310   : > { %3399 = vrcp.f32 %v2625_v40  ;;  %v2464_v58 = vadd.f32 %v5115_v35, %v3229_v30 }
 0x311   : > { %v2458_v48 = vpop.f32.mrf.mxu1 }
 0x312   : > { %v2532_v63 = vsub.f32 0.0, %v2464_v58  ;;  %v2459_v52 = vadd.f32 %v5115_v35, %v2458_v48 }
 0x314   : > { %v2587_v13 = vmul.f32 1.442695, %v2532_v63  ;;  %v2531_v49 = vsub.f32 0.0, %v2459_v52 }
 0x316   : > { %3401 = vpow2.f32 %v2587_v13  ;;  %v2585_v3 = vmul.f32 1.442695, %v2531_v49 }
 0x318   : > { %3403 = vpow2.f32 %v2585_v3 }
 0x31b   : > { %v3398_v54 = vpop.eup %3397 }
 0x31c   : > { %v2723_v41 = vsel %vm2701_vm12, %v3398_v54, %v2454_v12 }
 0x31d   : > { %v3400_v17 = vpop.eup %3399  ;;  %2756 = vst.msk [vmem:[%s4783_s21 + $0xa8] sm:$0xff] %vm2734_vm13, %v2723_v41  ;;  %v2859_v11 = vmul.f32 %v2723_v41, %v2723_v41  ;;  %v2808_v39 = vsel %vm2734_vm13, %v2723_v41, 0.0 }
 0x31e   : > { %v2722_v55 = vsel %vm2701_vm12, %v3400_v17, %v2449_v16 }
 0x31f   : > { %2755 = vst.msk [vmem:[%s4783_s21 + $0xa0] sm:$0xff] %vm2734_vm13, %v2722_v55  ;;  %v2806_v9 = vsel %vm2734_vm13, %v2722_v55, 0.0  ;;  %v2858_v34 = vmul.f32 %v2722_v55, %v2722_v55  ;;  %v2911_v45 = vsel %vm2734_vm13, %v2859_v11, 0.0 }
 0x320   : > { %v2807_v53 = vadd.f32 %v2806_v9, %v2805_v26 }
 0x321   : > { %v2909_v24 = vsel %vm2734_vm13, %v2858_v34, 0.0 }
 0x322   : > { %v2910_v8 = vadd.f32 %v2909_v24, %v2908_v7  ;;  %v2809_v59 = vadd.f32 %v2808_v39, %v2807_v53 }
 0x323   : > { %v3402_v23 = vpop.eup %3401 }
 0x324   : > { %v2628_v19 = vadd.f32 1.0, %v3402_v23  ;;  %v2912_v29 = vadd.f32 %v2911_v45, %v2910_v8 }
 0x325   : > { %v3404_v1 = vpop.eup %3403 }
 0x326   : > { %3405 = vrcp.f32 %v2628_v19  ;;  %v2627_v15 = vadd.f32 1.0, %v3404_v1 }
 0x327   : > { %v3232_v27 = vpop.f32.mrf.mxu1 }
 0x328   : > { %3407 = vrcp.f32 %v2627_v15  ;;  %v2474_v33 = vadd.f32 %v5115_v35, %v3232_v27 }
 0x329   : > { %v2468_v5 = vpop.f32.mrf.mxu1 }
 0x32a   : > { %v2534_v44 = vsub.f32 0.0, %v2474_v33  ;;  %v2469_v51 = vadd.f32 %v5115_v35, %v2468_v5 }
 0x32c   : > { %v2591_v62 = vmul.f32 1.442695, %v2534_v44  ;;  %v2533_v28 = vsub.f32 0.0, %v2469_v51 }
 0x32e   : > { %3409 = vpow2.f32 %v2591_v62  ;;  %v2589_v43 = vmul.f32 1.442695, %v2533_v28 }
 0x330   : > { %3411 = vpow2.f32 %v2589_v43 }
 0x333   : > { %v3406_v60 = vpop.eup %3405 }
 0x334   : > { %v2725_v61 = vsel %vm2701_vm12, %v3406_v60, %v2464_v58 }
 0x335   : > { %v3408_v37 = vpop.eup %3407  ;;  %2758 = vst.msk [vmem:[%s4783_s21 + $0xb8] sm:$0xff] %vm2734_vm13, %v2725_v61  ;;  %v2861_v2 = vmul.f32 %v2725_v61, %v2725_v61  ;;  %v2812_v18 = vsel %vm2734_vm13, %v2725_v61, 0.0 }
 0x336   : > { %v2724_v12 = vsel %vm2701_vm12, %v3408_v37, %v2459_v52 }
 0x337   : > { %2757 = vst.msk [vmem:[%s4783_s21 + $0xb0] sm:$0xff] %vm2734_vm13, %v2724_v12  ;;  %v2810_v42 = vsel %vm2734_vm13, %v2724_v12, 0.0  ;;  %v2860_v16 = vmul.f32 %v2724_v12, %v2724_v12  ;;  %v2915_v56 = vsel %vm2734_vm13, %v2861_v2, 0.0 }
 0x338   : > { %v2811_v32 = vadd.f32 %v2810_v42, %v2809_v59 }
 0x339   : > { %v2913_v21 = vsel %vm2734_vm13, %v2860_v16, 0.0 }
 0x33a   : > { %v2914_v22 = vadd.f32 %v2913_v21, %v2912_v29  ;;  %v5172_v50 = vadd.f32 %v2812_v18, %v2811_v32 }
 0x33b   : > { %v3410_v38 = vpop.eup %3409 }
 0x33c   : > { %v2630_v10 = vadd.f32 1.0, %v3410_v38  ;;  %v5175_v36 = vadd.f32 %v2915_v56, %v2914_v22 }
 0x33d   : > { %v3412_v47 = vpop.eup %3411 }
 0x33e   : > { %3413 = vrcp.f32 %v2630_v10  ;;  %v2629_v25 = vadd.f32 1.0, %v3412_v47 }
 0x33f   : > { %v3235_v57 = vpop.f32.mrf.mxu1 }
 0x340   : > { %3415 = vrcp.f32 %v2629_v25  ;;  %v2484_v6 = vadd.f32 %v5115_v35, %v3235_v57 }
 0x341   : > { %v2478_v31 = vpop.f32.mrf.mxu1 }
 0x342   : > { %v2536_v26 = vsub.f32 0.0, %v2484_v6  ;;  %v2479_v46 = vadd.f32 %v5115_v35, %v2478_v31 }
 0x344   : > { %v2595_v0 = vmul.f32 1.442695, %v2536_v26  ;;  %v2535_v20 = vsub.f32 0.0, %v2479_v46 }
 0x346   : > { %3417 = vpow2.f32 %v2595_v0  ;;  %v2593_v7 = vmul.f32 1.442695, %v2535_v20 }
 0x348   : > { %3419 = vpow2.f32 %v2593_v7 }
 0x34b   : > { %v3414_v14 = vpop.eup %3413 }
 0x34c   : > { %v2727_v40 = vsel %vm2701_vm12, %v3414_v14, %v2474_v33 }
 0x34d   : > { %v3416_v30 = vpop.eup %3415  ;;  %2760 = vst.msk [vmem:[%s4783_s21 + $0xc8] sm:$0xff] %vm2734_vm13, %v2727_v40  ;;  %v2863_v32 = vmul.f32 %v2727_v40, %v2727_v40  ;;  %v2816_v22 = vsel %vm2734_vm13, %v2727_v40, 0.0 }
 0x34e   : > { %v2726_v58 = vsel %vm2701_vm12, %v3416_v30, %v2469_v51 }
 0x34f   : > { %2759 = vst.msk [vmem:[%s4783_s21 + $0xc0] sm:$0xff] %vm2734_vm13, %v2726_v58  ;;  %v2862_v62 = vmul.f32 %v2726_v58, %v2726_v58  ;;  %v2919_v10 = vsel %vm2734_vm13, %v2863_v32, 0.0 }
 0x351   : > { %v2917_v2 = vsel %vm2734_vm13, %v2862_v62, 0.0 }
 0x352   : > { %v2918_v21 = vadd.f32 %v2917_v2, %v5175_v36 }
 0x353   : > { %v3418_v48 = vpop.eup %3417 }
 0x354   : > { %v2632_v63 = vadd.f32 1.0, %v3418_v48  ;;  %v2920_v57 = vadd.f32 %v2919_v10, %v2918_v21 }
 0x355   : > { %v3420_v52 = vpop.eup %3419 }
 0x356   : > { %3421 = vrcp.f32 %v2632_v63  ;;  %v2631_v13 = vadd.f32 1.0, %v3420_v52 }
 0x357   : > { %v3238_v49 = vpop.f32.mrf.mxu1 }
 0x358   : > { %3423 = vrcp.f32 %v2631_v13  ;;  %v2494_v3 = vadd.f32 %v5115_v35, %v3238_v49 }
 0x359   : > { %v2488_v54 = vpop.f32.mrf.mxu1 }
 0x35a   : > { %v2538_v41 = vsub.f32 0.0, %v2494_v3  ;;  %v2489_v17 = vadd.f32 %v5115_v35, %v2488_v54 }
 0x35c   : > { %v2599_v55 = vmul.f32 1.442695, %v2538_v41  ;;  %v2537_v11 = vsub.f32 0.0, %v2489_v17 }
 0x35e   : > { %3425 = vpow2.f32 %v2599_v55  ;;  %v2597_v9 = vmul.f32 1.442695, %v2537_v11 }
 0x360   : > { %3427 = vpow2.f32 %v2597_v9 }
 0x363   : > { %v3422_v34 = vpop.eup %3421 }
 0x364   : > { %v2729_v53 = vsel %vm2701_vm12, %v3422_v34, %v2484_v6 }
 0x365   : > { %v3424_v39 = vpop.eup %3423  ;;  %2762 = vst.msk [vmem:[%s4783_s21 + $0xd8] sm:$0xff] %vm2734_vm13, %v2729_v53  ;;  %v2865_v6 = vmul.f32 %v2729_v53, %v2729_v53  ;;  %v2820_v26 = vsel %vm2734_vm13, %v2729_v53, 0.0 }
 0x366   : > { %v2728_v24 = vsel %vm2701_vm12, %v3424_v39, %v2479_v46 }
 0x367   : > { %2761 = vst.msk [vmem:[%s4783_s21 + $0xd0] sm:$0xff] %vm2734_vm13, %v2728_v24  ;;  %v2864_v18 = vmul.f32 %v2728_v24, %v2728_v24  ;;  %v2818_v38 = vsel %vm2734_vm13, %v2728_v24, 0.0  ;;  %v2923_v0 = vsel %vm2734_vm13, %v2865_v6, 0.0 }
 0x369   : > { %v2921_v47 = vsel %vm2734_vm13, %v2864_v18, 0.0 }
 0x36a   : > { %v3241_v8 = vpop.f32.mrf.mxu1  ;;  %v2922_v31 = vadd.f32 %v2921_v47, %v2920_v57 }
 0x36b   : > { %v3426_v59 = vpop.eup %3425  ;;  %v2504_v23 = vadd.f32 %v5115_v35, %v3241_v8 }
 0x36c   : > { %v2634_v45 = vadd.f32 1.0, %v3426_v59  ;;  %v2498_v19 = vpop.f32.mrf.mxu1  ;;  %v2924_v14 = vadd.f32 %v2923_v0, %v2922_v31 }
 0x36d   : > { %v3428_v29 = vpop.eup %3427  ;;  %v2540_v1 = vsub.f32 0.0, %v2504_v23  ;;  %v2499_v15 = vadd.f32 %v5115_v35, %v2498_v19  ;;  %v2814_v35 = vsel %vm2734_vm13, %v2726_v58, 0.0 }
 0x36e   : > { %3429 = vrcp.f32 %v2634_v45  ;;  %v2633_v27 = vadd.f32 1.0, %v3428_v29  ;;  %v2815_v42 = vadd.f32 %v2814_v35, %v5172_v50 }
 0x36f   : > { %v2603_v33 = vmul.f32 1.442695, %v2540_v1  ;;  %v2539_v5 = vsub.f32 0.0, %v2499_v15 }
 0x370   : > { %3431 = vrcp.f32 %v2633_v27  ;;  %v2817_v56 = vadd.f32 %v2816_v22, %v2815_v42 }
 0x371   : > { %3433 = vpow2.f32 %v2603_v33  ;;  %v2601_v44 = vmul.f32 1.442695, %v2539_v5 }
 0x372   : > { %v2819_v25 = vadd.f32 %v2818_v38, %v2817_v56 }
 0x373   : > { %3435 = vpow2.f32 %v2601_v44 }
 0x374   : > { %v2821_v46 = vadd.f32 %v2820_v26, %v2819_v25 }
 0x37b   : > { %v3430_v51 = vpop.eup %3429 }
 0x37c   : > { %v2731_v28 = vsel %vm2701_vm12, %v3430_v51, %v2494_v3 }
 0x37d   : > { %v3432_v43 = vpop.eup %3431  ;;  %2764 = vst.msk [vmem:[%s4783_s21 + $0xe8] sm:$0xff] %vm2734_vm13, %v2731_v28  ;;  %v2867_v30 = vmul.f32 %v2731_v28, %v2731_v28  ;;  %v2824_v52 = vsel %vm2734_vm13, %v2731_v28, 0.0 }
 0x37e   : > { %v3434_v60 = vpop.eup %3433  ;;  %v2730_v61 = vsel %vm2701_vm12, %v3432_v43, %v2489_v17 }
 0x37f   : > { %2763 = vst.msk [vmem:[%s4783_s21 + $0xe0] sm:$0xff] %vm2734_vm13, %v2730_v61  ;;  %v2636_v37 = vadd.f32 1.0, %v3434_v60  ;;  %v2866_v50 = vmul.f32 %v2730_v61, %v2730_v61  ;;  %v2822_v36 = vsel %vm2734_vm13, %v2730_v61, 0.0  ;;  %v2927_v3 = vsel %vm2734_vm13, %v2867_v30, 0.0 }
 0x380   : > { %v3436_v12 = vpop.eup %3435  ;;  %v2823_v7 = vadd.f32 %v2822_v36, %v2821_v46 }
 0x381   : > { %3437 = vrcp.f32 %v2636_v37  ;;  %v2635_v16 = vadd.f32 1.0, %v3436_v12  ;;  %v2925_v20 = vsel %vm2734_vm13, %v2866_v50, 0.0 }
 0x382   : > { %v2926_v58 = vadd.f32 %v2925_v20, %v2924_v14  ;;  %v2825_v49 = vadd.f32 %v2824_v52, %v2823_v7 }
 0x383   : > { %3439 = vrcp.f32 %v2635_v16 }
 0x384   : > { %v2928_v11 = vadd.f32 %v2927_v3, %v2926_v58 }
 0x38e   : > { %v3438_v40 = vpop.eup %3437 }
 0x38f   : > { %v2733_v48 = vsel %vm2701_vm12, %v3438_v40, %v2504_v23 }
 0x390   : > { %v3440_v63 = vpop.eup %3439  ;;  %2766 = vst.msk [vmem:[%s4783_s21 + $0xf8] sm:$0xff] %vm2734_vm13, %v2733_v48  ;;  %v2869_v54 = vmul.f32 %v2733_v48, %v2733_v48  ;;  %v2828_v9 = vsel %vm2734_vm13, %v2733_v48, 0.0 }
 0x391   : > { %v2732_v13 = vsel %vm2701_vm12, %v3440_v63, %v2499_v15 }
 0x392   : > { %2765 = vst.msk [vmem:[%s4783_s21 + $0xf0] sm:$0xff] %vm2734_vm13, %v2732_v13  ;;  %v2826_v41 = vsel %vm2734_vm13, %v2732_v13, 0.0  ;;  %v2868_v17 = vmul.f32 %v2732_v13, %v2732_v13  ;;  %v2931_v39 = vsel %vm2734_vm13, %v2869_v54, 0.0  ;;  %s2946_s21 = scalar_lea.sflag [#allocation4], %s5234_s9 }
 0x393   : > { %v2827_v55 = vadd.f32 %v2826_v41, %v2825_v49 }
 0x394   : > { %v2929_v34 = vsel %vm2734_vm13, %v2868_v17, 0.0 }
 0x395   : > { %v2829_v53 = vadd.f32 %v2828_v9, %v2827_v55  ;;  %v2930_v4 = vadd.f32 %v2929_v34, %v2928_v11 }
 0x397   : > { %v2830_v24 = vrot.slane %v2829_v53, 4  ;;  %v2932_v8 = vadd.f32 %v2931_v39, %v2930_v4 }
 0x399   : > { %v2831_v59 = vadd.f32 %v2830_v24, %v2829_v53  ;;  %v2933_v23 = vrot.slane %v2932_v8, 4 }
 0x39b   : > { %v2832_v45 = vrot.slane %v2831_v59, 2  ;;  %v2934_v19 = vadd.f32 %v2933_v23, %v2932_v8 }
 0x39d   : > { %v2833_v29 = vadd.f32 %v2832_v45, %v2831_v59  ;;  %v2935_v1 = vrot.slane %v2934_v19, 2 }
 0x39f   : > { %v2834_v15 = vrot.slane %v2833_v29, 1  ;;  %v2936_v27 = vadd.f32 %v2935_v1, %v2934_v19 }
 0x3a1   : > { %v2835_v33 = vadd.f32 %v2834_v15, %v2833_v29  ;;  %v2937_v5 = vrot.slane %v2936_v27, 1 }
 0x3a3   : > { %2837 = vst.msk [vmem:[%s281_s8] sm:$0x1] %vm2836_vm0, %v2835_v33  ;;  %v2938_v44 = vadd.f32 %v2937_v5, %v2936_v27 }
 0x3a4   : > { %3457 = shalt.err (!%p3454_p3)
}
 0x3a5   : > { %s3458_s17 = scalar_lea.hbm %s5244_s16, 16  ;;  %s3462_s29 = scalar_lea.hbm %s5324_s6, 32 }
 0x3a6   : > { %p3459_p4 = scmp.ne.s32.totalorder %s5244_s16, %s3458_s17  ;;  %p3463_p9 = scmp.lt.s32.totalorder %s5244_s16, %s5324_s6 }
 0x3a7   : > { %p3464_p10 = scmp.lt.s32.totalorder %s3462_s29, %s3458_s17 }
 0x3a8   : > { %p3460_p7 = pnand %p3459_p4, %p3625_p5 }
 0x3a9   : > { %p3465_p11 = por %p3464_p10, %p3463_p9 }
 0x3aa   : > { %p3461_p8 = pneg %p3460_p7 }
 0x3ac   : > { %p3466_p12 = pnand %p3465_p11, %p3461_p8 }
 0x3ae   : > { %3469 = shalt.err (!%p3466_p12)
}
 0x3af   : > { %3260 = dma.vmem_to_hbm [thread:$0]  (%p3625_p5), %s5246_s18, 16, %s5244_s16, %s2946_s21  }
 0x3b0   : > { %s5411_s13 = scalar_lea.vmem [#allocation5], %s5234_s9  ;;  %s2950_s22 = scalar_lea.sflag [#allocation6], %s5234_s9 }
 0x3b1   : > { %2939 = vst.msk [vmem:[%s5411_s13] sm:$0x1] %vm2836_vm0, %v2938_v44  ;;  %s3470_s15 = scalar_lea.vmem %s5254_s23, 16  ;;  %s3546_s19 = smov [#allocation5]  }
 0x3b2   : > { %p3471_p13 = scmp.ne.s32.totalorder %s5254_s23, %s3470_s15  ;;  %s3474_s17 = sshll.u32 %s3546_s19, 4  ;;  %s3475_s17 = int_to_ptr.vmem [resolvable:$false] %s3474_s17 }
 0x3b3   : > { %s3476_s8 = scalar_lea.vmem %s3475_s17, 32  ;;  %p3477_p2 = scmp.lt.s32.totalorder %s5254_s23, %s3475_s17 }
 0x3b4   : > { %p3472_p0 = pnand %p3471_p13, %p3625_p5  ;;  %p3478_p3 = scmp.lt.s32.totalorder %s3476_s8, %s3470_s15 }
 0x3b6   : > { %p3473_p1 = pneg %p3472_p0  ;;  %p3479_p4 = por %p3478_p3, %p3477_p2 }
 0x3b8   : > { %p3480_p7 = pnand %p3479_p4, %p3473_p1 }
 0x3ba   : > { %3483 = shalt.err (!%p3480_p7)
}
 0x3bb   : > { %s3484_s18 = scalar_lea.hbm %s5252_s20, 16  ;;  %s3488_s21 = scalar_lea.hbm %s5325_s7, 32 }
 0x3bc   : > { %p3485_p8 = scmp.ne.s32.totalorder %s5252_s20, %s3484_s18  ;;  %p3489_p11 = scmp.lt.s32.totalorder %s5252_s20, %s5325_s7 }
 0x3bd   : > { %p3490_p12 = scmp.lt.s32.totalorder %s3488_s21, %s3484_s18 }
 0x3be   : > { %p3486_p9 = pnand %p3485_p8, %p3625_p5 }
 0x3bf   : > { %p3491_p13 = por %p3490_p12, %p3489_p11 }
 0x3c0   : > { %p3487_p10 = pneg %p3486_p9 }
 0x3c2   : > { %p3492_p0 = pnand %p3491_p13, %p3487_p10 }
 0x3c4   : > { %3495 = shalt.err (!%p3492_p0)
}
 0x3c5   : > { %3261 = dma.vmem_to_hbm [thread:$0]  (%p3625_p5), %s5254_s23, 16, %s5252_s20, %s2950_s22  }
 0x3c6 PF: > { %p3271_p1 = scmp.ge.s32.totalorder %s3534_s27, 2  ;;  %s2998_s14 = sand.u32 1, %s3522_s24  }
 0x3c7   : > { %s2999_s13 = scalar_lea.sflag [#allocation4], %s2998_s14 }
 0x3c8   : > { %p3265_p2 = pnand %p3271_p1, %p3629_p6 }
 0x3ca   : > { %p3266_p3 = pneg %p3265_p2 }
 0x3cc   : > { %3513 = dma.done.wait (%p3266_p3), %s2999_s13, 16  }
 0x3cd   : > { %3515 = vsyncadd (%p3266_p3), %s2999_s13, 4294967280  ;;  %s3007_s15 = scalar_lea.sflag [#allocation6], %s2998_s14 }
 0x3ce   : > { %3517 = dma.done.wait (%p3266_p3), %s3007_s15, 16  }
 0x3cf   : > { %3519 = vsyncadd (%p3266_p3), %s3007_s15, 4294967280  ;;  %p21_p5 = scmp.ge.s32.totalorder %s3612_s30, 4   ;;  %s5412_s24 = smov %s3526_s25 }
 0x3d0   : > { %s5413_s25 = smov %s3530_s26  ;;  %s5414_s26 = smov %s3623_s10 }
 0x3d1   : > { %s5415_s27 = smov %s3612_s30  ;;  %23 = sbr.rel (!%p21_p5) target bundleno = 5 (0x5), region = 106 }
 0x3d6   :  { %3011 = vsyncpa [#allocation4], 1 }
 0x3d7   :  { %3013 = vsyncpa [#allocation4 + $0x1], 1 }
 0x3d8   :  { %3014 = vsyncpa [#allocation6], 1 }
 0x3d9   :  { %3016 = vsyncpa [#allocation6 + $0x1], 1 }

</bundles_post_ra>
